<compile_context>
chip_gen: v7x
topology: tpu7x:2x2x1
jax: 0.10.0
libtpu: 0.0.40
codegen_flags: <defaults>
</compile_context>

<pallas_src>
import numpy as np
import jax
import jax.numpy as jnp
from jax.experimental import pallas as pl
from jax.experimental.pallas import tpu as pltpu


# ----------------------------- Pallas kernels -------------------------------

def conv_pool_relu_kernel(cols_ref, w_ref, b_ref, o_ref):
    """Fused Conv2d + bias + max_pool2d(3, 2) + ReLU for one image.

    cols_ref: (1, 9*Pp, K) bf16 im2col patches; rows ordered (dh, dw, pool_pixel) so
              window offset k = dh*3 + dw owns the contiguous row block [k*Pp,(k+1)*Pp).
    w_ref:    (K, Cout)    bf16 conv weight, K = kh*kw*Cin (matches patch ordering)
    b_ref:    (1, Cout)    f32 conv bias
    o_ref:    (1, Pp, Cout) bf16 pooled+relu output (rows >= true Ph*Pw are padding)
    """
    pp = o_ref.shape[1]
    conv = jnp.dot(cols_ref[0], w_ref[...], preferred_element_type=jnp.float32)
    conv = conv + b_ref[...]                              # (9*Pp, Cout) f32
    pooled = conv[0:pp, :]
    for k in range(1, 9):                                 # VPU max over the 3x3 window
        pooled = jnp.maximum(pooled, conv[k * pp:(k + 1) * pp, :])
    o_ref[0] = jnp.maximum(pooled, 0.0).astype(o_ref.dtype)   # ReLU, bf16 store


def mlp_kernel(x_ref, w1_ref, b1_ref, w2_ref, b2_ref, o_ref):
    """o = fc2(relu(fc1(x))).  Matmuls in bf16, accumulate / elementwise in f32."""
    h = jnp.dot(x_ref[...], w1_ref[...], preferred_element_type=jnp.float32) + b1_ref[...]
    h = jnp.maximum(h, 0.0).astype(w2_ref.dtype)
    o_ref[...] = jnp.dot(h, w2_ref[...], preferred_element_type=jnp.float32) + b2_ref[...]


# ----------------------------- host-side glue -------------------------------

def _pool_dims(ho, wo):
    # torch max_pool2d(kernel=3, stride=2, floor)
    return (ho - 3) // 2 + 1, (wo - 3) // 2 + 1


def _round8(n):
    return -(-n // 8) * 8


def im2col_pool(x, kh, kw):
    """x: (N, H, W, C) -> cols (N, 9*Pp, kh*kw*C) bf16, rows ordered (dh, dw, ph, pw).

    Row ((dh*3+dw)*Pp + ph*Pw + pw) holds the conv im2col patch of conv-output pixel
    (2*ph+dh, 2*pw+dw), i.e. pooling window (ph, pw) at offset (dh, dw).
    """
    n, h, w, c = x.shape
    ho, wo = h - kh + 1, w - kw + 1
    ph, pw = _pool_dims(ho, wo)
    p, pp = ph * pw, _round8(ph * pw)
    blocks = []
    for dh in range(3):
        for dw in range(3):
            patches = []
            for i in range(kh):
                for j in range(kw):
                    sl = x[:, dh + i: dh + i + 2 * (ph - 1) + 1: 2,
                              dw + j: dw + j + 2 * (pw - 1) + 1: 2, :]
                    patches.append(sl)                     # (N, Ph, Pw, C)
            blk = jnp.stack(patches, axis=3)               # (N, Ph, Pw, kh*kw, C)
            blk = blk.reshape(n, p, kh * kw * c)
            blocks.append(jnp.pad(blk, ((0, 0), (0, pp - p), (0, 0))))
    cols = jnp.concatenate(blocks, axis=1)                 # (N, 9*Pp, kh*kw*C)
    return cols.astype(jnp.bfloat16), ph, pw, pp


def conv_pool_relu(x, w, b, kh, kw):
    # x: (N, H, W, Cin); w: (kh*kw*Cin, Cout) bf16; b: (1, Cout) f32
    n = x.shape[0]
    cout = w.shape[-1]
    cols, ph, pw, pp = im2col_pool(x, kh, kw)
    kdim = cols.shape[-1]
    out = pl.pallas_call(
        conv_pool_relu_kernel,
        out_shape=jax.ShapeDtypeStruct((n, pp, cout), jnp.bfloat16),
        grid=(n,),
        in_specs=[
            pl.BlockSpec((1, 9 * pp, kdim), lambda i: (i, 0, 0)),
            pl.BlockSpec((kdim, cout), lambda i: (0, 0)),
            pl.BlockSpec((1, cout), lambda i: (0, 0)),
        ],
        out_specs=pl.BlockSpec((1, pp, cout), lambda i: (i, 0, 0)),
        compiler_params=pltpu.CompilerParams(
            dimension_semantics=("parallel",),          # batch images are independent
            vmem_limit_bytes=32 * 1024 * 1024,          # <= 64 MiB: valid on v7x too
        ),
    )(cols, w, b)
    return out[:, :ph * pw, :].reshape(n, ph, pw, cout)


def feature_dims(h, w):
    """Spatial dims reaching the flatten, per forward() semantics."""
    def stage(hh, ww, k):
        return _pool_dims(hh - k + 1, ww - k + 1)
    h, w = stage(h, w, 5)
    h, w = stage(h, w, 4)
    h, w = stage(h, w, 3)
    return h, w


def neuron_counter(h, w):
    ph, pw = feature_dims(h, w)
    return 64 * ph * pw


def init_params(key, num_actions, h, w):
    ph3, pw3 = feature_dims(h, w)
    flat = 64 * ph3 * pw3
    ks = jax.random.split(key, 10)

    def u(k, shape, fan_in):
        bound = 1.0 / float(np.sqrt(fan_in))
        return jax.random.uniform(k, shape, jnp.float32, -bound, bound)

    # Conv weights stored (KH, KW, Cin, Cout) then flattened to match im2col ordering.
    w1 = u(ks[0], (5, 5, 1, 32), 5 * 5 * 1).reshape(25, 32)
    b1 = u(ks[1], (1, 32), 5 * 5 * 1)
    w2 = u(ks[2], (4, 4, 32, 32), 4 * 4 * 32).reshape(512, 32)
    b2 = u(ks[3], (1, 32), 4 * 4 * 32)
    w3 = u(ks[4], (3, 3, 32, 64), 3 * 3 * 32).reshape(288, 64)
    b3 = u(ks[5], (1, 64), 3 * 3 * 32)

    # fc1 is generated against torch's NCHW flatten order, then its rows are permuted
    # ONCE here so the kernels can consume the NHWC-flattened features directly
    # (removes the per-forward device transpose).
    w_fc1_nchw = u(ks[6], (flat, 50), flat)
    perm = np.arange(flat).reshape(64, ph3 * pw3).T.reshape(-1)  # nhwc pos -> nchw idx
    w_fc1 = w_fc1_nchw[perm]
    b_fc1 = u(ks[7], (1, 50), flat)

    # TODO(synk): original module declares fc2 = Linear(in_features=40, ...) which is
    # inconsistent with fc1's 50 outputs (torch forward would crash); we use 50 here.
    w_fc2 = u(ks[8], (50, num_actions), 50)
    b_fc2 = u(ks[9], (1, num_actions), 50)
    # Pad fc2 output to a lane-dense 128-wide slab; sliced back to num_actions on host.
    w_fc2 = jnp.pad(w_fc2, ((0, 0), (0, 128 - num_actions)))
    b_fc2 = jnp.pad(b_fc2, ((0, 0), (0, 128 - num_actions)))

    bf = jnp.bfloat16
    return dict(w1=w1.astype(bf), b1=b1, w2=w2.astype(bf), b2=b2,
                w3=w3.astype(bf), b3=b3,
                w_fc1=w_fc1.astype(bf), b_fc1=b_fc1,
                w_fc2=w_fc2.astype(bf), b_fc2=b_fc2)


def cnn_forward(x_nchw, params, num_actions):
    # NCHW (torch convention) -> NHWC for the TPU kernels.
    x = jnp.transpose(x_nchw, (0, 2, 3, 1)).astype(jnp.float32)
    x = conv_pool_relu(x, params["w1"], params["b1"], 5, 5)
    x = conv_pool_relu(x, params["w2"], params["b2"], 4, 4)
    x = conv_pool_relu(x, params["w3"], params["b3"], 3, 3)
    n = x.shape[0]
    flat = x.reshape(n, -1)     # NHWC flatten; w_fc1 rows were pre-permuted to match
    out = pl.pallas_call(
        mlp_kernel,
        out_shape=jax.ShapeDtypeStruct((n, params["w_fc2"].shape[-1]), jnp.float32),
        in_specs=[pl.BlockSpec(memory_space=pltpu.MemorySpace.VMEM)] * 5,
        out_specs=pl.BlockSpec(memory_space=pltpu.MemorySpace.VMEM),
        compiler_params=pltpu.CompilerParams(vmem_limit_bytes=32 * 1024 * 1024),
    )(flat, params["w_fc1"], params["b_fc1"], params["w_fc2"], params["b_fc2"])
    return out[:, :num_actions]


if __name__ == "__main__":
    key = jax.random.PRNGKey(0)
    kx, kp = jax.random.split(key)

    N, H, W = 2, 48, 48          # small test shapes; the real (1, 80, 80) also fits now
    num_actions = 6

    x = jax.random.uniform(kx, (N, 1, H, W), jnp.float32)   # NCHW, like torch
    params = init_params(kp, num_actions, H, W)

    forward = jax.jit(lambda inp, p: cnn_forward(inp, p, num_actions))
    out = jax.block_until_ready(forward(x, params))
    assert out.shape == (N, num_actions)
    assert bool(jnp.all(jnp.isfinite(out)))
    print("KERNEL_OK")
</pallas_src>

<mosaic_0001>
module attributes {stable_mosaic.version = 11 : i64} {
  func.func @conv_pool_relu_kernel(%arg0: i32, %arg1: memref<1x4032x25xbf16, #tpu.memory_space<vmem>>, %arg2: memref<25x32xbf16, #tpu.memory_space<vmem>>, %arg3: memref<1x32xf32, #tpu.memory_space<vmem>>, %arg4: memref<1x448x32xbf16, #tpu.memory_space<vmem>>) attributes {dimension_semantics = [#tpu.dimension_semantics<parallel>], iteration_bounds = array<i64: 2>, scalar_prefetch = 0 : i64, scratch_operands = 0 : i64, tpu.core_type = #tpu.core_type<tc>, window_params = [{transform_indices = @transform_0, window_bounds = array<i64: 1, 4032, 25>}, {pipeline_mode = #tpu.pipeline_mode<synchronous>, transform_indices = @transform_1, window_bounds = array<i64: 25, 32>}, {pipeline_mode = #tpu.pipeline_mode<synchronous>, transform_indices = @transform_2, window_bounds = array<i64: 1, 32>}, {transform_indices = @transform_3, window_bounds = array<i64: 1, 448, 32>}]} {
    %c0 = arith.constant 0 : index
    %c0_0 = arith.constant 0 : index
    %c0_1 = arith.constant 0 : index
    %0 = vector.load %arg1[%c0, %c0_0, %c0_1] : memref<1x4032x25xbf16, #tpu.memory_space<vmem>>, vector<1x4032x25xbf16>
    %1 = vector.shape_cast %0 : vector<1x4032x25xbf16> to vector<4032x25xbf16>
    %c0_2 = arith.constant 0 : index
    %c0_3 = arith.constant 0 : index
    %2 = vector.load %arg2[%c0_2, %c0_3] : memref<25x32xbf16, #tpu.memory_space<vmem>>, vector<25x32xbf16>
    %cst = arith.constant dense<0.000000e+00> : vector<4032x32xf32>
    %3 = tpu.matmul %1, %2, %cst {dimension_numbers = #tpu.dot_dimension_numbers<[1], [0], [0], [1], [0, 0, 1, 1], [], []>} : vector<4032x25xbf16>, vector<25x32xbf16>, vector<4032x32xf32> -> vector<4032x32xf32>
    %c0_4 = arith.constant 0 : index
    %c0_5 = arith.constant 0 : index
    %4 = vector.load %arg3[%c0_4, %c0_5] : memref<1x32xf32, #tpu.memory_space<vmem>>, vector<1x32xf32>
    %5 = vector.broadcast %4 : vector<1x32xf32> to vector<4032x32xf32>
    %6 = arith.addf %3, %5 : vector<4032x32xf32>
    %7 = vector.extract_strided_slice %6 {offsets = [0, 0], sizes = [448, 32], strides = [1, 1]} : vector<4032x32xf32> to vector<448x32xf32>
    %8 = vector.extract_strided_slice %6 {offsets = [448, 0], sizes = [448, 32], strides = [1, 1]} : vector<4032x32xf32> to vector<448x32xf32>
    %9 = arith.maximumf %7, %8 : vector<448x32xf32>
    %10 = vector.extract_strided_slice %6 {offsets = [896, 0], sizes = [448, 32], strides = [1, 1]} : vector<4032x32xf32> to vector<448x32xf32>
    %11 = arith.maximumf %9, %10 : vector<448x32xf32>
    %12 = vector.extract_strided_slice %6 {offsets = [1344, 0], sizes = [448, 32], strides = [1, 1]} : vector<4032x32xf32> to vector<448x32xf32>
    %13 = arith.maximumf %11, %12 : vector<448x32xf32>
    %14 = vector.extract_strided_slice %6 {offsets = [1792, 0], sizes = [448, 32], strides = [1, 1]} : vector<4032x32xf32> to vector<448x32xf32>
    %15 = arith.maximumf %13, %14 : vector<448x32xf32>
    %16 = vector.extract_strided_slice %6 {offsets = [2240, 0], sizes = [448, 32], strides = [1, 1]} : vector<4032x32xf32> to vector<448x32xf32>
    %17 = arith.maximumf %15, %16 : vector<448x32xf32>
    %18 = vector.extract_strided_slice %6 {offsets = [2688, 0], sizes = [448, 32], strides = [1, 1]} : vector<4032x32xf32> to vector<448x32xf32>
    %19 = arith.maximumf %17, %18 : vector<448x32xf32>
    %20 = vector.extract_strided_slice %6 {offsets = [3136, 0], sizes = [448, 32], strides = [1, 1]} : vector<4032x32xf32> to vector<448x32xf32>
    %21 = arith.maximumf %19, %20 : vector<448x32xf32>
    %22 = vector.extract_strided_slice %6 {offsets = [3584, 0], sizes = [448, 32], strides = [1, 1]} : vector<4032x32xf32> to vector<448x32xf32>
    %23 = arith.maximumf %21, %22 : vector<448x32xf32>
    %cst_6 = arith.constant 0.000000e+00 : f32
    %24 = vector.broadcast %cst_6 : f32 to vector<448x32xf32>
    %25 = arith.maximumf %23, %24 : vector<448x32xf32>
    %26 = arith.truncf %25 : vector<448x32xf32> to vector<448x32xbf16>
    %c0_7 = arith.constant 0 : index
    %c0_8 = arith.constant 0 : index
    %c0_9 = arith.constant 0 : index
    %27 = vector.load %arg4[%c0_7, %c0_8, %c0_9] : memref<1x448x32xbf16, #tpu.memory_space<vmem>>, vector<1x448x32xbf16>
    %28 = vector.shape_cast %27 : vector<1x448x32xbf16> to vector<448x32xbf16>
    %29 = vector.shape_cast %26 : vector<448x32xbf16> to vector<1x448x32xbf16>
    tpu.vector_store %arg4[%c0_7, %c0_8, %c0_9], %29 {strides = array<i32>} : memref<1x448x32xbf16, #tpu.memory_space<vmem>>, vector<1x448x32xbf16>,
    return
  }
  func.func @transform_0(%arg0: i32) -> (i32, i32, i32) {
    %c0_i32 = arith.constant 0 : i32
    %c0_i32_0 = arith.constant 0 : i32
    %c0_i32_1 = arith.constant 0 : i32
    return %arg0, %c0_i32, %c0_i32_0 : i32, i32, i32
  }
  func.func @transform_1(%arg0: i32) -> (i32, i32) {
    %c0_i32 = arith.constant 0 : i32
    %c0_i32_0 = arith.constant 0 : i32
    %c0_i32_1 = arith.constant 0 : i32
    return %c0_i32, %c0_i32_0 : i32, i32
  }
  func.func @transform_2(%arg0: i32) -> (i32, i32) {
    %c0_i32 = arith.constant 0 : i32
    %c0_i32_0 = arith.constant 0 : i32
    %c0_i32_1 = arith.constant 0 : i32
    return %c0_i32, %c0_i32_0 : i32, i32
  }
  func.func @transform_3(%arg0: i32) -> (i32, i32, i32) {
    %c0_i32 = arith.constant 0 : i32
    %c0_i32_0 = arith.constant 0 : i32
    %c0_i32_1 = arith.constant 0 : i32
    return %arg0, %c0_i32, %c0_i32_0 : i32, i32, i32
  }
}

module attributes {stable_mosaic.version = 11 : i64} {
  func.func @conv_pool_relu_kernel(%arg0: i32, %arg1: memref<1x576x512xbf16, #tpu.memory_space<vmem>>, %arg2: memref<512x32xbf16, #tpu.memory_space<vmem>>, %arg3: memref<1x32xf32, #tpu.memory_space<vmem>>, %arg4: memref<1x64x32xbf16, #tpu.memory_space<vmem>>) attributes {dimension_semantics = [#tpu.dimension_semantics<parallel>], iteration_bounds = array<i64: 2>, scalar_prefetch = 0 : i64, scratch_operands = 0 : i64, tpu.core_type = #tpu.core_type<tc>, window_params = [{transform_indices = @transform_0, window_bounds = array<i64: 1, 576, 512>}, {pipeline_mode = #tpu.pipeline_mode<synchronous>, transform_indices = @transform_1, window_bounds = array<i64: 512, 32>}, {pipeline_mode = #tpu.pipeline_mode<synchronous>, transform_indices = @transform_2, window_bounds = array<i64: 1, 32>}, {transform_indices = @transform_3, window_bounds = array<i64: 1, 64, 32>}]} {
    %c0 = arith.constant 0 : index
    %c0_0 = arith.constant 0 : index
    %c0_1 = arith.constant 0 : index
    %0 = vector.load %arg1[%c0, %c0_0, %c0_1] : memref<1x576x512xbf16, #tpu.memory_space<vmem>>, vector<1x576x512xbf16>
    %1 = vector.shape_cast %0 : vector<1x576x512xbf16> to vector<576x512xbf16>
    %c0_2 = arith.constant 0 : index
    %c0_3 = arith.constant 0 : index
    %2 = vector.load %arg2[%c0_2, %c0_3] : memref<512x32xbf16, #tpu.memory_space<vmem>>, vector<512x32xbf16>
    %cst = arith.constant dense<0.000000e+00> : vector<576x32xf32>
    %3 = tpu.matmul %1, %2, %cst {dimension_numbers = #tpu.dot_dimension_numbers<[1], [0], [0], [1], [0, 0, 1, 1], [], []>} : vector<576x512xbf16>, vector<512x32xbf16>, vector<576x32xf32> -> vector<576x32xf32>
    %c0_4 = arith.constant 0 : index
    %c0_5 = arith.constant 0 : index
    %4 = vector.load %arg3[%c0_4, %c0_5] : memref<1x32xf32, #tpu.memory_space<vmem>>, vector<1x32xf32>
    %5 = vector.broadcast %4 : vector<1x32xf32> to vector<576x32xf32>
    %6 = arith.addf %3, %5 : vector<576x32xf32>
    %7 = vector.extract_strided_slice %6 {offsets = [0, 0], sizes = [64, 32], strides = [1, 1]} : vector<576x32xf32> to vector<64x32xf32>
    %8 = vector.extract_strided_slice %6 {offsets = [64, 0], sizes = [64, 32], strides = [1, 1]} : vector<576x32xf32> to vector<64x32xf32>
    %9 = arith.maximumf %7, %8 : vector<64x32xf32>
    %10 = vector.extract_strided_slice %6 {offsets = [128, 0], sizes = [64, 32], strides = [1, 1]} : vector<576x32xf32> to vector<64x32xf32>
    %11 = arith.maximumf %9, %10 : vector<64x32xf32>
    %12 = vector.extract_strided_slice %6 {offsets = [192, 0], sizes = [64, 32], strides = [1, 1]} : vector<576x32xf32> to vector<64x32xf32>
    %13 = arith.maximumf %11, %12 : vector<64x32xf32>
    %14 = vector.extract_strided_slice %6 {offsets = [256, 0], sizes = [64, 32], strides = [1, 1]} : vector<576x32xf32> to vector<64x32xf32>
    %15 = arith.maximumf %13, %14 : vector<64x32xf32>
    %16 = vector.extract_strided_slice %6 {offsets = [320, 0], sizes = [64, 32], strides = [1, 1]} : vector<576x32xf32> to vector<64x32xf32>
    %17 = arith.maximumf %15, %16 : vector<64x32xf32>
    %18 = vector.extract_strided_slice %6 {offsets = [384, 0], sizes = [64, 32], strides = [1, 1]} : vector<576x32xf32> to vector<64x32xf32>
    %19 = arith.maximumf %17, %18 : vector<64x32xf32>
    %20 = vector.extract_strided_slice %6 {offsets = [448, 0], sizes = [64, 32], strides = [1, 1]} : vector<576x32xf32> to vector<64x32xf32>
    %21 = arith.maximumf %19, %20 : vector<64x32xf32>
    %22 = vector.extract_strided_slice %6 {offsets = [512, 0], sizes = [64, 32], strides = [1, 1]} : vector<576x32xf32> to vector<64x32xf32>
    %23 = arith.maximumf %21, %22 : vector<64x32xf32>
    %cst_6 = arith.constant 0.000000e+00 : f32
    %24 = vector.broadcast %cst_6 : f32 to vector<64x32xf32>
    %25 = arith.maximumf %23, %24 : vector<64x32xf32>
    %26 = arith.truncf %25 : vector<64x32xf32> to vector<64x32xbf16>
    %c0_7 = arith.constant 0 : index
    %c0_8 = arith.constant 0 : index
    %c0_9 = arith.constant 0 : index
    %27 = vector.load %arg4[%c0_7, %c0_8, %c0_9] : memref<1x64x32xbf16, #tpu.memory_space<vmem>>, vector<1x64x32xbf16>
    %28 = vector.shape_cast %27 : vector<1x64x32xbf16> to vector<64x32xbf16>
    %29 = vector.shape_cast %26 : vector<64x32xbf16> to vector<1x64x32xbf16>
    tpu.vector_store %arg4[%c0_7, %c0_8, %c0_9], %29 {strides = array<i32>} : memref<1x64x32xbf16, #tpu.memory_space<vmem>>, vector<1x64x32xbf16>,
    return
  }
  func.func @transform_0(%arg0: i32) -> (i32, i32, i32) {
    %c0_i32 = arith.constant 0 : i32
    %c0_i32_0 = arith.constant 0 : i32
    %c0_i32_1 = arith.constant 0 : i32
    return %arg0, %c0_i32, %c0_i32_0 : i32, i32, i32
  }
  func.func @transform_1(%arg0: i32) -> (i32, i32) {
    %c0_i32 = arith.constant 0 : i32
    %c0_i32_0 = arith.constant 0 : i32
    %c0_i32_1 = arith.constant 0 : i32
    return %c0_i32, %c0_i32_0 : i32, i32
  }
  func.func @transform_2(%arg0: i32) -> (i32, i32) {
    %c0_i32 = arith.constant 0 : i32
    %c0_i32_0 = arith.constant 0 : i32
    %c0_i32_1 = arith.constant 0 : i32
    return %c0_i32, %c0_i32_0 : i32, i32
  }
  func.func @transform_3(%arg0: i32) -> (i32, i32, i32) {
    %c0_i32 = arith.constant 0 : i32
    %c0_i32_0 = arith.constant 0 : i32
    %c0_i32_1 = arith.constant 0 : i32
    return %arg0, %c0_i32, %c0_i32_0 : i32, i32, i32
  }
}

module attributes {stable_mosaic.version = 11 : i64} {
  func.func @conv_pool_relu_kernel(%arg0: i32, %arg1: memref<1x72x288xbf16, #tpu.memory_space<vmem>>, %arg2: memref<288x64xbf16, #tpu.memory_space<vmem>>, %arg3: memref<1x64xf32, #tpu.memory_space<vmem>>, %arg4: memref<1x8x64xbf16, #tpu.memory_space<vmem>>) attributes {dimension_semantics = [#tpu.dimension_semantics<parallel>], iteration_bounds = array<i64: 2>, scalar_prefetch = 0 : i64, scratch_operands = 0 : i64, tpu.core_type = #tpu.core_type<tc>, window_params = [{transform_indices = @transform_0, window_bounds = array<i64: 1, 72, 288>}, {pipeline_mode = #tpu.pipeline_mode<synchronous>, transform_indices = @transform_1, window_bounds = array<i64: 288, 64>}, {pipeline_mode = #tpu.pipeline_mode<synchronous>, transform_indices = @transform_2, window_bounds = array<i64: 1, 64>}, {transform_indices = @transform_3, window_bounds = array<i64: 1, 8, 64>}]} {
    %c0 = arith.constant 0 : index
    %c0_0 = arith.constant 0 : index
    %c0_1 = arith.constant 0 : index
    %0 = vector.load %arg1[%c0, %c0_0, %c0_1] : memref<1x72x288xbf16, #tpu.memory_space<vmem>>, vector<1x72x288xbf16>
    %1 = vector.shape_cast %0 : vector<1x72x288xbf16> to vector<72x288xbf16>
    %c0_2 = arith.constant 0 : index
    %c0_3 = arith.constant 0 : index
    %2 = vector.load %arg2[%c0_2, %c0_3] : memref<288x64xbf16, #tpu.memory_space<vmem>>, vector<288x64xbf16>
    %cst = arith.constant dense<0.000000e+00> : vector<72x64xf32>
    %3 = tpu.matmul %1, %2, %cst {dimension_numbers = #tpu.dot_dimension_numbers<[1], [0], [0], [1], [0, 0, 1, 1], [], []>} : vector<72x288xbf16>, vector<288x64xbf16>, vector<72x64xf32> -> vector<72x64xf32>
    %c0_4 = arith.constant 0 : index
    %c0_5 = arith.constant 0 : index
    %4 = vector.load %arg3[%c0_4, %c0_5] : memref<1x64xf32, #tpu.memory_space<vmem>>, vector<1x64xf32>
    %5 = vector.broadcast %4 : vector<1x64xf32> to vector<72x64xf32>
    %6 = arith.addf %3, %5 : vector<72x64xf32>
    %7 = vector.extract_strided_slice %6 {offsets = [0, 0], sizes = [8, 64], strides = [1, 1]} : vector<72x64xf32> to vector<8x64xf32>
    %8 = vector.extract_strided_slice %6 {offsets = [8, 0], sizes = [8, 64], strides = [1, 1]} : vector<72x64xf32> to vector<8x64xf32>
    %9 = arith.maximumf %7, %8 : vector<8x64xf32>
    %10 = vector.extract_strided_slice %6 {offsets = [16, 0], sizes = [8, 64], strides = [1, 1]} : vector<72x64xf32> to vector<8x64xf32>
    %11 = arith.maximumf %9, %10 : vector<8x64xf32>
    %12 = vector.extract_strided_slice %6 {offsets = [24, 0], sizes = [8, 64], strides = [1, 1]} : vector<72x64xf32> to vector<8x64xf32>
    %13 = arith.maximumf %11, %12 : vector<8x64xf32>
    %14 = vector.extract_strided_slice %6 {offsets = [32, 0], sizes = [8, 64], strides = [1, 1]} : vector<72x64xf32> to vector<8x64xf32>
    %15 = arith.maximumf %13, %14 : vector<8x64xf32>
    %16 = vector.extract_strided_slice %6 {offsets = [40, 0], sizes = [8, 64], strides = [1, 1]} : vector<72x64xf32> to vector<8x64xf32>
    %17 = arith.maximumf %15, %16 : vector<8x64xf32>
    %18 = vector.extract_strided_slice %6 {offsets = [48, 0], sizes = [8, 64], strides = [1, 1]} : vector<72x64xf32> to vector<8x64xf32>
    %19 = arith.maximumf %17, %18 : vector<8x64xf32>
    %20 = vector.extract_strided_slice %6 {offsets = [56, 0], sizes = [8, 64], strides = [1, 1]} : vector<72x64xf32> to vector<8x64xf32>
    %21 = arith.maximumf %19, %20 : vector<8x64xf32>
    %22 = vector.extract_strided_slice %6 {offsets = [64, 0], sizes = [8, 64], strides = [1, 1]} : vector<72x64xf32> to vector<8x64xf32>
    %23 = arith.maximumf %21, %22 : vector<8x64xf32>
    %cst_6 = arith.constant 0.000000e+00 : f32
    %24 = vector.broadcast %cst_6 : f32 to vector<8x64xf32>
    %25 = arith.maximumf %23, %24 : vector<8x64xf32>
    %26 = arith.truncf %25 : vector<8x64xf32> to vector<8x64xbf16>
    %c0_7 = arith.constant 0 : index
    %c0_8 = arith.constant 0 : index
    %c0_9 = arith.constant 0 : index
    %27 = vector.load %arg4[%c0_7, %c0_8, %c0_9] : memref<1x8x64xbf16, #tpu.memory_space<vmem>>, vector<1x8x64xbf16>
    %28 = vector.shape_cast %27 : vector<1x8x64xbf16> to vector<8x64xbf16>
    %29 = vector.shape_cast %26 : vector<8x64xbf16> to vector<1x8x64xbf16>
    tpu.vector_store %arg4[%c0_7, %c0_8, %c0_9], %29 {strides = array<i32>} : memref<1x8x64xbf16, #tpu.memory_space<vmem>>, vector<1x8x64xbf16>,
    return
  }
  func.func @transform_0(%arg0: i32) -> (i32, i32, i32) {
    %c0_i32 = arith.constant 0 : i32
    %c0_i32_0 = arith.constant 0 : i32
    %c0_i32_1 = arith.constant 0 : i32
    return %arg0, %c0_i32, %c0_i32_0 : i32, i32, i32
  }
  func.func @transform_1(%arg0: i32) -> (i32, i32) {
    %c0_i32 = arith.constant 0 : i32
    %c0_i32_0 = arith.constant 0 : i32
    %c0_i32_1 = arith.constant 0 : i32
    return %c0_i32, %c0_i32_0 : i32, i32
  }
  func.func @transform_2(%arg0: i32) -> (i32, i32) {
    %c0_i32 = arith.constant 0 : i32
    %c0_i32_0 = arith.constant 0 : i32
    %c0_i32_1 = arith.constant 0 : i32
    return %c0_i32, %c0_i32_0 : i32, i32
  }
  func.func @transform_3(%arg0: i32) -> (i32, i32, i32) {
    %c0_i32 = arith.constant 0 : i32
    %c0_i32_0 = arith.constant 0 : i32
    %c0_i32_1 = arith.constant 0 : i32
    return %arg0, %c0_i32, %c0_i32_0 : i32, i32, i32
  }
}

module attributes {stable_mosaic.version = 11 : i64} {
  func.func @mlp_kernel(%arg0: memref<2x256xbf16, #tpu.memory_space<vmem>>, %arg1: memref<256x50xbf16, #tpu.memory_space<vmem>>, %arg2: memref<1x50xf32, #tpu.memory_space<vmem>>, %arg3: memref<50x128xbf16, #tpu.memory_space<vmem>>, %arg4: memref<1x128xf32, #tpu.memory_space<vmem>>, %arg5: memref<2x128xf32, #tpu.memory_space<vmem>>) attributes {dimension_semantics = [], scalar_prefetch = 0 : i64, scratch_operands = 0 : i64, tpu.core_type = #tpu.core_type<tc>} {
    %c0 = arith.constant 0 : index
    %c0_0 = arith.constant 0 : index
    %0 = vector.load %arg0[%c0, %c0_0] : memref<2x256xbf16, #tpu.memory_space<vmem>>, vector<2x256xbf16>
    %c0_1 = arith.constant 0 : index
    %c0_2 = arith.constant 0 : index
    %1 = vector.load %arg1[%c0_1, %c0_2] : memref<256x50xbf16, #tpu.memory_space<vmem>>, vector<256x50xbf16>
    %cst = arith.constant dense<0.000000e+00> : vector<2x50xf32>
    %2 = tpu.matmul %0, %1, %cst {dimension_numbers = #tpu.dot_dimension_numbers<[1], [0], [0], [1], [0, 0, 1, 1], [], []>} : vector<2x256xbf16>, vector<256x50xbf16>, vector<2x50xf32> -> vector<2x50xf32>
    %c0_3 = arith.constant 0 : index
    %c0_4 = arith.constant 0 : index
    %3 = vector.load %arg2[%c0_3, %c0_4] : memref<1x50xf32, #tpu.memory_space<vmem>>, vector<1x50xf32>
    %4 = vector.broadcast %3 : vector<1x50xf32> to vector<2x50xf32>
    %5 = arith.addf %2, %4 : vector<2x50xf32>
    %cst_5 = arith.constant 0.000000e+00 : f32
    %6 = vector.broadcast %cst_5 : f32 to vector<2x50xf32>
    %7 = arith.maximumf %5, %6 : vector<2x50xf32>
    %8 = arith.truncf %7 : vector<2x50xf32> to vector<2x50xbf16>
    %c0_6 = arith.constant 0 : index
    %c0_7 = arith.constant 0 : index
    %9 = vector.load %arg3[%c0_6, %c0_7] : memref<50x128xbf16, #tpu.memory_space<vmem>>, vector<50x128xbf16>
    %cst_8 = arith.constant dense<0.000000e+00> : vector<2x128xf32>
    %10 = tpu.matmul %8, %9, %cst_8 {dimension_numbers = #tpu.dot_dimension_numbers<[1], [0], [0], [1], [0, 0, 1, 1], [], []>} : vector<2x50xbf16>, vector<50x128xbf16>, vector<2x128xf32> -> vector<2x128xf32>
    %c0_9 = arith.constant 0 : index
    %c0_10 = arith.constant 0 : index
    %11 = vector.load %arg4[%c0_9, %c0_10] : memref<1x128xf32, #tpu.memory_space<vmem>>, vector<1x128xf32>
    %12 = vector.broadcast %11 : vector<1x128xf32> to vector<2x128xf32>
    %13 = arith.addf %10, %12 : vector<2x128xf32>
    %c0_11 = arith.constant 0 : index
    %c0_12 = arith.constant 0 : index
    %14 = vector.load %arg5[%c0_11, %c0_12] : memref<2x128xf32, #tpu.memory_space<vmem>>, vector<2x128xf32>
    tpu.vector_store %arg5[%c0_11, %c0_12], %13 {strides = array<i32>} : memref<2x128xf32, #tpu.memory_space<vmem>>, vector<2x128xf32>,
    return
  }
}

</mosaic_0001>

<bundles_post_ra>
// kernel: _lambda_.4
= control target key start
LH: loop header
LB: loop body
LE: loop exit
PB: predicated region body
PF: predicated region fallthrough
CT: control target
= control target key end

     0   :  { %s7302_s12 = smov 0   ;;  %s10825_s0 = inlined_call_operand.vmem [shape: bf16[2,4032,25], index: 0, kind: input, shape index: {}]   ;;  %s10826_s1 = inlined_call_operand.vmem [shape: bf16[25,32], index: 1, kind: input, shape index: {}]   ;;  %s10827_s2 = inlined_call_operand.vmem [shape: f32[1,32], index: 2, kind: input, shape index: {}]   ;;  %s10828_s3 = inlined_call_operand.vmem [shape: bf16[2,448,32], index: 3, kind: output, shape index: {}]  }
   0x1 LB: > { %s5611_s13 = sadd.s32 4294967295, %s7279_s12   ;;  %p5615_p0 = scmp.ge.s32.totalorder %s7279_s12, 1  ;;  %s7279_s12 = sphi %s7302_s12, %s13_s12  }
   0x2   : > { %p137_p1 = scmp.lt.s32.totalorder %s7279_s12, 3 }
   0x4   : > { %p138_p2 = pnand %p5615_p0, %p137_p1 }
   0x6   : > { %141 = sbr.rel (%p138_p2) target bundleno = 777 (0x309), region = 32 }
   0xd   : > { %v7016_v0 = vld [vmem:[%s10826_s1] sm:$0xff]   ;;  %vm2715_vm0 = vcmask 1043456   ;;  %v7017_v1 = vld [vmem:[%s10826_s1 + $0x8] sm:$0x1f]   ;;  %vm2716_vm1 = vcmask 1044480   ;;  %p161_p3 = scmp.lt.s32.totalorder %s5611_s13, 1 }
   0xe   : > { %6493 = vmatprep.subr.bf16.mxu0 %v7016_v0  ;;  %7001 = vmatprep.subr.bf16.mxu1 %v7016_v0  ;;  %v7281_v2 = vmov 65535   ;;  %vm1958_vm2 = vcmask 203776   ;;  %vm5499_vm3 = vcmask 257024  }
   0xf   : > { %6494 = vmatpush3.bf16.msra.mxu0 %v7016_v0  ;;  %7003 = vmatpush3.bf16.msra.mxu1 %v7016_v0  ;;  %v2717_v3 = vsel %vm2715_vm0, 4294967295, %v7281_v2  ;;  %s11896_s13 = smov (!%p161_p3, %s5611_s13), 1 }
  0x10   : > { %v2718_v4 = vsel %vm2716_vm1, %v2717_v3, 0  ;;  %s7005_s18 = smul.u32 2016, %s11896_s13 }
  0x11   : > { %v2720_v5 = vand.u32 %v7017_v1, %v2718_v4  ;;  %s7006_s28 = smul.u32 224, %s11896_s13 }
  0x12   : > { %s7322_s21 = scalar_lea.vmem %s10825_s0, %s7005_s18 }
  0x13   : > { %6495 = vmatprep.subr.bf16.mxu0 %v2720_v5  ;;  %7002 = vmatprep.subr.bf16.mxu1 %v2720_v5  ;;  %v7018_v6 = vld [vmem:[%s7322_s21] sm:$0xff]   ;;  %v7019_v7 = vld [vmem:[%s7322_s21 + $0x3f0] sm:$0xff]   ;;  %v7020_v8 = vld [vmem:[%s7322_s21 + $0x8] sm:$0xff]   ;;  %s10496_s4 = scalar_lea.vmem %s10828_s3, %s7006_s28 }
  0x14   : > { %6496 = vmatpush3.bf16.msra.mxu0 %v2720_v5  ;;  %7004 = vmatpush3.bf16.msra.mxu1 %v2720_v5  ;;  %v7021_v9 = vld [vmem:[%s7322_s21 + $0x3f8] sm:$0xff]   ;;  %v7022_v10 = vld [vmem:[%s7322_s21 + $0x10] sm:$0xff]   ;;  %v7023_v11 = vld [vmem:[%s7322_s21 + $0x400] sm:$0xff]  }
  0x15   : > { %6497 = vmatprep.mubr.msk.bf16.mxu0 %vm1958_vm2, %v7018_v6  ;;  %6749 = vmatprep.mubr.msk.bf16.mxu1 %vm1958_vm2, %v7019_v7  ;;  %v7024_v12 = vld [vmem:[%s7322_s21 + $0x18] sm:$0xff]   ;;  %v7025_v13 = vld [vmem:[%s7322_s21 + $0x408] sm:$0xff]   ;;  %v7026_v14 = vld [vmem:[%s7322_s21 + $0x20] sm:$0xff]  }
  0x16   : > { %v7027_v15 = vld [vmem:[%s7322_s21 + $0x410] sm:$0xff]   ;;  %v7028_v16 = vld [vmem:[%s7322_s21 + $0x28] sm:$0xff]   ;;  %v7029_v17 = vld [vmem:[%s7322_s21 + $0x418] sm:$0xff]  }
  0x17   : > { %6498 = vmatmul.mubr.msk.bf16.vlgmr.msra.gmra.mrb[0].mxu0 %vm1958_vm2, %v7020_v8  ;;  %6750 = vmatmul.mubr.msk.bf16.vlgmr.msra.gmra.mrb[0].mxu1 %vm1958_vm2, %v7021_v9  ;;  %v7030_v18 = vld [vmem:[%s7322_s21 + $0x30] sm:$0xff]   ;;  %v7031_v19 = vld [vmem:[%s7322_s21 + $0x420] sm:$0xff]   ;;  %v7032_v20 = vld [vmem:[%s7322_s21 + $0x38] sm:$0xff]  }
  0x18   : > { %6501 = vmatprep.mubr.msk.bf16.mxu0 %vm1958_vm2, %v7022_v10  ;;  %6753 = vmatprep.mubr.msk.bf16.mxu1 %vm1958_vm2, %v7023_v11  ;;  %v7033_v21 = vld [vmem:[%s7322_s21 + $0x428] sm:$0xff]   ;;  %v7034_v22 = vld [vmem:[%s7322_s21 + $0x40] sm:$0xff]   ;;  %v7035_v23 = vld [vmem:[%s7322_s21 + $0x430] sm:$0xff]  }
  0x19   : > { %v7036_v24 = vld [vmem:[%s7322_s21 + $0x48] sm:$0xff]   ;;  %v7037_v25 = vld [vmem:[%s7322_s21 + $0x438] sm:$0xff]   ;;  %v7038_v26 = vld [vmem:[%s7322_s21 + $0x50] sm:$0xff]  }
  0x1a   : > { %v7039_v27 = vld [vmem:[%s7322_s21 + $0x440] sm:$0xff]   ;;  %v7040_v28 = vld [vmem:[%s7322_s21 + $0x58] sm:$0xff]   ;;  %v7041_v29 = vld [vmem:[%s7322_s21 + $0x448] sm:$0xff]  }
  0x1b   : > { %v7042_v30 = vld [vmem:[%s7322_s21 + $0x60] sm:$0xff]   ;;  %v7043_v31 = vld [vmem:[%s7322_s21 + $0x450] sm:$0xff]   ;;  %v7044_v32 = vld [vmem:[%s7322_s21 + $0x68] sm:$0xff]  }
  0x1c   : > { %v7045_v33 = vld [vmem:[%s7322_s21 + $0x458] sm:$0xff]   ;;  %v7046_v34 = vld [vmem:[%s7322_s21 + $0x70] sm:$0xff]   ;;  %v7047_v35 = vld [vmem:[%s7322_s21 + $0x460] sm:$0xff]  }
  0x1d   : > { %v7048_v36 = vld [vmem:[%s7322_s21 + $0x78] sm:$0xff]   ;;  %v7049_v37 = vld [vmem:[%s7322_s21 + $0x468] sm:$0xff]   ;;  %v7050_v38 = vld [vmem:[%s7322_s21 + $0x80] sm:$0xff]  }
  0x1e   : > { %v7051_v39 = vld [vmem:[%s7322_s21 + $0x470] sm:$0xff]   ;;  %v7052_v40 = vld [vmem:[%s7322_s21 + $0x88] sm:$0xff]   ;;  %v7053_v41 = vld [vmem:[%s7322_s21 + $0x478] sm:$0xff]  }
  0x1f   : > { %6502 = vmatmul.mubr.msk.bf16.gmra.mrb[4].mxu0 %vm1958_vm2, %v7024_v12  ;;  %6754 = vmatmul.mubr.msk.bf16.gmra.mrb[4].mxu1 %vm1958_vm2, %v7025_v13  ;;  %v7054_v42 = vld [vmem:[%s7322_s21 + $0x90] sm:$0xff]   ;;  %v7055_v43 = vld [vmem:[%s7322_s21 + $0x480] sm:$0xff]   ;;  %v7056_v44 = vld [vmem:[%s7322_s21 + $0x98] sm:$0xff]  }
  0x20   : > { %6505 = vmatprep.mubr.msk.bf16.mxu0 %vm1958_vm2, %v7026_v14  ;;  %6757 = vmatprep.mubr.msk.bf16.mxu1 %vm1958_vm2, %v7027_v15  ;;  %v7057_v45 = vld [vmem:[%s7322_s21 + $0x488] sm:$0xff]   ;;  %v7058_v46 = vld [vmem:[%s7322_s21 + $0xa0] sm:$0xff]   ;;  %v7059_v47 = vld [vmem:[%s7322_s21 + $0x490] sm:$0xff]  }
  0x21   : > { %v7060_v48 = vld [vmem:[%s7322_s21 + $0xa8] sm:$0xff]   ;;  %v7061_v49 = vld [vmem:[%s7322_s21 + $0x498] sm:$0xff]   ;;  %v7062_v50 = vld [vmem:[%s7322_s21 + $0xb0] sm:$0xff]  }
  0x22   : > { %v7063_v51 = vld [vmem:[%s7322_s21 + $0x4a0] sm:$0xff]   ;;  %v7064_v52 = vld [vmem:[%s7322_s21 + $0xb8] sm:$0xff]   ;;  %v7065_v53 = vld [vmem:[%s7322_s21 + $0x4a8] sm:$0xff]  }
  0x23   : > { %v7066_v54 = vld [vmem:[%s7322_s21 + $0xc0] sm:$0xff]   ;;  %v7067_v55 = vld [vmem:[%s7322_s21 + $0x4b0] sm:$0xff]   ;;  %v7068_v56 = vld [vmem:[%s7322_s21 + $0xc8] sm:$0xff]  }
  0x24   : > { %v7069_v57 = vld [vmem:[%s7322_s21 + $0x4b8] sm:$0xff]   ;;  %v7070_v58 = vld [vmem:[%s7322_s21 + $0xd0] sm:$0xff]   ;;  %v7071_v59 = vld [vmem:[%s7322_s21 + $0x4c0] sm:$0xff]  }
  0x25   : > { %v7072_v60 = vld [vmem:[%s7322_s21 + $0xd8] sm:$0xff]   ;;  %v7073_v61 = vld [vmem:[%s7322_s21 + $0x4c8] sm:$0xff]   ;;  %v7074_v62 = vld [vmem:[%s7322_s21 + $0xe0] sm:$0xff]  }
  0x26   : > { %v7075_v63 = vld [vmem:[%s7322_s21 + $0x4d0] sm:$0xff]   ;;  %v7076_v0 = vld [vmem:[%s7322_s21 + $0xe8] sm:$0xff]   ;;  %v7077_v1 = vld [vmem:[%s7322_s21 + $0x4d8] sm:$0xff]  }
  0x27   : > { %6506 = vmatmul.mubr.msk.bf16.gmra.mrb[8].mxu0 %vm1958_vm2, %v7028_v16  ;;  %6758 = vmatmul.mubr.msk.bf16.gmra.mrb[8].mxu1 %vm1958_vm2, %v7029_v17  ;;  %v7078_v2 = vld [vmem:[%s7322_s21 + $0xf0] sm:$0xff]   ;;  %v7079_v3 = vld [vmem:[%s7322_s21 + $0x4e0] sm:$0xff]   ;;  %v7080_v4 = vld [vmem:[%s7322_s21 + $0xf8] sm:$0xff]  }
  0x28   : > { %6509 = vmatprep.mubr.msk.bf16.mxu0 %vm1958_vm2, %v7030_v18  ;;  %6761 = vmatprep.mubr.msk.bf16.mxu1 %vm1958_vm2, %v7031_v19  ;;  %v7081_v5 = vld [vmem:[%s7322_s21 + $0x4e8] sm:$0xff]   ;;  %v7082_v6 = vld [vmem:[%s7322_s21 + $0x100] sm:$0xff]   ;;  %v7083_v7 = vld [vmem:[%s7322_s21 + $0x4f0] sm:$0xff]  }
  0x29   : > { %v7084_v8 = vld [vmem:[%s7322_s21 + $0x108] sm:$0xff]   ;;  %v7085_v9 = vld [vmem:[%s7322_s21 + $0x4f8] sm:$0xff]   ;;  %v7086_v10 = vld [vmem:[%s7322_s21 + $0x110] sm:$0xff]  }
  0x2a   : > { %v7087_v11 = vld [vmem:[%s7322_s21 + $0x500] sm:$0xff]   ;;  %v7088_v12 = vld [vmem:[%s7322_s21 + $0x118] sm:$0xff]   ;;  %v7089_v13 = vld [vmem:[%s7322_s21 + $0x508] sm:$0xff]  }
  0x2b   : > { %v7090_v14 = vld [vmem:[%s7322_s21 + $0x120] sm:$0xff]   ;;  %v7091_v15 = vld [vmem:[%s7322_s21 + $0x510] sm:$0xff]   ;;  %v7092_v16 = vld [vmem:[%s7322_s21 + $0x128] sm:$0xff]  }
  0x2c   : > { %v7093_v17 = vld [vmem:[%s7322_s21 + $0x518] sm:$0xff]   ;;  %v7094_v18 = vld [vmem:[%s7322_s21 + $0x130] sm:$0xff]   ;;  %v7095_v19 = vld [vmem:[%s7322_s21 + $0x520] sm:$0xff]  }
  0x2f   : > { %6510 = vmatmul.mubr.msk.bf16.gmra.mrb[12].mxu0 %vm1958_vm2, %v7032_v20  ;;  %6762 = vmatmul.mubr.msk.bf16.gmra.mrb[12].mxu1 %vm1958_vm2, %v7033_v21  ;;  %v7096_v20 = vld [vmem:[%s7322_s21 + $0x138] sm:$0xff]   ;;  %v7097_v21 = vld [vmem:[%s7322_s21 + $0x528] sm:$0xff]  }
  0x30   : > { %6513 = vmatprep.mubr.msk.bf16.mxu0 %vm1958_vm2, %v7034_v22  ;;  %6765 = vmatprep.mubr.msk.bf16.mxu1 %vm1958_vm2, %v7035_v23  ;;  %v7098_v22 = vld [vmem:[%s7322_s21 + $0x140] sm:$0xff]   ;;  %v7099_v23 = vld [vmem:[%s7322_s21 + $0x530] sm:$0xff]  }
  0x37   : > { %6514 = vmatmul.mubr.msk.bf16.gmra.mrb[16].mxu0 %vm1958_vm2, %v7036_v24  ;;  %6766 = vmatmul.mubr.msk.bf16.gmra.mrb[16].mxu1 %vm1958_vm2, %v7037_v25  ;;  %v7100_v24 = vld [vmem:[%s7322_s21 + $0x148] sm:$0xff]   ;;  %v7101_v25 = vld [vmem:[%s7322_s21 + $0x538] sm:$0xff]  }
  0x38   : > { %6517 = vmatprep.mubr.msk.bf16.mxu0 %vm1958_vm2, %v7038_v26  ;;  %6769 = vmatprep.mubr.msk.bf16.mxu1 %vm1958_vm2, %v7039_v27  ;;  %v7102_v26 = vld [vmem:[%s7322_s21 + $0x150] sm:$0xff]   ;;  %v7103_v27 = vld [vmem:[%s7322_s21 + $0x540] sm:$0xff]  }
  0x3f   : > { %6518 = vmatmul.mubr.msk.bf16.gmra.mrb[20].mxu0 %vm1958_vm2, %v7040_v28  ;;  %6770 = vmatmul.mubr.msk.bf16.gmra.mrb[20].mxu1 %vm1958_vm2, %v7041_v29  ;;  %v7104_v28 = vld [vmem:[%s7322_s21 + $0x158] sm:$0xff]   ;;  %v7105_v29 = vld [vmem:[%s7322_s21 + $0x548] sm:$0xff]  }
  0x40   : > { %6521 = vmatprep.mubr.msk.bf16.mxu0 %vm1958_vm2, %v7042_v30  ;;  %6773 = vmatprep.mubr.msk.bf16.mxu1 %vm1958_vm2, %v7043_v31  ;;  %v7106_v30 = vld [vmem:[%s7322_s21 + $0x160] sm:$0xff]   ;;  %v7107_v31 = vld [vmem:[%s7322_s21 + $0x550] sm:$0xff]  }
  0x47   : > { %6522 = vmatmul.mubr.msk.bf16.gmra.mrb[24].mxu0 %vm1958_vm2, %v7044_v32  ;;  %6774 = vmatmul.mubr.msk.bf16.gmra.mrb[24].mxu1 %vm1958_vm2, %v7045_v33  ;;  %v7108_v32 = vld [vmem:[%s7322_s21 + $0x168] sm:$0xff]   ;;  %v7109_v33 = vld [vmem:[%s7322_s21 + $0x558] sm:$0xff]  }
  0x48   : > { %6525 = vmatprep.mubr.msk.bf16.mxu0 %vm1958_vm2, %v7046_v34  ;;  %6777 = vmatprep.mubr.msk.bf16.mxu1 %vm1958_vm2, %v7047_v35  ;;  %v7110_v34 = vld [vmem:[%s7322_s21 + $0x170] sm:$0xff]   ;;  %v7111_v35 = vld [vmem:[%s7322_s21 + $0x560] sm:$0xff]  }
  0x4f   : > { %6526 = vmatmul.mubr.msk.bf16.gmra.mrb[28].mxu0 %vm1958_vm2, %v7048_v36  ;;  %6778 = vmatmul.mubr.msk.bf16.gmra.mrb[28].mxu1 %vm1958_vm2, %v7049_v37  ;;  %v7112_v36 = vld [vmem:[%s7322_s21 + $0x178] sm:$0xff]   ;;  %v7113_v37 = vld [vmem:[%s7322_s21 + $0x568] sm:$0xff]  }
  0x50   : > { %6529 = vmatprep.mubr.msk.bf16.mxu0 %vm1958_vm2, %v7050_v38  ;;  %6781 = vmatprep.mubr.msk.bf16.mxu1 %vm1958_vm2, %v7051_v39  ;;  %v7114_v38 = vld [vmem:[%s7322_s21 + $0x180] sm:$0xff]   ;;  %v7115_v39 = vld [vmem:[%s7322_s21 + $0x570] sm:$0xff]  }
  0x57   : > { %6530 = vmatmul.mubr.msk.bf16.gmra.mrb[32].mxu0 %vm1958_vm2, %v7052_v40  ;;  %6782 = vmatmul.mubr.msk.bf16.gmra.mrb[32].mxu1 %vm1958_vm2, %v7053_v41  ;;  %v7116_v40 = vld [vmem:[%s7322_s21 + $0x188] sm:$0xff]   ;;  %v7117_v41 = vld [vmem:[%s7322_s21 + $0x578] sm:$0xff]  }
  0x58   : > { %6533 = vmatprep.mubr.msk.bf16.mxu0 %vm1958_vm2, %v7054_v42  ;;  %6785 = vmatprep.mubr.msk.bf16.mxu1 %vm1958_vm2, %v7055_v43  ;;  %v7118_v42 = vld [vmem:[%s7322_s21 + $0x190] sm:$0xff]   ;;  %v7119_v43 = vld [vmem:[%s7322_s21 + $0x580] sm:$0xff]  }
  0x5f   : > { %6534 = vmatmul.mubr.msk.bf16.gmra.mrb[36].mxu0 %vm1958_vm2, %v7056_v44  ;;  %6786 = vmatmul.mubr.msk.bf16.gmra.mrb[36].mxu1 %vm1958_vm2, %v7057_v45  ;;  %v7120_v44 = vld [vmem:[%s7322_s21 + $0x198] sm:$0xff]   ;;  %v7121_v45 = vld [vmem:[%s7322_s21 + $0x588] sm:$0xff]  }
  0x60   : > { %6537 = vmatprep.mubr.msk.bf16.mxu0 %vm1958_vm2, %v7058_v46  ;;  %6789 = vmatprep.mubr.msk.bf16.mxu1 %vm1958_vm2, %v7059_v47  ;;  %v7122_v46 = vld [vmem:[%s7322_s21 + $0x1a0] sm:$0xff]   ;;  %v7123_v47 = vld [vmem:[%s7322_s21 + $0x590] sm:$0xff]  }
  0x67   : > { %6538 = vmatmul.mubr.msk.bf16.gmra.mrb[40].mxu0 %vm1958_vm2, %v7060_v48  ;;  %6790 = vmatmul.mubr.msk.bf16.gmra.mrb[40].mxu1 %vm1958_vm2, %v7061_v49  ;;  %v7124_v48 = vld [vmem:[%s7322_s21 + $0x1a8] sm:$0xff]   ;;  %v7125_v49 = vld [vmem:[%s7322_s21 + $0x598] sm:$0xff]  }
  0x68   : > { %6541 = vmatprep.mubr.msk.bf16.mxu0 %vm1958_vm2, %v7062_v50  ;;  %6793 = vmatprep.mubr.msk.bf16.mxu1 %vm1958_vm2, %v7063_v51  ;;  %v7126_v50 = vld [vmem:[%s7322_s21 + $0x1b0] sm:$0xff]   ;;  %v7127_v51 = vld [vmem:[%s7322_s21 + $0x5a0] sm:$0xff]  }
  0x6f   : > { %6542 = vmatmul.mubr.msk.bf16.gmra.mrb[44].mxu0 %vm1958_vm2, %v7064_v52  ;;  %6794 = vmatmul.mubr.msk.bf16.gmra.mrb[44].mxu1 %vm1958_vm2, %v7065_v53  ;;  %v7128_v52 = vld [vmem:[%s7322_s21 + $0x1b8] sm:$0xff]  }
  0x70   : > { %6545 = vmatprep.mubr.msk.bf16.mxu0 %vm1958_vm2, %v7066_v54  ;;  %6797 = vmatprep.mubr.msk.bf16.mxu1 %vm1958_vm2, %v7067_v55  ;;  %v7129_v54 = vld [vmem:[%s7322_s21 + $0x5a8] sm:$0xff]   ;;  %v7130_v55 = vld [vmem:[%s7322_s21 + $0x1c0] sm:$0xff]  }
  0x77   : > { %6546 = vmatmul.mubr.msk.bf16.gmra.mrb[48].mxu0 %vm1958_vm2, %v7068_v56  ;;  %6798 = vmatmul.mubr.msk.bf16.gmra.mrb[48].mxu1 %vm1958_vm2, %v7069_v57 }
  0x78   : > { %6549 = vmatprep.mubr.msk.bf16.mxu0 %vm1958_vm2, %v7070_v58  ;;  %6801 = vmatprep.mubr.msk.bf16.mxu1 %vm1958_vm2, %v7071_v59 }
  0x7f   : > { %6550 = vmatmul.mubr.msk.bf16.gmra.mrb[52].mxu0 %vm1958_vm2, %v7072_v60  ;;  %6802 = vmatmul.mubr.msk.bf16.gmra.mrb[52].mxu1 %vm1958_vm2, %v7073_v61 }
  0x80   : > { %6553 = vmatprep.mubr.msk.bf16.mxu0 %vm1958_vm2, %v7074_v62  ;;  %6805 = vmatprep.mubr.msk.bf16.mxu1 %vm1958_vm2, %v7075_v63  ;;  %v7131_v62 = vld [vmem:[%s7322_s21 + $0x5b0] sm:$0xff]  }
  0x87   : > { %6554 = vmatmul.mubr.msk.bf16.gmra.mrb[56].mxu0 %vm1958_vm2, %v7076_v0  ;;  %6806 = vmatmul.mubr.msk.bf16.gmra.mrb[56].mxu1 %vm1958_vm2, %v7077_v1  ;;  %v7132_v0 = vld [vmem:[%s7322_s21 + $0x1c8] sm:$0xff]  }
  0x88   : > { %6557 = vmatprep.mubr.msk.bf16.mxu0 %vm1958_vm2, %v7078_v2  ;;  %6809 = vmatprep.mubr.msk.bf16.mxu1 %vm1958_vm2, %v7079_v3  ;;  %v7133_v2 = vld [vmem:[%s7322_s21 + $0x5b8] sm:$0xff]   ;;  %v7134_v3 = vld [vmem:[%s7322_s21 + $0x1d0] sm:$0xff]  }
  0x8f   : > { %6558 = vmatmul.mubr.msk.bf16.gmra.mrb[60].mxu0 %vm1958_vm2, %v7080_v4  ;;  %6810 = vmatmul.mubr.msk.bf16.gmra.mrb[60].mxu1 %vm1958_vm2, %v7081_v5 }
  0x90   : > { %6561 = vmatprep.mubr.msk.bf16.mxu0 %vm1958_vm2, %v7082_v6  ;;  %6813 = vmatprep.mubr.msk.bf16.mxu1 %vm1958_vm2, %v7083_v7 }
  0x97   : > { %6562 = vmatmul.mubr.msk.bf16.gmra.mrb[64].mxu0 %vm1958_vm2, %v7084_v8  ;;  %6814 = vmatmul.mubr.msk.bf16.gmra.mrb[64].mxu1 %vm1958_vm2, %v7085_v9 }
  0x98   : > { %6565 = vmatprep.mubr.msk.bf16.mxu0 %vm1958_vm2, %v7086_v10  ;;  %6817 = vmatprep.mubr.msk.bf16.mxu1 %vm1958_vm2, %v7087_v11  ;;  %v7135_v10 = vld [vmem:[%s7322_s21 + $0x5c0] sm:$0xff]  }
  0x9f   : > { %6566 = vmatmul.mubr.msk.bf16.gmra.mrb[68].mxu0 %vm1958_vm2, %v7088_v12  ;;  %6818 = vmatmul.mubr.msk.bf16.gmra.mrb[68].mxu1 %vm1958_vm2, %v7089_v13 }
  0xa0   : > { %6569 = vmatprep.mubr.msk.bf16.mxu0 %vm1958_vm2, %v7090_v14  ;;  %6821 = vmatprep.mubr.msk.bf16.mxu1 %vm1958_vm2, %v7091_v15  ;;  %v7136_v14 = vld [vmem:[%s7322_s21 + $0x1d8] sm:$0xff]  }
  0xa7   : > { %6570 = vmatmul.mubr.msk.bf16.gmra.mrb[72].mxu0 %vm1958_vm2, %v7092_v16  ;;  %6822 = vmatmul.mubr.msk.bf16.gmra.mrb[72].mxu1 %vm1958_vm2, %v7093_v17  ;;  %v7137_v17 = vld [vmem:[%s7322_s21 + $0x5c8] sm:$0xff]  }
  0xa8   : > { %6573 = vmatprep.mubr.msk.bf16.mxu0 %vm1958_vm2, %v7094_v18  ;;  %6825 = vmatprep.mubr.msk.bf16.mxu1 %vm1958_vm2, %v7095_v19  ;;  %v7138_v19 = vld [vmem:[%s7322_s21 + $0x1e0] sm:$0xff]  }
  0xaf   : > { %6574 = vmatmul.mubr.msk.bf16.gmra.mrb[76].mxu0 %vm1958_vm2, %v7096_v20  ;;  %6826 = vmatmul.mubr.msk.bf16.gmra.mrb[76].mxu1 %vm1958_vm2, %v7097_v21 }
  0xb0   : > { %6577 = vmatprep.mubr.msk.bf16.mxu0 %vm1958_vm2, %v7098_v22  ;;  %6829 = vmatprep.mubr.msk.bf16.mxu1 %vm1958_vm2, %v7099_v23  ;;  %v7139_v22 = vld [vmem:[%s7322_s21 + $0x5d0] sm:$0xff]  }
  0xb7   : > { %6578 = vmatmul.mubr.msk.bf16.gmra.mrb[80].mxu0 %vm1958_vm2, %v7100_v24  ;;  %6830 = vmatmul.mubr.msk.bf16.gmra.mrb[80].mxu1 %vm1958_vm2, %v7101_v25 }
  0xb8   : > { %6581 = vmatprep.mubr.msk.bf16.mxu0 %vm1958_vm2, %v7102_v26  ;;  %6833 = vmatprep.mubr.msk.bf16.mxu1 %vm1958_vm2, %v7103_v27  ;;  %v7140_v26 = vld [vmem:[%s7322_s21 + $0x1e8] sm:$0xff]  }
  0xbf   : > { %6582 = vmatmul.mubr.msk.bf16.gmra.mrb[84].mxu0 %vm1958_vm2, %v7104_v28  ;;  %6834 = vmatmul.mubr.msk.bf16.gmra.mrb[84].mxu1 %vm1958_vm2, %v7105_v29  ;;  %v7141_v29 = vld [vmem:[%s7322_s21 + $0x5d8] sm:$0xff]  }
  0xc0   : > { %6585 = vmatprep.mubr.msk.bf16.mxu0 %vm1958_vm2, %v7106_v30  ;;  %6837 = vmatprep.mubr.msk.bf16.mxu1 %vm1958_vm2, %v7107_v31  ;;  %v7142_v31 = vld [vmem:[%s7322_s21 + $0x1f0] sm:$0xff]  }
  0xc7   : > { %6586 = vmatmul.mubr.msk.bf16.gmra.mrb[88].mxu0 %vm1958_vm2, %v7108_v32  ;;  %6838 = vmatmul.mubr.msk.bf16.gmra.mrb[88].mxu1 %vm1958_vm2, %v7109_v33 }
  0xc8   : > { %6589 = vmatprep.mubr.msk.bf16.mxu0 %vm1958_vm2, %v7110_v34  ;;  %6841 = vmatprep.mubr.msk.bf16.mxu1 %vm1958_vm2, %v7111_v35  ;;  %v7143_v34 = vld [vmem:[%s7322_s21 + $0x5e0] sm:$0xff]  }
  0xcf   : > { %6590 = vmatmul.mubr.msk.bf16.gmra.mrb[92].mxu0 %vm1958_vm2, %v7112_v36  ;;  %6842 = vmatmul.mubr.msk.bf16.gmra.mrb[92].mxu1 %vm1958_vm2, %v7113_v37 }
  0xd0   : > { %6593 = vmatprep.mubr.msk.bf16.mxu0 %vm1958_vm2, %v7114_v38  ;;  %6845 = vmatprep.mubr.msk.bf16.mxu1 %vm1958_vm2, %v7115_v39  ;;  %v7144_v38 = vld [vmem:[%s7322_s21 + $0x1f8] sm:$0xff]  }
  0xd7   : > { %6594 = vmatmul.mubr.msk.bf16.gmra.mrb[96].mxu0 %vm1958_vm2, %v7116_v40  ;;  %6846 = vmatmul.mubr.msk.bf16.gmra.mrb[96].mxu1 %vm1958_vm2, %v7117_v41  ;;  %v7145_v41 = vld [vmem:[%s7322_s21 + $0x5e8] sm:$0xff]  }
  0xd8   : > { %6597 = vmatprep.mubr.msk.bf16.mxu0 %vm1958_vm2, %v7118_v42  ;;  %6849 = vmatprep.mubr.msk.bf16.mxu1 %vm1958_vm2, %v7119_v43  ;;  %v7146_v43 = vld [vmem:[%s7322_s21 + $0x200] sm:$0xff]  }
  0xdf   : > { %6598 = vmatmul.mubr.msk.bf16.gmra.mrb[100].mxu0 %vm1958_vm2, %v7120_v44  ;;  %6850 = vmatmul.mubr.msk.bf16.gmra.mrb[100].mxu1 %vm1958_vm2, %v7121_v45 }
  0xe0   : > { %6601 = vmatprep.mubr.msk.bf16.mxu0 %vm1958_vm2, %v7122_v46  ;;  %6853 = vmatprep.mubr.msk.bf16.mxu1 %vm1958_vm2, %v7123_v47  ;;  %v7147_v46 = vld [vmem:[%s7322_s21 + $0x5f0] sm:$0xff]  }
  0xe7   : > { %6602 = vmatmul.mubr.msk.bf16.gmra.mrb[104].mxu0 %vm1958_vm2, %v7124_v48  ;;  %6854 = vmatmul.mubr.msk.bf16.gmra.mrb[104].mxu1 %vm1958_vm2, %v7125_v49 }
  0xe8   : > { %6605 = vmatprep.mubr.msk.bf16.mxu0 %vm1958_vm2, %v7126_v50  ;;  %6857 = vmatprep.mubr.msk.bf16.mxu1 %vm1958_vm2, %v7127_v51  ;;  %v7148_v50 = vld [vmem:[%s7322_s21 + $0x208] sm:$0xff]  }
  0xea   : > { %v7545_v53 = vpop.f32.mrb[0].mxu0  ;;  %v7551_v57 = vpop.f32.mrb[0].mxu1 }
  0xeb   : > { %v7549_v56 = vpop.f32.mrb[1].mxu0  ;;  %10979 = vst [vmem:[#allocation2_spill] sm:$0xff] %v7551_v57  ;;  %v7555_v59 = vpop.f32.mrb[1].mxu1  ;;  %v7170_v57 = vld [vmem:[%s7322_s21 + $0x260] sm:$0xff]  }
  0xec   : > { %v7553_v58 = vpop.f32.mrb[2].mxu0  ;;  %10980 = vst [vmem:[#allocation3_spill] sm:$0xff] %v7555_v59  ;;  %v7559_v61 = vpop.f32.mrb[2].mxu1 }
  0xed   : > { %v7557_v60 = vpop.f32.mrb[3].mxu0  ;;  %10981 = vst [vmem:[#allocation4_spill] sm:$0xff] %v7559_v61  ;;  %v7562_v63 = vpop.f32.mrb[3].mxu1 }
  0xee   : > { %10982 = vst [vmem:[#allocation5_spill] sm:$0xff] %v7562_v63 }
  0xef   : > { %6606 = vmatmul.mubr.msk.bf16.gmra.mrb[108].mxu0 %vm1958_vm2, %v7128_v52  ;;  %6858 = vmatmul.mubr.msk.bf16.gmra.mrb[108].mxu1 %vm1958_vm2, %v7129_v54  ;;  %v7149_v54 = vld [vmem:[%s7322_s21 + $0x5f8] sm:$0xff]  }
  0xf0   : > { %6609 = vmatprep.mubr.msk.bf16.mxu0 %vm1958_vm2, %v7130_v55  ;;  %6861 = vmatprep.mubr.msk.bf16.mxu1 %vm1958_vm2, %v7131_v62  ;;  %v7150_v62 = vld [vmem:[%s7322_s21 + $0x210] sm:$0xff]  }
  0xf2   : > { %v7569_v1 = vpop.f32.mrb[4].mxu0  ;;  %v7575_v5 = vpop.f32.mrb[4].mxu1 }
  0xf3   : > { %v7573_v4 = vpop.f32.mrb[5].mxu0  ;;  %10983 = vst [vmem:[#allocation6_spill] sm:$0xff] %v7575_v5  ;;  %v7579_v7 = vpop.f32.mrb[5].mxu1 }
  0xf4   : > { %v7577_v6 = vpop.f32.mrb[6].mxu0  ;;  %10984 = vst [vmem:[#allocation7_spill] sm:$0xff] %v7579_v7  ;;  %v7583_v9 = vpop.f32.mrb[6].mxu1 }
  0xf5   : > { %v7581_v8 = vpop.f32.mrb[7].mxu0  ;;  %10985 = vst [vmem:[#allocation8_spill] sm:$0xff] %v7583_v9  ;;  %v7586_v11 = vpop.f32.mrb[7].mxu1 }
  0xf6   : > { %10986 = vst [vmem:[#allocation9_spill] sm:$0xff] %v7586_v11 }
  0xf7   : > { %6610 = vmatmul.mubr.msk.bf16.gmra.mrb[112].mxu0 %vm1958_vm2, %v7132_v0  ;;  %6862 = vmatmul.mubr.msk.bf16.gmra.mrb[112].mxu1 %vm1958_vm2, %v7133_v2 }
  0xf8   : > { %6613 = vmatprep.mubr.msk.bf16.mxu0 %vm1958_vm2, %v7134_v3  ;;  %6865 = vmatprep.mubr.msk.bf16.mxu1 %vm1958_vm2, %v7135_v10  ;;  %v7151_v3 = vld [vmem:[%s7322_s21 + $0x600] sm:$0xff]  }
  0xfa   : > { %v7592_v12 = vpop.f32.mrb[8].mxu0  ;;  %v7597_v15 = vpop.f32.mrb[8].mxu1 }
  0xfb   : > { %v7594_v13 = vpop.f32.mrb[9].mxu0  ;;  %10987 = vst [vmem:[#allocation10_spill] sm:$0xff] %v7597_v15  ;;  %v7602_v18 = vpop.f32.mrb[9].mxu1  ;;  %v7166_v15 = vld [vmem:[%s7322_s21 + $0x250] sm:$0xff]  }
  0xfc   : > { %v7599_v16 = vpop.f32.mrb[10].mxu0  ;;  %10988 = vst [vmem:[#allocation11_spill] sm:$0xff] %v7602_v18  ;;  %v7607_v21 = vpop.f32.mrb[10].mxu1 }
  0xfd   : > { %v7605_v20 = vpop.f32.mrb[11].mxu0  ;;  %10989 = vst [vmem:[#allocation12_spill] sm:$0xff] %v7607_v21  ;;  %v7610_v23 = vpop.f32.mrb[11].mxu1 }
  0xfe   : > { %10990 = vst [vmem:[#allocation13_spill] sm:$0xff] %v7610_v23 }
  0xff   : > { %6614 = vmatmul.mubr.msk.bf16.gmra.mrb[116].mxu0 %vm1958_vm2, %v7136_v14  ;;  %6866 = vmatmul.mubr.msk.bf16.gmra.mrb[116].mxu1 %vm1958_vm2, %v7137_v17 }
 0x100   : > { %6617 = vmatprep.mubr.msk.bf16.mxu0 %vm1958_vm2, %v7138_v19  ;;  %6869 = vmatprep.mubr.msk.bf16.mxu1 %vm1958_vm2, %v7139_v22  ;;  %v7152_v19 = vld [vmem:[%s7322_s21 + $0x218] sm:$0xff]  }
 0x102   : > { %v7616_v24 = vpop.f32.mrb[12].mxu0  ;;  %v7621_v27 = vpop.f32.mrb[12].mxu1 }
 0x103   : > { %v7618_v25 = vpop.f32.mrb[13].mxu0  ;;  %10991 = vst [vmem:[#allocation14_spill] sm:$0xff] %v7621_v27  ;;  %v7626_v30 = vpop.f32.mrb[13].mxu1 }
 0x104   : > { %v7623_v28 = vpop.f32.mrb[14].mxu0  ;;  %10992 = vst [vmem:[#allocation15_spill] sm:$0xff] %v7626_v30  ;;  %v7631_v33 = vpop.f32.mrb[14].mxu1 }
 0x105   : > { %v7629_v32 = vpop.f32.mrb[15].mxu0  ;;  %10993 = vst [vmem:[#allocation16_spill] sm:$0xff] %v7631_v33  ;;  %v7634_v35 = vpop.f32.mrb[15].mxu1 }
 0x106   : > { %10994 = vst [vmem:[#allocation17_spill] sm:$0xff] %v7634_v35 }
 0x107   : > { %6618 = vmatmul.mubr.msk.bf16.gmra.mrb[120].mxu0 %vm1958_vm2, %v7140_v26  ;;  %6870 = vmatmul.mubr.msk.bf16.gmra.mrb[120].mxu1 %vm1958_vm2, %v7141_v29  ;;  %v7153_v29 = vld [vmem:[%s7322_s21 + $0x608] sm:$0xff]  }
 0x108   : > { %6621 = vmatprep.mubr.msk.bf16.mxu0 %vm1958_vm2, %v7142_v31  ;;  %6873 = vmatprep.mubr.msk.bf16.mxu1 %vm1958_vm2, %v7143_v34  ;;  %v7154_v34 = vld [vmem:[%s7322_s21 + $0x220] sm:$0xff]  }
 0x10a   : > { %v7640_v36 = vpop.f32.mrb[16].mxu0  ;;  %v7645_v39 = vpop.f32.mrb[16].mxu1 }
 0x10b   : > { %v7642_v37 = vpop.f32.mrb[17].mxu0  ;;  %10995 = vst [vmem:[#allocation18_spill] sm:$0xff] %v7645_v39  ;;  %v7650_v42 = vpop.f32.mrb[17].mxu1  ;;  %v7162_v39 = vld [vmem:[%s7322_s21 + $0x240] sm:$0xff]  }
 0x10c   : > { %v7647_v40 = vpop.f32.mrb[18].mxu0  ;;  %10996 = vst [vmem:[#allocation19_spill] sm:$0xff] %v7650_v42  ;;  %v7655_v45 = vpop.f32.mrb[18].mxu1 }
 0x10d   : > { %v7653_v44 = vpop.f32.mrb[19].mxu0  ;;  %10997 = vst [vmem:[#allocation20_spill] sm:$0xff] %v7655_v45  ;;  %v7658_v47 = vpop.f32.mrb[19].mxu1 }
 0x10e   : > { %10998 = vst [vmem:[#allocation21_spill] sm:$0xff] %v7658_v47 }
 0x10f   : > { %6622 = vmatmul.mubr.msk.bf16.gmra.mrb[124].mxu0 %vm1958_vm2, %v7144_v38  ;;  %6874 = vmatmul.mubr.msk.bf16.gmra.mrb[124].mxu1 %vm1958_vm2, %v7145_v41 }
 0x110   : > { %6625 = vmatprep.mubr.msk.bf16.mxu0 %vm1958_vm2, %v7146_v43  ;;  %6877 = vmatprep.mubr.msk.bf16.mxu1 %vm1958_vm2, %v7147_v46  ;;  %v7155_v43 = vld [vmem:[%s7322_s21 + $0x610] sm:$0xff]  }
 0x112   : > { %v7664_v48 = vpop.f32.mrb[20].mxu0  ;;  %v7669_v51 = vpop.f32.mrb[20].mxu1 }
 0x113   : > { %v7666_v49 = vpop.f32.mrb[21].mxu0  ;;  %10999 = vst [vmem:[#allocation22_spill] sm:$0xff] %v7669_v51  ;;  %v7674_v55 = vpop.f32.mrb[21].mxu1 }
 0x114   : > { %v7671_v52 = vpop.f32.mrb[22].mxu0  ;;  %11000 = vst [vmem:[#allocation23_spill] sm:$0xff] %v7674_v55  ;;  %v7679_v2 = vpop.f32.mrb[22].mxu1 }
 0x115   : > { %v7677_v0 = vpop.f32.mrb[23].mxu0  ;;  %11001 = vst [vmem:[#allocation24_spill] sm:$0xff] %v7679_v2  ;;  %v7682_v10 = vpop.f32.mrb[23].mxu1 }
 0x116   : > { %11002 = vst [vmem:[#allocation25_spill] sm:$0xff] %v7682_v10 }
 0x117   : > { %6626 = vmatmul.mubr.msk.bf16.gmra.mrb[128].mxu0 %vm1958_vm2, %v7148_v50  ;;  %6878 = vmatmul.mubr.msk.bf16.gmra.mrb[128].mxu1 %vm1958_vm2, %v7149_v54  ;;  %v7714_v50 = vld [vmem:[%s10827_s2] ss:$0 sm:$0xff] }
 0x118   : > { %6629 = vmatprep.mubr.msk.bf16.mxu0 %vm1958_vm2, %v7150_v62  ;;  %6881 = vmatprep.mubr.msk.bf16.mxu1 %vm1958_vm2, %v7151_v3  ;;  %v7156_v3 = vld [vmem:[%s7322_s21 + $0x228] sm:$0xff]   ;;  %v7745_v51 = vadd.f32 %v7553_v58, %v7714_v50  ;;  %v7754_v45 = vadd.f32 %v7714_v50, %v7557_v60  ;;  %v7797_v27 = vadd.f32 %v7577_v6, %v7714_v50 }
 0x119   : > { %v7806_v21 = vadd.f32 %v7714_v50, %v7581_v8  ;;  %v7849_v5 = vadd.f32 %v7599_v16, %v7714_v50  ;;  %v7858_v61 = vadd.f32 %v7714_v50, %v7605_v20 }
 0x11a   : > { %v7688_v14 = vpop.f32.mrb[24].mxu0  ;;  %v7693_v22 = vpop.f32.mrb[24].mxu1 }
 0x11b   : > { %v7690_v17 = vpop.f32.mrb[25].mxu0  ;;  %11003 = vst [vmem:[#allocation26_spill] sm:$0xff] %v7693_v22  ;;  %v7698_v31 = vpop.f32.mrb[25].mxu1  ;;  %v7158_v22 = vld [vmem:[%s7322_s21 + $0x230] sm:$0xff]  }
 0x11c   : > { %v7695_v26 = vpop.f32.mrb[26].mxu0  ;;  %11004 = vst [vmem:[#allocation27_spill] sm:$0xff] %v7698_v31  ;;  %v7703_v41 = vpop.f32.mrb[26].mxu1 }
 0x11d   : > { %v7701_v38 = vpop.f32.mrb[27].mxu0  ;;  %11005 = vst [vmem:[#allocation28_spill] sm:$0xff] %v7703_v41  ;;  %v7706_v46 = vpop.f32.mrb[27].mxu1  ;;  %v7157_v41 = vld [vmem:[%s7322_s21 + $0x618] sm:$0xff]  }
 0x11e   : > { %11006 = vst [vmem:[#allocation29_spill] sm:$0xff] %v7706_v46 }
 0x11f   : > { %6630 = vmatmul.mubr.msk.bf16.gmra.mrb[132].mxu0 %vm1958_vm2, %v7152_v19  ;;  %6882 = vmatmul.mubr.msk.bf16.gmra.mrb[132].mxu1 %vm1958_vm2, %v7153_v29  ;;  %v7724_v19 = vadd.f32 %v7545_v53, %v7714_v50  ;;  %v7159_v53 = vld [vmem:[%s7322_s21 + $0x620] sm:$0xff]  }
 0x120   : > { %6633 = vmatprep.mubr.msk.bf16.mxu0 %vm1958_vm2, %v7154_v34  ;;  %6885 = vmatprep.mubr.msk.bf16.mxu1 %vm1958_vm2, %v7155_v43  ;;  %v7735_v43 = vadd.f32 %v7714_v50, %v7549_v56 }
 0x122   : > { %v7717_v54 = vpop.f32.mrb[28].mxu0  ;;  %v6779_v46 = vpop.f32.mrb[28].mxu1 }
 0x123   : > { %11007 = vst [vmem:[#allocation30_spill] sm:$0xff] %v7717_v54  ;;  %v7719_v62 = vpop.f32.mrb[29].mxu0  ;;  %v7729_v34 = vadd.f32 %v6779_v46, %v7714_v50  ;;  %v3876_v31 = vpop.f32.mrb[29].mxu1  ;;  %v7160_v46 = vld [vmem:[%s7322_s21 + $0x238] sm:$0xff]   ;;  %v7182_v54 = vld [vmem:[%s7322_s21 + $0x290] sm:$0xff]  }
 0x124   : > { %11008 = vst [vmem:[#allocation31_spill] sm:$0xff] %v7719_v62  ;;  %v7726_v29 = vpop.f32.mrb[30].mxu0  ;;  %v7740_v2 = vadd.f32 %v7714_v50, %v3876_v31  ;;  %v6780_v55 = vpop.f32.mrb[30].mxu1 }
 0x125   : > { %11009 = vst [vmem:[#allocation32_spill] sm:$0xff] %v7726_v29  ;;  %v7737_v10 = vpop.f32.mrb[31].mxu0  ;;  %v7750_v47 = vadd.f32 %v6780_v55, %v7714_v50  ;;  %v3879_v56 = vpop.f32.mrb[31].mxu1  ;;  %v7161_v55 = vld [vmem:[%s7322_s21 + $0x628] sm:$0xff]  }
 0x126   : > { %11010 = vst [vmem:[#allocation33_spill] sm:$0xff] %v7737_v10  ;;  %v7760_v58 = vadd.f32 %v7714_v50, %v3879_v56 }
 0x127   : > { %6634 = vmatmul.mubr.msk.bf16.gmra.mrb[136].mxu0 %vm1958_vm2, %v7156_v3  ;;  %6886 = vmatmul.mubr.msk.bf16.gmra.mrb[136].mxu1 %vm1958_vm2, %v7157_v41  ;;  %v7776_v41 = vadd.f32 %v7569_v1, %v7714_v50  ;;  %v7163_v1 = vld [vmem:[%s7322_s21 + $0x630] sm:$0xff]  }
 0x128   : > { %6637 = vmatprep.mubr.msk.bf16.mxu0 %vm1958_vm2, %v7158_v22  ;;  %6889 = vmatprep.mubr.msk.bf16.mxu1 %vm1958_vm2, %v7159_v53  ;;  %v7787_v53 = vadd.f32 %v7714_v50, %v7573_v4 }
 0x12a   : > { %v7769_v3 = vpop.f32.mrb[32].mxu0  ;;  %v6783_v56 = vpop.f32.mrb[32].mxu1 }
 0x12b   : > { %11011 = vst [vmem:[#allocation34_spill] sm:$0xff] %v7769_v3  ;;  %v7771_v31 = vpop.f32.mrb[33].mxu0  ;;  %v7781_v22 = vadd.f32 %v6783_v56, %v7714_v50  ;;  %v3892_v60 = vpop.f32.mrb[33].mxu1  ;;  %v7164_v56 = vld [vmem:[%s7322_s21 + $0x248] sm:$0xff]   ;;  %v7178_v3 = vld [vmem:[%s7322_s21 + $0x280] sm:$0xff]  }
 0x12c   : > { %11012 = vst [vmem:[#allocation35_spill] sm:$0xff] %v7771_v31  ;;  %v7778_v42 = vpop.f32.mrb[34].mxu0  ;;  %v7792_v33 = vadd.f32 %v7714_v50, %v3892_v60  ;;  %v6784_v30 = vpop.f32.mrb[34].mxu1 }
 0x12d   : > { %11013 = vst [vmem:[#allocation36_spill] sm:$0xff] %v7778_v42  ;;  %v7789_v35 = vpop.f32.mrb[35].mxu0  ;;  %v7802_v23 = vadd.f32 %v6784_v30, %v7714_v50  ;;  %v3895_v4 = vpop.f32.mrb[35].mxu1  ;;  %v7165_v30 = vld [vmem:[%s7322_s21 + $0x638] sm:$0xff]  }
 0x12e   : > { %11014 = vst [vmem:[#allocation37_spill] sm:$0xff] %v7789_v35  ;;  %v7812_v6 = vadd.f32 %v7714_v50, %v3895_v4 }
 0x12f   : > { %6638 = vmatmul.mubr.msk.bf16.gmra.mrb[140].mxu0 %vm1958_vm2, %v7160_v46  ;;  %6890 = vmatmul.mubr.msk.bf16.gmra.mrb[140].mxu1 %vm1958_vm2, %v7161_v55  ;;  %v7828_v55 = vadd.f32 %v7592_v12, %v7714_v50  ;;  %v7167_v12 = vld [vmem:[%s7322_s21 + $0x640] sm:$0xff]  }
 0x130   : > { %6641 = vmatprep.mubr.msk.bf16.mxu0 %vm1958_vm2, %v7162_v39  ;;  %6893 = vmatprep.mubr.msk.bf16.mxu1 %vm1958_vm2, %v7163_v1  ;;  %v7839_v1 = vadd.f32 %v7714_v50, %v7594_v13 }
 0x132   : > { %v7821_v46 = vpop.f32.mrb[36].mxu0  ;;  %v6787_v4 = vpop.f32.mrb[36].mxu1 }
 0x133   : > { %11015 = vst [vmem:[#allocation38_spill] sm:$0xff] %v7821_v46  ;;  %v7823_v60 = vpop.f32.mrb[37].mxu0  ;;  %v7833_v39 = vadd.f32 %v6787_v4, %v7714_v50  ;;  %v3908_v8 = vpop.f32.mrb[37].mxu1  ;;  %v7168_v4 = vld [vmem:[%s7322_s21 + $0x258] sm:$0xff]   ;;  %v7174_v46 = vld [vmem:[%s7322_s21 + $0x270] sm:$0xff]  }
 0x134   : > { %11016 = vst [vmem:[#allocation39_spill] sm:$0xff] %v7823_v60  ;;  %v7830_v18 = vpop.f32.mrb[38].mxu0  ;;  %v7844_v9 = vadd.f32 %v7714_v50, %v3908_v8  ;;  %v6788_v7 = vpop.f32.mrb[38].mxu1 }
 0x135   : > { %11017 = vst [vmem:[#allocation40_spill] sm:$0xff] %v7830_v18  ;;  %v7841_v11 = vpop.f32.mrb[39].mxu0  ;;  %v7854_v63 = vadd.f32 %v6788_v7, %v7714_v50  ;;  %v3911_v13 = vpop.f32.mrb[39].mxu1  ;;  %v7169_v7 = vld [vmem:[%s7322_s21 + $0x648] sm:$0xff]  }
 0x136   : > { %11018 = vst [vmem:[#allocation41_spill] sm:$0xff] %v7841_v11  ;;  %v7864_v16 = vadd.f32 %v7714_v50, %v3911_v13 }
 0x137   : > { %6642 = vmatmul.mubr.msk.bf16.gmra.mrb[144].mxu0 %vm1958_vm2, %v7164_v56  ;;  %6894 = vmatmul.mubr.msk.bf16.gmra.mrb[144].mxu1 %vm1958_vm2, %v7165_v30  ;;  %v7880_v30 = vadd.f32 %v7616_v24, %v7714_v50  ;;  %v7171_v24 = vld [vmem:[%s7322_s21 + $0x650] sm:$0xff]  }
 0x138   : > { %6645 = vmatprep.mubr.msk.bf16.mxu0 %vm1958_vm2, %v7166_v15  ;;  %6897 = vmatprep.mubr.msk.bf16.mxu1 %vm1958_vm2, %v7167_v12  ;;  %v7891_v12 = vadd.f32 %v7714_v50, %v7618_v25 }
 0x13a   : > { %v7873_v56 = vpop.f32.mrb[40].mxu0  ;;  %v6791_v13 = vpop.f32.mrb[40].mxu1 }
 0x13b   : > { %11019 = vst [vmem:[#allocation42_spill] sm:$0xff] %v7873_v56  ;;  %v7875_v8 = vpop.f32.mrb[41].mxu0  ;;  %v7885_v15 = vadd.f32 %v6791_v13, %v7714_v50  ;;  %v3924_v20 = vpop.f32.mrb[41].mxu1  ;;  %v7172_v13 = vld [vmem:[%s7322_s21 + $0x268] sm:$0xff]  }
 0x13c   : > { %11020 = vst [vmem:[#allocation43_spill] sm:$0xff] %v7875_v8  ;;  %v7882_v59 = vpop.f32.mrb[42].mxu0  ;;  %v7896_v8 = vadd.f32 %v7714_v50, %v3924_v20  ;;  %v6792_v11 = vpop.f32.mrb[42].mxu1 }
 0x13d   : > { %11021 = vst [vmem:[#allocation44_spill] sm:$0xff] %v7882_v59  ;;  %v7893_v56 = vpop.f32.mrb[43].mxu0  ;;  %v7901_v59 = vadd.f32 %v7623_v28, %v7714_v50  ;;  %v7906_v18 = vadd.f32 %v6792_v11, %v7714_v50  ;;  %v3927_v25 = vpop.f32.mrb[43].mxu1  ;;  %v7173_v11 = vld [vmem:[%s7322_s21 + $0x658] sm:$0xff]  }
 0x13e   : > { %11022 = vst [vmem:[#allocation45_spill] sm:$0xff] %v7893_v56  ;;  %v7910_v56 = vadd.f32 %v7714_v50, %v7629_v32  ;;  %v7916_v28 = vadd.f32 %v7714_v50, %v3927_v25 }
 0x13f   : > { %6646 = vmatmul.mubr.msk.bf16.gmra.mrb[148].mxu0 %vm1958_vm2, %v7168_v4  ;;  %6898 = vmatmul.mubr.msk.bf16.gmra.mrb[148].mxu1 %vm1958_vm2, %v7169_v7  ;;  %v7932_v7 = vadd.f32 %v7640_v36, %v7714_v50  ;;  %v7175_v36 = vld [vmem:[%s7322_s21 + $0x660] sm:$0xff]  }
 0x140   : > { %6649 = vmatprep.mubr.msk.bf16.mxu0 %vm1958_vm2, %v7170_v57  ;;  %6901 = vmatprep.mubr.msk.bf16.mxu1 %vm1958_vm2, %v7171_v24  ;;  %v7943_v24 = vadd.f32 %v7714_v50, %v7642_v37 }
 0x142   : > { %v7925_v4 = vpop.f32.mrb[44].mxu0  ;;  %v6795_v25 = vpop.f32.mrb[44].mxu1 }
 0x143   : > { %11023 = vst [vmem:[#allocation46_spill] sm:$0xff] %v7925_v4  ;;  %v7927_v20 = vpop.f32.mrb[45].mxu0  ;;  %v7937_v57 = vadd.f32 %v6795_v25, %v7714_v50  ;;  %v3940_v32 = vpop.f32.mrb[45].mxu1  ;;  %v7176_v25 = vld [vmem:[%s7322_s21 + $0x278] sm:$0xff]  }
 0x144   : > { %11024 = vst [vmem:[#allocation47_spill] sm:$0xff] %v7927_v20  ;;  %v7934_v60 = vpop.f32.mrb[46].mxu0  ;;  %v7948_v20 = vadd.f32 %v7714_v50, %v3940_v32  ;;  %v6796_v35 = vpop.f32.mrb[46].mxu1 }
 0x145   : > { %11025 = vst [vmem:[#allocation48_spill] sm:$0xff] %v7934_v60  ;;  %v7945_v4 = vpop.f32.mrb[47].mxu0  ;;  %v7953_v60 = vadd.f32 %v7647_v40, %v7714_v50  ;;  %v7958_v42 = vadd.f32 %v6796_v35, %v7714_v50  ;;  %v3943_v37 = vpop.f32.mrb[47].mxu1  ;;  %v7177_v35 = vld [vmem:[%s7322_s21 + $0x668] sm:$0xff]  }
 0x146   : > { %11026 = vst [vmem:[#allocation49_spill] sm:$0xff] %v7945_v4  ;;  %v7962_v4 = vadd.f32 %v7714_v50, %v7653_v44  ;;  %v7968_v40 = vadd.f32 %v7714_v50, %v3943_v37 }
 0x147   : > { %6650 = vmatmul.mubr.msk.bf16.gmra.mrb[152].mxu0 %vm1958_vm2, %v7172_v13  ;;  %6902 = vmatmul.mubr.msk.bf16.gmra.mrb[152].mxu1 %vm1958_vm2, %v7173_v11  ;;  %v7984_v11 = vadd.f32 %v7664_v48, %v7714_v50  ;;  %v7179_v48 = vld [vmem:[%s7322_s21 + $0x670] sm:$0xff]  }
 0x148   : > { %6653 = vmatprep.mubr.msk.bf16.mxu0 %vm1958_vm2, %v7174_v46  ;;  %6905 = vmatprep.mubr.msk.bf16.mxu1 %vm1958_vm2, %v7175_v36  ;;  %v7995_v36 = vadd.f32 %v7714_v50, %v7666_v49 }
 0x14a   : > { %v7977_v13 = vpop.f32.mrb[48].mxu0  ;;  %v6799_v37 = vpop.f32.mrb[48].mxu1 }
 0x14b   : > { %11027 = vst [vmem:[#allocation50_spill] sm:$0xff] %v7977_v13  ;;  %v7979_v32 = vpop.f32.mrb[49].mxu0  ;;  %v7989_v46 = vadd.f32 %v6799_v37, %v7714_v50  ;;  %v3956_v44 = vpop.f32.mrb[49].mxu1  ;;  %v7180_v37 = vld [vmem:[%s7322_s21 + $0x288] sm:$0xff]  }
 0x14c   : > { %11028 = vst [vmem:[#allocation51_spill] sm:$0xff] %v7979_v32  ;;  %v7986_v31 = vpop.f32.mrb[50].mxu0  ;;  %v8000_v32 = vadd.f32 %v7714_v50, %v3956_v44  ;;  %v6800_v10 = vpop.f32.mrb[50].mxu1 }
 0x14d   : > { %11029 = vst [vmem:[#allocation52_spill] sm:$0xff] %v7986_v31  ;;  %v7997_v13 = vpop.f32.mrb[51].mxu0  ;;  %v8005_v31 = vadd.f32 %v7671_v52, %v7714_v50  ;;  %v8010_v29 = vadd.f32 %v6800_v10, %v7714_v50  ;;  %v3959_v49 = vpop.f32.mrb[51].mxu1  ;;  %v7181_v10 = vld [vmem:[%s7322_s21 + $0x678] sm:$0xff]  }
 0x14e   : > { %11030 = vst [vmem:[#allocation53_spill] sm:$0xff] %v7997_v13  ;;  %v8014_v13 = vadd.f32 %v7714_v50, %v7677_v0  ;;  %v8020_v52 = vadd.f32 %v7714_v50, %v3959_v49 }
 0x14f   : > { %6654 = vmatmul.mubr.msk.bf16.gmra.mrb[156].mxu0 %vm1958_vm2, %v7176_v25  ;;  %6906 = vmatmul.mubr.msk.bf16.gmra.mrb[156].mxu1 %vm1958_vm2, %v7177_v35  ;;  %v8036_v35 = vadd.f32 %v7688_v14, %v7714_v50  ;;  %v7183_v14 = vld [vmem:[%s7322_s21 + $0x680] sm:$0xff]  }
 0x150   : > { %11031 = vst [vmem:[#allocation54_spill] sm:$0xff] %v8014_v13  ;;  %11032 = vst [vmem:[#allocation55_spill] sm:$0xff] %v8020_v52  ;;  %6657 = vmatprep.mubr.msk.bf16.mxu0 %vm1958_vm2, %v7178_v3  ;;  %6909 = vmatprep.mubr.msk.bf16.mxu1 %vm1958_vm2, %v7179_v48  ;;  %v8047_v48 = vadd.f32 %v7714_v50, %v7690_v17 }
 0x152   : > { %v8029_v25 = vpop.f32.mrb[52].mxu0  ;;  %v6803_v49 = vpop.f32.mrb[52].mxu1  ;;  %11037 = vst [vmem:[#allocation60_spill] sm:$0xff] %v8047_v48 }
 0x153   : > { %11033 = vst [vmem:[#allocation56_spill] sm:$0xff] %v8029_v25  ;;  %v8031_v44 = vpop.f32.mrb[53].mxu0  ;;  %v8041_v3 = vadd.f32 %v6803_v49, %v7714_v50  ;;  %v3972_v0 = vpop.f32.mrb[53].mxu1 }
 0x154   : > { %11034 = vst [vmem:[#allocation57_spill] sm:$0xff] %v8031_v44  ;;  %v8038_v62 = vpop.f32.mrb[54].mxu0  ;;  %v8052_v44 = vadd.f32 %v7714_v50, %v3972_v0  ;;  %v6804_v52 = vpop.f32.mrb[54].mxu1 }
 0x155   : > { %11035 = vst [vmem:[#allocation58_spill] sm:$0xff] %v8038_v62  ;;  %11036 = vst [vmem:[#allocation59_spill] sm:$0xff] %v8041_v3  ;;  %v8049_v25 = vpop.f32.mrb[55].mxu0  ;;  %v8057_v62 = vadd.f32 %v7695_v26, %v7714_v50  ;;  %v8062_v13 = vadd.f32 %v6804_v52, %v7714_v50  ;;  %v3975_v17 = vpop.f32.mrb[55].mxu1  ;;  %v7185_v3 = vld [vmem:[%s7322_s21 + $0x688] sm:$0xff]  }
 0x156   : > { %11038 = vst [vmem:[#allocation61_spill] sm:$0xff] %v8049_v25  ;;  %11039 = vst [vmem:[#allocation62_spill] sm:$0xff] %v8052_v44  ;;  %v8066_v25 = vadd.f32 %v7714_v50, %v7701_v38  ;;  %v8072_v26 = vadd.f32 %v7714_v50, %v3975_v17  ;;  %v7184_v44 = vld [vmem:[%s7322_s21 + $0x298] sm:$0xff]   ;;  %v11046_v38 = vmax.f32 %v7724_v19, %v7729_v34 }
 0x157   : > { %11040 = vst [vmem:[#allocation63_spill] sm:$0xff] %v8057_v62  ;;  %11041 = vst [vmem:[#allocation64_spill] sm:$0xff] %v8062_v13  ;;  %6658 = vmatmul.mubr.msk.bf16.gmra.mrb[160].mxu0 %vm1958_vm2, %v7180_v37  ;;  %6910 = vmatmul.mubr.msk.bf16.gmra.mrb[160].mxu1 %vm1958_vm2, %v7181_v10  ;;  %v7187_v13 = vld [vmem:[%s7322_s21 + $0x690] sm:$0xff]   ;;  %v11050_v19 = vmax.f32 %v7745_v51, %v7750_v47 }
 0x158   : > { %11042 = vst [vmem:[#allocation65_spill] sm:$0xff] %v8066_v25  ;;  %11043 = vst [vmem:[#allocation66_spill] sm:$0xff] %v8072_v26  ;;  %6661 = vmatprep.mubr.msk.bf16.mxu0 %vm1958_vm2, %v7182_v54  ;;  %6913 = vmatprep.mubr.msk.bf16.mxu1 %vm1958_vm2, %v7183_v14  ;;  %v7186_v54 = vld [vmem:[%s7322_s21 + $0x2a0] sm:$0xff]  }
 0x15a   : > { %v6555_v37 = vpop.f32.mrb[56].mxu0  ;;  %v8083_v17 = vpop.f32.mrb[56].mxu1 }
 0x15b   : > { %v2989_v0 = vadd.f32 %v6555_v37, %v7714_v50  ;;  %v2980_v49 = vpop.f32.mrb[57].mxu0  ;;  %11044 = vst [vmem:[#allocation67_spill] sm:$0xff] %v8083_v17  ;;  %v8087_v52 = vpop.f32.mrb[57].mxu1 }
 0x15c   : > { %v2981_v10 = vadd.f32 %v7714_v50, %v2980_v49  ;;  %v6556_v48 = vpop.f32.mrb[58].mxu0  ;;  %11045 = vst [vmem:[#allocation68_spill] sm:$0xff] %v8087_v52  ;;  %v8096_v25 = vpop.f32.mrb[58].mxu1  ;;  %v11048_v49 = vmax.f32 %v7735_v43, %v7740_v2  ;;  %v7188_v43 = vld [vmem:[%s7322_s21 + $0x2a8] sm:$0xff]  }
 0x15d   : > { %v8093_v26 = vmax.f32 %v11046_v38, %v2989_v0  ;;  %v2992_v14 = vadd.f32 %v6556_v48, %v7714_v50  ;;  %v2983_v37 = vpop.f32.mrb[59].mxu0  ;;  %11047 = vst [vmem:[#allocation69_spill] sm:$0xff] %v8096_v25  ;;  %v8105_v62 = vpop.f32.mrb[59].mxu1  ;;  %v11051_v48 = vmax.f32 %v7754_v45, %v7760_v58  ;;  %v7189_v45 = vld [vmem:[%s7322_s21 + $0x698] sm:$0xff]   ;;  %v11141_v25 = vld [vmem:[#allocation39_spill] sm:$0xff] }
 0x15e   : > { %v8102_v17 = vmax.f32 %v11048_v49, %v2981_v10  ;;  %v2984_v52 = vadd.f32 %v7714_v50, %v2983_v37  ;;  %11049 = vst [vmem:[#allocation70_spill] sm:$0xff] %v8105_v62  ;;  %v7191_v49 = vld [vmem:[%s7322_s21 + $0x6a0] sm:$0xff]  }
 0x15f   : > { %v8110_v34 = vmax.f32 %v11050_v19, %v2992_v14  ;;  %6662 = vmatmul.mubr.msk.bf16.gmra.mrb[164].mxu0 %vm1958_vm2, %v7184_v44  ;;  %6914 = vmatmul.mubr.msk.bf16.gmra.mrb[164].mxu1 %vm1958_vm2, %v7185_v3  ;;  %v11054_v3 = vmax.f32 %v7776_v41, %v7781_v22  ;;  %v11056_v19 = vmax.f32 %v7787_v53, %v7792_v33  ;;  %v7192_v53 = vld [vmem:[%s7322_s21 + $0x2b8] sm:$0xff]  }
 0x160   : > { %v8116_v0 = vmax.f32 %v11051_v48, %v2984_v52  ;;  %6665 = vmatprep.mubr.msk.bf16.mxu0 %vm1958_vm2, %v7186_v54  ;;  %6917 = vmatprep.mubr.msk.bf16.mxu1 %vm1958_vm2, %v7187_v13  ;;  %v7190_v52 = vld [vmem:[%s7322_s21 + $0x2b0] sm:$0xff]   ;;  %v11058_v41 = vmax.f32 %v7797_v27, %v7802_v23 }
 0x162   : > { %v6559_v2 = vpop.f32.mrb[60].mxu0  ;;  %v8123_v38 = vpop.f32.mrb[60].mxu1 }
 0x163   : > { %v3005_v47 = vadd.f32 %v6559_v2, %v7714_v50  ;;  %v2996_v51 = vpop.f32.mrb[61].mxu0  ;;  %11052 = vst [vmem:[#allocation71_spill] sm:$0xff] %v8123_v38  ;;  %v8127_v58 = vpop.f32.mrb[61].mxu1 }
 0x164   : > { %v2997_v44 = vadd.f32 %v7714_v50, %v2996_v51  ;;  %v6560_v10 = vpop.f32.mrb[62].mxu0  ;;  %11053 = vst [vmem:[#allocation72_spill] sm:$0xff] %v8127_v58  ;;  %v8136_v37 = vpop.f32.mrb[62].mxu1 }
 0x165   : > { %v8133_v54 = vmax.f32 %v11054_v3, %v3005_v47  ;;  %v3008_v13 = vadd.f32 %v6560_v10, %v7714_v50  ;;  %v2999_v14 = vpop.f32.mrb[63].mxu0  ;;  %11055 = vst [vmem:[#allocation73_spill] sm:$0xff] %v8136_v37  ;;  %v8145_v51 = vpop.f32.mrb[63].mxu1  ;;  %v11059_v47 = vmax.f32 %v7806_v21, %v7812_v6  ;;  %v7193_v21 = vld [vmem:[%s7322_s21 + $0x6a8] sm:$0xff]  }
 0x166   : > { %v8142_v48 = vmax.f32 %v11056_v19, %v2997_v44  ;;  %v3000_v2 = vadd.f32 %v7714_v50, %v2999_v14  ;;  %11057 = vst [vmem:[#allocation74_spill] sm:$0xff] %v8145_v51 }
 0x167   : > { %v8150_v22 = vmax.f32 %v11058_v41, %v3008_v13  ;;  %6666 = vmatmul.mubr.msk.bf16.gmra.mrb[168].mxu0 %vm1958_vm2, %v7188_v43  ;;  %6918 = vmatmul.mubr.msk.bf16.gmra.mrb[168].mxu1 %vm1958_vm2, %v7189_v45  ;;  %v7194_v13 = vld [vmem:[%s7322_s21 + $0x2c0] sm:$0xff]   ;;  %v11062_v45 = vmax.f32 %v7828_v55, %v7833_v39  ;;  %v11064_v41 = vmax.f32 %v7839_v1, %v7844_v9  ;;  %v7196_v1 = vld [vmem:[%s7322_s21 + $0x2c8] sm:$0xff]  }
 0x168   : > { %v8156_v10 = vmax.f32 %v11059_v47, %v3000_v2  ;;  %6669 = vmatprep.mubr.msk.bf16.mxu0 %vm1958_vm2, %v7190_v52  ;;  %6921 = vmatprep.mubr.msk.bf16.mxu1 %vm1958_vm2, %v7191_v49  ;;  %v7195_v2 = vld [vmem:[%s7322_s21 + $0x6b0] sm:$0xff]   ;;  %v11066_v55 = vmax.f32 %v7849_v5, %v7854_v63 }
 0x16a   : > { %v6563_v33 = vpop.f32.mrb[64].mxu0  ;;  %v8163_v44 = vpop.f32.mrb[64].mxu1 }
 0x16b   : > { %v3021_v23 = vadd.f32 %v6563_v33, %v7714_v50  ;;  %v3012_v27 = vpop.f32.mrb[65].mxu0  ;;  %11060 = vst [vmem:[#allocation75_spill] sm:$0xff] %v8163_v44  ;;  %v8167_v6 = vpop.f32.mrb[65].mxu1 }
 0x16c   : > { %v3013_v43 = vadd.f32 %v7714_v50, %v3012_v27  ;;  %v6564_v3 = vpop.f32.mrb[66].mxu0  ;;  %11061 = vst [vmem:[#allocation76_spill] sm:$0xff] %v8167_v6  ;;  %v8176_v19 = vpop.f32.mrb[66].mxu1  ;;  %v11134_v6 = vld [vmem:[#allocation37_spill] sm:$0xff] }
 0x16d   : > { %v8173_v52 = vmax.f32 %v11062_v45, %v3021_v23  ;;  %v3024_v14 = vadd.f32 %v6564_v3, %v7714_v50  ;;  %v3015_v49 = vpop.f32.mrb[67].mxu0  ;;  %11063 = vst [vmem:[#allocation77_spill] sm:$0xff] %v8176_v19  ;;  %v8185_v27 = vpop.f32.mrb[67].mxu1  ;;  %v11067_v23 = vmax.f32 %v7858_v61, %v7864_v16  ;;  %v7197_v61 = vld [vmem:[%s7322_s21 + $0x6b8] sm:$0xff]   ;;  %v7218_v19 = vld [vmem:[%s7322_s21 + $0x320] sm:$0xff]   ;;  %v8451_v44 = vadd.f32 %v7714_v50, %v11134_v6  ;;  %v7220_v6 = vld [vmem:[%s7322_s21 + $0x328] sm:$0xff]  }
 0x16e   : > { %v8182_v47 = vmax.f32 %v11064_v41, %v3013_v43  ;;  %v3016_v33 = vadd.f32 %v7714_v50, %v3015_v49  ;;  %11065 = vst [vmem:[#allocation78_spill] sm:$0xff] %v8185_v27 }
 0x16f   : > { %v8190_v39 = vmax.f32 %v11066_v55, %v3024_v14  ;;  %6670 = vmatmul.mubr.msk.bf16.gmra.mrb[172].mxu0 %vm1958_vm2, %v7192_v53  ;;  %6922 = vmatmul.mubr.msk.bf16.gmra.mrb[172].mxu1 %vm1958_vm2, %v7193_v21  ;;  %v7198_v14 = vld [vmem:[%s7322_s21 + $0x2d0] sm:$0xff]   ;;  %v11070_v21 = vmax.f32 %v7880_v30, %v7885_v15  ;;  %v11072_v55 = vmax.f32 %v7891_v12, %v7896_v8  ;;  %v7200_v12 = vld [vmem:[%s7322_s21 + $0x2d8] sm:$0xff]  }
 0x170   : > { %v8196_v3 = vmax.f32 %v11067_v23, %v3016_v33  ;;  %6673 = vmatprep.mubr.msk.bf16.mxu0 %vm1958_vm2, %v7194_v13  ;;  %6925 = vmatprep.mubr.msk.bf16.mxu1 %vm1958_vm2, %v7195_v2  ;;  %v7199_v33 = vld [vmem:[%s7322_s21 + $0x6c0] sm:$0xff]   ;;  %v11074_v30 = vmax.f32 %v7901_v59, %v7906_v18  ;;  %11135 = vst [vmem:[#allocation37_spill] sm:$0xff] %v8451_v44 }
 0x172   : > { %v6567_v9 = vpop.f32.mrb[68].mxu0  ;;  %v8203_v43 = vpop.f32.mrb[68].mxu1 }
 0x173   : > { %v3037_v63 = vadd.f32 %v6567_v9, %v7714_v50  ;;  %v3028_v5 = vpop.f32.mrb[69].mxu0  ;;  %11068 = vst [vmem:[#allocation79_spill] sm:$0xff] %v8203_v43  ;;  %v8207_v16 = vpop.f32.mrb[69].mxu1 }
 0x174   : > { %v3029_v53 = vadd.f32 %v7714_v50, %v3028_v5  ;;  %v6568_v45 = vpop.f32.mrb[70].mxu0  ;;  %11069 = vst [vmem:[#allocation80_spill] sm:$0xff] %v8207_v16  ;;  %v8216_v41 = vpop.f32.mrb[70].mxu1 }
 0x175   : > { %v8213_v13 = vmax.f32 %v11070_v21, %v3037_v63  ;;  %v3040_v49 = vadd.f32 %v6568_v45, %v7714_v50  ;;  %v3031_v2 = vpop.f32.mrb[71].mxu0  ;;  %11071 = vst [vmem:[#allocation81_spill] sm:$0xff] %v8216_v41  ;;  %v8225_v5 = vpop.f32.mrb[71].mxu1  ;;  %v11075_v63 = vmax.f32 %v7910_v56, %v7916_v28  ;;  %v7201_v56 = vld [vmem:[%s7322_s21 + $0x6c8] sm:$0xff]  }
 0x176   : > { %v8222_v23 = vmax.f32 %v11072_v55, %v3029_v53  ;;  %v3032_v9 = vadd.f32 %v7714_v50, %v3031_v2  ;;  %11073 = vst [vmem:[#allocation82_spill] sm:$0xff] %v8225_v5  ;;  %v11129_v41 = vld [vmem:[#allocation35_spill] sm:$0xff] }
 0x177   : > { %v8230_v15 = vmax.f32 %v11074_v30, %v3040_v49  ;;  %6674 = vmatmul.mubr.msk.bf16.gmra.mrb[176].mxu0 %vm1958_vm2, %v7196_v1  ;;  %6926 = vmatmul.mubr.msk.bf16.gmra.mrb[176].mxu1 %vm1958_vm2, %v7197_v61  ;;  %v7202_v49 = vld [vmem:[%s7322_s21 + $0x2e0] sm:$0xff]   ;;  %v11079_v61 = vmax.f32 %v7932_v7, %v7937_v57  ;;  %v11081_v30 = vmax.f32 %v7943_v24, %v7948_v20  ;;  %v7204_v24 = vld [vmem:[%s7322_s21 + $0x2e8] sm:$0xff]  }
 0x178   : > { %v8236_v45 = vmax.f32 %v11075_v63, %v3032_v9  ;;  %6677 = vmatprep.mubr.msk.bf16.mxu0 %vm1958_vm2, %v7198_v14  ;;  %6929 = vmatprep.mubr.msk.bf16.mxu1 %vm1958_vm2, %v7199_v33  ;;  %v7203_v9 = vld [vmem:[%s7322_s21 + $0x6d0] sm:$0xff]   ;;  %v11083_v7 = vmax.f32 %v7953_v60, %v7958_v42 }
 0x17a   : > { %11076 = vst [vmem:[#allocation83_spill] sm:$0xff] %v8236_v45  ;;  %v6571_v8 = vpop.f32.mrb[72].mxu0  ;;  %v8243_v53 = vpop.f32.mrb[72].mxu1 }
 0x17b   : > { %v3053_v59 = vadd.f32 %v6571_v8, %v7714_v50  ;;  %v3044_v18 = vpop.f32.mrb[73].mxu0  ;;  %11077 = vst [vmem:[#allocation84_spill] sm:$0xff] %v8243_v53  ;;  %v8247_v28 = vpop.f32.mrb[73].mxu1 }
 0x17c   : > { %v3045_v1 = vadd.f32 %v7714_v50, %v3044_v18  ;;  %v6572_v21 = vpop.f32.mrb[74].mxu0  ;;  %11078 = vst [vmem:[#allocation85_spill] sm:$0xff] %v8247_v28  ;;  %v8256_v55 = vpop.f32.mrb[74].mxu1 }
 0x17d   : > { %v8253_v14 = vmax.f32 %v11079_v61, %v3053_v59  ;;  %v3056_v2 = vadd.f32 %v6572_v21, %v7714_v50  ;;  %v3047_v33 = vpop.f32.mrb[75].mxu0  ;;  %11080 = vst [vmem:[#allocation86_spill] sm:$0xff] %v8256_v55  ;;  %v8265_v18 = vpop.f32.mrb[75].mxu1  ;;  %v11085_v59 = vmax.f32 %v7962_v4, %v7968_v40  ;;  %v7205_v4 = vld [vmem:[%s7322_s21 + $0x6d8] sm:$0xff]  }
 0x17e   : > { %v8262_v63 = vmax.f32 %v11081_v30, %v3045_v1  ;;  %v3048_v8 = vadd.f32 %v7714_v50, %v3047_v33  ;;  %11082 = vst [vmem:[#allocation87_spill] sm:$0xff] %v8265_v18 }
 0x17f   : > { %v8270_v57 = vmax.f32 %v11083_v7, %v3056_v2  ;;  %6678 = vmatmul.mubr.msk.bf16.gmra.mrb[180].mxu0 %vm1958_vm2, %v7200_v12  ;;  %6930 = vmatmul.mubr.msk.bf16.gmra.mrb[180].mxu1 %vm1958_vm2, %v7201_v56  ;;  %v7206_v2 = vld [vmem:[%s7322_s21 + $0x2f0] sm:$0xff]   ;;  %v11089_v56 = vmax.f32 %v7984_v11, %v7989_v46  ;;  %v11091_v7 = vmax.f32 %v7995_v36, %v8000_v32  ;;  %v7208_v36 = vld [vmem:[%s7322_s21 + $0x2f8] sm:$0xff]  }
 0x180   : > { %v8276_v21 = vmax.f32 %v11085_v59, %v3048_v8  ;;  %6681 = vmatprep.mubr.msk.bf16.mxu0 %vm1958_vm2, %v7202_v49  ;;  %6933 = vmatprep.mubr.msk.bf16.mxu1 %vm1958_vm2, %v7203_v9  ;;  %v7207_v8 = vld [vmem:[%s7322_s21 + $0x6e0] sm:$0xff]   ;;  %v11093_v11 = vmax.f32 %v8005_v31, %v8010_v29 }
 0x181   : > { %11084 = vst [vmem:[#allocation88_spill] sm:$0xff] %v8270_v57 }
 0x182   : > { %11086 = vst [vmem:[#allocation89_spill] sm:$0xff] %v8276_v21  ;;  %v6575_v20 = vpop.f32.mrb[76].mxu0  ;;  %v8283_v1 = vpop.f32.mrb[76].mxu1 }
 0x183   : > { %v3069_v42 = vadd.f32 %v6575_v20, %v7714_v50  ;;  %v3060_v60 = vpop.f32.mrb[77].mxu0  ;;  %11087 = vst [vmem:[#allocation90_spill] sm:$0xff] %v8283_v1  ;;  %v8287_v40 = vpop.f32.mrb[77].mxu1  ;;  %v11108_v1 = vld [vmem:[#allocation63_spill] sm:$0xff] }
 0x184   : > { %v3061_v12 = vadd.f32 %v7714_v50, %v3060_v60  ;;  %v6576_v61 = vpop.f32.mrb[78].mxu0  ;;  %11088 = vst [vmem:[#allocation91_spill] sm:$0xff] %v8287_v40  ;;  %v8296_v30 = vpop.f32.mrb[78].mxu1 }
 0x185   : > { %v8293_v49 = vmax.f32 %v11089_v56, %v3069_v42  ;;  %v3072_v33 = vadd.f32 %v6576_v61, %v7714_v50  ;;  %v3063_v9 = vpop.f32.mrb[79].mxu0  ;;  %11090 = vst [vmem:[#allocation92_spill] sm:$0xff] %v8296_v30  ;;  %v8305_v60 = vpop.f32.mrb[79].mxu1  ;;  %v11095_v42 = vld [vmem:[#allocation54_spill] sm:$0xff]  ;;  %v11096_v61 = vld [vmem:[#allocation55_spill] sm:$0xff] }
 0x186   : > { %v8302_v59 = vmax.f32 %v11091_v7, %v3061_v12  ;;  %v3064_v20 = vadd.f32 %v7714_v50, %v3063_v9  ;;  %11092 = vst [vmem:[#allocation93_spill] sm:$0xff] %v8305_v60  ;;  %v11097_v56 = vmax.f32 %v11095_v42, %v11096_v61  ;;  %v7209_v9 = vld [vmem:[%s7322_s21 + $0x6e8] sm:$0xff]  }
 0x187   : > { %v8310_v46 = vmax.f32 %v11093_v11, %v3072_v33  ;;  %6682 = vmatmul.mubr.msk.bf16.gmra.mrb[184].mxu0 %vm1958_vm2, %v7204_v24  ;;  %6934 = vmatmul.mubr.msk.bf16.gmra.mrb[184].mxu1 %vm1958_vm2, %v7205_v4  ;;  %v11101_v4 = vld [vmem:[#allocation59_spill] sm:$0xff] }
 0x188   : > { %v8316_v30 = vmax.f32 %v11097_v56, %v3064_v20  ;;  %6685 = vmatprep.mubr.msk.bf16.mxu0 %vm1958_vm2, %v7206_v2  ;;  %6937 = vmatprep.mubr.msk.bf16.mxu1 %vm1958_vm2, %v7207_v8  ;;  %v7210_v20 = vld [vmem:[%s7322_s21 + $0x300] sm:$0xff]   ;;  %v11102_v2 = vmax.f32 %v8036_v35, %v11101_v4  ;;  %v7211_v56 = vld [vmem:[%s7322_s21 + $0x6f0] sm:$0xff]  }
 0x189   : > { %11094 = vst [vmem:[#allocation94_spill] sm:$0xff] %v8310_v46  ;;  %v11109_v35 = vld [vmem:[#allocation64_spill] sm:$0xff] }
 0x18a   : > { %11098 = vst [vmem:[#allocation54_spill] sm:$0xff] %v8316_v30  ;;  %v6579_v32 = vpop.f32.mrb[80].mxu0  ;;  %v8323_v12 = vpop.f32.mrb[80].mxu1 }
 0x18b   : > { %v3085_v29 = vadd.f32 %v6579_v32, %v7714_v50  ;;  %v3076_v31 = vpop.f32.mrb[81].mxu0  ;;  %11099 = vst [vmem:[#allocation55_spill] sm:$0xff] %v8323_v12  ;;  %v8327_v7 = vpop.f32.mrb[81].mxu1  ;;  %v11104_v32 = vld [vmem:[#allocation60_spill] sm:$0xff]  ;;  %v11105_v12 = vld [vmem:[#allocation62_spill] sm:$0xff] }
 0x18c   : > { %v3077_v24 = vadd.f32 %v7714_v50, %v3076_v31  ;;  %v6580_v33 = vpop.f32.mrb[82].mxu0  ;;  %11100 = vst [vmem:[#allocation95_spill] sm:$0xff] %v8327_v7  ;;  %v8336_v61 = vpop.f32.mrb[82].mxu1  ;;  %v11106_v31 = vmax.f32 %v11104_v32, %v11105_v12 }
 0x18d   : > { %v8333_v11 = vmax.f32 %v11102_v2, %v3085_v29  ;;  %v3088_v8 = vadd.f32 %v6580_v33, %v7714_v50  ;;  %v3079_v42 = vpop.f32.mrb[83].mxu0  ;;  %11103 = vst [vmem:[#allocation59_spill] sm:$0xff] %v8336_v61  ;;  %v8345_v40 = vpop.f32.mrb[83].mxu1  ;;  %v11110_v29 = vmax.f32 %v11108_v1, %v11109_v35  ;;  %v11111_v33 = vld [vmem:[#allocation65_spill] sm:$0xff]  ;;  %v11112_v2 = vld [vmem:[#allocation66_spill] sm:$0xff] }
 0x18e   : > { %v8342_v60 = vmax.f32 %v11106_v31, %v3077_v24  ;;  %v3080_v7 = vadd.f32 %v7714_v50, %v3079_v42  ;;  %11107 = vst [vmem:[#allocation60_spill] sm:$0xff] %v8345_v40  ;;  %v11113_v61 = vmax.f32 %v11111_v33, %v11112_v2  ;;  %v11114_v1 = vld [vmem:[#allocation30_spill] sm:$0xff]  ;;  %v7212_v42 = vld [vmem:[%s7322_s21 + $0x308] sm:$0xff]   ;;  %v7214_v2 = vld [vmem:[%s7322_s21 + $0x310] sm:$0xff]  }
 0x18f   : > { %v8350_v4 = vmax.f32 %v11110_v29, %v3088_v8  ;;  %6686 = vmatmul.mubr.msk.bf16.gmra.mrb[188].mxu0 %vm1958_vm2, %v7208_v36  ;;  %6938 = vmatmul.mubr.msk.bf16.gmra.mrb[188].mxu1 %vm1958_vm2, %v7209_v9  ;;  %v8363_v24 = vadd.f32 %v11114_v1, %v7714_v50  ;;  %v7213_v29 = vld [vmem:[%s7322_s21 + $0x6f8] sm:$0xff]  }
 0x190   : > { %v8356_v18 = vmax.f32 %v11113_v61, %v3080_v7  ;;  %6689 = vmatprep.mubr.msk.bf16.mxu0 %vm1958_vm2, %v7210_v20  ;;  %6941 = vmatprep.mubr.msk.bf16.mxu1 %vm1958_vm2, %v7211_v56  ;;  %v11117_v61 = vld [vmem:[#allocation31_spill] sm:$0xff]  ;;  %v11119_v20 = vld [vmem:[#allocation32_spill] sm:$0xff] }
 0x191   : > { %11115 = vst [vmem:[#allocation62_spill] sm:$0xff] %v8363_v24  ;;  %v8371_v9 = vadd.f32 %v7714_v50, %v11117_v61  ;;  %v8375_v32 = vadd.f32 %v11119_v20, %v7714_v50 }
 0x192   : > { %v6583_v12 = vpop.f32.mrb[84].mxu0  ;;  %v6835_v7 = vpop.f32.mrb[84].mxu1 }
 0x193   : > { %v8366_v36 = vadd.f32 %v6583_v12, %v7714_v50  ;;  %v3092_v8 = vpop.f32.mrb[85].mxu0  ;;  %11118 = vst [vmem:[#allocation64_spill] sm:$0xff] %v8371_v9  ;;  %11120 = vst [vmem:[#allocation65_spill] sm:$0xff] %v8375_v32  ;;  %v8381_v35 = vadd.f32 %v6835_v7, %v7714_v50  ;;  %v4100_v33 = vpop.f32.mrb[85].mxu1  ;;  %v11122_v12 = vld [vmem:[#allocation33_spill] sm:$0xff]  ;;  %v7215_v7 = vld [vmem:[%s7322_s21 + $0x700] sm:$0xff]  }
 0x194   : > { %v8378_v56 = vadd.f32 %v7714_v50, %v3092_v8  ;;  %v6584_v31 = vpop.f32.mrb[86].mxu0  ;;  %v8387_v1 = vadd.f32 %v7714_v50, %v11122_v12  ;;  %v8395_v8 = vadd.f32 %v7714_v50, %v4100_v33  ;;  %v6836_v55 = vpop.f32.mrb[86].mxu1  ;;  %v7216_v12 = vld [vmem:[%s7322_s21 + $0x318] sm:$0xff]  }
 0x195   : > { %11116 = vst [vmem:[#allocation63_spill] sm:$0xff] %v8366_v36  ;;  %v8392_v20 = vadd.f32 %v6584_v31, %v7714_v50  ;;  %v3095_v40 = vpop.f32.mrb[87].mxu0  ;;  %v8406_v61 = vadd.f32 %v6836_v55, %v7714_v50  ;;  %v4103_v31 = vpop.f32.mrb[87].mxu1 }
 0x196   : > { %11121 = vst [vmem:[#allocation66_spill] sm:$0xff] %v8378_v56  ;;  %11123 = vst [vmem:[#allocation30_spill] sm:$0xff] %v8387_v1  ;;  %v8401_v53 = vadd.f32 %v7714_v50, %v3095_v40  ;;  %v8414_v28 = vadd.f32 %v7714_v50, %v4103_v31  ;;  %v11126_v31 = vld [vmem:[#allocation34_spill] sm:$0xff] }
 0x197   : > { %11124 = vst [vmem:[#allocation31_spill] sm:$0xff] %v8392_v20  ;;  %6690 = vmatmul.mubr.msk.bf16.gmra.mrb[192].mxu0 %vm1958_vm2, %v7212_v42  ;;  %6942 = vmatmul.mubr.msk.bf16.gmra.mrb[192].mxu1 %vm1958_vm2, %v7213_v29  ;;  %v8427_v5 = vadd.f32 %v11126_v31, %v7714_v50  ;;  %v11131_v42 = vld [vmem:[#allocation36_spill] sm:$0xff] }
 0x198   : > { %11125 = vst [vmem:[#allocation32_spill] sm:$0xff] %v8401_v53  ;;  %6693 = vmatprep.mubr.msk.bf16.mxu0 %vm1958_vm2, %v7214_v2  ;;  %6945 = vmatprep.mubr.msk.bf16.mxu1 %vm1958_vm2, %v7215_v7  ;;  %v8435_v2 = vadd.f32 %v7714_v50, %v11129_v41  ;;  %v8439_v16 = vadd.f32 %v11131_v42, %v7714_v50 }
 0x199   : > { %11127 = vst [vmem:[#allocation33_spill] sm:$0xff] %v8427_v5 }
 0x19a   : > { %v6587_v33 = vpop.f32.mrb[88].mxu0  ;;  %v6839_v55 = vpop.f32.mrb[88].mxu1  ;;  %11130 = vst [vmem:[#allocation35_spill] sm:$0xff] %v8435_v2  ;;  %11132 = vst [vmem:[#allocation36_spill] sm:$0xff] %v8439_v16  ;;  %v7222_v16 = vld [vmem:[%s7322_s21 + $0x330] sm:$0xff]  }
 0x19b   : > { %v8430_v40 = vadd.f32 %v6587_v33, %v7714_v50  ;;  %v3108_v29 = vpop.f32.mrb[89].mxu0  ;;  %v8445_v43 = vadd.f32 %v6839_v55, %v7714_v50  ;;  %v7217_v33 = vld [vmem:[%s7322_s21 + $0x708] sm:$0xff]   ;;  %v4116_v27 = vpop.f32.mrb[89].mxu1  ;;  %v7219_v55 = vld [vmem:[%s7322_s21 + $0x710] sm:$0xff]  }
 0x19c   : > { %v8442_v7 = vadd.f32 %v7714_v50, %v3108_v29  ;;  %v6588_v31 = vpop.f32.mrb[90].mxu0  ;;  %v8459_v29 = vadd.f32 %v7714_v50, %v4116_v27  ;;  %v6840_v37 = vpop.f32.mrb[90].mxu1 }
 0x19d   : > { %11128 = vst [vmem:[#allocation34_spill] sm:$0xff] %v8430_v40  ;;  %v8456_v42 = vadd.f32 %v6588_v31, %v7714_v50  ;;  %v3111_v51 = vpop.f32.mrb[91].mxu0  ;;  %v8470_v41 = vadd.f32 %v6840_v37, %v7714_v50  ;;  %v4119_v31 = vpop.f32.mrb[91].mxu1 }
 0x19e   : > { %11133 = vst [vmem:[#allocation96_spill] sm:$0xff] %v8442_v7  ;;  %v8465_v38 = vadd.f32 %v7714_v50, %v3111_v51  ;;  %v8478_v58 = vadd.f32 %v7714_v50, %v4119_v31  ;;  %v11138_v31 = vld [vmem:[#allocation38_spill] sm:$0xff]  ;;  %v11146_v7 = vld [vmem:[#allocation41_spill] sm:$0xff] }
 0x19f   : > { %11136 = vst [vmem:[#allocation97_spill] sm:$0xff] %v8456_v42  ;;  %6694 = vmatmul.mubr.msk.bf16.gmra.mrb[196].mxu0 %vm1958_vm2, %v7216_v12  ;;  %6946 = vmatmul.mubr.msk.bf16.gmra.mrb[196].mxu1 %vm1958_vm2, %v7217_v33  ;;  %v8491_v62 = vadd.f32 %v11138_v31, %v7714_v50  ;;  %v11143_v12 = vld [vmem:[#allocation40_spill] sm:$0xff]  ;;  %v8515_v2 = vadd.f32 %v7714_v50, %v11146_v7  ;;  %v7224_v7 = vld [vmem:[%s7322_s21 + $0x338] sm:$0xff]  }
 0x1a0   : > { %11137 = vst [vmem:[#allocation98_spill] sm:$0xff] %v8465_v38  ;;  %6697 = vmatprep.mubr.msk.bf16.mxu0 %vm1958_vm2, %v7218_v19  ;;  %6949 = vmatprep.mubr.msk.bf16.mxu1 %vm1958_vm2, %v7219_v55  ;;  %v8499_v19 = vadd.f32 %v7714_v50, %v11141_v25  ;;  %v8503_v38 = vadd.f32 %v11143_v12, %v7714_v50 }
 0x1a1   : > { %11139 = vst [vmem:[#allocation38_spill] sm:$0xff] %v8491_v62  ;;  %11147 = vst [vmem:[#allocation41_spill] sm:$0xff] %v8515_v2 }
 0x1a2   : > { %v6591_v27 = vpop.f32.mrb[92].mxu0  ;;  %v6843_v37 = vpop.f32.mrb[92].mxu1  ;;  %11142 = vst [vmem:[#allocation39_spill] sm:$0xff] %v8499_v19  ;;  %11144 = vst [vmem:[#allocation40_spill] sm:$0xff] %v8503_v38  ;;  %v11158_v19 = vld [vmem:[#allocation45_spill] sm:$0xff] }
 0x1a3   : > { %v8494_v51 = vadd.f32 %v6591_v27, %v7714_v50  ;;  %v3124_v33 = vpop.f32.mrb[93].mxu0  ;;  %v8509_v44 = vadd.f32 %v6843_v37, %v7714_v50  ;;  %v7221_v27 = vld [vmem:[%s7322_s21 + $0x718] sm:$0xff]   ;;  %v4132_v42 = vpop.f32.mrb[93].mxu1  ;;  %v7223_v37 = vld [vmem:[%s7322_s21 + $0x720] sm:$0xff]   ;;  %v8579_v62 = vadd.f32 %v7714_v50, %v11158_v19  ;;  %v11166_v19 = vld [vmem:[#allocation47_spill] sm:$0xff] }
 0x1a4   : > { %v8506_v55 = vadd.f32 %v7714_v50, %v3124_v33  ;;  %v6592_v31 = vpop.f32.mrb[94].mxu0  ;;  %v8523_v33 = vadd.f32 %v7714_v50, %v4132_v42  ;;  %v6844_v5 = vpop.f32.mrb[94].mxu1 }
 0x1a5   : > { %11140 = vst [vmem:[#allocation99_spill] sm:$0xff] %v8494_v51  ;;  %v8520_v12 = vadd.f32 %v6592_v31, %v7714_v50  ;;  %v3127_v40 = vpop.f32.mrb[95].mxu0  ;;  %v8534_v25 = vadd.f32 %v6844_v5, %v7714_v50  ;;  %v4135_v31 = vpop.f32.mrb[95].mxu1  ;;  %11159 = vst [vmem:[#allocation45_spill] sm:$0xff] %v8579_v62 }
 0x1a6   : > { %11145 = vst [vmem:[#allocation100_spill] sm:$0xff] %v8506_v55  ;;  %v8529_v1 = vadd.f32 %v7714_v50, %v3127_v40  ;;  %v8542_v53 = vadd.f32 %v7714_v50, %v4135_v31  ;;  %v11150_v31 = vld [vmem:[#allocation42_spill] sm:$0xff] }
 0x1a7   : > { %11148 = vst [vmem:[#allocation101_spill] sm:$0xff] %v8520_v12  ;;  %6698 = vmatmul.mubr.msk.bf16.gmra.mrb[200].mxu0 %vm1958_vm2, %v7220_v6  ;;  %6950 = vmatmul.mubr.msk.bf16.gmra.mrb[200].mxu1 %vm1958_vm2, %v7221_v27  ;;  %v8555_v51 = vadd.f32 %v11150_v31, %v7714_v50  ;;  %v11155_v6 = vld [vmem:[#allocation44_spill] sm:$0xff]  ;;  %v7226_v55 = vld [vmem:[%s7322_s21 + $0x340] sm:$0xff]  }
 0x1a8   : > { %11149 = vst [vmem:[#allocation102_spill] sm:$0xff] %v8529_v1  ;;  %6701 = vmatprep.mubr.msk.bf16.mxu0 %vm1958_vm2, %v7222_v16  ;;  %6953 = vmatprep.mubr.msk.bf16.mxu1 %vm1958_vm2, %v7223_v37  ;;  %v11153_v1 = vld [vmem:[#allocation43_spill] sm:$0xff]  ;;  %v8567_v2 = vadd.f32 %v11155_v6, %v7714_v50 }
 0x1a9   : > { %11151 = vst [vmem:[#allocation42_spill] sm:$0xff] %v8555_v51  ;;  %v8563_v16 = vadd.f32 %v7714_v50, %v11153_v1 }
 0x1aa   : > { %v6595_v42 = vpop.f32.mrb[96].mxu0  ;;  %v6847_v5 = vpop.f32.mrb[96].mxu1  ;;  %11156 = vst [vmem:[#allocation44_spill] sm:$0xff] %v8567_v2 }
 0x1ab   : > { %v8558_v40 = vadd.f32 %v6595_v42, %v7714_v50  ;;  %v3140_v27 = vpop.f32.mrb[97].mxu0  ;;  %11154 = vst [vmem:[#allocation43_spill] sm:$0xff] %v8563_v16  ;;  %v8573_v12 = vadd.f32 %v6847_v5, %v7714_v50  ;;  %v7225_v42 = vld [vmem:[%s7322_s21 + $0x728] sm:$0xff]   ;;  %v4148_v38 = vpop.f32.mrb[97].mxu1  ;;  %v7227_v5 = vld [vmem:[%s7322_s21 + $0x730] sm:$0xff]   ;;  %v11171_v16 = vld [vmem:[#allocation49_spill] sm:$0xff] }
 0x1ac   : > { %v8570_v37 = vadd.f32 %v7714_v50, %v3140_v27  ;;  %v6596_v31 = vpop.f32.mrb[98].mxu0  ;;  %v8587_v27 = vadd.f32 %v7714_v50, %v4148_v38  ;;  %v6848_v32 = vpop.f32.mrb[98].mxu1 }
 0x1ad   : > { %11152 = vst [vmem:[#allocation103_spill] sm:$0xff] %v8558_v40  ;;  %v8584_v6 = vadd.f32 %v6596_v31, %v7714_v50  ;;  %v3143_v20 = vpop.f32.mrb[99].mxu0  ;;  %v8598_v1 = vadd.f32 %v6848_v32, %v7714_v50  ;;  %v4151_v31 = vpop.f32.mrb[99].mxu1  ;;  %v7228_v32 = vld [vmem:[%s7322_s21 + $0x348] sm:$0xff]  }
 0x1ae   : > { %11157 = vst [vmem:[#allocation104_spill] sm:$0xff] %v8570_v37  ;;  %v8593_v9 = vadd.f32 %v7714_v50, %v3143_v20  ;;  %v8606_v56 = vadd.f32 %v7714_v50, %v4151_v31  ;;  %v11163_v31 = vld [vmem:[#allocation46_spill] sm:$0xff]  ;;  %v7230_v37 = vld [vmem:[%s7322_s21 + $0x350] sm:$0xff]  }
 0x1af   : > { %11160 = vst [vmem:[#allocation105_spill] sm:$0xff] %v8584_v6  ;;  %6702 = vmatmul.mubr.msk.bf16.gmra.mrb[204].mxu0 %vm1958_vm2, %v7224_v7  ;;  %6954 = vmatmul.mubr.msk.bf16.gmra.mrb[204].mxu1 %vm1958_vm2, %v7225_v42  ;;  %v8619_v40 = vadd.f32 %v11163_v31, %v7714_v50  ;;  %v8624_v42 = vld [vmem:[%s10827_s2] ss:$0 sm:$0xff] }
 0x1b0   : > { %11161 = vst [vmem:[#allocation106_spill] sm:$0xff] %v8593_v9  ;;  %11162 = vst [vmem:[#allocation107_spill] sm:$0xff] %v8606_v56  ;;  %6705 = vmatprep.mubr.msk.bf16.mxu0 %vm1958_vm2, %v7226_v55  ;;  %6957 = vmatprep.mubr.msk.bf16.mxu1 %vm1958_vm2, %v7227_v5  ;;  %v8632_v5 = vadd.f32 %v8624_v42, %v11166_v19  ;;  %v11168_v9 = vld [vmem:[#allocation48_spill] sm:$0xff]  ;;  %v8648_v51 = vadd.f32 %v8624_v42, %v11171_v16  ;;  %v7232_v16 = vld [vmem:[%s7322_s21 + $0x358] sm:$0xff]  }
 0x1b1   : > { %11164 = vst [vmem:[#allocation46_spill] sm:$0xff] %v8619_v40  ;;  %v8636_v50 = vadd.f32 %v8624_v42, %v11168_v9 }
 0x1b2   : > { %v6599_v38 = vpop.f32.mrb[100].mxu0  ;;  %v6851_v7 = vpop.f32.mrb[100].mxu1  ;;  %11167 = vst [vmem:[#allocation47_spill] sm:$0xff] %v8632_v5  ;;  %11172 = vst [vmem:[#allocation49_spill] sm:$0xff] %v8648_v51  ;;  %v11182_v51 = vld [vmem:[#allocation52_spill] sm:$0xff]  ;;  %v11185_v5 = vld [vmem:[#allocation53_spill] sm:$0xff] }
 0x1b3   : > { %v8627_v20 = vadd.f32 %v8624_v42, %v6599_v38  ;;  %v3156_v55 = vpop.f32.mrb[101].mxu0  ;;  %11169 = vst [vmem:[#allocation48_spill] sm:$0xff] %v8636_v50  ;;  %v8642_v6 = vadd.f32 %v8624_v42, %v6851_v7  ;;  %v7229_v38 = vld [vmem:[%s7322_s21 + $0x738] sm:$0xff]   ;;  %v4164_v2 = vpop.f32.mrb[101].mxu1  ;;  %v7231_v7 = vld [vmem:[%s7322_s21 + $0x740] sm:$0xff]   ;;  %v8712_v40 = vadd.f32 %v8624_v42, %v11185_v5  ;;  %v7236_v5 = vld [vmem:[%s7322_s21 + $0x368] sm:$0xff]  }
 0x1b4   : > { %v8639_v31 = vadd.f32 %v8624_v42, %v3156_v55  ;;  %v6600_v62 = vpop.f32.mrb[102].mxu0  ;;  %v8656_v55 = vadd.f32 %v8624_v42, %v4164_v2  ;;  %v6852_v24 = vpop.f32.mrb[102].mxu1 }
 0x1b5   : > { %11165 = vst [vmem:[#allocation108_spill] sm:$0xff] %v8627_v20  ;;  %v8653_v9 = vadd.f32 %v8624_v42, %v6600_v62  ;;  %v3159_v36 = vpop.f32.mrb[103].mxu0  ;;  %v8667_v19 = vadd.f32 %v8624_v42, %v6852_v24  ;;  %v4167_v62 = vpop.f32.mrb[103].mxu1  ;;  %11186 = vst [vmem:[#allocation53_spill] sm:$0xff] %v8712_v40  ;;  %v11195_v40 = vld [vmem:[#allocation58_spill] sm:$0xff] }
 0x1b6   : > { %11170 = vst [vmem:[#allocation109_spill] sm:$0xff] %v8639_v31  ;;  %v8662_v45 = vadd.f32 %v8624_v42, %v3159_v36  ;;  %v8675_v56 = vadd.f32 %v8624_v42, %v4167_v62  ;;  %v11177_v62 = vld [vmem:[#allocation50_spill] sm:$0xff] }
 0x1b7   : > { %11173 = vst [vmem:[#allocation110_spill] sm:$0xff] %v8653_v9  ;;  %11175 = vst [vmem:[#allocation112_spill] sm:$0xff] %v8667_v19  ;;  %6706 = vmatmul.mubr.msk.bf16.gmra.mrb[208].mxu0 %vm1958_vm2, %v7228_v32  ;;  %6958 = vmatmul.mubr.msk.bf16.gmra.mrb[208].mxu1 %vm1958_vm2, %v7229_v38  ;;  %v8688_v20 = vadd.f32 %v8624_v42, %v11177_v62  ;;  %v8700_v32 = vadd.f32 %v8624_v42, %v11182_v51  ;;  %v7234_v31 = vld [vmem:[%s7322_s21 + $0x360] sm:$0xff]  }
 0x1b8   : > { %11174 = vst [vmem:[#allocation111_spill] sm:$0xff] %v8662_v45  ;;  %11176 = vst [vmem:[#allocation113_spill] sm:$0xff] %v8675_v56  ;;  %6709 = vmatprep.mubr.msk.bf16.mxu0 %vm1958_vm2, %v7230_v37  ;;  %6961 = vmatprep.mubr.msk.bf16.mxu1 %vm1958_vm2, %v7231_v7  ;;  %v11180_v45 = vld [vmem:[#allocation51_spill] sm:$0xff] }
 0x1b9   : > { %11178 = vst [vmem:[#allocation50_spill] sm:$0xff] %v8688_v20  ;;  %v8696_v37 = vadd.f32 %v8624_v42, %v11180_v45  ;;  %11183 = vst [vmem:[#allocation52_spill] sm:$0xff] %v8700_v32 }
 0x1ba   : > { %v6603_v2 = vpop.f32.mrb[104].mxu0  ;;  %v6855_v24 = vpop.f32.mrb[104].mxu1 }
 0x1bb   : > { %v8691_v36 = vadd.f32 %v8624_v42, %v6603_v2  ;;  %v3172_v38 = vpop.f32.mrb[105].mxu0  ;;  %11181 = vst [vmem:[#allocation51_spill] sm:$0xff] %v8696_v37  ;;  %v8706_v9 = vadd.f32 %v8624_v42, %v6855_v24  ;;  %v7233_v2 = vld [vmem:[%s7322_s21 + $0x748] sm:$0xff]   ;;  %v4180_v50 = vpop.f32.mrb[105].mxu1  ;;  %v7235_v24 = vld [vmem:[%s7322_s21 + $0x750] sm:$0xff]   ;;  %v11198_v37 = vld [vmem:[#allocation61_spill] sm:$0xff] }
 0x1bc   : > { %v8703_v7 = vadd.f32 %v8624_v42, %v3172_v38  ;;  %v6604_v62 = vpop.f32.mrb[106].mxu0  ;;  %v8720_v38 = vadd.f32 %v8624_v42, %v4180_v50  ;;  %v6856_v21 = vpop.f32.mrb[106].mxu1  ;;  %v8776_v20 = vadd.f32 %v8624_v42, %v11198_v37 }
 0x1bd   : > { %11179 = vst [vmem:[#allocation114_spill] sm:$0xff] %v8691_v36  ;;  %v8717_v51 = vadd.f32 %v8624_v42, %v6604_v62  ;;  %v3175_v56 = vpop.f32.mrb[107].mxu0  ;;  %v8731_v45 = vadd.f32 %v8624_v42, %v6856_v21  ;;  %v4183_v62 = vpop.f32.mrb[107].mxu1 }
 0x1be   : > { %11184 = vst [vmem:[#allocation115_spill] sm:$0xff] %v8703_v7  ;;  %v8726_v57 = vadd.f32 %v8624_v42, %v3175_v56  ;;  %v8739_v19 = vadd.f32 %v8624_v42, %v4183_v62  ;;  %v11191_v62 = vld [vmem:[#allocation56_spill] sm:$0xff]  ;;  %11199 = vst [vmem:[#allocation61_spill] sm:$0xff] %v8776_v20 }
 0x1bf   : > { %11187 = vst [vmem:[#allocation116_spill] sm:$0xff] %v8717_v51  ;;  %11189 = vst [vmem:[#allocation118_spill] sm:$0xff] %v8731_v45  ;;  %6710 = vmatmul.mubr.msk.bf16.gmra.mrb[212].mxu0 %vm1958_vm2, %v7232_v16  ;;  %6962 = vmatmul.mubr.msk.bf16.gmra.mrb[212].mxu1 %vm1958_vm2, %v7233_v2  ;;  %v8752_v36 = vadd.f32 %v8624_v42, %v11191_v62  ;;  %v8764_v16 = vadd.f32 %v8624_v42, %v11195_v40  ;;  %v7238_v7 = vld [vmem:[%s7322_s21 + $0x370] sm:$0xff]  }
 0x1c0   : > { %11188 = vst [vmem:[#allocation117_spill] sm:$0xff] %v8726_v57  ;;  %11190 = vst [vmem:[#allocation119_spill] sm:$0xff] %v8739_v19  ;;  %6713 = vmatprep.mubr.msk.bf16.mxu0 %vm1958_vm2, %v7234_v31  ;;  %6965 = vmatprep.mubr.msk.bf16.mxu1 %vm1958_vm2, %v7235_v24  ;;  %v11193_v57 = vld [vmem:[#allocation57_spill] sm:$0xff] }
 0x1c1   : > { %v8760_v31 = vadd.f32 %v8624_v42, %v11193_v57  ;;  %11196 = vst [vmem:[#allocation58_spill] sm:$0xff] %v8764_v16 }
 0x1c2   : > { %v6607_v50 = vpop.f32.mrb[108].mxu0  ;;  %v6859_v21 = vpop.f32.mrb[108].mxu1 }
 0x1c3   : > { %v8755_v56 = vadd.f32 %v8624_v42, %v6607_v50  ;;  %v3188_v2 = vpop.f32.mrb[109].mxu0  ;;  %11194 = vst [vmem:[#allocation57_spill] sm:$0xff] %v8760_v31  ;;  %v8770_v51 = vadd.f32 %v8624_v42, %v6859_v21  ;;  %v7237_v50 = vld [vmem:[%s7322_s21 + $0x758] sm:$0xff]   ;;  %v4196_v32 = vpop.f32.mrb[109].mxu1  ;;  %v7239_v21 = vld [vmem:[%s7322_s21 + $0x760] sm:$0xff]   ;;  %v7243_v31 = vld [vmem:[%s7322_s21 + $0x770] sm:$0xff]  }
 0x1c4   : > { %v8767_v24 = vadd.f32 %v8624_v42, %v3188_v2  ;;  %v6608_v62 = vpop.f32.mrb[110].mxu0  ;;  %v8784_v2 = vadd.f32 %v8624_v42, %v4196_v32  ;;  %v6860_v30 = vpop.f32.mrb[110].mxu1 }
 0x1c5   : > { %11192 = vst [vmem:[#allocation56_spill] sm:$0xff] %v8755_v56  ;;  %v8781_v40 = vadd.f32 %v8624_v42, %v6608_v62  ;;  %v3191_v19 = vpop.f32.mrb[111].mxu0  ;;  %v8795_v57 = vadd.f32 %v8624_v42, %v6860_v30  ;;  %v4199_v62 = vpop.f32.mrb[111].mxu1 }
 0x1c6   : > { %11197 = vst [vmem:[#allocation120_spill] sm:$0xff] %v8767_v24  ;;  %v8790_v46 = vadd.f32 %v8624_v42, %v3191_v19  ;;  %v8803_v19 = vadd.f32 %v8624_v42, %v4199_v62 }
 0x1c7   : > { %11200 = vst [vmem:[#allocation121_spill] sm:$0xff] %v8781_v40  ;;  %6714 = vmatmul.mubr.msk.bf16.gmra.mrb[216].mxu0 %vm1958_vm2, %v7236_v5  ;;  %6966 = vmatmul.mubr.msk.bf16.gmra.mrb[216].mxu1 %vm1958_vm2, %v7237_v50  ;;  %v7240_v40 = vld [vmem:[%s7322_s21 + $0x378] sm:$0xff]   ;;  %v11204_v5 = vmax.f32 %v8093_v26, %v8381_v35  ;;  %v11208_v26 = vmax.f32 %v8110_v34, %v8406_v61 }
 0x1c8   : > { %11201 = vst [vmem:[#allocation122_spill] sm:$0xff] %v8790_v46  ;;  %6717 = vmatprep.mubr.msk.bf16.mxu0 %vm1958_vm2, %v7238_v7  ;;  %6969 = vmatprep.mubr.msk.bf16.mxu1 %vm1958_vm2, %v7239_v21  ;;  %v7241_v46 = vld [vmem:[%s7322_s21 + $0x768] sm:$0xff]   ;;  %v7242_v7 = vld [vmem:[%s7322_s21 + $0x380] sm:$0xff]  }
 0x1ca   : > { %v6611_v32 = vpop.f32.mrb[112].mxu0  ;;  %v8816_v16 = vpop.f32.mrb[112].mxu1 }
 0x1cb   : > { %v3213_v62 = vadd.f32 %v8624_v42, %v6611_v32  ;;  %v3204_v45 = vpop.f32.mrb[113].mxu0  ;;  %11202 = vst [vmem:[#allocation123_spill] sm:$0xff] %v8816_v16  ;;  %v8820_v30 = vpop.f32.mrb[113].mxu1 }
 0x1cc   : > { %v3205_v50 = vadd.f32 %v8624_v42, %v3204_v45  ;;  %v6612_v37 = vpop.f32.mrb[114].mxu0  ;;  %11203 = vst [vmem:[#allocation124_spill] sm:$0xff] %v8820_v30  ;;  %v8829_v24 = vpop.f32.mrb[114].mxu1  ;;  %v11206_v45 = vmax.f32 %v8102_v17, %v8395_v8  ;;  %v7244_v8 = vld [vmem:[%s7322_s21 + $0x388] sm:$0xff]  }
 0x1cd   : > { %v8826_v20 = vmax.f32 %v11204_v5, %v3213_v62  ;;  %v3216_v21 = vadd.f32 %v8624_v42, %v6612_v37  ;;  %v3207_v32 = vpop.f32.mrb[115].mxu0  ;;  %11205 = vst [vmem:[#allocation125_spill] sm:$0xff] %v8829_v24  ;;  %v8838_v56 = vpop.f32.mrb[115].mxu1  ;;  %v11209_v37 = vmax.f32 %v8116_v0, %v8414_v28  ;;  %v7245_v0 = vld [vmem:[%s7322_s21 + $0x778] sm:$0xff]  }
 0x1ce   : > { %v8835_v16 = vmax.f32 %v11206_v45, %v3205_v50  ;;  %v3208_v30 = vadd.f32 %v8624_v42, %v3207_v32  ;;  %11207 = vst [vmem:[#allocation126_spill] sm:$0xff] %v8838_v56  ;;  %v7247_v45 = vld [vmem:[%s7322_s21 + $0x780] sm:$0xff]   ;;  %v11341_v56 = vld [vmem:[#allocation109_spill] sm:$0xff] }
 0x1cf   : > { %v8843_v35 = vmax.f32 %v11208_v26, %v3216_v21  ;;  %6718 = vmatmul.mubr.msk.bf16.gmra.mrb[220].mxu0 %vm1958_vm2, %v7240_v40  ;;  %6970 = vmatmul.mubr.msk.bf16.gmra.mrb[220].mxu1 %vm1958_vm2, %v7241_v46  ;;  %v11212_v46 = vmax.f32 %v8133_v54, %v8445_v43  ;;  %v11214_v26 = vmax.f32 %v8142_v48, %v8459_v29  ;;  %v7248_v29 = vld [vmem:[%s7322_s21 + $0x398] sm:$0xff]  }
 0x1d0   : > { %v8849_v5 = vmax.f32 %v11209_v37, %v3208_v30  ;;  %6721 = vmatprep.mubr.msk.bf16.mxu0 %vm1958_vm2, %v7242_v7  ;;  %6973 = vmatprep.mubr.msk.bf16.mxu1 %vm1958_vm2, %v7243_v31  ;;  %v7246_v30 = vld [vmem:[%s7322_s21 + $0x390] sm:$0xff]   ;;  %v11216_v54 = vmax.f32 %v8150_v22, %v8470_v41 }
 0x1d2   : > { %v6615_v17 = vpop.f32.mrb[116].mxu0  ;;  %v8856_v62 = vpop.f32.mrb[116].mxu1 }
 0x1d3   : > { %v3229_v34 = vadd.f32 %v8624_v42, %v6615_v17  ;;  %v3220_v61 = vpop.f32.mrb[117].mxu0  ;;  %11210 = vst [vmem:[#allocation127_spill] sm:$0xff] %v8856_v62  ;;  %v8860_v28 = vpop.f32.mrb[117].mxu1  ;;  %v11340_v62 = vld [vmem:[#allocation47_spill] sm:$0xff] }
 0x1d4   : > { %v3221_v40 = vadd.f32 %v8624_v42, %v3220_v61  ;;  %v6616_v50 = vpop.f32.mrb[118].mxu0  ;;  %11211 = vst [vmem:[#allocation128_spill] sm:$0xff] %v8860_v28  ;;  %v8869_v32 = vpop.f32.mrb[118].mxu1 }
 0x1d5   : > { %v8866_v7 = vmax.f32 %v11212_v46, %v3229_v34  ;;  %v3232_v31 = vadd.f32 %v8624_v42, %v6616_v50  ;;  %v3223_v21 = vpop.f32.mrb[119].mxu0  ;;  %11213 = vst [vmem:[#allocation129_spill] sm:$0xff] %v8869_v32  ;;  %v8878_v61 = vpop.f32.mrb[119].mxu1  ;;  %v11217_v34 = vmax.f32 %v8156_v10, %v8478_v58  ;;  %v7249_v58 = vld [vmem:[%s7322_s21 + $0x788] sm:$0xff]  }
 0x1d6   : > { %v8875_v37 = vmax.f32 %v11214_v26, %v3221_v40  ;;  %v3224_v17 = vadd.f32 %v8624_v42, %v3223_v21  ;;  %11215 = vst [vmem:[#allocation130_spill] sm:$0xff] %v8878_v61  ;;  %v11324_v61 = vld [vmem:[#allocation104_spill] sm:$0xff] }
 0x1d7   : > { %v8883_v43 = vmax.f32 %v11216_v54, %v3232_v31  ;;  %6722 = vmatmul.mubr.msk.bf16.gmra.mrb[224].mxu0 %vm1958_vm2, %v7244_v8  ;;  %6974 = vmatmul.mubr.msk.bf16.gmra.mrb[224].mxu1 %vm1958_vm2, %v7245_v0  ;;  %v7250_v31 = vld [vmem:[%s7322_s21 + $0x3a0] sm:$0xff]   ;;  %v11220_v0 = vmax.f32 %v8173_v52, %v8509_v44  ;;  %v11222_v54 = vmax.f32 %v8182_v47, %v8523_v33  ;;  %v7252_v33 = vld [vmem:[%s7322_s21 + $0x3a8] sm:$0xff]  }
 0x1d8   : > { %v8889_v50 = vmax.f32 %v11217_v34, %v3224_v17  ;;  %6725 = vmatprep.mubr.msk.bf16.mxu0 %vm1958_vm2, %v7246_v30  ;;  %6977 = vmatprep.mubr.msk.bf16.mxu1 %vm1958_vm2, %v7247_v45  ;;  %v7251_v17 = vld [vmem:[%s7322_s21 + $0x790] sm:$0xff]   ;;  %v11224_v44 = vmax.f32 %v8190_v39, %v8534_v25 }
 0x1da   : > { %v6619_v48 = vpop.f32.mrb[120].mxu0  ;;  %v8896_v40 = vpop.f32.mrb[120].mxu1 }
 0x1db   : > { %v3245_v22 = vadd.f32 %v8624_v42, %v6619_v48  ;;  %v3236_v41 = vpop.f32.mrb[121].mxu0  ;;  %11218 = vst [vmem:[#allocation131_spill] sm:$0xff] %v8896_v40  ;;  %v8900_v10 = vpop.f32.mrb[121].mxu1  ;;  %v11323_v40 = vld [vmem:[#allocation43_spill] sm:$0xff] }
 0x1dc   : > { %v3237_v8 = vadd.f32 %v8624_v42, %v3236_v41  ;;  %v6620_v46 = vpop.f32.mrb[122].mxu0  ;;  %11219 = vst [vmem:[#allocation132_spill] sm:$0xff] %v8900_v10  ;;  %v8909_v26 = vpop.f32.mrb[122].mxu1 }
 0x1dd   : > { %v8906_v30 = vmax.f32 %v11220_v0, %v3245_v22  ;;  %v3248_v21 = vadd.f32 %v8624_v42, %v6620_v46  ;;  %v3239_v45 = vpop.f32.mrb[123].mxu0  ;;  %11221 = vst [vmem:[#allocation133_spill] sm:$0xff] %v8909_v26  ;;  %v8918_v41 = vpop.f32.mrb[123].mxu1  ;;  %v11225_v22 = vmax.f32 %v8196_v3, %v8542_v53  ;;  %v7253_v3 = vld [vmem:[%s7322_s21 + $0x798] sm:$0xff]  }
 0x1de   : > { %v8915_v34 = vmax.f32 %v11222_v54, %v3237_v8  ;;  %v3240_v48 = vadd.f32 %v8624_v42, %v3239_v45  ;;  %11223 = vst [vmem:[#allocation134_spill] sm:$0xff] %v8918_v41  ;;  %v11308_v41 = vld [vmem:[#allocation100_spill] sm:$0xff] }
 0x1df   : > { %v8923_v52 = vmax.f32 %v11224_v44, %v3248_v21  ;;  %6726 = vmatmul.mubr.msk.bf16.gmra.mrb[228].mxu0 %vm1958_vm2, %v7248_v29  ;;  %6978 = vmatmul.mubr.msk.bf16.gmra.mrb[228].mxu1 %vm1958_vm2, %v7249_v58  ;;  %v7254_v21 = vld [vmem:[%s7322_s21 + $0x3b0] sm:$0xff]   ;;  %v11228_v58 = vmax.f32 %v8213_v13, %v8573_v12  ;;  %v11230_v44 = vmax.f32 %v8222_v23, %v8587_v27  ;;  %v7256_v27 = vld [vmem:[%s7322_s21 + $0x3b8] sm:$0xff]  }
 0x1e0   : > { %v8929_v46 = vmax.f32 %v11225_v22, %v3240_v48  ;;  %6729 = vmatprep.mubr.msk.bf16.mxu0 %vm1958_vm2, %v7250_v31  ;;  %6981 = vmatprep.mubr.msk.bf16.mxu1 %vm1958_vm2, %v7251_v17  ;;  %v7255_v48 = vld [vmem:[%s7322_s21 + $0x7a0] sm:$0xff]   ;;  %v11232_v13 = vmax.f32 %v8230_v15, %v8598_v1 }
 0x1e2   : > { %v6623_v47 = vpop.f32.mrb[124].mxu0  ;;  %v8936_v8 = vpop.f32.mrb[124].mxu1 }
 0x1e3   : > { %v3261_v39 = vadd.f32 %v8624_v42, %v6623_v47  ;;  %v3252_v25 = vpop.f32.mrb[125].mxu0  ;;  %11226 = vst [vmem:[#allocation135_spill] sm:$0xff] %v8936_v8  ;;  %v8940_v53 = vpop.f32.mrb[125].mxu1  ;;  %v11307_v8 = vld [vmem:[#allocation39_spill] sm:$0xff] }
 0x1e4   : > { %v3253_v29 = vadd.f32 %v8624_v42, %v3252_v25  ;;  %v6624_v0 = vpop.f32.mrb[126].mxu0  ;;  %11227 = vst [vmem:[#allocation136_spill] sm:$0xff] %v8940_v53  ;;  %v8949_v54 = vpop.f32.mrb[126].mxu1 }
 0x1e5   : > { %v8946_v31 = vmax.f32 %v11228_v58, %v3261_v39  ;;  %v3264_v45 = vadd.f32 %v8624_v42, %v6624_v0  ;;  %v3255_v17 = vpop.f32.mrb[127].mxu0  ;;  %11229 = vst [vmem:[#allocation137_spill] sm:$0xff] %v8949_v54  ;;  %v8958_v25 = vpop.f32.mrb[127].mxu1  ;;  %v11233_v39 = vld [vmem:[#allocation83_spill] sm:$0xff] }
 0x1e6   : > { %v8955_v22 = vmax.f32 %v11230_v44, %v3253_v29  ;;  %v3256_v47 = vadd.f32 %v8624_v42, %v3255_v17  ;;  %11231 = vst [vmem:[#allocation138_spill] sm:$0xff] %v8958_v25  ;;  %v11234_v0 = vld [vmem:[#allocation107_spill] sm:$0xff] }
 0x1e7   : > { %v8963_v12 = vmax.f32 %v11232_v13, %v3264_v45  ;;  %6730 = vmatmul.mubr.msk.bf16.gmra.mrb[232].mxu0 %vm1958_vm2, %v7252_v33  ;;  %v11235_v58 = vmax.f32 %v11233_v39, %v11234_v0  ;;  %6982 = vmatmul.mubr.msk.bf16.gmra.mrb[232].mxu1 %vm1958_vm2, %v7253_v3  ;;  %v7257_v17 = vld [vmem:[%s7322_s21 + $0x7a8] sm:$0xff]   ;;  %v11238_v3 = vmax.f32 %v8253_v14, %v8642_v6  ;;  %v7259_v0 = vld [vmem:[%s7322_s21 + $0x7b0] sm:$0xff]  }
 0x1e8   : > { %6733 = vmatprep.mubr.msk.bf16.mxu0 %vm1958_vm2, %v7254_v21  ;;  %6985 = vmatprep.mubr.msk.bf16.mxu1 %vm1958_vm2, %v7255_v48  ;;  %v11242_v14 = vld [vmem:[#allocation88_spill] sm:$0xff] }
 0x1e9   : > { %v8969_v54 = vmax.f32 %v11235_v58, %v3256_v47  ;;  %v7258_v47 = vld [vmem:[%s7322_s21 + $0x3c0] sm:$0xff]   ;;  %v11240_v58 = vmax.f32 %v8262_v63, %v8656_v55  ;;  %v11243_v6 = vld [vmem:[#allocation112_spill] sm:$0xff] }
 0x1ea   : > { %v6627_v23 = vpop.f32.mrb[128].mxu0  ;;  %v8976_v29 = vpop.f32.mrb[128].mxu1 }
 0x1eb   : > { %v3277_v15 = vadd.f32 %v8624_v42, %v6627_v23  ;;  %v3268_v1 = vpop.f32.mrb[129].mxu0  ;;  %11236 = vst [vmem:[#allocation83_spill] sm:$0xff] %v8976_v29  ;;  %v8980_v44 = vpop.f32.mrb[129].mxu1 }
 0x1ec   : > { %v3269_v33 = vadd.f32 %v8624_v42, %v3268_v1  ;;  %v6628_v45 = vpop.f32.mrb[130].mxu0  ;;  %11237 = vst [vmem:[#allocation107_spill] sm:$0xff] %v8980_v44  ;;  %v8989_v39 = vpop.f32.mrb[130].mxu1 }
 0x1ed   : > { %v8986_v21 = vmax.f32 %v11238_v3, %v3277_v15  ;;  %v3280_v48 = vadd.f32 %v8624_v42, %v6628_v45  ;;  %v3271_v13 = vpop.f32.mrb[131].mxu0  ;;  %11239 = vst [vmem:[#allocation139_spill] sm:$0xff] %v8989_v39  ;;  %v8998_v44 = vpop.f32.mrb[131].mxu1  ;;  %v11244_v15 = vmax.f32 %v11242_v14, %v11243_v6  ;;  %v11246_v3 = vld [vmem:[#allocation89_spill] sm:$0xff] }
 0x1ee   : > { %v8995_v23 = vmax.f32 %v11240_v58, %v3269_v33  ;;  %v3272_v1 = vadd.f32 %v8624_v42, %v3271_v13  ;;  %11241 = vst [vmem:[#allocation140_spill] sm:$0xff] %v8998_v44  ;;  %v11247_v39 = vld [vmem:[#allocation113_spill] sm:$0xff] }
 0x1ef   : > { %v9003_v45 = vmax.f32 %v11244_v15, %v3280_v48  ;;  %6734 = vmatmul.mubr.msk.bf16.gmra.mrb[236].mxu0 %vm1958_vm2, %v7256_v27  ;;  %v11248_v29 = vmax.f32 %v11246_v3, %v11247_v39  ;;  %6986 = vmatmul.mubr.msk.bf16.gmra.mrb[236].mxu1 %vm1958_vm2, %v7257_v17  ;;  %v7260_v48 = vld [vmem:[%s7322_s21 + $0x3c8] sm:$0xff]   ;;  %v7261_v39 = vld [vmem:[%s7322_s21 + $0x7b8] sm:$0xff]   ;;  %v11252_v17 = vmax.f32 %v8293_v49, %v8706_v9  ;;  %v7263_v15 = vld [vmem:[%s7322_s21 + $0x7c0] sm:$0xff]  }
 0x1f0   : > { %6737 = vmatprep.mubr.msk.bf16.mxu0 %vm1958_vm2, %v7258_v47  ;;  %6989 = vmatprep.mubr.msk.bf16.mxu1 %vm1958_vm2, %v7259_v0  ;;  %v11254_v3 = vmax.f32 %v8302_v59, %v8720_v38  ;;  %v11256_v49 = vld [vmem:[#allocation94_spill] sm:$0xff] }
 0x1f1   : > { %11245 = vst [vmem:[#allocation88_spill] sm:$0xff] %v9003_v45  ;;  %v9009_v25 = vmax.f32 %v11248_v29, %v3272_v1  ;;  %v7262_v1 = vld [vmem:[%s7322_s21 + $0x3d0] sm:$0xff]   ;;  %v11257_v9 = vld [vmem:[#allocation118_spill] sm:$0xff] }
 0x1f2   : > { %v6631_v63 = vpop.f32.mrb[132].mxu0  ;;  %v9016_v13 = vpop.f32.mrb[132].mxu1 }
 0x1f3   : > { %11249 = vst [vmem:[#allocation112_spill] sm:$0xff] %v9009_v25  ;;  %v3293_v55 = vadd.f32 %v8624_v42, %v6631_v63  ;;  %v3284_v33 = vpop.f32.mrb[133].mxu0  ;;  %11250 = vst [vmem:[#allocation89_spill] sm:$0xff] %v9016_v13  ;;  %v9020_v29 = vpop.f32.mrb[133].mxu1  ;;  %v11359_v25 = vld [vmem:[#allocation115_spill] sm:$0xff] }
 0x1f4   : > { %v3285_v27 = vadd.f32 %v8624_v42, %v3284_v33  ;;  %v6632_v58 = vpop.f32.mrb[134].mxu0  ;;  %11251 = vst [vmem:[#allocation113_spill] sm:$0xff] %v9020_v29  ;;  %v9029_v6 = vpop.f32.mrb[134].mxu1 }
 0x1f5   : > { %v9026_v47 = vmax.f32 %v11252_v17, %v3293_v55  ;;  %v3296_v0 = vadd.f32 %v8624_v42, %v6632_v58  ;;  %v3287_v14 = vpop.f32.mrb[135].mxu0  ;;  %11253 = vst [vmem:[#allocation141_spill] sm:$0xff] %v9029_v6  ;;  %v9038_v29 = vpop.f32.mrb[135].mxu1  ;;  %v11258_v55 = vmax.f32 %v11256_v49, %v11257_v9  ;;  %v11259_v17 = vld [vmem:[#allocation54_spill] sm:$0xff]  ;;  %v11260_v6 = vld [vmem:[#allocation119_spill] sm:$0xff] }
 0x1f6   : > { %v9035_v63 = vmax.f32 %v11254_v3, %v3285_v27  ;;  %v3288_v33 = vadd.f32 %v8624_v42, %v3287_v14  ;;  %11255 = vst [vmem:[#allocation142_spill] sm:$0xff] %v9038_v29  ;;  %v11261_v13 = vmax.f32 %v11259_v17, %v11260_v6  ;;  %v7265_v6 = vld [vmem:[%s7322_s21 + $0x7c8] sm:$0xff]   ;;  %v11267_v17 = vmax.f32 %v8342_v60, %v8784_v2 }
 0x1f7   : > { %v9043_v58 = vmax.f32 %v11258_v55, %v3296_v0  ;;  %6738 = vmatmul.mubr.msk.bf16.gmra.mrb[240].mxu0 %vm1958_vm2, %v7260_v48  ;;  %6990 = vmatmul.mubr.msk.bf16.gmra.mrb[240].mxu1 %vm1958_vm2, %v7261_v39  ;;  %v7264_v0 = vld [vmem:[%s7322_s21 + $0x3d8] sm:$0xff]   ;;  %v11265_v39 = vmax.f32 %v8333_v11, %v8770_v51  ;;  %v7267_v55 = vld [vmem:[%s7322_s21 + $0x7d0] sm:$0xff]   ;;  %v11269_v11 = vmax.f32 %v8350_v4, %v8795_v57  ;;  %v7268_v4 = vld [vmem:[%s7322_s21 + $0x3e8] sm:$0xff]  }
 0x1f8   : > { %v9049_v44 = vmax.f32 %v11261_v13, %v3288_v33  ;;  %6741 = vmatprep.mubr.msk.bf16.mxu0 %vm1958_vm2, %v7262_v1  ;;  %6993 = vmatprep.mubr.msk.bf16.mxu1 %vm1958_vm2, %v7263_v15  ;;  %v7266_v33 = vld [vmem:[%s7322_s21 + $0x3e0] sm:$0xff]  }
 0x1fa   : > { %11262 = vst [vmem:[#allocation94_spill] sm:$0xff] %v9049_v44  ;;  %v6635_v59 = vpop.f32.mrb[136].mxu0  ;;  %v9056_v14 = vpop.f32.mrb[136].mxu1 }
 0x1fb   : > { %v3309_v38 = vadd.f32 %v8624_v42, %v6635_v59  ;;  %v3300_v27 = vpop.f32.mrb[137].mxu0  ;;  %11263 = vst [vmem:[#allocation118_spill] sm:$0xff] %v9056_v14  ;;  %v9060_v13 = vpop.f32.mrb[137].mxu1 }
 0x1fc   : > { %v3301_v48 = vadd.f32 %v8624_v42, %v3300_v27  ;;  %v6636_v3 = vpop.f32.mrb[138].mxu0  ;;  %11264 = vst [vmem:[#allocation54_spill] sm:$0xff] %v9060_v13  ;;  %v9069_v9 = vpop.f32.mrb[138].mxu1 }
 0x1fd   : > { %v9066_v1 = vmax.f32 %v11265_v39, %v3309_v38  ;;  %v3312_v15 = vadd.f32 %v8624_v42, %v6636_v3  ;;  %v3303_v49 = vpop.f32.mrb[139].mxu0  ;;  %11266 = vst [vmem:[#allocation119_spill] sm:$0xff] %v9069_v9  ;;  %v9078_v13 = vpop.f32.mrb[139].mxu1  ;;  %v11270_v38 = vmax.f32 %v8356_v18, %v8803_v19  ;;  %v7269_v18 = vld [vmem:[%s7322_s21 + $0x7d8] sm:$0xff]  }
 0x1fe   : > { %v9075_v59 = vmax.f32 %v11267_v17, %v3301_v48  ;;  %v3304_v27 = vadd.f32 %v8624_v42, %v3303_v49  ;;  %11268 = vst [vmem:[#allocation143_spill] sm:$0xff] %v9078_v13  ;;  %v11271_v49 = vld [vmem:[#allocation62_spill] sm:$0xff] }
 0x1ff   : > { %v9083_v51 = vmax.f32 %v11269_v11, %v3312_v15  ;;  %6742 = vmatmul.mubr.msk.bf16.gmra.mrb[244].mxu0 %vm1958_vm2, %v7264_v0  ;;  %6994 = vmatmul.mubr.msk.bf16.gmra.mrb[244].mxu1 %vm1958_vm2, %v7265_v6  ;;  %v11272_v6 = vld [vmem:[#allocation63_spill] sm:$0xff] }
 0x200   : > { %v9089_v3 = vmax.f32 %v11270_v38, %v3304_v27  ;;  %6745 = vmatprep.mubr.msk.bf16.mxu0 %vm1958_vm2, %v7266_v33  ;;  %6997 = vmatprep.mubr.msk.bf16.mxu1 %vm1958_vm2, %v7267_v55  ;;  %v11273_v17 = vmax.f32 %v11271_v49, %v11272_v6  ;;  %v11280_v6 = vld [vmem:[#allocation31_spill] sm:$0xff] }
 0x202   : > { %v6639_v60 = vpop.f32.mrb[140].mxu0  ;;  %v6891_v57 = vpop.f32.mrb[140].mxu1 }
 0x203   : > { %v3325_v2 = vadd.f32 %v8624_v42, %v6639_v60  ;;  %v3316_v48 = vpop.f32.mrb[141].mxu0  ;;  %v9098_v15 = vadd.f32 %v8624_v42, %v6891_v57  ;;  %v4324_v19 = vpop.f32.mrb[141].mxu1  ;;  %v11275_v60 = vld [vmem:[#allocation64_spill] sm:$0xff] }
 0x204   : > { %v3317_v39 = vadd.f32 %v8624_v42, %v3316_v48  ;;  %v6640_v0 = vpop.f32.mrb[142].mxu0  ;;  %v9108_v11 = vadd.f32 %v8624_v42, %v4324_v19  ;;  %v6892_v38 = vpop.f32.mrb[142].mxu1  ;;  %v11276_v48 = vld [vmem:[#allocation66_spill] sm:$0xff] }
 0x205   : > { %v9104_v33 = vmax.f32 %v11273_v17, %v3325_v2  ;;  %v3328_v55 = vadd.f32 %v8624_v42, %v6640_v0  ;;  %v3319_v27 = vpop.f32.mrb[143].mxu0  ;;  %v11277_v13 = vmax.f32 %v11275_v60, %v11276_v48  ;;  %v9119_v2 = vadd.f32 %v8624_v42, %v6892_v38  ;;  %v4327_v49 = vpop.f32.mrb[143].mxu1  ;;  %v11279_v0 = vld [vmem:[#allocation65_spill] sm:$0xff]  ;;  %v11284_v60 = vld [vmem:[#allocation32_spill] sm:$0xff] }
 0x206   : > { %v3320_v57 = vadd.f32 %v8624_v42, %v3319_v27  ;;  %v11281_v17 = vmax.f32 %v11279_v0, %v11280_v6  ;;  %v11283_v27 = vld [vmem:[#allocation30_spill] sm:$0xff] }
 0x207   : > { %11274 = vst [vmem:[#allocation62_spill] sm:$0xff] %v9104_v33  ;;  %v9113_v9 = vmax.f32 %v11277_v13, %v3317_v39  ;;  %6746 = vmatmul.mubr.msk.bf16.gmra.mrb[248].mxu0 %vm1958_vm2, %v7268_v4  ;;  %v9130_v39 = vadd.f32 %v8624_v42, %v4327_v49  ;;  %v11285_v48 = vmax.f32 %v11283_v27, %v11284_v60  ;;  %v11287_v60 = vld [vmem:[#allocation33_spill] sm:$0xff]  ;;  %v11292_v33 = vld [vmem:[#allocation96_spill] sm:$0xff] }
 0x208   : > { %v9124_v19 = vmax.f32 %v11281_v17, %v3328_v55  ;;  %6998 = vmatmul.mubr.msk.bf16.gmra.mrb[248].mxu1 %vm1958_vm2, %v7269_v18  ;;  %v11288_v18 = vld [vmem:[#allocation34_spill] sm:$0xff] }
 0x209   : > { %11278 = vst [vmem:[#allocation63_spill] sm:$0xff] %v9113_v9  ;;  %v9135_v14 = vmax.f32 %v11285_v48, %v3320_v57  ;;  %v11289_v48 = vmax.f32 %v11287_v60, %v11288_v18  ;;  %v11291_v9 = vld [vmem:[#allocation35_spill] sm:$0xff]  ;;  %v11296_v18 = vld [vmem:[#allocation97_spill] sm:$0xff] }
 0x20a   : > { %11282 = vst [vmem:[#allocation64_spill] sm:$0xff] %v9124_v19  ;;  %v6643_v4 = vpop.f32.mrb[144].mxu0  ;;  %v6895_v17 = vpop.f32.mrb[144].mxu1 }
 0x20b   : > { %11286 = vst [vmem:[#allocation66_spill] sm:$0xff] %v9135_v14  ;;  %v3341_v0 = vadd.f32 %v8624_v42, %v6643_v4  ;;  %v3332_v6 = vpop.f32.mrb[145].mxu0  ;;  %v9145_v27 = vadd.f32 %v8624_v42, %v6895_v17  ;;  %v4340_v57 = vpop.f32.mrb[145].mxu1 }
 0x20c   : > { %v3333_v49 = vadd.f32 %v8624_v42, %v3332_v6  ;;  %v6644_v13 = vpop.f32.mrb[146].mxu0  ;;  %v9154_v19 = vadd.f32 %v8624_v42, %v4340_v57  ;;  %v6896_v4 = vpop.f32.mrb[146].mxu1  ;;  %v11293_v6 = vmax.f32 %v11291_v9, %v11292_v33  ;;  %v11299_v33 = vld [vmem:[#allocation37_spill] sm:$0xff] }
 0x20d   : > { %v9150_v14 = vmax.f32 %v11289_v48, %v3341_v0  ;;  %v3344_v38 = vadd.f32 %v8624_v42, %v6644_v13  ;;  %v3335_v55 = vpop.f32.mrb[147].mxu0  ;;  %v9165_v0 = vadd.f32 %v8624_v42, %v6896_v4  ;;  %v4343_v60 = vpop.f32.mrb[147].mxu1  ;;  %v11295_v13 = vld [vmem:[#allocation36_spill] sm:$0xff] }
 0x20e   : > { %v9159_v29 = vmax.f32 %v11293_v6, %v3333_v49  ;;  %v3336_v17 = vadd.f32 %v8624_v42, %v3335_v55  ;;  %v11297_v48 = vmax.f32 %v11295_v13, %v11296_v18  ;;  %v9175_v9 = vadd.f32 %v8624_v42, %v4343_v60  ;;  %v11300_v55 = vld [vmem:[#allocation98_spill] sm:$0xff] }
 0x20f   : > { %11290 = vst [vmem:[#allocation65_spill] sm:$0xff] %v9150_v14  ;;  %v11301_v49 = vmax.f32 %v11299_v33, %v11300_v55  ;;  %v11304_v55 = vld [vmem:[#allocation99_spill] sm:$0xff] }
 0x210   : > { %11294 = vst [vmem:[#allocation31_spill] sm:$0xff] %v9159_v29  ;;  %v9170_v57 = vmax.f32 %v11297_v48, %v3344_v38 }
 0x211   : > { %v9180_v6 = vmax.f32 %v11301_v49, %v3336_v17  ;;  %v11303_v17 = vld [vmem:[#allocation38_spill] sm:$0xff] }
 0x212   : > { %11298 = vst [vmem:[#allocation30_spill] sm:$0xff] %v9170_v57  ;;  %v6647_v13 = vpop.f32.mrb[148].mxu0  ;;  %v6899_v48 = vpop.f32.mrb[148].mxu1  ;;  %v11305_v49 = vmax.f32 %v11303_v17, %v11304_v55  ;;  %v11312_v55 = vld [vmem:[#allocation101_spill] sm:$0xff] }
 0x213   : > { %11302 = vst [vmem:[#allocation32_spill] sm:$0xff] %v9180_v6  ;;  %v3357_v38 = vadd.f32 %v8624_v42, %v6647_v13  ;;  %v3348_v18 = vpop.f32.mrb[149].mxu0  ;;  %v9189_v57 = vadd.f32 %v8624_v42, %v6899_v48  ;;  %v4356_v33 = vpop.f32.mrb[149].mxu1 }
 0x214   : > { %v3349_v14 = vadd.f32 %v8624_v42, %v3348_v18  ;;  %v6648_v60 = vpop.f32.mrb[150].mxu0  ;;  %v9198_v29 = vadd.f32 %v8624_v42, %v4356_v33  ;;  %v6900_v13 = vpop.f32.mrb[150].mxu1  ;;  %v11309_v18 = vmax.f32 %v11307_v8, %v11308_v41  ;;  %v11315_v8 = vld [vmem:[#allocation41_spill] sm:$0xff] }
 0x215   : > { %v9194_v6 = vmax.f32 %v11305_v49, %v3357_v38  ;;  %v3360_v4 = vadd.f32 %v8624_v42, %v6648_v60  ;;  %v3351_v53 = vpop.f32.mrb[151].mxu0  ;;  %v9209_v38 = vadd.f32 %v8624_v42, %v6900_v13  ;;  %v4359_v17 = vpop.f32.mrb[151].mxu1  ;;  %v11311_v60 = vld [vmem:[#allocation40_spill] sm:$0xff] }
 0x216   : > { %v9203_v26 = vmax.f32 %v11309_v18, %v3349_v14  ;;  %v3352_v48 = vadd.f32 %v8624_v42, %v3351_v53  ;;  %v11313_v49 = vmax.f32 %v11311_v60, %v11312_v55  ;;  %v9219_v41 = vadd.f32 %v8624_v42, %v4359_v17  ;;  %v11316_v53 = vld [vmem:[#allocation102_spill] sm:$0xff] }
 0x217   : > { %11306 = vst [vmem:[#allocation33_spill] sm:$0xff] %v9194_v6  ;;  %v11317_v14 = vmax.f32 %v11315_v8, %v11316_v53  ;;  %v11320_v53 = vld [vmem:[#allocation103_spill] sm:$0xff] }
 0x218   : > { %11310 = vst [vmem:[#allocation34_spill] sm:$0xff] %v9203_v26  ;;  %v9214_v33 = vmax.f32 %v11313_v49, %v3360_v4 }
 0x219   : > { %v9224_v18 = vmax.f32 %v11317_v14, %v3352_v48  ;;  %v11319_v48 = vld [vmem:[#allocation42_spill] sm:$0xff] }
 0x21a   : > { %11314 = vst [vmem:[#allocation35_spill] sm:$0xff] %v9214_v33  ;;  %v6651_v60 = vpop.f32.mrb[152].mxu0  ;;  %v6903_v49 = vpop.f32.mrb[152].mxu1  ;;  %v11321_v14 = vmax.f32 %v11319_v48, %v11320_v53  ;;  %v11328_v53 = vld [vmem:[#allocation105_spill] sm:$0xff] }
 0x21b   : > { %11318 = vst [vmem:[#allocation96_spill] sm:$0xff] %v9224_v18  ;;  %v3373_v4 = vadd.f32 %v8624_v42, %v6651_v60  ;;  %v3364_v55 = vpop.f32.mrb[153].mxu0  ;;  %v9233_v33 = vadd.f32 %v8624_v42, %v6903_v49  ;;  %v4372_v8 = vpop.f32.mrb[153].mxu1 }
 0x21c   : > { %v3365_v6 = vadd.f32 %v8624_v42, %v3364_v55  ;;  %v6652_v17 = vpop.f32.mrb[154].mxu0  ;;  %v9242_v26 = vadd.f32 %v8624_v42, %v4372_v8  ;;  %v6904_v60 = vpop.f32.mrb[154].mxu1  ;;  %v11325_v55 = vmax.f32 %v11323_v40, %v11324_v61  ;;  %v11332_v40 = vld [vmem:[#allocation45_spill] sm:$0xff] }
 0x21d   : > { %v9238_v18 = vmax.f32 %v11321_v14, %v3373_v4  ;;  %v3376_v13 = vadd.f32 %v8624_v42, %v6652_v17  ;;  %v3367_v10 = vpop.f32.mrb[155].mxu0  ;;  %v9253_v4 = vadd.f32 %v8624_v42, %v6904_v60  ;;  %v4375_v48 = vpop.f32.mrb[155].mxu1  ;;  %v11327_v17 = vld [vmem:[#allocation44_spill] sm:$0xff] }
 0x21e   : > { %v9247_v32 = vmax.f32 %v11325_v55, %v3365_v6  ;;  %v3368_v49 = vadd.f32 %v8624_v42, %v3367_v10  ;;  %v11329_v14 = vmax.f32 %v11327_v17, %v11328_v53  ;;  %v9263_v61 = vadd.f32 %v8624_v42, %v4375_v48  ;;  %v11333_v10 = vld [vmem:[#allocation106_spill] sm:$0xff] }
 0x21f   : > { %11322 = vst [vmem:[#allocation36_spill] sm:$0xff] %v9238_v18  ;;  %v11334_v6 = vmax.f32 %v11332_v40, %v11333_v10  ;;  %v11337_v10 = vld [vmem:[#allocation108_spill] sm:$0xff] }
 0x220   : > { %11326 = vst [vmem:[#allocation97_spill] sm:$0xff] %v9247_v32  ;;  %v9258_v8 = vmax.f32 %v11329_v14, %v3376_v13  ;;  %11331 = vst [vmem:[#allocation98_spill] sm:$0xff] %v9263_v61 }
 0x221   : > { %v9268_v55 = vmax.f32 %v11334_v6, %v3368_v49  ;;  %v11336_v49 = vld [vmem:[#allocation46_spill] sm:$0xff] }
 0x222   : > { %11330 = vst [vmem:[#allocation37_spill] sm:$0xff] %v9258_v8  ;;  %v6655_v17 = vpop.f32.mrb[156].mxu0  ;;  %v6907_v14 = vpop.f32.mrb[156].mxu1  ;;  %v11338_v6 = vmax.f32 %v11336_v49, %v11337_v10  ;;  %v11346_v10 = vld [vmem:[#allocation110_spill] sm:$0xff] }
 0x223   : > { %11335 = vst [vmem:[#allocation38_spill] sm:$0xff] %v9268_v55  ;;  %v3389_v13 = vadd.f32 %v8624_v42, %v6655_v17  ;;  %v3380_v53 = vpop.f32.mrb[157].mxu0  ;;  %v9277_v8 = vadd.f32 %v8624_v42, %v6907_v14  ;;  %v4388_v40 = vpop.f32.mrb[157].mxu1 }
 0x224   : > { %v3381_v18 = vadd.f32 %v8624_v42, %v3380_v53  ;;  %v6656_v48 = vpop.f32.mrb[158].mxu0  ;;  %v9286_v32 = vadd.f32 %v8624_v42, %v4388_v40  ;;  %v6908_v17 = vpop.f32.mrb[158].mxu1  ;;  %v11342_v53 = vmax.f32 %v11340_v62, %v11341_v56  ;;  %v11350_v62 = vld [vmem:[#allocation49_spill] sm:$0xff] }
 0x225   : > { %v9282_v55 = vmax.f32 %v11338_v6, %v3389_v13  ;;  %v3392_v60 = vadd.f32 %v8624_v42, %v6656_v48  ;;  %v3383_v28 = vpop.f32.mrb[159].mxu0  ;;  %v9297_v13 = vadd.f32 %v8624_v42, %v6908_v17  ;;  %v4391_v49 = vpop.f32.mrb[159].mxu1  ;;  %v11345_v48 = vld [vmem:[#allocation48_spill] sm:$0xff] }
 0x226   : > { %v9291_v24 = vmax.f32 %v11342_v53, %v3381_v18  ;;  %v3384_v14 = vadd.f32 %v8624_v42, %v3383_v28  ;;  %v11347_v6 = vmax.f32 %v11345_v48, %v11346_v10  ;;  %v9307_v56 = vadd.f32 %v8624_v42, %v4391_v49  ;;  %v11351_v28 = vld [vmem:[#allocation111_spill] sm:$0xff] }
 0x227   : > { %11339 = vst [vmem:[#allocation99_spill] sm:$0xff] %v9282_v55  ;;  %11344 = vst [vmem:[#allocation100_spill] sm:$0xff] %v9297_v13  ;;  %v11352_v18 = vmax.f32 %v11350_v62, %v11351_v28  ;;  %v11355_v28 = vld [vmem:[#allocation114_spill] sm:$0xff] }
 0x228   : > { %11343 = vst [vmem:[#allocation39_spill] sm:$0xff] %v9291_v24  ;;  %v9302_v40 = vmax.f32 %v11347_v6, %v3392_v60  ;;  %11349 = vst [vmem:[#allocation101_spill] sm:$0xff] %v9307_v56  ;;  %v11358_v56 = vld [vmem:[#allocation51_spill] sm:$0xff] }
 0x229   : > { %v9312_v53 = vmax.f32 %v11352_v18, %v3384_v14  ;;  %v11354_v14 = vld [vmem:[#allocation50_spill] sm:$0xff] }
 0x22a   : > { %11348 = vst [vmem:[#allocation40_spill] sm:$0xff] %v9302_v40  ;;  %v6659_v48 = vpop.f32.mrb[160].mxu0  ;;  %v6911_v6 = vpop.f32.mrb[160].mxu1  ;;  %v11356_v18 = vmax.f32 %v11354_v14, %v11355_v28  ;;  %v11364_v28 = vld [vmem:[#allocation116_spill] sm:$0xff] }
 0x22b   : > { %11353 = vst [vmem:[#allocation41_spill] sm:$0xff] %v9312_v53  ;;  %v3405_v60 = vadd.f32 %v8624_v42, %v6659_v48  ;;  %v3396_v10 = vpop.f32.mrb[161].mxu0  ;;  %v9321_v40 = vadd.f32 %v8624_v42, %v6911_v6  ;;  %v4404_v62 = vpop.f32.mrb[161].mxu1 }
 0x22c   : > { %v3397_v55 = vadd.f32 %v8624_v42, %v3396_v10  ;;  %v6660_v49 = vpop.f32.mrb[162].mxu0  ;;  %v9330_v24 = vadd.f32 %v8624_v42, %v4404_v62  ;;  %v6912_v48 = vpop.f32.mrb[162].mxu1  ;;  %v11360_v10 = vmax.f32 %v11358_v56, %v11359_v25 }
 0x22d   : > { %v9326_v53 = vmax.f32 %v11356_v18, %v3405_v60  ;;  %v3408_v17 = vadd.f32 %v8624_v42, %v6660_v49  ;;  %v3399_v61 = vpop.f32.mrb[163].mxu0  ;;  %v9341_v60 = vadd.f32 %v8624_v42, %v6912_v48  ;;  %v4407_v14 = vpop.f32.mrb[163].mxu1  ;;  %v11363_v49 = vld [vmem:[#allocation52_spill] sm:$0xff] }
 0x22e   : > { %v9335_v13 = vmax.f32 %v11360_v10, %v3397_v55  ;;  %v3400_v6 = vadd.f32 %v8624_v42, %v3399_v61  ;;  %v11365_v18 = vmax.f32 %v11363_v49, %v11364_v28  ;;  %v9351_v25 = vadd.f32 %v8624_v42, %v4407_v14  ;;  %v11368_v55 = vld [vmem:[#allocation53_spill] sm:$0xff] }
 0x22f   : > { %11357 = vst [vmem:[#allocation102_spill] sm:$0xff] %v9326_v53  ;;  %11362 = vst [vmem:[#allocation103_spill] sm:$0xff] %v9341_v60  ;;  %v11369_v61 = vld [vmem:[#allocation117_spill] sm:$0xff] }
 0x230   : > { %11361 = vst [vmem:[#allocation42_spill] sm:$0xff] %v9335_v13  ;;  %v9346_v62 = vmax.f32 %v11365_v18, %v3408_v17  ;;  %11367 = vst [vmem:[#allocation104_spill] sm:$0xff] %v9351_v25  ;;  %v11370_v56 = vmax.f32 %v11368_v55, %v11369_v61  ;;  %v11375_v13 = vld [vmem:[#allocation57_spill] sm:$0xff]  ;;  %v11376_v25 = vld [vmem:[#allocation120_spill] sm:$0xff] }
 0x232   : > { %11366 = vst [vmem:[#allocation43_spill] sm:$0xff] %v9346_v62  ;;  %v9356_v10 = vmax.f32 %v11370_v56, %v3400_v6  ;;  %v6663_v49 = vpop.f32.mrb[164].mxu0  ;;  %v6915_v18 = vpop.f32.mrb[164].mxu1  ;;  %v11372_v6 = vld [vmem:[#allocation56_spill] sm:$0xff] }
 0x233   : > { %v3421_v17 = vadd.f32 %v8624_v42, %v6663_v49  ;;  %v3412_v28 = vpop.f32.mrb[165].mxu0  ;;  %v9365_v62 = vadd.f32 %v8624_v42, %v6915_v18  ;;  %v4420_v55 = vpop.f32.mrb[165].mxu1  ;;  %v11373_v61 = vmax.f32 %v8752_v36, %v11372_v6  ;;  %v11380_v6 = vld [vmem:[#allocation121_spill] sm:$0xff] }
 0x234   : > { %11371 = vst [vmem:[#allocation44_spill] sm:$0xff] %v9356_v10  ;;  %v3413_v53 = vadd.f32 %v8624_v42, %v3412_v28  ;;  %v6664_v14 = vpop.f32.mrb[166].mxu0  ;;  %v9374_v10 = vadd.f32 %v8624_v42, %v4420_v55  ;;  %v6916_v49 = vpop.f32.mrb[166].mxu1  ;;  %v11377_v28 = vmax.f32 %v11375_v13, %v11376_v25 }
 0x235   : > { %v9370_v56 = vmax.f32 %v11373_v61, %v3421_v17  ;;  %v3424_v48 = vadd.f32 %v8624_v42, %v6664_v14  ;;  %v3415_v45 = vpop.f32.mrb[167].mxu0  ;;  %v9385_v36 = vadd.f32 %v8624_v42, %v6916_v49  ;;  %v4423_v17 = vpop.f32.mrb[167].mxu1  ;;  %v11379_v14 = vld [vmem:[#allocation58_spill] sm:$0xff] }
 0x236   : > { %v9379_v44 = vmax.f32 %v11377_v28, %v3413_v53  ;;  %v3416_v18 = vadd.f32 %v8624_v42, %v3415_v45  ;;  %v11381_v61 = vmax.f32 %v11379_v14, %v11380_v6  ;;  %v9395_v13 = vadd.f32 %v8624_v42, %v4423_v17  ;;  %v11383_v53 = vld [vmem:[#allocation61_spill] sm:$0xff]  ;;  %v11384_v45 = vld [vmem:[#allocation122_spill] sm:$0xff] }
 0x237   : > { %11374 = vst [vmem:[#allocation105_spill] sm:$0xff] %v9370_v56  ;;  %v11385_v25 = vmax.f32 %v11383_v53, %v11384_v45 }
 0x238   : > { %11378 = vst [vmem:[#allocation45_spill] sm:$0xff] %v9379_v44  ;;  %v9390_v55 = vmax.f32 %v11381_v61, %v3424_v48  ;;  %v11389_v44 = vmax.f32 %v8843_v35, %v9119_v2  ;;  %v11391_v35 = vmax.f32 %v8866_v7, %v9145_v27  ;;  %v11397_v27 = vmax.f32 %v8889_v50, %v9175_v9 }
 0x239   : > { %v9400_v28 = vmax.f32 %v11385_v25, %v3416_v18  ;;  %v11387_v18 = vmax.f32 %v8826_v20, %v9098_v15  ;;  %v11390_v15 = vmax.f32 %v8849_v5, %v9130_v39 }
 0x23a   : > { %11382 = vst [vmem:[#allocation106_spill] sm:$0xff] %v9390_v55  ;;  %v6667_v14 = vpop.f32.mrb[168].mxu0  ;;  %v9407_v61 = vpop.f32.mrb[168].mxu1 }
 0x23b   : > { %11386 = vst [vmem:[#allocation46_spill] sm:$0xff] %v9400_v28  ;;  %v3437_v48 = vadd.f32 %v8624_v42, %v6667_v14  ;;  %v3428_v6 = vpop.f32.mrb[169].mxu0  ;;  %v9410_v55 = vpop.f32.mrb[169].mxu1  ;;  %v11388_v14 = vmax.f32 %v8835_v16, %v9108_v11 }
 0x23c   : > { %v3429_v17 = vadd.f32 %v8624_v42, %v3428_v6  ;;  %v6668_v56 = vpop.f32.mrb[170].mxu0  ;;  %v9418_v60 = vpop.f32.mrb[170].mxu1 }
 0x23d   : > { %v9415_v53 = vmax.f32 %v11387_v18, %v3437_v48  ;;  %v3440_v45 = vadd.f32 %v8624_v42, %v6668_v56  ;;  %v3431_v25 = vpop.f32.mrb[171].mxu0  ;;  %v9426_v28 = vpop.f32.mrb[171].mxu1 }
 0x23e   : > { %v9423_v49 = vmax.f32 %v11388_v14, %v3429_v17  ;;  %v3432_v6 = vadd.f32 %v8624_v42, %v3431_v25 }
 0x23f   : > { %v9431_v20 = vmax.f32 %v11389_v44, %v3440_v45  ;;  %v11393_v45 = vmax.f32 %v8875_v37, %v9154_v19 }
 0x240   : > { %v9436_v56 = vmax.f32 %v11390_v15, %v3432_v6 }
 0x242   : > { %v6671_v48 = vpop.f32.mrb[172].mxu0  ;;  %v9439_v11 = vpop.f32.mrb[172].mxu1 }
 0x243   : > { %v3453_v18 = vadd.f32 %v8624_v42, %v6671_v48  ;;  %v3444_v16 = vpop.f32.mrb[173].mxu0  ;;  %v9442_v14 = vpop.f32.mrb[173].mxu1 }
 0x244   : > { %v3445_v17 = vadd.f32 %v8624_v42, %v3444_v16  ;;  %v6672_v25 = vpop.f32.mrb[174].mxu0  ;;  %v9450_v39 = vpop.f32.mrb[174].mxu1  ;;  %v11395_v16 = vmax.f32 %v8883_v43, %v9165_v0  ;;  %v11399_v43 = vmax.f32 %v8906_v30, %v9189_v57  ;;  %v11405_v57 = vmax.f32 %v8929_v46, %v9219_v41  ;;  %v11411_v46 = vld [vmem:[#allocation6_spill] sm:$0xff] }
 0x245   : > { %v9447_v44 = vmax.f32 %v11391_v35, %v3453_v18  ;;  %v3456_v5 = vadd.f32 %v8624_v42, %v6672_v25  ;;  %v3447_v2 = vpop.f32.mrb[175].mxu0  ;;  %v9458_v48 = vpop.f32.mrb[175].mxu1  ;;  %v9520_v41 = vadd.f32 %v8624_v42, %v11411_v46 }
 0x246   : > { %v9455_v6 = vmax.f32 %v11393_v45, %v3445_v17  ;;  %v3448_v15 = vadd.f32 %v8624_v42, %v3447_v2 }
 0x247   : > { %11392 = vst [vmem:[#allocation108_spill] sm:$0xff] %v9447_v44  ;;  %v9463_v7 = vmax.f32 %v11395_v16, %v3456_v5  ;;  %11412 = vst [vmem:[#allocation114_spill] sm:$0xff] %v9520_v41  ;;  %v11540_v41 = vld [vmem:[#allocation127_spill] sm:$0xff] }
 0x248   : > { %11394 = vst [vmem:[#allocation47_spill] sm:$0xff] %v9455_v6  ;;  %v9468_v18 = vmax.f32 %v11397_v27, %v3448_v15  ;;  %v11401_v15 = vmax.f32 %v8915_v34, %v9198_v29  ;;  %v11408_v34 = vld [vmem:[#allocation3_spill] sm:$0xff] }
 0x249   : > { %11396 = vst [vmem:[#allocation109_spill] sm:$0xff] %v9463_v7  ;;  %v9508_v29 = vadd.f32 %v8624_v42, %v11408_v34 }
 0x24a   : > { %11398 = vst [vmem:[#allocation48_spill] sm:$0xff] %v9468_v18  ;;  %v6675_v25 = vpop.f32.mrb[176].mxu0  ;;  %v9471_v19 = vpop.f32.mrb[176].mxu1 }
 0x24b   : > { %v3469_v35 = vadd.f32 %v8624_v42, %v6675_v25  ;;  %v3460_v37 = vpop.f32.mrb[177].mxu0  ;;  %v9474_v45 = vpop.f32.mrb[177].mxu1 }
 0x24c   : > { %v3461_v17 = vadd.f32 %v8624_v42, %v3460_v37  ;;  %v6676_v2 = vpop.f32.mrb[178].mxu0  ;;  %v9482_v5 = vpop.f32.mrb[178].mxu1  ;;  %v11403_v37 = vmax.f32 %v8923_v52, %v9209_v38  ;;  %v11410_v52 = vld [vmem:[#allocation5_spill] sm:$0xff] }
 0x24d   : > { %v9479_v0 = vmax.f32 %v11399_v43, %v3469_v35  ;;  %v3472_v50 = vadd.f32 %v8624_v42, %v6676_v2  ;;  %v3463_v9 = vpop.f32.mrb[179].mxu0  ;;  %v9490_v25 = vpop.f32.mrb[179].mxu1  ;;  %v11407_v2 = vld [vmem:[#allocation2_spill] sm:$0xff]  ;;  %v9516_v38 = vadd.f32 %v8624_v42, %v11410_v52  ;;  %v11417_v52 = vld [vmem:[#allocation9_spill] sm:$0xff] }
 0x24e   : > { %v9487_v16 = vmax.f32 %v11401_v15, %v3461_v17  ;;  %v3464_v27 = vadd.f32 %v8624_v42, %v3463_v9  ;;  %v9504_v43 = vadd.f32 %v8624_v42, %v11407_v2  ;;  %v11409_v17 = vld [vmem:[#allocation4_spill] sm:$0xff]  ;;  %v11413_v15 = vld [vmem:[#allocation7_spill] sm:$0xff] }
 0x24f   : > { %11400 = vst [vmem:[#allocation110_spill] sm:$0xff] %v9479_v0  ;;  %v9495_v30 = vmax.f32 %v11403_v37, %v3472_v50  ;;  %v9512_v9 = vadd.f32 %v8624_v42, %v11409_v17  ;;  %v11415_v37 = vld [vmem:[#allocation8_spill] sm:$0xff] }
 0x250   : > { %11402 = vst [vmem:[#allocation49_spill] sm:$0xff] %v9487_v16  ;;  %v9500_v35 = vmax.f32 %v11405_v57, %v3464_v27  ;;  %v9524_v27 = vadd.f32 %v8624_v42, %v11413_v15  ;;  %v9528_v57 = vadd.f32 %v8624_v42, %v11415_v37  ;;  %v11421_v16 = vld [vmem:[#allocation11_spill] sm:$0xff] }
 0x251   : > { %11404 = vst [vmem:[#allocation111_spill] sm:$0xff] %v9495_v30  ;;  %v11419_v30 = vld [vmem:[#allocation10_spill] sm:$0xff]  ;;  %v9543_v15 = vadd.f32 %v8624_v42, %v11421_v16  ;;  %v11427_v16 = vmax.f32 %v8946_v31, %v9233_v33 }
 0x252   : > { %11406 = vst [vmem:[#allocation50_spill] sm:$0xff] %v9500_v35  ;;  %v6679_v50 = vpop.f32.mrb[180].mxu0  ;;  %11414 = vst [vmem:[#allocation51_spill] sm:$0xff] %v9524_v27  ;;  %v9531_v17 = vpop.f32.mrb[180].mxu1  ;;  %v9535_v35 = vadd.f32 %v8624_v42, %v11417_v52  ;;  %v9539_v46 = vadd.f32 %v8624_v42, %v11419_v30  ;;  %v9555_v52 = vld [vmem:[%s10827_s2] ss:$0 sm:$0xff] }
 0x253   : > { %11416 = vst [vmem:[#allocation115_spill] sm:$0xff] %v9528_v57  ;;  %v3485_v2 = vadd.f32 %v8624_v42, %v6679_v50  ;;  %v3476_v34 = vpop.f32.mrb[181].mxu0  ;;  %11422 = vst [vmem:[#allocation53_spill] sm:$0xff] %v9543_v15  ;;  %v9546_v18 = vpop.f32.mrb[181].mxu1  ;;  %v11423_v50 = vld [vmem:[#allocation12_spill] sm:$0xff]  ;;  %v11425_v30 = vld [vmem:[#allocation13_spill] sm:$0xff]  ;;  %v9827_v44 = vadd.f32 %v9555_v52, %v11540_v41 }
 0x254   : > { %11418 = vst [vmem:[#allocation52_spill] sm:$0xff] %v9535_v35  ;;  %11420 = vst [vmem:[#allocation116_spill] sm:$0xff] %v9539_v46  ;;  %v3477_v37 = vadd.f32 %v8624_v42, %v3476_v34  ;;  %v6680_v0 = vpop.f32.mrb[182].mxu0  ;;  %v9550_v57 = vadd.f32 %v8624_v42, %v11423_v50  ;;  %v9559_v46 = vadd.f32 %v9555_v52, %v11425_v30  ;;  %v9567_v7 = vpop.f32.mrb[182].mxu1  ;;  %v11429_v42 = vld [vmem:[#allocation14_spill] sm:$0xff] }
 0x255   : > { %v9564_v34 = vmax.f32 %v11427_v16, %v3485_v2  ;;  %v3488_v15 = vadd.f32 %v9555_v52, %v6680_v0  ;;  %v3479_v35 = vpop.f32.mrb[183].mxu0  ;;  %v9571_v50 = vadd.f32 %v9555_v52, %v11429_v42  ;;  %v11433_v30 = vmax.f32 %v8955_v22, %v9242_v26  ;;  %v9583_v33 = vpop.f32.mrb[183].mxu1  ;;  %v11435_v0 = vld [vmem:[#allocation16_spill] sm:$0xff]  ;;  %v11437_v16 = vld [vmem:[#allocation17_spill] sm:$0xff] }
 0x256   : > { %11424 = vst [vmem:[#allocation117_spill] sm:$0xff] %v9550_v57  ;;  %11426 = vst [vmem:[#allocation56_spill] sm:$0xff] %v9559_v46  ;;  %v11431_v57 = vld [vmem:[#allocation15_spill] sm:$0xff]  ;;  %v3480_v31 = vadd.f32 %v9555_v52, %v3479_v35  ;;  %v9587_v2 = vadd.f32 %v9555_v52, %v11435_v0  ;;  %v9591_v42 = vadd.f32 %v9555_v52, %v11437_v16 }
 0x257   : > { %11428 = vst [vmem:[#allocation57_spill] sm:$0xff] %v9564_v34  ;;  %11430 = vst [vmem:[#allocation120_spill] sm:$0xff] %v9571_v50  ;;  %v9575_v27 = vadd.f32 %v9555_v52, %v11431_v57  ;;  %v9580_v46 = vmax.f32 %v11433_v30, %v3477_v37  ;;  %v11439_v50 = vld [vmem:[#allocation18_spill] sm:$0xff]  ;;  %v11441_v26 = vmax.f32 %v8963_v12, %v9253_v4  ;;  %v11443_v35 = vld [vmem:[#allocation19_spill] sm:$0xff] }
 0x258   : > { %11436 = vst [vmem:[#allocation61_spill] sm:$0xff] %v9587_v2  ;;  %11438 = vst [vmem:[#allocation122_spill] sm:$0xff] %v9591_v42  ;;  %v9595_v57 = vadd.f32 %v9555_v52, %v11439_v50  ;;  %v9604_v37 = vadd.f32 %v9555_v52, %v11443_v35  ;;  %v11445_v30 = vld [vmem:[#allocation20_spill] sm:$0xff]  ;;  %v11447_v2 = vld [vmem:[#allocation21_spill] sm:$0xff] }
 0x259   : > { %11432 = vst [vmem:[#allocation58_spill] sm:$0xff] %v9575_v27  ;;  %11434 = vst [vmem:[#allocation121_spill] sm:$0xff] %v9580_v46  ;;  %v9600_v22 = vmax.f32 %v11441_v26, %v3488_v15  ;;  %v9608_v0 = vadd.f32 %v9555_v52, %v11445_v30  ;;  %v9612_v16 = vadd.f32 %v9555_v52, %v11447_v2  ;;  %v11449_v50 = vld [vmem:[#allocation98_spill] sm:$0xff]  ;;  %v11454_v15 = vld [vmem:[#allocation23_spill] sm:$0xff] }
 0x25a   : > { %11440 = vst [vmem:[#allocation2_spill] sm:$0xff] %v9595_v57  ;;  %11444 = vst [vmem:[#allocation4_spill] sm:$0xff] %v9604_v37  ;;  %v11450_v57 = vmax.f32 %v8969_v54, %v11449_v50  ;;  %v11452_v12 = vld [vmem:[#allocation22_spill] sm:$0xff]  ;;  %v9625_v26 = vadd.f32 %v9555_v52, %v11454_v15  ;;  %v11456_v35 = vld [vmem:[#allocation24_spill] sm:$0xff] }
 0x25b   : > { %11442 = vst [vmem:[#allocation3_spill] sm:$0xff] %v9600_v22  ;;  %11446 = vst [vmem:[#allocation5_spill] sm:$0xff] %v9608_v0  ;;  %v9621_v4 = vadd.f32 %v9555_v52, %v11452_v12  ;;  %v9629_v30 = vadd.f32 %v9555_v52, %v11456_v35  ;;  %v11458_v0 = vld [vmem:[#allocation25_spill] sm:$0xff]  ;;  %v11464_v50 = vld [vmem:[#allocation28_spill] sm:$0xff] }
 0x25c   : > { %11448 = vst [vmem:[#allocation6_spill] sm:$0xff] %v9612_v16  ;;  %v9617_v42 = vmax.f32 %v11450_v57, %v3480_v31  ;;  %11455 = vst [vmem:[#allocation9_spill] sm:$0xff] %v9625_v26  ;;  %v9633_v2 = vadd.f32 %v9555_v52, %v11458_v0  ;;  %v11460_v16 = vld [vmem:[#allocation26_spill] sm:$0xff]  ;;  %v11462_v31 = vld [vmem:[#allocation27_spill] sm:$0xff]  ;;  %v9645_v12 = vadd.f32 %v9555_v52, %v11464_v50 }
 0x25d   : > { %11453 = vst [vmem:[#allocation8_spill] sm:$0xff] %v9621_v4  ;;  %11457 = vst [vmem:[#allocation10_spill] sm:$0xff] %v9629_v30  ;;  %v9637_v54 = vadd.f32 %v9555_v52, %v11460_v16  ;;  %v9641_v57 = vadd.f32 %v9555_v52, %v11462_v31  ;;  %v11466_v15 = vld [vmem:[#allocation29_spill] sm:$0xff]  ;;  %v6683_v30 = vpop.f32.mrb[184].mxu0  ;;  %v11468_v26 = vld [vmem:[#allocation67_spill] sm:$0xff] }
 0x25e   : > { %11451 = vst [vmem:[#allocation7_spill] sm:$0xff] %v9617_v42  ;;  %11459 = vst [vmem:[#allocation11_spill] sm:$0xff] %v9633_v2  ;;  %v9649_v35 = vadd.f32 %v9555_v52, %v11466_v15  ;;  %v9653_v0 = vadd.f32 %v9555_v52, %v11468_v26  ;;  %v11469_v2 = vld [vmem:[#allocation68_spill] sm:$0xff]  ;;  %v3501_v50 = vadd.f32 %v9555_v52, %v6683_v30  ;;  %v11471_v15 = vld [vmem:[#allocation70_spill] sm:$0xff] }
 0x25f   : > { %11461 = vst [vmem:[#allocation12_spill] sm:$0xff] %v9637_v54  ;;  %11463 = vst [vmem:[#allocation13_spill] sm:$0xff] %v9641_v57  ;;  %v9657_v16 = vadd.f32 %v9555_v52, %v11469_v2  ;;  %v11470_v54 = vld [vmem:[#allocation69_spill] sm:$0xff]  ;;  %v9664_v57 = vpop.f32.mrb[184].mxu1  ;;  %v11472_v4 = vld [vmem:[#allocation71_spill] sm:$0xff] }
 0x260   : > { %11465 = vst [vmem:[#allocation14_spill] sm:$0xff] %v9645_v12  ;;  %11467 = vst [vmem:[#allocation15_spill] sm:$0xff] %v9649_v35  ;;  %v9661_v31 = vadd.f32 %v9555_v52, %v11470_v54  ;;  %v3492_v12 = vpop.f32.mrb[185].mxu0  ;;  %v9668_v35 = vadd.f32 %v9555_v52, %v11471_v15  ;;  %v9672_v26 = vadd.f32 %v9555_v52, %v11472_v4  ;;  %v11474_v37 = vld [vmem:[#allocation72_spill] sm:$0xff]  ;;  %v9679_v22 = vpop.f32.mrb[185].mxu1  ;;  %v11476_v30 = vld [vmem:[#allocation73_spill] sm:$0xff] }
 0x261   : > { %v9676_v2 = vadd.f32 %v9555_v52, %v11474_v37  ;;  %v3493_v54 = vadd.f32 %v9555_v52, %v3492_v12  ;;  %v6684_v42 = vpop.f32.mrb[186].mxu0  ;;  %v9683_v27 = vadd.f32 %v9555_v52, %v11476_v30  ;;  %v11478_v46 = vld [vmem:[#allocation74_spill] sm:$0xff]  ;;  %v11480_v4 = vmax.f32 %v8986_v21, %v9277_v8  ;;  %v9695_v12 = vpop.f32.mrb[186].mxu1  ;;  %v11484_v30 = vld [vmem:[#allocation76_spill] sm:$0xff] }
 0x262   : > { %11473 = vst [vmem:[#allocation16_spill] sm:$0xff] %v9672_v26  ;;  %v9687_v15 = vadd.f32 %v9555_v52, %v11478_v46  ;;  %v3504_v37 = vadd.f32 %v9555_v52, %v6684_v42  ;;  %v11482_v26 = vld [vmem:[#allocation75_spill] sm:$0xff]  ;;  %v11486_v46 = vmax.f32 %v8995_v23, %v9286_v32  ;;  %v9711_v8 = vpop.f32.mrb[187].mxu1  ;;  %v11488_v42 = vld [vmem:[#allocation77_spill] sm:$0xff]  ;;  %v11495_v32 = vld [vmem:[#allocation100_spill] sm:$0xff] }
 0x263   : > { %11475 = vst [vmem:[#allocation17_spill] sm:$0xff] %v9676_v2  ;;  %11477 = vst [vmem:[#allocation18_spill] sm:$0xff] %v9683_v27  ;;  %v9692_v34 = vmax.f32 %v11480_v4, %v3501_v50  ;;  %v3495_v2 = vpop.f32.mrb[187].mxu0  ;;  %v9699_v6 = vadd.f32 %v9555_v52, %v11482_v26  ;;  %v9703_v27 = vadd.f32 %v9555_v52, %v11484_v30  ;;  %v11490_v4 = vld [vmem:[#allocation78_spill] sm:$0xff] }
 0x264   : > { %11479 = vst [vmem:[#allocation19_spill] sm:$0xff] %v9687_v15  ;;  %v9708_v15 = vmax.f32 %v11486_v46, %v3493_v54  ;;  %v3496_v21 = vadd.f32 %v9555_v52, %v3495_v2  ;;  %v9715_v50 = vadd.f32 %v9555_v52, %v11488_v42  ;;  %v9719_v26 = vadd.f32 %v9555_v52, %v11490_v4  ;;  %v11498_v2 = vld [vmem:[#allocation80_spill] sm:$0xff] }
 0x265   : > { %11481 = vst [vmem:[#allocation20_spill] sm:$0xff] %v9692_v34  ;;  %11483 = vst [vmem:[#allocation21_spill] sm:$0xff] %v9699_v6  ;;  %v11492_v34 = vld [vmem:[#allocation79_spill] sm:$0xff]  ;;  %v9732_v46 = vadd.f32 %v9555_v52, %v11498_v2  ;;  %v11512_v2 = vld [vmem:[#allocation86_spill] sm:$0xff] }
 0x266   : > { %11485 = vst [vmem:[#allocation98_spill] sm:$0xff] %v9703_v27  ;;  %11487 = vst [vmem:[#allocation22_spill] sm:$0xff] %v9708_v15  ;;  %v9723_v30 = vadd.f32 %v9555_v52, %v11492_v34  ;;  %v11494_v27 = vld [vmem:[#allocation88_spill] sm:$0xff]  ;;  %v11500_v15 = vld [vmem:[#allocation81_spill] sm:$0xff] }
 0x267   : > { %11489 = vst [vmem:[#allocation23_spill] sm:$0xff] %v9715_v50  ;;  %11491 = vst [vmem:[#allocation24_spill] sm:$0xff] %v9719_v26  ;;  %v11496_v23 = vmax.f32 %v11494_v27, %v11495_v32  ;;  %v9736_v42 = vadd.f32 %v9555_v52, %v11500_v15  ;;  %v11502_v50 = vld [vmem:[#allocation82_spill] sm:$0xff]  ;;  %v11504_v26 = vld [vmem:[#allocation112_spill] sm:$0xff]  ;;  %v9757_v15 = vadd.f32 %v9555_v52, %v11512_v2 }
 0x268   : > { %11493 = vst [vmem:[#allocation25_spill] sm:$0xff] %v9723_v30  ;;  %11499 = vst [vmem:[#allocation27_spill] sm:$0xff] %v9732_v46  ;;  %v9740_v4 = vadd.f32 %v9555_v52, %v11502_v50  ;;  %v11505_v34 = vld [vmem:[#allocation101_spill] sm:$0xff]  ;;  %v11508_v27 = vld [vmem:[#allocation84_spill] sm:$0xff] }
 0x269   : > { %v9728_v54 = vmax.f32 %v11496_v23, %v3504_v37  ;;  %11501 = vst [vmem:[#allocation28_spill] sm:$0xff] %v9736_v42  ;;  %v11506_v30 = vmax.f32 %v11504_v26, %v11505_v34  ;;  %v9749_v37 = vadd.f32 %v9555_v52, %v11508_v27  ;;  %v11510_v32 = vld [vmem:[#allocation85_spill] sm:$0xff]  ;;  %11513 = vst [vmem:[#allocation70_spill] sm:$0xff] %v9757_v15  ;;  %v11518_v26 = vld [vmem:[#allocation91_spill] sm:$0xff]  ;;  %v6687_v15 = vpop.f32.mrb[188].mxu0 }
 0x26a   : > { %11503 = vst [vmem:[#allocation29_spill] sm:$0xff] %v9740_v4  ;;  %v9753_v23 = vadd.f32 %v9555_v52, %v11510_v32  ;;  %v11516_v4 = vld [vmem:[#allocation90_spill] sm:$0xff]  ;;  %v11520_v34 = vld [vmem:[#allocation92_spill] sm:$0xff]  ;;  %v11522_v32 = vld [vmem:[#allocation93_spill] sm:$0xff] }
 0x26b   : > { %11497 = vst [vmem:[#allocation26_spill] sm:$0xff] %v9728_v54  ;;  %v9745_v6 = vmax.f32 %v11506_v30, %v3496_v21  ;;  %11509 = vst [vmem:[#allocation68_spill] sm:$0xff] %v9749_v37  ;;  %v11514_v54 = vld [vmem:[#allocation87_spill] sm:$0xff]  ;;  %v9765_v21 = vadd.f32 %v9555_v52, %v11516_v4  ;;  %v9769_v30 = vadd.f32 %v9555_v52, %v11518_v26  ;;  %v11536_v42 = vld [vmem:[#allocation126_spill] sm:$0xff] }
 0x26c   : > { %11511 = vst [vmem:[#allocation69_spill] sm:$0xff] %v9753_v23  ;;  %v9761_v50 = vadd.f32 %v9555_v52, %v11514_v54  ;;  %v9773_v27 = vadd.f32 %v9555_v52, %v11520_v34  ;;  %v9777_v2 = vadd.f32 %v9555_v52, %v11522_v32  ;;  %v11524_v23 = vld [vmem:[#allocation55_spill] sm:$0xff]  ;;  %v3517_v34 = vadd.f32 %v9555_v52, %v6687_v15  ;;  %v11530_v32 = vld [vmem:[#allocation60_spill] sm:$0xff]  ;;  %v11534_v15 = vld [vmem:[#allocation125_spill] sm:$0xff] }
 0x26d   : > { %11507 = vst [vmem:[#allocation67_spill] sm:$0xff] %v9745_v6  ;;  %11517 = vst [vmem:[#allocation72_spill] sm:$0xff] %v9765_v21  ;;  %v9781_v54 = vadd.f32 %v9555_v52, %v11524_v23  ;;  %v11528_v21 = vld [vmem:[#allocation59_spill] sm:$0xff]  ;;  %v9811_v37 = vadd.f32 %v9555_v52, %v11534_v15  ;;  %v11541_v15 = vld [vmem:[#allocation128_spill] sm:$0xff] }
 0x26e   : > { %11515 = vst [vmem:[#allocation71_spill] sm:$0xff] %v9761_v50  ;;  %11519 = vst [vmem:[#allocation73_spill] sm:$0xff] %v9769_v30  ;;  %v11526_v50 = vld [vmem:[#allocation95_spill] sm:$0xff]  ;;  %v9789_v26 = vadd.f32 %v9555_v52, %v11528_v21  ;;  %v9792_v30 = vpop.f32.mrb[188].mxu1 }
 0x26f   : > { %11521 = vst [vmem:[#allocation74_spill] sm:$0xff] %v9773_v27  ;;  %11523 = vst [vmem:[#allocation75_spill] sm:$0xff] %v9777_v2  ;;  %v9785_v4 = vadd.f32 %v9555_v52, %v11526_v50  ;;  %v3508_v27 = vpop.f32.mrb[189].mxu0  ;;  %v9796_v2 = vadd.f32 %v9555_v52, %v11530_v32  ;;  %v11532_v6 = vld [vmem:[#allocation123_spill] sm:$0xff]  ;;  %v9815_v32 = vadd.f32 %v9555_v52, %v11536_v42 }
 0x270   : > { %11525 = vst [vmem:[#allocation76_spill] sm:$0xff] %v9781_v54  ;;  %11529 = vst [vmem:[#allocation78_spill] sm:$0xff] %v9789_v26  ;;  %v9800_v23 = vadd.f32 %v9555_v52, %v11532_v6  ;;  %v11533_v54 = vld [vmem:[#allocation124_spill] sm:$0xff]  ;;  %v3509_v21 = vadd.f32 %v9555_v52, %v3508_v27  ;;  %v6688_v26 = vpop.f32.mrb[190].mxu0  ;;  %v11538_v6 = vmax.f32 %v9026_v47, %v9321_v40 }
 0x271   : > { %11527 = vst [vmem:[#allocation77_spill] sm:$0xff] %v9785_v4  ;;  %11531 = vst [vmem:[#allocation79_spill] sm:$0xff] %v9796_v2  ;;  %v9804_v50 = vadd.f32 %v9555_v52, %v11533_v54  ;;  %v9807_v4 = vpop.f32.mrb[189].mxu1  ;;  %v3520_v54 = vadd.f32 %v9555_v52, %v6688_v26  ;;  %v3511_v46 = vpop.f32.mrb[191].mxu0  ;;  %v11543_v42 = vmax.f32 %v9035_v63, %v9330_v24  ;;  %v11545_v26 = vld [vmem:[#allocation129_spill] sm:$0xff]  ;;  %v11551_v24 = vld [vmem:[#allocation103_spill] sm:$0xff] }
 0x272   : > { %11535 = vst [vmem:[#allocation88_spill] sm:$0xff] %v9811_v37  ;;  %11537 = vst [vmem:[#allocation100_spill] sm:$0xff] %v9815_v32  ;;  %v9820_v2 = vmax.f32 %v11538_v6, %v3517_v34  ;;  %v9823_v27 = vpop.f32.mrb[190].mxu1  ;;  %v9831_v37 = vadd.f32 %v9555_v52, %v11541_v15  ;;  %v3512_v47 = vadd.f32 %v9555_v52, %v3511_v46  ;;  %v11547_v6 = vld [vmem:[#allocation130_spill] sm:$0xff]  ;;  %v11554_v46 = vld [vmem:[#allocation132_spill] sm:$0xff] }
 0x273   : > { %v9836_v32 = vmax.f32 %v11543_v42, %v3509_v21  ;;  %v9839_v40 = vpop.f32.mrb[191].mxu1  ;;  %v9843_v34 = vadd.f32 %v9555_v52, %v11545_v26  ;;  %v9847_v41 = vadd.f32 %v9555_v52, %v11547_v6  ;;  %v11552_v63 = vmax.f32 %v9043_v58, %v11551_v24  ;;  %v11563_v58 = vld [vmem:[#allocation135_spill] sm:$0xff]  ;;  %v11565_v24 = vld [vmem:[#allocation136_spill] sm:$0xff] }
 0x274   : > { %11539 = vst [vmem:[#allocation80_spill] sm:$0xff] %v9820_v2  ;;  %11542 = vst [vmem:[#allocation81_spill] sm:$0xff] %v9831_v37  ;;  %v11549_v2 = vld [vmem:[#allocation131_spill] sm:$0xff]  ;;  %v9860_v42 = vadd.f32 %v9555_v52, %v11554_v46  ;;  %v11567_v46 = vld [vmem:[#allocation137_spill] sm:$0xff] }
 0x275   : > { %11544 = vst [vmem:[#allocation82_spill] sm:$0xff] %v9836_v32  ;;  %11546 = vst [vmem:[#allocation112_spill] sm:$0xff] %v9843_v34  ;;  %v9851_v15 = vadd.f32 %v9555_v52, %v11549_v2  ;;  %v9856_v21 = vmax.f32 %v11552_v63, %v3520_v54  ;;  %v11555_v32 = vld [vmem:[#allocation133_spill] sm:$0xff]  ;;  %v11557_v34 = vld [vmem:[#allocation134_spill] sm:$0xff]  ;;  %v9877_v54 = vadd.f32 %v9555_v52, %v11563_v58 }
 0x276   : > { %11548 = vst [vmem:[#allocation101_spill] sm:$0xff] %v9847_v41  ;;  %v9864_v26 = vadd.f32 %v9555_v52, %v11555_v32  ;;  %v9868_v6 = vadd.f32 %v9555_v52, %v11557_v34  ;;  %v11559_v41 = vld [vmem:[#allocation94_spill] sm:$0xff]  ;;  %v11560_v2 = vld [vmem:[#allocation104_spill] sm:$0xff]  ;;  %v9881_v63 = vadd.f32 %v9555_v52, %v11565_v24  ;;  %v9885_v32 = vadd.f32 %v9555_v52, %v11567_v46 }
 0x277   : > { %11550 = vst [vmem:[#allocation84_spill] sm:$0xff] %v9851_v15  ;;  %11553 = vst [vmem:[#allocation85_spill] sm:$0xff] %v9856_v21  ;;  %v11561_v15 = vmax.f32 %v11559_v41, %v11560_v2  ;;  %v11569_v21 = vld [vmem:[#allocation138_spill] sm:$0xff]  ;;  %v11573_v41 = vld [vmem:[#allocation107_spill] sm:$0xff] }
 0x278   : > { %11556 = vst [vmem:[#allocation86_spill] sm:$0xff] %v9864_v26  ;;  %11558 = vst [vmem:[#allocation87_spill] sm:$0xff] %v9868_v6  ;;  %v9889_v34 = vadd.f32 %v9555_v52, %v11569_v21  ;;  %v11571_v6 = vld [vmem:[#allocation83_spill] sm:$0xff]  ;;  %v11577_v24 = vld [vmem:[#allocation140_spill] sm:$0xff] }
 0x279   : > { %v9873_v37 = vmax.f32 %v11561_v15, %v3512_v47  ;;  %11564 = vst [vmem:[#allocation91_spill] sm:$0xff] %v9877_v54  ;;  %11566 = vst [vmem:[#allocation92_spill] sm:$0xff] %v9881_v63  ;;  %v9893_v47 = vadd.f32 %v9555_v52, %v11571_v6  ;;  %v9897_v15 = vadd.f32 %v9555_v52, %v11573_v41  ;;  %v11575_v2 = vld [vmem:[#allocation139_spill] sm:$0xff]  ;;  %v11587_v63 = vld [vmem:[#allocation118_spill] sm:$0xff] }
 0x27a   : > { %11568 = vst [vmem:[#allocation93_spill] sm:$0xff] %v9885_v32  ;;  %11570 = vst [vmem:[#allocation55_spill] sm:$0xff] %v9889_v34  ;;  %v9901_v58 = vadd.f32 %v9555_v52, %v11575_v2  ;;  %v9905_v46 = vadd.f32 %v9555_v52, %v11577_v24  ;;  %v11579_v32 = vld [vmem:[#allocation89_spill] sm:$0xff]  ;;  %v11585_v24 = vld [vmem:[#allocation142_spill] sm:$0xff] }
 0x27b   : > { %11562 = vst [vmem:[#allocation90_spill] sm:$0xff] %v9873_v37  ;;  %11572 = vst [vmem:[#allocation95_spill] sm:$0xff] %v9893_v47  ;;  %v6691_v37 = vpop.f32.mrb[192].mxu0  ;;  %v9909_v21 = vadd.f32 %v9555_v52, %v11579_v32  ;;  %v11581_v34 = vld [vmem:[#allocation113_spill] sm:$0xff]  ;;  %v9928_v32 = vadd.f32 %v9555_v52, %v11587_v63  ;;  %v11593_v26 = vld [vmem:[#allocation143_spill] sm:$0xff]  ;;  %v11595_v63 = vmax.f32 %v9066_v1, %v9365_v62 }
 0x27c   : > { %11574 = vst [vmem:[#allocation59_spill] sm:$0xff] %v9897_v15  ;;  %11576 = vst [vmem:[#allocation60_spill] sm:$0xff] %v9901_v58  ;;  %v9913_v6 = vadd.f32 %v9555_v52, %v11581_v34  ;;  %v11583_v47 = vld [vmem:[#allocation141_spill] sm:$0xff]  ;;  %v3533_v2 = vadd.f32 %v9555_v52, %v6691_v37  ;;  %v3524_v58 = vpop.f32.mrb[193].mxu0  ;;  %v9920_v15 = vpop.f32.mrb[192].mxu1  ;;  %v11591_v37 = vld [vmem:[#allocation119_spill] sm:$0xff] }
 0x27d   : > { %11578 = vst [vmem:[#allocation123_spill] sm:$0xff] %v9905_v46  ;;  %11580 = vst [vmem:[#allocation124_spill] sm:$0xff] %v9909_v21  ;;  %v9917_v41 = vadd.f32 %v9555_v52, %v11583_v47  ;;  %v9924_v46 = vadd.f32 %v9555_v52, %v11585_v24  ;;  %v11589_v21 = vld [vmem:[#allocation54_spill] sm:$0xff]  ;;  %v3525_v47 = vadd.f32 %v9555_v52, %v3524_v58 }
 0x27e   : > { %11582 = vst [vmem:[#allocation125_spill] sm:$0xff] %v9913_v6  ;;  %11588 = vst [vmem:[#allocation128_spill] sm:$0xff] %v9928_v32  ;;  %v9932_v34 = vadd.f32 %v9555_v52, %v11589_v21  ;;  %v9935_v6 = vpop.f32.mrb[193].mxu1  ;;  %v9939_v54 = vadd.f32 %v9555_v52, %v11591_v37  ;;  %v9943_v24 = vadd.f32 %v9555_v52, %v11593_v26 }
 0x27f   : > { %11584 = vst [vmem:[#allocation126_spill] sm:$0xff] %v9917_v41  ;;  %11586 = vst [vmem:[#allocation127_spill] sm:$0xff] %v9924_v46  ;;  %v6692_v41 = vpop.f32.mrb[194].mxu0  ;;  %v9948_v32 = vmax.f32 %v11595_v63, %v3533_v2  ;;  %v9951_v58 = vpop.f32.mrb[194].mxu1  ;;  %v9955_v46 = vadd.f32 %v9555_v52, %v9407_v61  ;;  %v9959_v37 = vadd.f32 %v9555_v52, %v9410_v55 }
 0x280   : > { %11590 = vst [vmem:[#allocation129_spill] sm:$0xff] %v9932_v34  ;;  %11592 = vst [vmem:[#allocation130_spill] sm:$0xff] %v9939_v54  ;;  %v3536_v21 = vadd.f32 %v9555_v52, %v6692_v41  ;;  %v3527_v34 = vpop.f32.mrb[195].mxu0  ;;  %v11597_v26 = vmax.f32 %v9075_v59, %v9374_v10  ;;  %v9967_v62 = vpop.f32.mrb[195].mxu1  ;;  %v9971_v41 = vadd.f32 %v9555_v52, %v9418_v60  ;;  %v11613_v54 = vld [vmem:[#allocation63_spill] sm:$0xff] }
 0x281   : > { %11594 = vst [vmem:[#allocation131_spill] sm:$0xff] %v9943_v24  ;;  %11596 = vst [vmem:[#allocation103_spill] sm:$0xff] %v9948_v32  ;;  %v3528_v1 = vadd.f32 %v9555_v52, %v3527_v34  ;;  %v9975_v61 = vadd.f32 %v9555_v52, %v9426_v28  ;;  %v9979_v55 = vadd.f32 %v9555_v52, %v9439_v11 }
 0x282   : > { %v9964_v24 = vmax.f32 %v11597_v26, %v3525_v47  ;;  %v11600_v59 = vmax.f32 %v9083_v51, %v9385_v36  ;;  %v9988_v2 = vadd.f32 %v9555_v52, %v9442_v14  ;;  %v9992_v60 = vadd.f32 %v9555_v52, %v9450_v39  ;;  %v6947_v47 = vpop.f32.mrb[196].mxu1 }
 0x283   : > { %11598 = vst [vmem:[#allocation132_spill] sm:$0xff] %v9975_v61  ;;  %11599 = vst [vmem:[#allocation133_spill] sm:$0xff] %v9979_v55  ;;  %v9996_v28 = vadd.f32 %v9555_v52, %v9458_v48  ;;  %v11603_v11 = vmax.f32 %v9089_v3, %v9395_v13  ;;  %v10005_v51 = vadd.f32 %v9555_v52, %v9471_v19 }
 0x284   : > { %v9984_v10 = vmax.f32 %v11600_v59, %v3536_v21  ;;  %v10009_v36 = vadd.f32 %v9555_v52, %v9474_v45  ;;  %v10013_v14 = vadd.f32 %v9555_v52, %v9482_v5  ;;  %v10017_v39 = vadd.f32 %v9555_v52, %v9490_v25  ;;  %v6695_v45 = vpop.f32.mrb[196].mxu0 }
 0x285   : > { %11602 = vst [vmem:[#allocation94_spill] sm:$0xff] %v9996_v28  ;;  %v10001_v34 = vmax.f32 %v11603_v11, %v3528_v1  ;;  %11605 = vst [vmem:[#allocation135_spill] sm:$0xff] %v10005_v51  ;;  %v10021_v3 = vadd.f32 %v9555_v52, %v9531_v17  ;;  %v10025_v13 = vadd.f32 %v9555_v52, %v9546_v18  ;;  %v3540_v17 = vpop.f32.mrb[197].mxu0  ;;  %v11612_v1 = vld [vmem:[#allocation62_spill] sm:$0xff]  ;;  %v11684_v28 = vld [vmem:[#allocation27_spill] sm:$0xff] }
 0x286   : > { %11601 = vst [vmem:[#allocation134_spill] sm:$0xff] %v9984_v10  ;;  %11606 = vst [vmem:[#allocation136_spill] sm:$0xff] %v10017_v39  ;;  %v10029_v48 = vadd.f32 %v9555_v52, %v9567_v7  ;;  %v10033_v19 = vadd.f32 %v9555_v52, %v9583_v33  ;;  %v10037_v5 = vadd.f32 %v9555_v52, %v9664_v57  ;;  %v11710_v39 = vld [vmem:[#allocation69_spill] sm:$0xff] }
 0x287   : > { %11604 = vst [vmem:[#allocation104_spill] sm:$0xff] %v10001_v34  ;;  %11607 = vst [vmem:[#allocation137_spill] sm:$0xff] %v10021_v3  ;;  %v10041_v25 = vadd.f32 %v9555_v52, %v9679_v22  ;;  %v10045_v18 = vadd.f32 %v9555_v52, %v9695_v12  ;;  %v3549_v7 = vadd.f32 %v9555_v52, %v6695_v45  ;;  %v6696_v22 = vpop.f32.mrb[198].mxu0  ;;  %v4548_v12 = vpop.f32.mrb[197].mxu1 }
 0x288   : > { %11608 = vst [vmem:[#allocation138_spill] sm:$0xff] %v10033_v19  ;;  %11609 = vst [vmem:[#allocation83_spill] sm:$0xff] %v10037_v5  ;;  %v10050_v33 = vadd.f32 %v9555_v52, %v9711_v8  ;;  %v10054_v57 = vadd.f32 %v9555_v52, %v9792_v30  ;;  %v3541_v63 = vadd.f32 %v9555_v52, %v3540_v17  ;;  %v3543_v11 = vpop.f32.mrb[199].mxu0  ;;  %v6948_v30 = vpop.f32.mrb[198].mxu1  ;;  %v11736_v19 = vld [vmem:[#allocation73_spill] sm:$0xff] }
 0x289   : > { %v10058_v21 = vadd.f32 %v9555_v52, %v6947_v47  ;;  %v10062_v26 = vadd.f32 %v9555_v52, %v9807_v4  ;;  %v4913_v59 = vmax.f32 %v11612_v1, %v3549_v7  ;;  %v3552_v8 = vadd.f32 %v9555_v52, %v6696_v22  ;;  %v4551_v4 = vpop.f32.mrb[199].mxu1  ;;  %v11614_v1 = vld [vmem:[#allocation64_spill] sm:$0xff]  ;;  %v11625_v47 = vld [vmem:[#allocation30_spill] sm:$0xff] }
 0x28a   : > { %11610 = vst [vmem:[#allocation107_spill] sm:$0xff] %v10054_v57  ;;  %v10067_v45 = vadd.f32 %v9555_v52, %v4548_v12  ;;  %v4911_v17 = vmax.f32 %v11613_v54, %v3541_v63  ;;  %v3544_v34 = vadd.f32 %v9555_v52, %v3543_v11  ;;  %v10074_v10 = vadd.f32 %v9555_v52, %v6948_v30  ;;  %v11615_v11 = vld [vmem:[#allocation66_spill] sm:$0xff] }
 0x28b   : > { %11611 = vst [vmem:[#allocation139_spill] sm:$0xff] %v10062_v26  ;;  %v4969_v7 = vmax.f32 %v4913_v59, %v9504_v43  ;;  %v4914_v22 = vmax.f32 %v11614_v1, %v3552_v8  ;;  %v10081_v26 = vadd.f32 %v9555_v52, %v4551_v4  ;;  %v10085_v54 = vadd.f32 %v9555_v52, %v9823_v27  ;;  %v11631_v4 = vld [vmem:[#allocation16_spill] sm:$0xff]  ;;  %v11660_v12 = vld [vmem:[#allocation98_spill] sm:$0xff] }
 0x28c   : > { %v4967_v63 = vmax.f32 %v4911_v17, %v9508_v29  ;;  %v4912_v30 = vmax.f32 %v11615_v11, %v3544_v34  ;;  %v10093_v43 = vadd.f32 %v9555_v52, %v9839_v40  ;;  %v10101_v27 = vadd.f32 %v9555_v52, %v9920_v15  ;;  %v6699_v17 = vpop.f32.mrb[200].mxu0  ;;  %v6951_v15 = vpop.f32.mrb[200].mxu1 }
 0x28d   : > { %v5025_v59 = vmax.f32 %v4969_v7, %v9653_v0  ;;  %v4970_v8 = vmax.f32 %v4914_v22, %v9512_v9  ;;  %v10105_v29 = vadd.f32 %v9555_v52, %v9935_v6  ;;  %v10111_v0 = vadd.f32 %v9555_v52, %v9951_v58  ;;  %v3556_v1 = vpop.f32.mrb[201].mxu0  ;;  %v4564_v11 = vpop.f32.mrb[201].mxu1 }
 0x28e   : > { %v5023_v34 = vmax.f32 %v4967_v63, %v9657_v16  ;;  %v4968_v40 = vmax.f32 %v4912_v30, %v9516_v38  ;;  %v3565_v7 = vadd.f32 %v9555_v52, %v6699_v17  ;;  %v3557_v16 = vadd.f32 %v9555_v52, %v3556_v1  ;;  %v6700_v63 = vpop.f32.mrb[202].mxu0 }
 0x28f   : > { %11616 = vst [vmem:[#allocation140_spill] sm:$0xff] %v10105_v29  ;;  %11617 = vst [vmem:[#allocation89_spill] sm:$0xff] %v10111_v0  ;;  %v5026_v9 = vmax.f32 %v4970_v8, %v9661_v31  ;;  %v10116_v22 = vmax.f32 %v5025_v59, %v9800_v23  ;;  %v10121_v38 = vadd.f32 %v9555_v52, %v6951_v15  ;;  %v11619_v31 = vld [vmem:[#allocation65_spill] sm:$0xff]  ;;  %v3559_v17 = vpop.f32.mrb[203].mxu0  ;;  %v6952_v59 = vpop.f32.mrb[202].mxu1 }
 0x290   : > { %v5024_v6 = vmax.f32 %v4968_v40, %v9668_v35  ;;  %v10124_v58 = vmax.f32 %v5023_v34, %v9804_v50  ;;  %v4917_v30 = vmax.f32 %v11619_v31, %v3565_v7  ;;  %v3568_v8 = vadd.f32 %v9555_v52, %v6700_v63  ;;  %v11621_v40 = vld [vmem:[#allocation31_spill] sm:$0xff]  ;;  %v4567_v7 = vpop.f32.mrb[203].mxu1  ;;  %v11624_v63 = vld [vmem:[#allocation114_spill] sm:$0xff] }
 0x291   : > { %11618 = vst [vmem:[#allocation113_spill] sm:$0xff] %v10121_v38  ;;  %v10129_v23 = vadd.f32 %v9555_v52, %v4564_v11  ;;  %v4915_v1 = vmax.f32 %v11621_v40, %v3557_v16  ;;  %v3560_v15 = vadd.f32 %v9555_v52, %v3559_v17  ;;  %v10138_v34 = vadd.f32 %v9555_v52, %v6952_v59  ;;  %v11628_v16 = vld [vmem:[#allocation51_spill] sm:$0xff]  ;;  %v11629_v17 = vld [vmem:[#allocation32_spill] sm:$0xff]  ;;  %v6955_v0 = vpop.f32.mrb[204].mxu1 }
 0x292   : > { %v4973_v31 = vmax.f32 %v4917_v30, %v11624_v63  ;;  %v4918_v11 = vmax.f32 %v11625_v47, %v3568_v8  ;;  %v10145_v35 = vadd.f32 %v9555_v52, %v4567_v7  ;;  %v11632_v63 = vld [vmem:[#allocation115_spill] sm:$0xff]  ;;  %v11638_v59 = vld [vmem:[#allocation100_spill] sm:$0xff] }
 0x293   : > { %11620 = vst [vmem:[#allocation141_spill] sm:$0xff] %v10129_v23  ;;  %11623 = vst [vmem:[#allocation142_spill] sm:$0xff] %v10138_v34  ;;  %v4971_v40 = vmax.f32 %v4915_v1, %v11628_v16  ;;  %v4916_v29 = vmax.f32 %v11629_v17, %v3560_v15  ;;  %v11634_v23 = vld [vmem:[#allocation88_spill] sm:$0xff]  ;;  %v10162_v1 = vadd.f32 %v9555_v52, %v9967_v62  ;;  %v11636_v15 = vld [vmem:[#allocation17_spill] sm:$0xff]  ;;  %v6703_v34 = vpop.f32.mrb[204].mxu0 }
 0x294   : > { %11627 = vst [vmem:[#allocation118_spill] sm:$0xff] %v10145_v35  ;;  %v5029_v30 = vmax.f32 %v4973_v31, %v11631_v4  ;;  %v4974_v47 = vmax.f32 %v4918_v11, %v11632_v63  ;;  %v10158_v7 = vmax.f32 %v5026_v9, %v11634_v23  ;;  %v11637_v17 = vld [vmem:[#allocation52_spill] sm:$0xff]  ;;  %v10167_v50 = vmax.f32 %v5024_v6, %v11638_v59  ;;  %v11639_v4 = vld [vmem:[#allocation18_spill] sm:$0xff]  ;;  %v3572_v63 = vpop.f32.mrb[205].mxu0  ;;  %v11641_v23 = vld [vmem:[#allocation19_spill] sm:$0xff]  ;;  %v4580_v59 = vpop.f32.mrb[205].mxu1 }
 0x295   : > { %11635 = vst [vmem:[#allocation54_spill] sm:$0xff] %v10162_v1  ;;  %v5027_v16 = vmax.f32 %v4971_v40, %v11636_v15  ;;  %v4972_v38 = vmax.f32 %v4916_v29, %v11637_v17  ;;  %v3581_v11 = vadd.f32 %v9555_v52, %v6703_v34  ;;  %v3573_v29 = vadd.f32 %v9555_v52, %v3572_v63  ;;  %v6704_v15 = vpop.f32.mrb[206].mxu0  ;;  %v11645_v63 = vld [vmem:[#allocation34_spill] sm:$0xff]  ;;  %v11649_v8 = vld [vmem:[#allocation35_spill] sm:$0xff]  ;;  %v11674_v35 = vld [vmem:[#allocation37_spill] sm:$0xff] }
 0x296   : > { %v5030_v31 = vmax.f32 %v4974_v47, %v11639_v4  ;;  %v10174_v62 = vmax.f32 %v5029_v30, %v9827_v44  ;;  %v10179_v6 = vadd.f32 %v9555_v52, %v6955_v0  ;;  %v11643_v47 = vld [vmem:[#allocation33_spill] sm:$0xff]  ;;  %v3584_v4 = vadd.f32 %v9555_v52, %v6704_v15  ;;  %v3575_v9 = vpop.f32.mrb[207].mxu0  ;;  %v6956_v30 = vpop.f32.mrb[206].mxu1  ;;  %v11648_v15 = vld [vmem:[#allocation116_spill] sm:$0xff] }
 0x297   : > { %v5028_v40 = vmax.f32 %v4972_v38, %v11641_v23  ;;  %v4921_v17 = vmax.f32 %v11643_v47, %v3581_v11  ;;  %v10186_v44 = vadd.f32 %v9555_v52, %v4580_v59  ;;  %v4919_v23 = vmax.f32 %v11645_v63, %v3573_v29  ;;  %v4583_v11 = vpop.f32.mrb[207].mxu1  ;;  %v11652_v29 = vld [vmem:[#allocation53_spill] sm:$0xff] }
 0x298   : > { %11640 = vst [vmem:[#allocation119_spill] sm:$0xff] %v10174_v62  ;;  %11642 = vst [vmem:[#allocation143_spill] sm:$0xff] %v10179_v6  ;;  %v3576_v0 = vadd.f32 %v9555_v52, %v3575_v9  ;;  %v10195_v34 = vadd.f32 %v9555_v52, %v6956_v30  ;;  %v4922_v59 = vmax.f32 %v11649_v8, %v3584_v4  ;;  %v11653_v9 = vld [vmem:[#allocation96_spill] sm:$0xff]  ;;  %v11655_v30 = vld [vmem:[#allocation81_spill] sm:$0xff]  ;;  %v6959_v61 = vpop.f32.mrb[208].mxu1 }
 0x299   : > { %11644 = vst [vmem:[#allocation62_spill] sm:$0xff] %v10186_v44  ;;  %v4977_v47 = vmax.f32 %v4921_v17, %v11648_v15  ;;  %v10202_v38 = vadd.f32 %v9555_v52, %v4583_v11  ;;  %v4975_v63 = vmax.f32 %v4919_v23, %v11652_v29  ;;  %v10209_v1 = vmax.f32 %v5027_v16, %v11655_v30  ;;  %v11656_v62 = vld [vmem:[#allocation21_spill] sm:$0xff]  ;;  %v11659_v44 = vld [vmem:[#allocation112_spill] sm:$0xff] }
 0x29a   : > { %11647 = vst [vmem:[#allocation63_spill] sm:$0xff] %v10195_v34  ;;  %v4920_v55 = vmax.f32 %v11653_v9, %v3576_v0  ;;  %v11657_v15 = vld [vmem:[#allocation117_spill] sm:$0xff]  ;;  %v10216_v11 = vmax.f32 %v5030_v31, %v11659_v44  ;;  %v11661_v29 = vld [vmem:[#allocation56_spill] sm:$0xff]  ;;  %v6707_v9 = vpop.f32.mrb[208].mxu0 }
 0x29b   : > { %11651 = vst [vmem:[#allocation64_spill] sm:$0xff] %v10202_v38  ;;  %v5033_v17 = vmax.f32 %v4977_v47, %v11656_v62  ;;  %v4978_v8 = vmax.f32 %v4922_v59, %v11657_v15  ;;  %v5031_v23 = vmax.f32 %v4975_v63, %v11660_v12  ;;  %v11662_v16 = vld [vmem:[#allocation101_spill] sm:$0xff]  ;;  %v11664_v62 = vld [vmem:[#allocation23_spill] sm:$0xff]  ;;  %v3597_v59 = vadd.f32 %v9555_v52, %v6707_v9  ;;  %v3588_v15 = vpop.f32.mrb[209].mxu0  ;;  %v11665_v44 = vld [vmem:[#allocation84_spill] sm:$0xff] }
 0x29c   : > { %v4976_v0 = vmax.f32 %v4920_v55, %v11661_v29  ;;  %v10223_v30 = vmax.f32 %v5028_v40, %v11662_v16  ;;  %v11666_v55 = vld [vmem:[#allocation24_spill] sm:$0xff]  ;;  %v3589_v29 = vadd.f32 %v9555_v52, %v3588_v15  ;;  %v6708_v6 = vpop.f32.mrb[210].mxu0  ;;  %v10235_v40 = vadd.f32 %v9555_v52, %v6959_v61  ;;  %v4596_v16 = vpop.f32.mrb[209].mxu1  ;;  %v11670_v15 = vld [vmem:[#allocation97_spill] sm:$0xff] }
 0x29d   : > { %v5034_v47 = vmax.f32 %v4978_v8, %v11664_v62  ;;  %v10230_v12 = vmax.f32 %v5033_v17, %v11665_v44  ;;  %v11668_v9 = vld [vmem:[#allocation36_spill] sm:$0xff]  ;;  %v3600_v38 = vadd.f32 %v9555_v52, %v6708_v6  ;;  %v3591_v31 = vpop.f32.mrb[211].mxu0  ;;  %v10242_v17 = vadd.f32 %v9555_v52, %v4596_v16  ;;  %v6960_v44 = vpop.f32.mrb[210].mxu1  ;;  %v11680_v4 = vld [vmem:[#allocation25_spill] sm:$0xff] }
 0x29e   : > { %11663 = vst [vmem:[#allocation66_spill] sm:$0xff] %v10223_v30  ;;  %v5032_v63 = vmax.f32 %v4976_v0, %v11666_v55  ;;  %11667 = vst [vmem:[#allocation65_spill] sm:$0xff] %v10235_v40  ;;  %v4925_v62 = vmax.f32 %v11668_v9, %v3597_v59  ;;  %v4923_v55 = vmax.f32 %v11670_v15, %v3589_v29  ;;  %v4599_v59 = vpop.f32.mrb[211].mxu1  ;;  %v11673_v6 = vld [vmem:[#allocation120_spill] sm:$0xff]  ;;  %v11677_v29 = vld [vmem:[#allocation58_spill] sm:$0xff] }
 0x29f   : > { %11669 = vst [vmem:[#allocation31_spill] sm:$0xff] %v10242_v17  ;;  %v3592_v61 = vadd.f32 %v9555_v52, %v3591_v31  ;;  %v10251_v8 = vadd.f32 %v9555_v52, %v6960_v44  ;;  %v4926_v16 = vmax.f32 %v11674_v35, %v3600_v38  ;;  %v10258_v0 = vadd.f32 %v9555_v52, %v4599_v59  ;;  %v11678_v31 = vld [vmem:[#allocation38_spill] sm:$0xff]  ;;  %v6963_v30 = vpop.f32.mrb[212].mxu1  ;;  %v11699_v34 = vld [vmem:[#allocation40_spill] sm:$0xff] }
 0x2a0   : > { %v4981_v9 = vmax.f32 %v4925_v62, %v11673_v6  ;;  %v4979_v15 = vmax.f32 %v4923_v55, %v11677_v29  ;;  %v10265_v44 = vmax.f32 %v5031_v23, %v9860_v42  ;;  %v11681_v6 = vld [vmem:[#allocation61_spill] sm:$0xff]  ;;  %v11683_v17 = vld [vmem:[#allocation86_spill] sm:$0xff]  ;;  %v11686_v42 = vld [vmem:[#allocation87_spill] sm:$0xff] }
 0x2a1   : > { %11672 = vst [vmem:[#allocation114_spill] sm:$0xff] %v10251_v8  ;;  %11676 = vst [vmem:[#allocation30_spill] sm:$0xff] %v10258_v0  ;;  %v4924_v51 = vmax.f32 %v11678_v31, %v3592_v61  ;;  %v4982_v35 = vmax.f32 %v4926_v16, %v11681_v6  ;;  %v10272_v59 = vmax.f32 %v5034_v47, %v11683_v17  ;;  %v11685_v29 = vld [vmem:[#allocation122_spill] sm:$0xff]  ;;  %v6711_v31 = vpop.f32.mrb[212].mxu0  ;;  %v11689_v17 = vld [vmem:[#allocation91_spill] sm:$0xff] }
 0x2a2   : > { %v5037_v62 = vmax.f32 %v4981_v9, %v11680_v4  ;;  %v5035_v55 = vmax.f32 %v4979_v15, %v11684_v28  ;;  %v10279_v23 = vmax.f32 %v5032_v63, %v11686_v42  ;;  %v11688_v4 = vld [vmem:[#allocation28_spill] sm:$0xff]  ;;  %v3613_v16 = vadd.f32 %v9555_v52, %v6711_v31  ;;  %v3604_v6 = vpop.f32.mrb[213].mxu0  ;;  %v4612_v42 = vpop.f32.mrb[213].mxu1  ;;  %v11693_v31 = vld [vmem:[#allocation99_spill] sm:$0xff] }
 0x2a3   : > { %v4980_v61 = vmax.f32 %v4924_v51, %v11685_v29  ;;  %v5038_v9 = vmax.f32 %v4982_v35, %v11688_v4  ;;  %v11691_v51 = vld [vmem:[#allocation29_spill] sm:$0xff]  ;;  %v3605_v29 = vadd.f32 %v9555_v52, %v3604_v6  ;;  %v6712_v40 = vpop.f32.mrb[214].mxu0  ;;  %v10291_v63 = vadd.f32 %v9555_v52, %v6963_v30  ;;  %v11695_v6 = vld [vmem:[#allocation39_spill] sm:$0xff] }
 0x2a4   : > { %11687 = vst [vmem:[#allocation51_spill] sm:$0xff] %v10279_v23  ;;  %v10286_v28 = vmax.f32 %v5037_v62, %v11689_v17  ;;  %v4929_v4 = vmax.f32 %v11693_v31, %v3613_v16  ;;  %v3616_v0 = vadd.f32 %v9555_v52, %v6712_v40  ;;  %v3607_v47 = vpop.f32.mrb[215].mxu0  ;;  %v10298_v62 = vadd.f32 %v9555_v52, %v4612_v42  ;;  %v6964_v17 = vpop.f32.mrb[214].mxu1  ;;  %v11698_v40 = vld [vmem:[#allocation2_spill] sm:$0xff]  ;;  %v11725_v8 = vld [vmem:[#allocation43_spill] sm:$0xff] }
 0x2a5   : > { %v5036_v15 = vmax.f32 %v4980_v61, %v11691_v51  ;;  %11692 = vst [vmem:[#allocation16_spill] sm:$0xff] %v10291_v63  ;;  %v4927_v51 = vmax.f32 %v11695_v6, %v3605_v29  ;;  %v3608_v30 = vadd.f32 %v9555_v52, %v3607_v47  ;;  %v10307_v35 = vadd.f32 %v9555_v52, %v6964_v17  ;;  %v4615_v16 = vpop.f32.mrb[215].mxu1  ;;  %v11702_v29 = vld [vmem:[#allocation4_spill] sm:$0xff]  ;;  %v11703_v47 = vld [vmem:[#allocation41_spill] sm:$0xff] }
 0x2a6   : > { %11690 = vst [vmem:[#allocation32_spill] sm:$0xff] %v10286_v28  ;;  %11694 = vst [vmem:[#allocation115_spill] sm:$0xff] %v10298_v62  ;;  %v4985_v31 = vmax.f32 %v4929_v4, %v11698_v40  ;;  %v4930_v42 = vmax.f32 %v11699_v34, %v3616_v0  ;;  %v10314_v61 = vadd.f32 %v9555_v52, %v4615_v16  ;;  %v11705_v17 = vld [vmem:[#allocation92_spill] sm:$0xff]  ;;  %v11707_v40 = vld [vmem:[#allocation5_spill] sm:$0xff]  ;;  %v6967_v23 = vpop.f32.mrb[216].mxu1 }
 0x2a7   : > { %11697 = vst [vmem:[#allocation88_spill] sm:$0xff] %v10307_v35  ;;  %v4983_v6 = vmax.f32 %v4927_v51, %v11702_v29  ;;  %v4928_v3 = vmax.f32 %v11703_v47, %v3608_v30  ;;  %v10321_v38 = vmax.f32 %v5035_v55, %v11705_v17  ;;  %v11706_v28 = vld [vmem:[#allocation68_spill] sm:$0xff]  ;;  %v11709_v62 = vld [vmem:[#allocation93_spill] sm:$0xff]  ;;  %v11711_v29 = vld [vmem:[#allocation6_spill] sm:$0xff]  ;;  %v6715_v47 = vpop.f32.mrb[216].mxu0 }
 0x2a8   : > { %11701 = vst [vmem:[#allocation17_spill] sm:$0xff] %v10314_v61  ;;  %v5041_v4 = vmax.f32 %v4985_v31, %v11706_v28  ;;  %v4986_v34 = vmax.f32 %v4930_v42, %v11707_v40  ;;  %v10328_v16 = vmax.f32 %v5038_v9, %v11709_v62  ;;  %v11712_v55 = vld [vmem:[#allocation55_spill] sm:$0xff]  ;;  %v11714_v28 = vld [vmem:[#allocation70_spill] sm:$0xff]  ;;  %v3629_v42 = vadd.f32 %v9555_v52, %v6715_v47  ;;  %v3620_v40 = vpop.f32.mrb[217].mxu0 }
 0x2a9   : > { %v5039_v51 = vmax.f32 %v4983_v6, %v11710_v39  ;;  %v4984_v30 = vmax.f32 %v4928_v3, %v11711_v29  ;;  %v10335_v17 = vmax.f32 %v5036_v15, %v11712_v55  ;;  %v11715_v62 = vld [vmem:[#allocation95_spill] sm:$0xff]  ;;  %v3621_v29 = vadd.f32 %v9555_v52, %v3620_v40  ;;  %v6716_v63 = vpop.f32.mrb[218].mxu0  ;;  %v4628_v55 = vpop.f32.mrb[217].mxu1  ;;  %v11719_v47 = vld [vmem:[#allocation102_spill] sm:$0xff] }
 0x2aa   : > { %v5042_v31 = vmax.f32 %v4986_v34, %v11714_v28  ;;  %v10342_v39 = vmax.f32 %v5041_v4, %v11715_v62  ;;  %v11717_v3 = vld [vmem:[#allocation71_spill] sm:$0xff]  ;;  %v10347_v15 = vadd.f32 %v9555_v52, %v6967_v23  ;;  %v4933_v28 = vmax.f32 %v11719_v47, %v3629_v42  ;;  %v3623_v9 = vpop.f32.mrb[219].mxu0  ;;  %v6968_v62 = vpop.f32.mrb[218].mxu1  ;;  %v11721_v40 = vld [vmem:[#allocation42_spill] sm:$0xff] }
 0x2ab   : > { %11713 = vst [vmem:[#allocation52_spill] sm:$0xff] %v10335_v17  ;;  %v5040_v6 = vmax.f32 %v4984_v30, %v11717_v3  ;;  %v3632_v61 = vadd.f32 %v9555_v52, %v6716_v63  ;;  %v10354_v4 = vadd.f32 %v9555_v52, %v4628_v55  ;;  %v4931_v3 = vmax.f32 %v11721_v40, %v3621_v29  ;;  %v4631_v42 = vpop.f32.mrb[219].mxu1  ;;  %v11724_v63 = vld [vmem:[#allocation8_spill] sm:$0xff]  ;;  %v11728_v29 = vld [vmem:[#allocation9_spill] sm:$0xff] }
 0x2ac   : > { %11716 = vst [vmem:[#allocation100_spill] sm:$0xff] %v10342_v39  ;;  %11718 = vst [vmem:[#allocation18_spill] sm:$0xff] %v10347_v15  ;;  %v3624_v23 = vadd.f32 %v9555_v52, %v3623_v9  ;;  %v10363_v34 = vadd.f32 %v9555_v52, %v6968_v62  ;;  %v4989_v47 = vmax.f32 %v4933_v28, %v11724_v63  ;;  %v11729_v9 = vld [vmem:[#allocation44_spill] sm:$0xff]  ;;  %v11731_v62 = vld [vmem:[#allocation59_spill] sm:$0xff]  ;;  %v6971_v17 = vpop.f32.mrb[220].mxu1 }
 0x2ad   : > { %11720 = vst [vmem:[#allocation19_spill] sm:$0xff] %v10354_v4  ;;  %v4934_v55 = vmax.f32 %v11725_v8, %v3632_v61  ;;  %v10370_v30 = vadd.f32 %v9555_v52, %v4631_v42  ;;  %v4987_v40 = vmax.f32 %v4931_v3, %v11728_v29  ;;  %v10377_v0 = vmax.f32 %v5039_v51, %v11731_v62  ;;  %v11732_v39 = vld [vmem:[#allocation72_spill] sm:$0xff]  ;;  %v11733_v63 = vld [vmem:[#allocation10_spill] sm:$0xff]  ;;  %v11737_v29 = vld [vmem:[#allocation11_spill] sm:$0xff] }
 0x2ae   : > { %11723 = vst [vmem:[#allocation33_spill] sm:$0xff] %v10363_v34  ;;  %v4932_v5 = vmax.f32 %v11729_v9, %v3624_v23  ;;  %v5045_v28 = vmax.f32 %v4989_v47, %v11732_v39  ;;  %v11735_v4 = vld [vmem:[#allocation60_spill] sm:$0xff]  ;;  %v6719_v9 = vpop.f32.mrb[220].mxu0  ;;  %v11738_v51 = vld [vmem:[#allocation123_spill] sm:$0xff]  ;;  %v11739_v39 = vld [vmem:[#allocation74_spill] sm:$0xff] }
 0x2af   : > { %11727 = vst [vmem:[#allocation34_spill] sm:$0xff] %v10370_v30  ;;  %v4990_v8 = vmax.f32 %v4934_v55, %v11733_v63  ;;  %v10384_v42 = vmax.f32 %v5042_v31, %v11735_v4  ;;  %v5043_v3 = vmax.f32 %v4987_v40, %v11736_v19  ;;  %v10391_v62 = vmax.f32 %v5040_v6, %v11738_v51  ;;  %v3636_v63 = vpop.f32.mrb[221].mxu0  ;;  %v11740_v4 = vld [vmem:[#allocation124_spill] sm:$0xff]  ;;  %v4644_v51 = vpop.f32.mrb[221].mxu1  ;;  %v11748_v34 = vld [vmem:[#allocation106_spill] sm:$0xff] }
 0x2b0   : > { %v4988_v23 = vmax.f32 %v4932_v5, %v11737_v29  ;;  %v3645_v55 = vadd.f32 %v9555_v52, %v6719_v9  ;;  %v10398_v19 = vmax.f32 %v5045_v28, %v11740_v4  ;;  %v11741_v5 = vld [vmem:[#allocation75_spill] sm:$0xff]  ;;  %v3637_v29 = vadd.f32 %v9555_v52, %v3636_v63  ;;  %v6720_v15 = vpop.f32.mrb[222].mxu0  ;;  %v11743_v9 = vld [vmem:[#allocation105_spill] sm:$0xff]  ;;  %v6972_v4 = vpop.f32.mrb[222].mxu1 }
 0x2b1   : > { %v5046_v47 = vmax.f32 %v4990_v8, %v11739_v39  ;;  %v10403_v6 = vadd.f32 %v9555_v52, %v6971_v17  ;;  %v3648_v30 = vadd.f32 %v9555_v52, %v6720_v15  ;;  %v3639_v31 = vpop.f32.mrb[223].mxu0  ;;  %v10410_v28 = vadd.f32 %v9555_v52, %v4644_v51  ;;  %v11745_v63 = vld [vmem:[#allocation45_spill] sm:$0xff]  ;;  %v11747_v15 = vld [vmem:[#allocation12_spill] sm:$0xff] }
 0x2b2   : > { %v5044_v40 = vmax.f32 %v4988_v23, %v11741_v5  ;;  %v4937_v39 = vmax.f32 %v11743_v9, %v3645_v55  ;;  %v4935_v5 = vmax.f32 %v11745_v63, %v3637_v29  ;;  %v3640_v17 = vadd.f32 %v9555_v52, %v3639_v31  ;;  %v4647_v55 = vpop.f32.mrb[223].mxu1  ;;  %v11750_v29 = vld [vmem:[#allocation13_spill] sm:$0xff]  ;;  %v11751_v31 = vld [vmem:[#allocation46_spill] sm:$0xff] }
 0x2b3   : > { %11742 = vst [vmem:[#allocation116_spill] sm:$0xff] %v10403_v6  ;;  %11744 = vst [vmem:[#allocation35_spill] sm:$0xff] %v10410_v28  ;;  %v10419_v8 = vadd.f32 %v9555_v52, %v6972_v4  ;;  %v4938_v51 = vmax.f32 %v11748_v34, %v3648_v30  ;;  %v10426_v23 = vadd.f32 %v9555_v52, %v4647_v55  ;;  %v11753_v6 = vld [vmem:[#allocation125_spill] sm:$0xff]  ;;  %v11755_v30 = vld [vmem:[#allocation14_spill] sm:$0xff] }
 0x2b4   : > { %v4993_v9 = vmax.f32 %v4937_v39, %v11747_v15  ;;  %v10429_v63 = vmax.f32 %v4935_v5, %v11750_v29  ;;  %v4936_v57 = vmax.f32 %v11751_v31, %v3640_v17  ;;  %v10435_v32 = vmax.f32 %v5043_v3, %v11753_v6  ;;  %v11754_v39 = vld [vmem:[#allocation76_spill] sm:$0xff]  ;;  %v11758_v5 = vld [vmem:[#allocation126_spill] sm:$0xff]  ;;  %v11759_v17 = vld [vmem:[#allocation77_spill] sm:$0xff]  ;;  %v6723_v3 = vpop.f32.mrb[224].mxu0 }
 0x2b5   : > { %11746 = vst [vmem:[#allocation53_spill] sm:$0xff] %v10419_v8  ;;  %11749 = vst [vmem:[#allocation96_spill] sm:$0xff] %v10426_v23  ;;  %v10439_v15 = vmax.f32 %v4938_v51, %v11755_v30  ;;  %v10444_v29 = vmax.f32 %v5046_v47, %v11758_v5  ;;  %v11760_v4 = vld [vmem:[#allocation15_spill] sm:$0xff]  ;;  %v3661_v35 = vadd.f32 %v9555_v52, %v6723_v3  ;;  %v6975_v47 = vpop.f32.mrb[224].mxu1  ;;  %v3652_v5 = vpop.f32.mrb[225].mxu0  ;;  %v11765_v23 = vld [vmem:[#allocation128_spill] sm:$0xff] }
 0x2b6   : > { %v5049_v34 = vmax.f32 %v4993_v9, %v11754_v39  ;;  %v10449_v8 = vmax.f32 %v4936_v57, %v11760_v4  ;;  %v11762_v6 = vld [vmem:[#allocation139_spill] sm:$0xff]  ;;  %v4660_v9 = vpop.f32.mrb[225].mxu1  ;;  %v6724_v30 = vpop.f32.mrb[226].mxu0  ;;  %v11767_v51 = vmax.f32 %v9415_v53, %v10058_v21  ;;  %v11769_v3 = vmax.f32 %v9423_v49, %v10067_v45 }
 0x2b7   : > { %11756 = vst [vmem:[#allocation81_spill] sm:$0xff] %v10439_v15  ;;  %v11763_v39 = vld [vmem:[#allocation127_spill] sm:$0xff]  ;;  %v6976_v15 = vpop.f32.mrb[226].mxu1  ;;  %v3655_v55 = vpop.f32.mrb[227].mxu0 }
 0x2b8   : > { %11761 = vst [vmem:[#allocation21_spill] sm:$0xff] %v10449_v8  ;;  %v10454_v61 = vmax.f32 %v5044_v40, %v11763_v39  ;;  %v10462_v57 = vmax.f32 %v5049_v34, %v11765_v23  ;;  %v4669_v40 = vadd.f32 %v9555_v52, %v6975_v47  ;;  %v3653_v39 = vadd.f32 %v9555_v52, %v3652_v5 }
 0x2b9   : > { %v5165_v31 = vmax.f32 %v11767_v51, %v3661_v35  ;;  %v4661_v23 = vadd.f32 %v9555_v52, %v4660_v9  ;;  %v3664_v34 = vadd.f32 %v9555_v52, %v6724_v30  ;;  %v11768_v5 = vmax.f32 %v10116_v22, %v9955_v46  ;;  %v4663_v35 = vpop.f32.mrb[227].mxu1 }
 0x2ba   : > { %v5163_v8 = vmax.f32 %v11769_v3, %v3653_v39  ;;  %v4672_v53 = vadd.f32 %v9555_v52, %v6976_v15  ;;  %v3656_v21 = vadd.f32 %v9555_v52, %v3655_v55  ;;  %v11770_v51 = vmax.f32 %v10124_v58, %v9959_v37 }
 0x2bb   : > { %v5193_v4 = vmax.f32 %v11768_v5, %v4669_v40  ;;  %v5221_v9 = vmax.f32 %v5165_v31, 0.0  ;;  %v11771_v47 = vmax.f32 %v9431_v20, %v10074_v10  ;;  %v4664_v46 = vadd.f32 %v9555_v52, %v4663_v35  ;;  %v11774_v31 = vld [vmem:[#allocation132_spill] sm:$0xff] }
 0x2bc   : > { %v5191_v30 = vmax.f32 %v11770_v51, %v4661_v23  ;;  %v5219_v45 = vmax.f32 %v5163_v8, 0.0  ;;  %v11772_v22 = vmax.f32 %v10158_v7, %v9971_v41  ;;  %v11773_v37 = vmax.f32 %v9436_v56, %v10081_v26 }
 0x2bd   : > { %v5166_v28 = vmax.f32 %v11771_v47, %v3664_v34  ;;  %v5249_v49 = vmax.f32 %v5193_v4, 0.0  ;;  %v6185_v20 = vpack.c.bf16 %v5221_v9, %v5221_v9  ;;  %v11775_v40 = vmax.f32 %v10167_v50, %v11774_v31  ;;  %v6727_v34 = vpop.f32.mrb[228].mxu0  ;;  %v6979_v47 = vpop.f32.mrb[228].mxu1 }
 0x2be   : > { %v5194_v15 = vmax.f32 %v11772_v22, %v4672_v53  ;;  %v5164_v58 = vmax.f32 %v11773_v37, %v3656_v21  ;;  %v5247_v10 = vmax.f32 %v5191_v30, 0.0  ;;  %v6183_v4 = vpack.c.bf16 %v5219_v45, %v5219_v45  ;;  %v4676_v35 = vpop.f32.mrb[229].mxu1  ;;  %v11776_v30 = vld [vmem:[#allocation108_spill] sm:$0xff] }
 0x2bf   : > { %v5222_v55 = vmax.f32 %v5166_v28, 0.0  ;;  %v5192_v39 = vmax.f32 %v11775_v40, %v4664_v46  ;;  %v6213_v3 = vpack.c.bf16 %v5249_v49, %v5249_v49  ;;  %5502 = vst.msk [vmem:[%s10496_s4 + $0x8] sm:$0xf] %vm5499_vm3, %v6185_v20  ;;  %v3677_v7 = vadd.f32 %v9555_v52, %v6727_v34  ;;  %v3668_v28 = vpop.f32.mrb[229].mxu0  ;;  %v11777_v46 = vld [vmem:[#allocation113_spill] sm:$0xff]  ;;  %v6980_v37 = vpop.f32.mrb[230].mxu1 }
 0x2c0   : > { %v5250_v8 = vmax.f32 %v5194_v15, 0.0  ;;  %v5220_v23 = vmax.f32 %v5164_v58, 0.0  ;;  %v6211_v56 = vpack.c.bf16 %v5247_v10, %v5247_v10  ;;  %5500 = vst.msk [vmem:[%s10496_s4] sm:$0xf] %vm5499_vm3, %v6183_v4  ;;  %v4685_v53 = vadd.f32 %v9555_v52, %v6979_v47  ;;  %v6728_v9 = vpop.f32.mrb[230].mxu0  ;;  %v11779_v20 = vld [vmem:[#allocation119_spill] sm:$0xff] }
 0x2c1   : > { %v6186_v41 = vpack.c.bf16 %v5222_v55, %v5222_v55  ;;  %v5248_v26 = vmax.f32 %v5192_v39, 0.0  ;;  %5530 = vst.msk [vmem:[%s10496_s4 + $0x78] sm:$0xf] %vm5499_vm3, %v6213_v3  ;;  %v3669_v21 = vadd.f32 %v9555_v52, %v3668_v28  ;;  %v11778_v49 = vmax.f32 %v11776_v30, %v11777_v46  ;;  %v3671_v58 = vpop.f32.mrb[231].mxu0  ;;  %v11780_v10 = vld [vmem:[#allocation133_spill] sm:$0xff]  ;;  %v11782_v40 = vld [vmem:[#allocation47_spill] sm:$0xff] }
 0x2c2   : > { %v6214_v50 = vpack.c.bf16 %v5250_v8, %v5250_v8  ;;  %v6184_v5 = vpack.c.bf16 %v5220_v23, %v5220_v23  ;;  %5528 = vst.msk [vmem:[%s10496_s4 + $0x70] sm:$0xf] %vm5499_vm3, %v6211_v56  ;;  %v4677_v22 = vadd.f32 %v9555_v52, %v4676_v35  ;;  %v3680_v15 = vadd.f32 %v9555_v52, %v6728_v9  ;;  %v11783_v39 = vld [vmem:[#allocation141_spill] sm:$0xff]  ;;  %v4679_v34 = vpop.f32.mrb[231].mxu1  ;;  %v11787_v47 = vld [vmem:[#allocation142_spill] sm:$0xff]  ;;  %v11790_v30 = vld [vmem:[#allocation48_spill] sm:$0xff] }
 0x2c3   : > { %5503 = vst.msk [vmem:[%s10496_s4 + $0xc] sm:$0xf] %vm5499_vm3, %v6186_v41  ;;  %v6212_v51 = vpack.c.bf16 %v5248_v26, %v5248_v26  ;;  %v5169_v45 = vmax.f32 %v11778_v49, %v3677_v7  ;;  %v11781_v55 = vmax.f32 %v11779_v20, %v11780_v10  ;;  %v11784_v3 = vmax.f32 %v11782_v40, %v11783_v39  ;;  %v11786_v7 = vld [vmem:[#allocation109_spill] sm:$0xff]  ;;  %v10560_v39 = vld [vmem:[%s10827_s2] ss:$0 sm:$0xff] }
 0x2c4   : > { %5531 = vst.msk [vmem:[%s10496_s4 + $0x7c] sm:$0xf] %vm5499_vm3, %v6214_v50  ;;  %5501 = vst.msk [vmem:[%s10496_s4 + $0x4] sm:$0xf] %vm5499_vm3, %v6184_v5  ;;  %v4688_v8 = vadd.f32 %v9555_v52, %v6980_v37  ;;  %v3672_v23 = vadd.f32 %v9555_v52, %v3671_v58  ;;  %v11785_v41 = vmax.f32 %v10209_v1, %v9988_v2  ;;  %v11794_v37 = vld [vmem:[#allocation94_spill] sm:$0xff] }
 0x2c5   : > { %v5197_v31 = vmax.f32 %v11781_v55, %v4685_v53  ;;  %v5167_v4 = vmax.f32 %v11784_v3, %v3669_v21  ;;  %5529 = vst.msk [vmem:[%s10496_s4 + $0x74] sm:$0xf] %vm5499_vm3, %v6212_v51  ;;  %v5225_v56 = vmax.f32 %v5169_v45, 0.0  ;;  %v11788_v28 = vmax.f32 %v11786_v7, %v11787_v47  ;;  %v11791_v51 = vld [vmem:[#allocation118_spill] sm:$0xff] }
 0x2c6   : > { %v5195_v26 = vmax.f32 %v11785_v41, %v4677_v22  ;;  %v4680_v5 = vadd.f32 %v9555_v52, %v4679_v34  ;;  %v11789_v35 = vmax.f32 %v10216_v11, %v9992_v60  ;;  %v11792_v46 = vmax.f32 %v11790_v30, %v11791_v51  ;;  %v11793_v22 = vld [vmem:[#allocation66_spill] sm:$0xff]  ;;  %v11799_v51 = vld [vmem:[#allocation135_spill] sm:$0xff] }
 0x2c7   : > { %v5170_v50 = vmax.f32 %v11788_v28, %v3680_v15  ;;  %v5253_v53 = vmax.f32 %v5197_v31, 0.0  ;;  %v5223_v21 = vmax.f32 %v5167_v4, 0.0  ;;  %v6189_v45 = vpack.c.bf16 %v5225_v56, %v5225_v56  ;;  %v6731_v31 = vpop.f32.mrb[232].mxu0  ;;  %v6983_v4 = vpop.f32.mrb[232].mxu1  ;;  %v11796_v28 = vld [vmem:[#allocation110_spill] sm:$0xff] }
 0x2c8   : > { %v5198_v9 = vmax.f32 %v11789_v35, %v4688_v8  ;;  %v5168_v49 = vmax.f32 %v11792_v46, %v3672_v23  ;;  %v5251_v2 = vmax.f32 %v5195_v26, 0.0  ;;  %v11795_v58 = vmax.f32 %v11793_v22, %v11794_v37  ;;  %v3684_v8 = vpop.f32.mrb[233].mxu0  ;;  %v4692_v26 = vpop.f32.mrb[233].mxu1 }
 0x2c9   : > { %v5226_v1 = vmax.f32 %v5170_v50, 0.0  ;;  %v6217_v52 = vpack.c.bf16 %v5253_v53, %v5253_v53  ;;  %v6187_v20 = vpack.c.bf16 %v5223_v21, %v5223_v21  ;;  %5506 = vst.msk [vmem:[%s10496_s4 + $0x18] sm:$0xf] %vm5499_vm3, %v6189_v45  ;;  %v3693_v3 = vadd.f32 %v10560_v39, %v6731_v31  ;;  %v6732_v7 = vpop.f32.mrb[234].mxu0  ;;  %v11797_v50 = vld [vmem:[#allocation143_spill] sm:$0xff]  ;;  %v11801_v45 = vld [vmem:[#allocation49_spill] sm:$0xff] }
 0x2ca   : > { %v5196_v15 = vmax.f32 %v11795_v58, %v4680_v5  ;;  %v5254_v10 = vmax.f32 %v5198_v9, 0.0  ;;  %v5224_v55 = vmax.f32 %v5168_v49, 0.0  ;;  %v6215_v60 = vpack.c.bf16 %v5251_v2, %v5251_v2  ;;  %v6984_v9 = vpop.f32.mrb[234].mxu1  ;;  %v3687_v30 = vpop.f32.mrb[235].mxu0  ;;  %v11802_v2 = vld [vmem:[#allocation62_spill] sm:$0xff]  ;;  %v11806_v31 = vld [vmem:[#allocation63_spill] sm:$0xff] }
 0x2cb   : > { %v6190_v11 = vpack.c.bf16 %v5226_v1, %v5226_v1  ;;  %5534 = vst.msk [vmem:[%s10496_s4 + $0x88] sm:$0xf] %vm5499_vm3, %v6217_v52  ;;  %5504 = vst.msk [vmem:[%s10496_s4 + $0x10] sm:$0xf] %vm5499_vm3, %v6187_v20  ;;  %v4701_v56 = vadd.f32 %v10560_v39, %v6983_v4  ;;  %v3685_v41 = vadd.f32 %v10560_v39, %v3684_v8 }
 0x2cc   : > { %v5252_v40 = vmax.f32 %v5196_v15, 0.0  ;;  %v6218_v23 = vpack.c.bf16 %v5254_v10, %v5254_v10  ;;  %v6188_v34 = vpack.c.bf16 %v5224_v55, %v5224_v55  ;;  %5532 = vst.msk [vmem:[%s10496_s4 + $0x80] sm:$0xf] %vm5499_vm3, %v6215_v60  ;;  %v11798_v5 = vmax.f32 %v11796_v28, %v11797_v50  ;;  %v4695_v15 = vpop.f32.mrb[235].mxu1  ;;  %v11805_v55 = vld [vmem:[#allocation111_spill] sm:$0xff] }
 0x2cd   : > { %5507 = vst.msk [vmem:[%s10496_s4 + $0x1c] sm:$0xf] %vm5499_vm3, %v6190_v11  ;;  %v4693_v21 = vadd.f32 %v10560_v39, %v4692_v26  ;;  %v3696_v35 = vadd.f32 %v10560_v39, %v6732_v7  ;;  %v11800_v46 = vmax.f32 %v10230_v12, %v11799_v51  ;;  %v11803_v1 = vmax.f32 %v11801_v45, %v11802_v2  ;;  %v11812_v7 = vld [vmem:[#allocation51_spill] sm:$0xff] }
 0x2ce   : > { %v6216_v47 = vpack.c.bf16 %v5252_v40, %v5252_v40  ;;  %v5173_v53 = vmax.f32 %v11798_v5, %v3693_v3  ;;  %5535 = vst.msk [vmem:[%s10496_s4 + $0x8c] sm:$0xf] %vm5499_vm3, %v6218_v23  ;;  %5505 = vst.msk [vmem:[%s10496_s4 + $0x14] sm:$0xf] %vm5499_vm3, %v6188_v34  ;;  %v4704_v37 = vadd.f32 %v10560_v39, %v6984_v9  ;;  %v11809_v23 = vld [vmem:[#allocation50_spill] sm:$0xff]  ;;  %v11810_v34 = vld [vmem:[#allocation64_spill] sm:$0xff] }
 0x2cf   : > { %v5201_v49 = vmax.f32 %v11800_v46, %v4701_v56  ;;  %v5171_v22 = vmax.f32 %v11803_v1, %v3685_v41  ;;  %v3688_v58 = vadd.f32 %v10560_v39, %v3687_v30  ;;  %v11804_v20 = vmax.f32 %v10265_v44, %v10009_v36  ;;  %v6735_v9 = vpop.f32.mrb[236].mxu0  ;;  %v6987_v46 = vpop.f32.mrb[236].mxu1 }
 0x2d0   : > { %5533 = vst.msk [vmem:[%s10496_s4 + $0x84] sm:$0xf] %vm5499_vm3, %v6216_v47  ;;  %v5229_v52 = vmax.f32 %v5173_v53, 0.0  ;;  %v11807_v12 = vmax.f32 %v11805_v55, %v11806_v31  ;;  %v4696_v11 = vadd.f32 %v10560_v39, %v4695_v15  ;;  %v11808_v4 = vmax.f32 %v10272_v59, %v10013_v14  ;;  %v11813_v47 = vld [vmem:[#allocation136_spill] sm:$0xff] }
 0x2d1   : > { %v5199_v10 = vmax.f32 %v11804_v20, %v4693_v21  ;;  %v5257_v40 = vmax.f32 %v5201_v49, 0.0  ;;  %v5227_v3 = vmax.f32 %v5171_v22, 0.0  ;;  %v11811_v56 = vmax.f32 %v11809_v23, %v11810_v34  ;;  %v3700_v49 = vpop.f32.mrb[237].mxu0  ;;  %v11816_v20 = vld [vmem:[#allocation65_spill] sm:$0xff]  ;;  %v11822_v34 = vld [vmem:[#allocation31_spill] sm:$0xff] }
 0x2d2   : > { %v5174_v60 = vmax.f32 %v11807_v12, %v3696_v35  ;;  %v5202_v8 = vmax.f32 %v11808_v4, %v4704_v37  ;;  %v6193_v26 = vpack.c.bf16 %v5229_v52, %v5229_v52  ;;  %v11814_v28 = vmax.f32 %v11812_v7, %v11813_v47  ;;  %v4708_v37 = vpop.f32.mrb[237].mxu1  ;;  %v11815_v52 = vld [vmem:[#allocation57_spill] sm:$0xff] }
 0x2d3   : > { %v5172_v41 = vmax.f32 %v11811_v56, %v3688_v58  ;;  %v5255_v36 = vmax.f32 %v5199_v10, 0.0  ;;  %v6221_v5 = vpack.c.bf16 %v5257_v40, %v5257_v40  ;;  %v6191_v53 = vpack.c.bf16 %v5227_v3, %v5227_v3  ;;  %v6736_v58 = vpop.f32.mrb[238].mxu0  ;;  %v11818_v40 = vld [vmem:[#allocation32_spill] sm:$0xff]  ;;  %v11819_v3 = vld [vmem:[#allocation137_spill] sm:$0xff] }
 0x2d4   : > { %v5230_v44 = vmax.f32 %v5174_v60, 0.0  ;;  %v5200_v50 = vmax.f32 %v11814_v28, %v4696_v11  ;;  %v5258_v21 = vmax.f32 %v5202_v8, 0.0  ;;  %5510 = vst.msk [vmem:[%s10496_s4 + $0x28] sm:$0xf] %vm5499_vm3, %v6193_v26  ;;  %v3709_v51 = vadd.f32 %v10560_v39, %v6735_v9  ;;  %v6988_v60 = vpop.f32.mrb[238].mxu1  ;;  %v3703_v11 = vpop.f32.mrb[239].mxu0 }
 0x2d5   : > { %v5228_v35 = vmax.f32 %v5172_v41, 0.0  ;;  %v6219_v14 = vpack.c.bf16 %v5255_v36, %v5255_v36  ;;  %5538 = vst.msk [vmem:[%s10496_s4 + $0x98] sm:$0xf] %vm5499_vm3, %v6221_v5  ;;  %5508 = vst.msk [vmem:[%s10496_s4 + $0x20] sm:$0xf] %vm5499_vm3, %v6191_v53  ;;  %v4717_v1 = vadd.f32 %v10560_v39, %v6987_v46  ;;  %v3701_v22 = vadd.f32 %v10560_v39, %v3700_v49  ;;  %v11821_v23 = vld [vmem:[#allocation121_spill] sm:$0xff] }
 0x2d6   : > { %v6194_v59 = vpack.c.bf16 %v5230_v44, %v5230_v44  ;;  %v5256_v30 = vmax.f32 %v5200_v50, 0.0  ;;  %v6222_v45 = vpack.c.bf16 %v5258_v21, %v5258_v21  ;;  %v11817_v10 = vmax.f32 %v11815_v52, %v11816_v20  ;;  %v4711_v44 = vpop.f32.mrb[239].mxu1  ;;  %v11825_v50 = vld [vmem:[#allocation3_spill] sm:$0xff]  ;;  %v11826_v5 = vld [vmem:[#allocation114_spill] sm:$0xff] }
 0x2d7   : > { %v6192_v2 = vpack.c.bf16 %v5228_v35, %v5228_v35  ;;  %5536 = vst.msk [vmem:[%s10496_s4 + $0x90] sm:$0xf] %vm5499_vm3, %v6219_v14  ;;  %v4709_v31 = vadd.f32 %v10560_v39, %v4708_v37  ;;  %v3712_v12 = vadd.f32 %v10560_v39, %v6736_v58  ;;  %v11820_v4 = vmax.f32 %v11818_v40, %v11819_v3  ;;  %v11830_v46 = vld [vmem:[#allocation30_spill] sm:$0xff] }
 0x2d8   : > { %5511 = vst.msk [vmem:[%s10496_s4 + $0x2c] sm:$0xf] %vm5499_vm3, %v6194_v59  ;;  %v6220_v15 = vpack.c.bf16 %v5256_v30, %v5256_v30  ;;  %v5177_v55 = vmax.f32 %v11817_v10, %v3709_v51  ;;  %5539 = vst.msk [vmem:[%s10496_s4 + $0x9c] sm:$0xf] %vm5499_vm3, %v6222_v45  ;;  %v11823_v56 = vmax.f32 %v11821_v23, %v11822_v34  ;;  %v11829_v51 = vld [vmem:[#allocation7_spill] sm:$0xff] }
 0x2d9   : > { %5509 = vst.msk [vmem:[%s10496_s4 + $0x24] sm:$0xf] %vm5499_vm3, %v6192_v2  ;;  %v5205_v8 = vmax.f32 %v11820_v4, %v4717_v1  ;;  %v4720_v26 = vadd.f32 %v10560_v39, %v6988_v60  ;;  %v3704_v36 = vadd.f32 %v10560_v39, %v3703_v11  ;;  %v11824_v47 = vmax.f32 %v10321_v38, %v10025_v13  ;;  %v11832_v1 = vld [vmem:[#allocation52_spill] sm:$0xff]  ;;  %v6991_v60 = vpop.f32.mrb[240].mxu1 }
 0x2da   : > { %v5175_v41 = vmax.f32 %v11823_v56, %v3701_v22  ;;  %5537 = vst.msk [vmem:[%s10496_s4 + $0x94] sm:$0xf] %vm5499_vm3, %v6220_v15  ;;  %v5233_v7 = vmax.f32 %v5177_v55, 0.0  ;;  %v11827_v53 = vmax.f32 %v11825_v50, %v11826_v5  ;;  %v4712_v35 = vadd.f32 %v10560_v39, %v4711_v44  ;;  %v11833_v22 = vld [vmem:[#allocation138_spill] sm:$0xff]  ;;  %v6739_v55 = vpop.f32.mrb[240].mxu0  ;;  %v4724_v23 = vpop.f32.mrb[241].mxu1 }
 0x2db   : > { %v5203_v28 = vmax.f32 %v11824_v47, %v4709_v31  ;;  %v5261_v9 = vmax.f32 %v5205_v8, 0.0  ;;  %v11828_v59 = vmax.f32 %v10328_v16, %v10029_v48  ;;  %v11831_v49 = vmax.f32 %v11829_v51, %v11830_v46  ;;  %v3716_v11 = vpop.f32.mrb[241].mxu0  ;;  %v11838_v5 = vld [vmem:[#allocation100_spill] sm:$0xff] }
 0x2dc   : > { %v5178_v21 = vmax.f32 %v11827_v53, %v3712_v12  ;;  %v5231_v14 = vmax.f32 %v5175_v41, 0.0  ;;  %v6197_v2 = vpack.c.bf16 %v5233_v7, %v5233_v7  ;;  %v11834_v37 = vmax.f32 %v11832_v1, %v11833_v22  ;;  %v6740_v34 = vpop.f32.mrb[242].mxu0  ;;  %v11835_v41 = vld [vmem:[#allocation20_spill] sm:$0xff]  ;;  %v11839_v53 = vld [vmem:[#allocation83_spill] sm:$0xff] }
 0x2dd   : > { %v5206_v30 = vmax.f32 %v11828_v59, %v4720_v26  ;;  %v5176_v45 = vmax.f32 %v11831_v49, %v3704_v36  ;;  %v5259_v13 = vmax.f32 %v5203_v28, 0.0  ;;  %v6225_v15 = vpack.c.bf16 %v5261_v9, %v5261_v9  ;;  %v11836_v26 = vld [vmem:[#allocation16_spill] sm:$0xff]  ;;  %v6992_v28 = vpop.f32.mrb[242].mxu1  ;;  %v3719_v50 = vpop.f32.mrb[243].mxu0  ;;  %v11841_v9 = vld [vmem:[#allocation22_spill] sm:$0xff] }
 0x2de   : > { %v5234_v38 = vmax.f32 %v5178_v21, 0.0  ;;  %v5204_v58 = vmax.f32 %v11834_v37, %v4712_v35  ;;  %v6195_v52 = vpack.c.bf16 %v5231_v14, %v5231_v14  ;;  %5514 = vst.msk [vmem:[%s10496_s4 + $0x38] sm:$0xf] %vm5499_vm3, %v6197_v2  ;;  %v3725_v12 = vadd.f32 %v10560_v39, %v6739_v55  ;;  %v11842_v14 = vld [vmem:[#allocation115_spill] sm:$0xff]  ;;  %v4727_v49 = vpop.f32.mrb[243].mxu1  ;;  %v11846_v1 = vld [vmem:[#allocation88_spill] sm:$0xff] }
 0x2df   : > { %v5262_v20 = vmax.f32 %v5206_v30, 0.0  ;;  %v5232_v10 = vmax.f32 %v5176_v45, 0.0  ;;  %v6223_v48 = vpack.c.bf16 %v5259_v13, %v5259_v13  ;;  %5542 = vst.msk [vmem:[%s10496_s4 + $0xa8] sm:$0xf] %vm5499_vm3, %v6225_v15  ;;  %v4733_v4 = vadd.f32 %v10560_v39, %v6991_v60  ;;  %v11849_v55 = vld [vmem:[#allocation67_spill] sm:$0xff] }
 0x2e0   : > { %v6198_v16 = vpack.c.bf16 %v5234_v38, %v5234_v38  ;;  %v5260_v31 = vmax.f32 %v5204_v58, 0.0  ;;  %5512 = vst.msk [vmem:[%s10496_s4 + $0x30] sm:$0xf] %vm5499_vm3, %v6195_v52  ;;  %v3717_v8 = vadd.f32 %v10560_v39, %v3716_v11  ;;  %v11837_v36 = vmax.f32 %v11835_v41, %v11836_v26  ;;  %v11845_v38 = vld [vmem:[#allocation26_spill] sm:$0xff]  ;;  %v6995_v41 = vpop.f32.mrb[244].mxu1 }
 0x2e1   : > { %v6226_v40 = vpack.c.bf16 %v5262_v20, %v5262_v20  ;;  %v6196_v3 = vpack.c.bf16 %v5232_v10, %v5232_v10  ;;  %5540 = vst.msk [vmem:[%s10496_s4 + $0xa0] sm:$0xf] %vm5499_vm3, %v6223_v48  ;;  %v4725_v7 = vadd.f32 %v10560_v39, %v4724_v23  ;;  %v3728_v47 = vadd.f32 %v10560_v39, %v6740_v34  ;;  %v11850_v48 = vld [vmem:[#allocation17_spill] sm:$0xff]  ;;  %v6743_v23 = vpop.f32.mrb[244].mxu0 }
 0x2e2   : > { %5515 = vst.msk [vmem:[%s10496_s4 + $0x3c] sm:$0xf] %vm5499_vm3, %v6198_v16  ;;  %v6224_v56 = vpack.c.bf16 %v5260_v31, %v5260_v31  ;;  %v5181_v44 = vmax.f32 %v11837_v36, %v3725_v12  ;;  %v11840_v21 = vmax.f32 %v11838_v5, %v11839_v53  ;;  %v11843_v59 = vmax.f32 %v11841_v9, %v11842_v14  ;;  %v3732_v26 = vpop.f32.mrb[245].mxu0  ;;  %v11854_v5 = vld [vmem:[#allocation18_spill] sm:$0xff] }
 0x2e3   : > { %5543 = vst.msk [vmem:[%s10496_s4 + $0xac] sm:$0xf] %vm5499_vm3, %v6226_v40  ;;  %5513 = vst.msk [vmem:[%s10496_s4 + $0x34] sm:$0xf] %vm5499_vm3, %v6196_v3  ;;  %v4736_v51 = vadd.f32 %v10560_v39, %v6992_v28  ;;  %v3720_v46 = vadd.f32 %v10560_v39, %v3719_v50  ;;  %v11844_v2 = vmax.f32 %v10377_v0, %v10041_v25  ;;  %v11853_v50 = vld [vmem:[#allocation80_spill] sm:$0xff] }
 0x2e4   : > { %v5209_v35 = vmax.f32 %v11840_v21, %v4733_v4  ;;  %v5179_v30 = vmax.f32 %v11843_v59, %v3717_v8  ;;  %5541 = vst.msk [vmem:[%s10496_s4 + $0xa4] sm:$0xf] %vm5499_vm3, %v6224_v56  ;;  %v5237_v45 = vmax.f32 %v5181_v44, 0.0  ;;  %v11847_v22 = vmax.f32 %v11845_v38, %v11846_v1 }
 0x2e5   : > { %v5207_v13 = vmax.f32 %v11844_v2, %v4725_v7  ;;  %v4728_v58 = vadd.f32 %v10560_v39, %v4727_v49  ;;  %v11848_v20 = vmax.f32 %v10384_v42, %v10045_v18  ;;  %v11851_v16 = vmax.f32 %v11849_v55, %v11850_v48  ;;  %v4740_v7 = vpop.f32.mrb[245].mxu1  ;;  %v11858_v49 = vld [vmem:[#allocation82_spill] sm:$0xff] }
 0x2e6   : > { %v5182_v37 = vmax.f32 %v11847_v22, %v3728_v47  ;;  %v5265_v15 = vmax.f32 %v5209_v35, 0.0  ;;  %v5235_v52 = vmax.f32 %v5179_v30, 0.0  ;;  %v6201_v12 = vpack.c.bf16 %v5237_v45, %v5237_v45  ;;  %v6744_v47 = vpop.f32.mrb[246].mxu0  ;;  %v6996_v14 = vpop.f32.mrb[246].mxu1  ;;  %v11856_v30 = vld [vmem:[#allocation107_spill] sm:$0xff] }
 0x2e7   : > { %v5210_v10 = vmax.f32 %v11848_v20, %v4736_v51  ;;  %v5180_v31 = vmax.f32 %v11851_v16, %v3720_v46  ;;  %v5263_v25 = vmax.f32 %v5207_v13, 0.0  ;;  %v11852_v60 = vmax.f32 %v10391_v62, %v10050_v33  ;;  %v3735_v59 = vpop.f32.mrb[247].mxu0  ;;  %v11859_v45 = vld [vmem:[#allocation19_spill] sm:$0xff]  ;;  %v4743_v22 = vpop.f32.mrb[247].mxu1  ;;  %v11863_v20 = vld [vmem:[#allocation33_spill] sm:$0xff] }
 0x2e8   : > { %v5238_v0 = vmax.f32 %v5182_v37, 0.0  ;;  %v6229_v40 = vpack.c.bf16 %v5265_v15, %v5265_v15  ;;  %v6199_v3 = vpack.c.bf16 %v5235_v52, %v5235_v52  ;;  %5518 = vst.msk [vmem:[%s10496_s4 + $0x48] sm:$0xf] %vm5499_vm3, %v6201_v12  ;;  %v3741_v56 = vadd.f32 %v10560_v39, %v6743_v23  ;;  %v11862_v52 = vld [vmem:[#allocation85_spill] sm:$0xff] }
 0x2e9   : > { %v5208_v11 = vmax.f32 %v11852_v60, %v4728_v58  ;;  %v5266_v4 = vmax.f32 %v5210_v10, 0.0  ;;  %v5236_v8 = vmax.f32 %v5180_v31, 0.0  ;;  %v6227_v18 = vpack.c.bf16 %v5263_v25, %v5263_v25  ;;  %v11866_v25 = vld [vmem:[#allocation90_spill] sm:$0xff] }
 0x2ea   : > { %v6202_v42 = vpack.c.bf16 %v5238_v0, %v5238_v0  ;;  %5546 = vst.msk [vmem:[%s10496_s4 + $0xb8] sm:$0xf] %vm5499_vm3, %v6229_v40  ;;  %5516 = vst.msk [vmem:[%s10496_s4 + $0x40] sm:$0xf] %vm5499_vm3, %v6199_v3  ;;  %v4749_v36 = vadd.f32 %v10560_v39, %v6995_v41  ;;  %v3733_v44 = vadd.f32 %v10560_v39, %v3732_v26  ;;  %v11867_v0 = vld [vmem:[#allocation34_spill] sm:$0xff]  ;;  %v6999_v26 = vpop.f32.mrb[248].mxu1 }
 0x2eb   : > { %v5264_v34 = vmax.f32 %v5208_v11, 0.0  ;;  %v6230_v33 = vpack.c.bf16 %v5266_v4, %v5266_v4  ;;  %v6200_v62 = vpack.c.bf16 %v5236_v8, %v5236_v8  ;;  %5544 = vst.msk [vmem:[%s10496_s4 + $0xb0] sm:$0xf] %vm5499_vm3, %v6227_v18  ;;  %v11855_v53 = vmax.f32 %v11853_v50, %v11854_v5  ;;  %v11871_v50 = vld [vmem:[#allocation116_spill] sm:$0xff] }
 0x2ec   : > { %5519 = vst.msk [vmem:[%s10496_s4 + $0x4c] sm:$0xf] %vm5499_vm3, %v6202_v42  ;;  %v4741_v35 = vadd.f32 %v10560_v39, %v4740_v7  ;;  %v3744_v9 = vadd.f32 %v10560_v39, %v6744_v47  ;;  %v11857_v51 = vmax.f32 %v10398_v19, %v11856_v30  ;;  %v11860_v2 = vmax.f32 %v11858_v49, %v11859_v45  ;;  %v11876_v49 = vld [vmem:[#allocation35_spill] sm:$0xff] }
 0x2ed   : > { %v6228_v28 = vpack.c.bf16 %v5264_v34, %v5264_v34  ;;  %v5185_v21 = vmax.f32 %v11855_v53, %v3741_v56  ;;  %5547 = vst.msk [vmem:[%s10496_s4 + $0xbc] sm:$0xf] %vm5499_vm3, %v6230_v33  ;;  %5517 = vst.msk [vmem:[%s10496_s4 + $0x44] sm:$0xf] %vm5499_vm3, %v6200_v62  ;;  %v4752_v38 = vadd.f32 %v10560_v39, %v6996_v14  ;;  %v6747_v34 = vpop.f32.mrb[248].mxu0 }
 0x2ee   : > { %v5213_v46 = vmax.f32 %v11857_v51, %v4749_v36  ;;  %v5183_v13 = vmax.f32 %v11860_v2, %v3733_v44  ;;  %v3736_v1 = vadd.f32 %v10560_v39, %v3735_v59  ;;  %v11861_v58 = vmax.f32 %v10435_v32, %v11762_v6  ;;  %v3748_v33 = vpop.f32.mrb[249].mxu0  ;;  %v4756_v44 = vpop.f32.mrb[249].mxu1 }
 0x2ef   : > { %5545 = vst.msk [vmem:[%s10496_s4 + $0xb4] sm:$0xf] %vm5499_vm3, %v6228_v28  ;;  %v5241_v37 = vmax.f32 %v5185_v21, 0.0  ;;  %v11864_v19 = vmax.f32 %v11862_v52, %v11863_v20  ;;  %v4744_v55 = vadd.f32 %v10560_v39, %v4743_v22  ;;  %v11865_v31 = vmax.f32 %v10444_v29, %v10085_v54  ;;  %v6748_v7 = vpop.f32.mrb[250].mxu0  ;;  %v11870_v28 = vld [vmem:[#allocation103_spill] sm:$0xff]  ;;  %v7000_v59 = vpop.f32.mrb[250].mxu1 }
 0x2f0   : > { %v5211_v15 = vmax.f32 %v11861_v58, %v4741_v35  ;;  %v5269_v48 = vmax.f32 %v5213_v46, 0.0  ;;  %v5239_v16 = vmax.f32 %v5183_v13, 0.0  ;;  %v11868_v60 = vmax.f32 %v11866_v25, %v11867_v0  ;;  %v11873_v35 = vld [vmem:[#allocation129_spill] sm:$0xff]  ;;  %v3751_v30 = vpop.f32.mrb[251].mxu0 }
 0x2f1   : > { %v5186_v10 = vmax.f32 %v11864_v19, %v3744_v9  ;;  %v5214_v12 = vmax.f32 %v11865_v31, %v4752_v38  ;;  %v6205_v40 = vpack.c.bf16 %v5241_v37, %v5241_v37  ;;  %v11869_v3 = vmax.f32 %v10454_v61, %v10093_v43  ;;  %v11879_v37 = vld [vmem:[#allocation130_spill] sm:$0xff]  ;;  %v11880_v58 = vld [vmem:[#allocation81_spill] sm:$0xff] }
 0x2f2   : > { %v5184_v11 = vmax.f32 %v11868_v60, %v3736_v1  ;;  %v5267_v32 = vmax.f32 %v5211_v15, 0.0  ;;  %v6233_v8 = vpack.c.bf16 %v5269_v48, %v5269_v48  ;;  %v6203_v23 = vpack.c.bf16 %v5239_v16, %v5239_v16  ;;  %v11878_v1 = vld [vmem:[#allocation140_spill] sm:$0xff]  ;;  %v11881_v15 = vld [vmem:[#allocation78_spill] sm:$0xff]  ;;  %v11886_v25 = vld [vmem:[#allocation89_spill] sm:$0xff] }
 0x2f3   : > { %v5242_v6 = vmax.f32 %v5186_v10, 0.0  ;;  %v5212_v4 = vmax.f32 %v11869_v3, %v4744_v55  ;;  %v5270_v18 = vmax.f32 %v5214_v12, 0.0  ;;  %5522 = vst.msk [vmem:[%s10496_s4 + $0x58] sm:$0xf] %vm5499_vm3, %v6205_v40  ;;  %v3757_v41 = vadd.f32 %v10560_v39, %v6747_v34  ;;  %v11883_v19 = vld [vmem:[#allocation134_spill] sm:$0xff]  ;;  %v11884_v10 = vld [vmem:[#allocation53_spill] sm:$0xff] }
 0x2f4   : > { %v5240_v42 = vmax.f32 %v5184_v11, 0.0  ;;  %v6231_v54 = vpack.c.bf16 %v5267_v32, %v5267_v32  ;;  %5550 = vst.msk [vmem:[%s10496_s4 + $0xc8] sm:$0xf] %vm5499_vm3, %v6233_v8  ;;  %5520 = vst.msk [vmem:[%s10496_s4 + $0x50] sm:$0xf] %vm5499_vm3, %v6203_v23  ;;  %v4765_v62 = vadd.f32 %v10560_v39, %v6999_v26  ;;  %v3749_v36 = vadd.f32 %v10560_v39, %v3748_v33  ;;  %v11887_v60 = vld [vmem:[#allocation104_spill] sm:$0xff] }
 0x2f5   : > { %v6206_v29 = vpack.c.bf16 %v5242_v6, %v5242_v6  ;;  %v5268_v56 = vmax.f32 %v5212_v4, 0.0  ;;  %v6234_v43 = vpack.c.bf16 %v5270_v18, %v5270_v18  ;;  %v11872_v5 = vmax.f32 %v11870_v28, %v11871_v50  ;;  %v11888_v11 = vld [vmem:[#allocation96_spill] sm:$0xff]  ;;  %v11890_v8 = vld [vmem:[#allocation131_spill] sm:$0xff]  ;;  %v11891_v23 = vld [vmem:[#allocation21_spill] sm:$0xff] }
 0x2f6   : > { %v6204_v61 = vpack.c.bf16 %v5240_v42, %v5240_v42  ;;  %5548 = vst.msk [vmem:[%s10496_s4 + $0xc0] sm:$0xf] %vm5499_vm3, %v6231_v54  ;;  %v4757_v21 = vadd.f32 %v10560_v39, %v4756_v44  ;;  %v11874_v9 = vmax.f32 %v10429_v63, %v11759_v17  ;;  %v11875_v51 = vmax.f32 %v10462_v57, %v10101_v27  ;;  %v4759_v63 = vpop.f32.mrb[251].mxu1  ;;  %v11892_v18 = vld [vmem:[#allocation79_spill] sm:$0xff] }
 0x2f7   : > { %5523 = vst.msk [vmem:[%s10496_s4 + $0x5c] sm:$0xf] %vm5499_vm3, %v6206_v29  ;;  %v6232_v47 = vpack.c.bf16 %v5268_v56, %v5268_v56  ;;  %v5189_v53 = vmax.f32 %v11872_v5, %v3757_v41  ;;  %5551 = vst.msk [vmem:[%s10496_s4 + $0xcc] sm:$0xf] %vm5499_vm3, %v6234_v43  ;;  %v11877_v45 = vmax.f32 %v9964_v24, %v11876_v49  ;;  %v11894_v41 = vld [vmem:[#allocation54_spill] sm:$0xff] }
 0x2f8   : > { %v5103_v14 = vmax.f32 %v11874_v9, %v11873_v35  ;;  %5521 = vst.msk [vmem:[%s10496_s4 + $0x54] sm:$0xf] %vm5499_vm3, %v6204_v61  ;;  %v5217_v46 = vmax.f32 %v11875_v51, %v4765_v62  ;;  %v3760_v13 = vadd.f32 %v10560_v39, %v6748_v7  ;;  %v4768_v38 = vadd.f32 %v10560_v39, %v7000_v59 }
 0x2f9   : > { %v5187_v2 = vmax.f32 %v11877_v45, %v3749_v36  ;;  %5549 = vst.msk [vmem:[%s10496_s4 + $0xc4] sm:$0xf] %vm5499_vm3, %v6232_v47  ;;  %v5245_v17 = vmax.f32 %v5189_v53, 0.0  ;;  %v11882_v27 = vmax.f32 %v11880_v58, %v11881_v15  ;;  %v3752_v52 = vadd.f32 %v10560_v39, %v3751_v30 }
 0x2fa   : > { %v5159_v22 = vmax.f32 %v5103_v14, %v11878_v1  ;;  %v5273_v24 = vmax.f32 %v5217_v46, 0.0  ;;  %v11885_v55 = vmax.f32 %v11883_v19, %v11884_v10  ;;  %v4760_v16 = vadd.f32 %v10560_v39, %v4759_v63 }
 0x2fb   : > { %v5106_v57 = vmax.f32 %v11882_v27, %v11879_v37  ;;  %v5243_v20 = vmax.f32 %v5187_v2, 0.0  ;;  %v6209_v31 = vpack.c.bf16 %v5245_v17, %v5245_v17  ;;  %v11889_v40 = vmax.f32 %v11887_v60, %v11888_v11 }
 0x2fc   : > { %v5190_v48 = vmax.f32 %v11885_v55, %v3760_v13  ;;  %v5215_v12 = vmax.f32 %v5159_v22, %v4757_v21  ;;  %v6237_v6 = vpack.c.bf16 %v5273_v24, %v5273_v24  ;;  %v11893_v42 = vmax.f32 %v11891_v23, %v11892_v18 }
 0x2fd   : > { %v5162_v0 = vmax.f32 %v5106_v57, %v11886_v25  ;;  %v5188_v32 = vmax.f32 %v11889_v40, %v3752_v52  ;;  %v6207_v3 = vpack.c.bf16 %v5243_v20, %v5243_v20  ;;  %5526 = vst.msk [vmem:[%s10496_s4 + $0x68] sm:$0xf] %vm5499_vm3, %v6209_v31 }
 0x2fe   : > { %v5246_v4 = vmax.f32 %v5190_v48, 0.0  ;;  %v5104_v34 = vmax.f32 %v11893_v42, %v11890_v8  ;;  %v5271_v39 = vmax.f32 %v5215_v12, 0.0  ;;  %5554 = vst.msk [vmem:[%s10496_s4 + $0xd8] sm:$0xf] %vm5499_vm3, %v6237_v6 }
 0x2ff   : > { %v5218_v54 = vmax.f32 %v5162_v0, %v4768_v38  ;;  %v5244_v29 = vmax.f32 %v5188_v32, 0.0  ;;  %5524 = vst.msk [vmem:[%s10496_s4 + $0x60] sm:$0xf] %vm5499_vm3, %v6207_v3 }
 0x300   : > { %v6210_v56 = vpack.c.bf16 %v5246_v4, %v5246_v4  ;;  %v5160_v26 = vmax.f32 %v5104_v34, %v11894_v41  ;;  %v6235_v33 = vpack.c.bf16 %v5271_v39, %v5271_v39 }
 0x301   : > { %v5274_v43 = vmax.f32 %v5218_v54, 0.0  ;;  %v6208_v61 = vpack.c.bf16 %v5244_v29, %v5244_v29 }
 0x302   : > { %5527 = vst.msk [vmem:[%s10496_s4 + $0x6c] sm:$0xf] %vm5499_vm3, %v6210_v56  ;;  %v5216_v62 = vmax.f32 %v5160_v26, %v4760_v16  ;;  %5552 = vst.msk [vmem:[%s10496_s4 + $0xd0] sm:$0xf] %vm5499_vm3, %v6235_v33 }
 0x303   : > { %v6238_v36 = vpack.c.bf16 %v5274_v43, %v5274_v43  ;;  %5525 = vst.msk [vmem:[%s10496_s4 + $0x64] sm:$0xf] %vm5499_vm3, %v6208_v61 }
 0x304   : > { %v5272_v44 = vmax.f32 %v5216_v62, 0.0 }
 0x305   : > { %5555 = vst.msk [vmem:[%s10496_s4 + $0xdc] sm:$0xf] %vm5499_vm3, %v6238_v36 }
 0x306   : > { %v6236_v7 = vpack.c.bf16 %v5272_v44, %v5272_v44 }
 0x308   : > { %5553 = vst.msk [vmem:[%s10496_s4 + $0xd4] sm:$0xf] %vm5499_vm3, %v6236_v7 }
 0x309 PF: > { %s13_s12 = sadd.s32 1, %s7279_s12  }
 0x30a   : > { %p10_p4 = scmp.ge.s32.totalorder %s13_s12, 4  }
 0x30c   :  { %12 = sbr.rel (!%p10_p4) target bundleno = 1 (0x1), region = 62 }

// kernel: _lambda_.5
= control target key start
LH: loop header
LB: loop body
LE: loop exit
PB: predicated region body
PF: predicated region fallthrough
CT: control target
= control target key end

     0   :  { %s2745_s12 = smov 0   ;;  %s3324_s0 = inlined_call_operand.vmem [shape: bf16[2,576,512], index: 0, kind: input, shape index: {}]   ;;  %s3325_s1 = inlined_call_operand.vmem [shape: bf16[512,32], index: 1, kind: input, shape index: {}]   ;;  %s3326_s2 = inlined_call_operand.vmem [shape: f32[1,32], index: 2, kind: input, shape index: {}]   ;;  %s3327_s3 = inlined_call_operand.vmem [shape: bf16[2,64,32], index: 3, kind: output, shape index: {}]  }
   0x1 LB: > { %s2109_s13 = sadd.s32 4294967295, %s2722_s12   ;;  %p2113_p0 = scmp.ge.s32.totalorder %s2722_s12, 1  ;;  %s2722_s12 = sphi %s2745_s12, %s13_s12  }
   0x2   : > { %p137_p1 = scmp.lt.s32.totalorder %s2722_s12, 3 }
   0x4   : > { %p138_p2 = pnand %p2113_p0, %p137_p1 }
   0x5   : > { %v2467_v0 = vld [vmem:[%s3325_s1] sm:$0xff] (!%p138_p2)   ;;  %v2724_v1 = vmov (!%p138_p2), 0   ;;  %v2469_v3 = vld [vmem:[%s3325_s1 + $0x8] sm:$0xff] (!%p138_p2)   ;;  %v2471_v5 = vld [vmem:[%s3325_s1 + $0x10] sm:$0xff] (!%p138_p2)   ;;  %p161_p3 = scmp.lt.s32.totalorder (!%p138_p2), %s2109_s13, 1  ;;  %vm2045_vm0 = vcmask (!%p138_p2), 257024  }
   0x6   : > { %141 = sbr.rel (%p138_p2) target bundleno = 575 (0x23f), region = 32  ;;  %1299 = vmatprep.subr.bf16.mxu1 (!%p138_p2), %v2724_v1  ;;  %1620 = vmatprep.subr.bf16.mxu0 (!%p138_p2), %v2724_v1  ;;  %v2468_v2 = vld [vmem:[%s3325_s1 + $0x80] sm:$0xff] (!%p138_p2)   ;;  %v2470_v4 = vld [vmem:[%s3325_s1 + $0x88] sm:$0xff] (!%p138_p2)   ;;  %v2472_v6 = vld [vmem:[%s3325_s1 + $0x90] sm:$0xff] (!%p138_p2)  }
   0x7   : > { %1300 = vmatpush1.bf16.msra.mxu1 (!%p138_p2), %v2467_v0  ;;  %1621 = vmatpush1.bf16.msra.mxu0 (!%p138_p2), %v2468_v2  ;;  %v2473_v7 = vld [vmem:[%s3325_s1 + $0x18] sm:$0xff] (!%p138_p2)   ;;  %v2475_v9 = vld [vmem:[%s3325_s1 + $0x20] sm:$0xff] (!%p138_p2)   ;;  %v2477_v11 = vld [vmem:[%s3325_s1 + $0x28] sm:$0xff] (!%p138_p2)  }
   0x8   : > { %1301 = vmatprep.subr.bf16.mxu1 (!%p138_p2), %v2724_v1  ;;  %1622 = vmatprep.subr.bf16.mxu0 (!%p138_p2), %v2724_v1  ;;  %v2474_v8 = vld [vmem:[%s3325_s1 + $0x98] sm:$0xff] (!%p138_p2)   ;;  %v2476_v10 = vld [vmem:[%s3325_s1 + $0xa0] sm:$0xff] (!%p138_p2)   ;;  %v2478_v12 = vld [vmem:[%s3325_s1 + $0xa8] sm:$0xff] (!%p138_p2)  }
   0x9   : > { %v2479_v13 = vld [vmem:[%s3325_s1 + $0x30] sm:$0xff] (!%p138_p2)   ;;  %v2481_v15 = vld [vmem:[%s3325_s1 + $0x38] sm:$0xff] (!%p138_p2)   ;;  %v2483_v17 = vld [vmem:[%s3325_s1 + $0x40] sm:$0xff] (!%p138_p2)  }
   0xa   : > { %v2480_v14 = vld [vmem:[%s3325_s1 + $0xb0] sm:$0xff] (!%p138_p2)   ;;  %v2482_v16 = vld [vmem:[%s3325_s1 + $0xb8] sm:$0xff] (!%p138_p2)   ;;  %v2484_v18 = vld [vmem:[%s3325_s1 + $0xc0] sm:$0xff] (!%p138_p2)  }
   0xb   : > { %1302 = vmatpush1.bf16.msra.mxu1 (!%p138_p2), %v2469_v3  ;;  %1623 = vmatpush1.bf16.msra.mxu0 (!%p138_p2), %v2470_v4  ;;  %v2485_v20 = vld [vmem:[%s3325_s1 + $0x48] sm:$0xff] (!%p138_p2)   ;;  %v2487_v23 = vld [vmem:[%s3325_s1 + $0x50] sm:$0xff] (!%p138_p2)   ;;  %v2489_v25 = vld [vmem:[%s3325_s1 + $0x58] sm:$0xff] (!%p138_p2)  }
   0xc   : > { %1303 = vmatprep.subr.bf16.mxu1 (!%p138_p2), %v2724_v1  ;;  %1624 = vmatprep.subr.bf16.mxu0 (!%p138_p2), %v2724_v1  ;;  %v2486_v22 = vld [vmem:[%s3325_s1 + $0xc8] sm:$0xff] (!%p138_p2)   ;;  %v2488_v24 = vld [vmem:[%s3325_s1 + $0xd0] sm:$0xff] (!%p138_p2)   ;;  %v2490_v26 = vld [vmem:[%s3325_s1 + $0xd8] sm:$0xff] (!%p138_p2)  }
   0xd   : > { %s3329_s13 = smov (!%p161_p3, %s2109_s13), 1  ;;  %v2491_v27 = vld [vmem:[%s3325_s1 + $0x60] sm:$0xff]   ;;  %v2493_v29 = vld [vmem:[%s3325_s1 + $0x68] sm:$0xff]   ;;  %v2495_v31 = vld [vmem:[%s3325_s1 + $0x70] sm:$0xff]  }
   0xe   : > { %s2457_s19 = smul.u32 1152, %s3329_s13  ;;  %v2492_v28 = vld [vmem:[%s3325_s1 + $0xe0] sm:$0xff]   ;;  %v2494_v30 = vld [vmem:[%s3325_s1 + $0xe8] sm:$0xff]   ;;  %v2496_v32 = vld [vmem:[%s3325_s1 + $0xf0] sm:$0xff]   ;;  %s2304_s9 = sshll.u32 %s3329_s13, 5 }
   0xf   : > { %1304 = vmatpush1.bf16.msra.mxu1 %v2471_v5  ;;  %1625 = vmatpush1.bf16.msra.mxu0 %v2472_v6  ;;  %v2497_v33 = vld [vmem:[%s3325_s1 + $0x78] sm:$0xff]   ;;  %s3279_s14 = scalar_lea.vmem %s3327_s3, %s2304_s9 }
  0x10   : > { %1305 = vmatprep.subr.bf16.mxu1 %v2724_v1  ;;  %1626 = vmatprep.subr.bf16.mxu0 %v2724_v1  ;;  %s2830_s26 = scalar_lea.vmem %s3324_s0, %s2457_s19  ;;  %v2498_v34 = vld [vmem:[%s3325_s1 + $0xf8] sm:$0xff]  }
  0x11   : > { %v2501_v19 = vld [vmem:[%s2830_s26 + $0x4] ss:$16 sps:$4 sm:$0xff]   ;;  %v2504_v21 = vld [vmem:[%s2830_s26 + $0xc] ss:$16 sps:$4 sm:$0xff]   ;;  %v2499_v35 = vld [vmem:[%s2830_s26] ss:$16 sps:$4 sm:$0xff]  }
  0x12   : > { %1331 = vmatprep.mubr.bf16.mxu1 %v2501_v19  ;;  %1652 = vmatprep.mubr.bf16.mxu0 %v2504_v21  ;;  %v2502_v36 = vld [vmem:[%s2830_s26 + $0x8] ss:$16 sps:$4 sm:$0xff]   ;;  %v2505_v37 = vld [vmem:[%s2830_s26 + $0x24] ss:$16 sps:$4 sm:$0xff]   ;;  %v2507_v38 = vld [vmem:[%s2830_s26 + $0x2c] ss:$16 sps:$4 sm:$0xff]  }
  0x13   : > { %1306 = vmatpush1.bf16.msra.mxu1 %v2473_v7  ;;  %1627 = vmatpush1.bf16.msra.mxu0 %v2474_v8  ;;  %v2509_v39 = vld [vmem:[%s2830_s26 + $0x20] ss:$16 sps:$4 sm:$0xff]   ;;  %v2510_v40 = vld [vmem:[%s2830_s26 + $0x28] ss:$16 sps:$4 sm:$0xff]   ;;  %v2511_v41 = vld [vmem:[%s2830_s26 + $0x44] ss:$16 sps:$4 sm:$0xff]  }
  0x14   : > { %1307 = vmatprep.subr.bf16.mxu1 %v2724_v1  ;;  %1628 = vmatprep.subr.bf16.mxu0 %v2724_v1  ;;  %v2513_v42 = vld [vmem:[%s2830_s26 + $0x4c] ss:$16 sps:$4 sm:$0xff]   ;;  %v2515_v43 = vld [vmem:[%s2830_s26 + $0x40] ss:$16 sps:$4 sm:$0xff]   ;;  %v2516_v44 = vld [vmem:[%s2830_s26 + $0x48] ss:$16 sps:$4 sm:$0xff]  }
  0x15   : > { %v2517_v45 = vld [vmem:[%s2830_s26 + $0x64] ss:$16 sps:$4 sm:$0xff]   ;;  %v2519_v46 = vld [vmem:[%s2830_s26 + $0x6c] ss:$16 sps:$4 sm:$0xff]   ;;  %v2521_v47 = vld [vmem:[%s2830_s26 + $0x60] ss:$16 sps:$4 sm:$0xff]  }
  0x16   : > { %v2522_v48 = vld [vmem:[%s2830_s26 + $0x68] ss:$16 sps:$4 sm:$0xff]   ;;  %v2523_v49 = vld [vmem:[%s2830_s26 + $0x84] ss:$16 sps:$4 sm:$0xff]   ;;  %v2525_v50 = vld [vmem:[%s2830_s26 + $0x8c] ss:$16 sps:$4 sm:$0xff]  }
  0x17   : > { %1308 = vmatpush1.bf16.msra.mxu1 %v2475_v9  ;;  %1629 = vmatpush1.bf16.msra.mxu0 %v2476_v10  ;;  %v2527_v51 = vld [vmem:[%s2830_s26 + $0x80] ss:$16 sps:$4 sm:$0xff]   ;;  %v2528_v52 = vld [vmem:[%s2830_s26 + $0x88] ss:$16 sps:$4 sm:$0xff]   ;;  %v2529_v53 = vld [vmem:[%s2830_s26 + $0xa4] ss:$16 sps:$4 sm:$0xff]  }
  0x18   : > { %1309 = vmatprep.subr.bf16.mxu1 %v2724_v1  ;;  %1630 = vmatprep.subr.bf16.mxu0 %v2724_v1  ;;  %v2531_v54 = vld [vmem:[%s2830_s26 + $0xac] ss:$16 sps:$4 sm:$0xff]   ;;  %v2533_v55 = vld [vmem:[%s2830_s26 + $0xa0] ss:$16 sps:$4 sm:$0xff]   ;;  %v2534_v56 = vld [vmem:[%s2830_s26 + $0xa8] ss:$16 sps:$4 sm:$0xff]  }
  0x19   : > { %v2535_v57 = vld [vmem:[%s2830_s26 + $0xc4] ss:$16 sps:$4 sm:$0xff]   ;;  %v2537_v58 = vld [vmem:[%s2830_s26 + $0xcc] ss:$16 sps:$4 sm:$0xff]   ;;  %v2539_v59 = vld [vmem:[%s2830_s26 + $0xc0] ss:$16 sps:$4 sm:$0xff]  }
  0x1a   : > { %v2540_v60 = vld [vmem:[%s2830_s26 + $0xc8] ss:$16 sps:$4 sm:$0xff]   ;;  %v2541_v61 = vld [vmem:[%s2830_s26 + $0xe4] ss:$16 sps:$4 sm:$0xff]   ;;  %v2543_v62 = vld [vmem:[%s2830_s26 + $0xec] ss:$16 sps:$4 sm:$0xff]  }
  0x1b   : > { %1310 = vmatpush1.bf16.msra.mxu1 %v2477_v11  ;;  %1631 = vmatpush1.bf16.msra.mxu0 %v2478_v12  ;;  %v2545_v63 = vld [vmem:[%s2830_s26 + $0xe0] ss:$16 sps:$4 sm:$0xff]   ;;  %v2546_v0 = vld [vmem:[%s2830_s26 + $0xe8] ss:$16 sps:$4 sm:$0xff]   ;;  %v2549_v2 = vld [vmem:[%s2830_s26 + $0x10c] ss:$16 sps:$4 sm:$0xff]  }
  0x1c   : > { %1311 = vmatprep.subr.bf16.mxu1 %v2724_v1  ;;  %1632 = vmatprep.subr.bf16.mxu0 %v2724_v1  ;;  %v2551_v3 = vld [vmem:[%s2830_s26 + $0x100] ss:$16 sps:$4 sm:$0xff]   ;;  %v2552_v4 = vld [vmem:[%s2830_s26 + $0x108] ss:$16 sps:$4 sm:$0xff]   ;;  %v2553_v5 = vld [vmem:[%s2830_s26 + $0x124] ss:$16 sps:$4 sm:$0xff]  }
  0x1d   : > { %v2555_v6 = vld [vmem:[%s2830_s26 + $0x12c] ss:$16 sps:$4 sm:$0xff]   ;;  %v2557_v7 = vld [vmem:[%s2830_s26 + $0x120] ss:$16 sps:$4 sm:$0xff]   ;;  %v2558_v8 = vld [vmem:[%s2830_s26 + $0x128] ss:$16 sps:$4 sm:$0xff]  }
  0x1e   : > { %v2559_v9 = vld [vmem:[%s2830_s26 + $0x144] ss:$16 sps:$4 sm:$0xff]   ;;  %v2561_v10 = vld [vmem:[%s2830_s26 + $0x14c] ss:$16 sps:$4 sm:$0xff]   ;;  %v2563_v11 = vld [vmem:[%s2830_s26 + $0x140] ss:$16 sps:$4 sm:$0xff]  }
  0x1f   : > { %1312 = vmatpush1.bf16.msra.mxu1 %v2479_v13  ;;  %1633 = vmatpush1.bf16.msra.mxu0 %v2480_v14  ;;  %v2564_v12 = vld [vmem:[%s2830_s26 + $0x148] ss:$16 sps:$4 sm:$0xff]   ;;  %v2565_v13 = vld [vmem:[%s2830_s26 + $0x164] ss:$16 sps:$4 sm:$0xff]   ;;  %v2567_v14 = vld [vmem:[%s2830_s26 + $0x16c] ss:$16 sps:$4 sm:$0xff]  }
  0x20   : > { %1313 = vmatprep.subr.bf16.mxu1 %v2724_v1  ;;  %1634 = vmatprep.subr.bf16.mxu0 %v2724_v1  ;;  %v2575_v19 = vld [vmem:[%s2830_s26 + $0x180] ss:$16 sps:$4 sm:$0xff]   ;;  %v2577_v21 = vld [vmem:[%s2830_s26 + $0x1a4] ss:$16 sps:$4 sm:$0xff]  }
  0x23   : > { %1314 = vmatpush1.bf16.msra.mxu1 %v2481_v15  ;;  %1635 = vmatpush1.bf16.msra.mxu0 %v2482_v16  ;;  %v2569_v15 = vld [vmem:[%s2830_s26 + $0x160] ss:$16 sps:$4 sm:$0xff]   ;;  %v2570_v16 = vld [vmem:[%s2830_s26 + $0x168] ss:$16 sps:$4 sm:$0xff]  }
  0x24   : > { %1315 = vmatprep.subr.bf16.mxu1 %v2724_v1  ;;  %1636 = vmatprep.subr.bf16.mxu0 %v2724_v1 }
  0x27   : > { %1316 = vmatpush1.bf16.msra.mxu1 %v2483_v17  ;;  %1637 = vmatpush1.bf16.msra.mxu0 %v2484_v18  ;;  %v2571_v17 = vld [vmem:[%s2830_s26 + $0x184] ss:$16 sps:$4 sm:$0xff]   ;;  %v2573_v18 = vld [vmem:[%s2830_s26 + $0x18c] ss:$16 sps:$4 sm:$0xff]  }
  0x28   : > { %1317 = vmatprep.subr.bf16.mxu1 %v2724_v1  ;;  %1638 = vmatprep.subr.bf16.mxu0 %v2724_v1 }
  0x2b   : > { %1318 = vmatpush1.bf16.msra.mxu1 %v2485_v20  ;;  %1639 = vmatpush1.bf16.msra.mxu0 %v2486_v22  ;;  %v2576_v20 = vld [vmem:[%s2830_s26 + $0x188] ss:$16 sps:$4 sm:$0xff]   ;;  %v2579_v22 = vld [vmem:[%s2830_s26 + $0x1ac] ss:$16 sps:$4 sm:$0xff]  }
  0x2c   : > { %1319 = vmatprep.subr.bf16.mxu1 %v2724_v1  ;;  %1640 = vmatprep.subr.bf16.mxu0 %v2724_v1 }
  0x2f   : > { %1320 = vmatpush1.bf16.msra.mxu1 %v2487_v23  ;;  %1641 = vmatpush1.bf16.msra.mxu0 %v2488_v24  ;;  %v2581_v23 = vld [vmem:[%s2830_s26 + $0x1a0] ss:$16 sps:$4 sm:$0xff]   ;;  %v2582_v24 = vld [vmem:[%s2830_s26 + $0x1a8] ss:$16 sps:$4 sm:$0xff]  }
  0x30   : > { %1321 = vmatprep.subr.bf16.mxu1 %v2724_v1  ;;  %1642 = vmatprep.subr.bf16.mxu0 %v2724_v1 }
  0x33   : > { %1322 = vmatpush1.bf16.msra.mxu1 %v2489_v25  ;;  %1643 = vmatpush1.bf16.msra.mxu0 %v2490_v26  ;;  %v2583_v25 = vld [vmem:[%s2830_s26 + $0x1c4] ss:$16 sps:$4 sm:$0xff]   ;;  %v2585_v26 = vld [vmem:[%s2830_s26 + $0x1cc] ss:$16 sps:$4 sm:$0xff]  }
  0x34   : > { %1323 = vmatprep.subr.bf16.mxu1 %v2724_v1  ;;  %1644 = vmatprep.subr.bf16.mxu0 %v2724_v1 }
  0x37   : > { %1324 = vmatpush1.bf16.msra.mxu1 %v2491_v27  ;;  %1645 = vmatpush1.bf16.msra.mxu0 %v2492_v28  ;;  %v2587_v27 = vld [vmem:[%s2830_s26 + $0x1c0] ss:$16 sps:$4 sm:$0xff]   ;;  %v2588_v28 = vld [vmem:[%s2830_s26 + $0x1c8] ss:$16 sps:$4 sm:$0xff]  }
  0x38   : > { %1325 = vmatprep.subr.bf16.mxu1 %v2724_v1  ;;  %1646 = vmatprep.subr.bf16.mxu0 %v2724_v1 }
  0x3b   : > { %1326 = vmatpush1.bf16.msra.mxu1 %v2493_v29  ;;  %1647 = vmatpush1.bf16.msra.mxu0 %v2494_v30  ;;  %v2589_v29 = vld [vmem:[%s2830_s26 + $0x1e4] ss:$16 sps:$4 sm:$0xff]   ;;  %v2591_v30 = vld [vmem:[%s2830_s26 + $0x1ec] ss:$16 sps:$4 sm:$0xff]  }
  0x3c   : > { %1327 = vmatprep.subr.bf16.mxu1 %v2724_v1  ;;  %1648 = vmatprep.subr.bf16.mxu0 %v2724_v1 }
  0x3f   : > { %1328 = vmatpush1.bf16.msra.mxu1 %v2495_v31  ;;  %1649 = vmatpush1.bf16.msra.mxu0 %v2496_v32  ;;  %v2593_v31 = vld [vmem:[%s2830_s26 + $0x1e0] ss:$16 sps:$4 sm:$0xff]   ;;  %v2594_v32 = vld [vmem:[%s2830_s26 + $0x1e8] ss:$16 sps:$4 sm:$0xff]  }
  0x40   : > { %1329 = vmatprep.subr.bf16.mxu1 %v2724_v1  ;;  %1650 = vmatprep.subr.bf16.mxu0 %v2724_v1  ;;  %v2547_v1 = vld [vmem:[%s2830_s26 + $0x104] ss:$16 sps:$4 sm:$0xff]  }
  0x43   : > { %1330 = vmatpush1.bf16.msra.mxu1 %v2497_v33  ;;  %1651 = vmatpush1.bf16.msra.mxu0 %v2498_v34  ;;  %v2595_v33 = vld [vmem:[%s2830_s26 + $0x204] ss:$16 sps:$4 sm:$0xff]   ;;  %v2597_v34 = vld [vmem:[%s2830_s26 + $0x20c] ss:$16 sps:$4 sm:$0xff]  }
  0x46   : > { %1332 = vmatmul.mubr.bf16.vlgmr.msra.gmra.mrb[0].mxu1 %v2499_v35  ;;  %1653 = vmatmul.mubr.bf16.vlgmr.msra.gmra.mrb[0].mxu0 %v2502_v36  ;;  %v2599_v35 = vld [vmem:[%s2830_s26 + $0x200] ss:$16 sps:$4 sm:$0xff]   ;;  %v2600_v36 = vld [vmem:[%s2830_s26 + $0x208] ss:$16 sps:$4 sm:$0xff]  }
  0x47   : > { %1339 = vmatprep.mubr.bf16.mxu1 %v2505_v37  ;;  %1660 = vmatprep.mubr.bf16.mxu0 %v2507_v38  ;;  %v2601_v37 = vld [vmem:[%s2830_s26 + $0x224] ss:$16 sps:$4 sm:$0xff]   ;;  %v2603_v38 = vld [vmem:[%s2830_s26 + $0x22c] ss:$16 sps:$4 sm:$0xff]  }
  0x4e   : > { %1340 = vmatmul.mubr.bf16.gmra.mrb[4].mxu1 %v2509_v39  ;;  %1661 = vmatmul.mubr.bf16.gmra.mrb[4].mxu0 %v2510_v40  ;;  %v2605_v39 = vld [vmem:[%s2830_s26 + $0x220] ss:$16 sps:$4 sm:$0xff]   ;;  %v2606_v40 = vld [vmem:[%s2830_s26 + $0x228] ss:$16 sps:$4 sm:$0xff]  }
  0x4f   : > { %1347 = vmatprep.mubr.bf16.mxu1 %v2511_v41  ;;  %1668 = vmatprep.mubr.bf16.mxu0 %v2513_v42  ;;  %v2607_v41 = vld [vmem:[%s2830_s26 + $0x244] ss:$16 sps:$4 sm:$0xff]   ;;  %v2609_v42 = vld [vmem:[%s2830_s26 + $0x24c] ss:$16 sps:$4 sm:$0xff]  }
  0x56   : > { %1348 = vmatmul.mubr.bf16.gmra.mrb[8].mxu1 %v2515_v43  ;;  %1669 = vmatmul.mubr.bf16.gmra.mrb[8].mxu0 %v2516_v44  ;;  %v2611_v43 = vld [vmem:[%s2830_s26 + $0x240] ss:$16 sps:$4 sm:$0xff]   ;;  %v2612_v44 = vld [vmem:[%s2830_s26 + $0x248] ss:$16 sps:$4 sm:$0xff]  }
  0x57   : > { %1355 = vmatprep.mubr.bf16.mxu1 %v2517_v45  ;;  %1676 = vmatprep.mubr.bf16.mxu0 %v2519_v46  ;;  %v2613_v45 = vld [vmem:[%s2830_s26 + $0x264] ss:$16 sps:$4 sm:$0xff]   ;;  %v2615_v46 = vld [vmem:[%s2830_s26 + $0x26c] ss:$16 sps:$4 sm:$0xff]  }
  0x5e   : > { %1356 = vmatmul.mubr.bf16.gmra.mrb[12].mxu1 %v2521_v47  ;;  %1677 = vmatmul.mubr.bf16.gmra.mrb[12].mxu0 %v2522_v48  ;;  %v2617_v47 = vld [vmem:[%s2830_s26 + $0x260] ss:$16 sps:$4 sm:$0xff]   ;;  %v2618_v48 = vld [vmem:[%s2830_s26 + $0x268] ss:$16 sps:$4 sm:$0xff]  }
  0x5f   : > { %1363 = vmatprep.mubr.bf16.mxu1 %v2523_v49  ;;  %1684 = vmatprep.mubr.bf16.mxu0 %v2525_v50  ;;  %v2619_v49 = vld [vmem:[%s2830_s26 + $0x284] ss:$16 sps:$4 sm:$0xff]   ;;  %v2621_v50 = vld [vmem:[%s2830_s26 + $0x28c] ss:$16 sps:$4 sm:$0xff]  }
  0x66   : > { %1364 = vmatmul.mubr.bf16.gmra.mrb[16].mxu1 %v2527_v51  ;;  %1685 = vmatmul.mubr.bf16.gmra.mrb[16].mxu0 %v2528_v52  ;;  %v2623_v51 = vld [vmem:[%s2830_s26 + $0x280] ss:$16 sps:$4 sm:$0xff]   ;;  %v2624_v52 = vld [vmem:[%s2830_s26 + $0x288] ss:$16 sps:$4 sm:$0xff]  }
  0x67   : > { %1371 = vmatprep.mubr.bf16.mxu1 %v2529_v53  ;;  %1692 = vmatprep.mubr.bf16.mxu0 %v2531_v54  ;;  %v2625_v53 = vld [vmem:[%s2830_s26 + $0x2a4] ss:$16 sps:$4 sm:$0xff]   ;;  %v2627_v54 = vld [vmem:[%s2830_s26 + $0x2ac] ss:$16 sps:$4 sm:$0xff]  }
  0x6e   : > { %1372 = vmatmul.mubr.bf16.gmra.mrb[20].mxu1 %v2533_v55  ;;  %1693 = vmatmul.mubr.bf16.gmra.mrb[20].mxu0 %v2534_v56  ;;  %v2629_v55 = vld [vmem:[%s2830_s26 + $0x2a0] ss:$16 sps:$4 sm:$0xff]   ;;  %v2630_v56 = vld [vmem:[%s2830_s26 + $0x2a8] ss:$16 sps:$4 sm:$0xff]  }
  0x6f   : > { %1379 = vmatprep.mubr.bf16.mxu1 %v2535_v57  ;;  %1700 = vmatprep.mubr.bf16.mxu0 %v2537_v58  ;;  %v2631_v57 = vld [vmem:[%s2830_s26 + $0x2c4] ss:$16 sps:$4 sm:$0xff]   ;;  %v2633_v58 = vld [vmem:[%s2830_s26 + $0x2cc] ss:$16 sps:$4 sm:$0xff]  }
  0x76   : > { %1380 = vmatmul.mubr.bf16.gmra.mrb[24].mxu1 %v2539_v59  ;;  %1701 = vmatmul.mubr.bf16.gmra.mrb[24].mxu0 %v2540_v60  ;;  %v2635_v59 = vld [vmem:[%s2830_s26 + $0x2c0] ss:$16 sps:$4 sm:$0xff]   ;;  %v2636_v60 = vld [vmem:[%s2830_s26 + $0x2c8] ss:$16 sps:$4 sm:$0xff]  }
  0x77   : > { %1387 = vmatprep.mubr.bf16.mxu1 %v2541_v61  ;;  %1708 = vmatprep.mubr.bf16.mxu0 %v2543_v62  ;;  %v2637_v61 = vld [vmem:[%s2830_s26 + $0x2e4] ss:$16 sps:$4 sm:$0xff]   ;;  %v2639_v62 = vld [vmem:[%s2830_s26 + $0x2ec] ss:$16 sps:$4 sm:$0xff]  }
  0x7e   : > { %1388 = vmatmul.mubr.bf16.gmra.mrb[28].mxu1 %v2545_v63  ;;  %1709 = vmatmul.mubr.bf16.gmra.mrb[28].mxu0 %v2546_v0  ;;  %v2641_v63 = vld [vmem:[%s2830_s26 + $0x2e0] ss:$16 sps:$4 sm:$0xff]   ;;  %v2642_v0 = vld [vmem:[%s2830_s26 + $0x2e8] ss:$16 sps:$4 sm:$0xff]  }
  0x7f   : > { %1395 = vmatprep.mubr.bf16.mxu1 %v2547_v1  ;;  %1716 = vmatprep.mubr.bf16.mxu0 %v2549_v2  ;;  %v2643_v1 = vld [vmem:[%s2830_s26 + $0x304] ss:$16 sps:$4 sm:$0xff]   ;;  %v2645_v2 = vld [vmem:[%s2830_s26 + $0x30c] ss:$16 sps:$4 sm:$0xff]  }
  0x86   : > { %1396 = vmatmul.mubr.bf16.gmra.mrb[32].mxu1 %v2551_v3  ;;  %1717 = vmatmul.mubr.bf16.gmra.mrb[32].mxu0 %v2552_v4  ;;  %v2647_v3 = vld [vmem:[%s2830_s26 + $0x300] ss:$16 sps:$4 sm:$0xff]   ;;  %v2648_v4 = vld [vmem:[%s2830_s26 + $0x308] ss:$16 sps:$4 sm:$0xff]  }
  0x87   : > { %1403 = vmatprep.mubr.bf16.mxu1 %v2553_v5  ;;  %1724 = vmatprep.mubr.bf16.mxu0 %v2555_v6  ;;  %v2649_v5 = vld [vmem:[%s2830_s26 + $0x324] ss:$16 sps:$4 sm:$0xff]   ;;  %v2651_v6 = vld [vmem:[%s2830_s26 + $0x32c] ss:$16 sps:$4 sm:$0xff]  }
  0x8e   : > { %1404 = vmatmul.mubr.bf16.gmra.mrb[36].mxu1 %v2557_v7  ;;  %1725 = vmatmul.mubr.bf16.gmra.mrb[36].mxu0 %v2558_v8  ;;  %v2653_v7 = vld [vmem:[%s2830_s26 + $0x320] ss:$16 sps:$4 sm:$0xff]   ;;  %v2654_v8 = vld [vmem:[%s2830_s26 + $0x328] ss:$16 sps:$4 sm:$0xff]  }
  0x8f   : > { %1411 = vmatprep.mubr.bf16.mxu1 %v2559_v9  ;;  %1732 = vmatprep.mubr.bf16.mxu0 %v2561_v10  ;;  %v2655_v9 = vld [vmem:[%s2830_s26 + $0x344] ss:$16 sps:$4 sm:$0xff]   ;;  %v2657_v10 = vld [vmem:[%s2830_s26 + $0x34c] ss:$16 sps:$4 sm:$0xff]  }
  0x96   : > { %1412 = vmatmul.mubr.bf16.gmra.mrb[40].mxu1 %v2563_v11  ;;  %1733 = vmatmul.mubr.bf16.gmra.mrb[40].mxu0 %v2564_v12  ;;  %v2659_v11 = vld [vmem:[%s2830_s26 + $0x340] ss:$16 sps:$4 sm:$0xff]   ;;  %v2660_v12 = vld [vmem:[%s2830_s26 + $0x348] ss:$16 sps:$4 sm:$0xff]  }
  0x97   : > { %1419 = vmatprep.mubr.bf16.mxu1 %v2565_v13  ;;  %1740 = vmatprep.mubr.bf16.mxu0 %v2567_v14  ;;  %v2661_v13 = vld [vmem:[%s2830_s26 + $0x364] ss:$16 sps:$4 sm:$0xff]   ;;  %v2663_v14 = vld [vmem:[%s2830_s26 + $0x36c] ss:$16 sps:$4 sm:$0xff]  }
  0x9e   : > { %1420 = vmatmul.mubr.bf16.gmra.mrb[44].mxu1 %v2569_v15  ;;  %1741 = vmatmul.mubr.bf16.gmra.mrb[44].mxu0 %v2570_v16  ;;  %v3006_v15 = vld [vmem:[%s3326_s2] ss:$0 sm:$0xff] }
  0x9f   : > { %1427 = vmatprep.mubr.bf16.mxu1 %v2571_v17  ;;  %1748 = vmatprep.mubr.bf16.mxu0 %v2573_v18 }
  0xa6   : > { %1428 = vmatmul.mubr.bf16.gmra.mrb[48].mxu1 %v2575_v19  ;;  %1749 = vmatmul.mubr.bf16.gmra.mrb[48].mxu0 %v2576_v20  ;;  %v2665_v20 = vld [vmem:[%s2830_s26 + $0x360] ss:$16 sps:$4 sm:$0xff]  }
  0xa7   : > { %1435 = vmatprep.mubr.bf16.mxu1 %v2577_v21  ;;  %1756 = vmatprep.mubr.bf16.mxu0 %v2579_v22 }
  0xae   : > { %1436 = vmatmul.mubr.bf16.gmra.mrb[52].mxu1 %v2581_v23  ;;  %1757 = vmatmul.mubr.bf16.gmra.mrb[52].mxu0 %v2582_v24  ;;  %v2666_v23 = vld [vmem:[%s2830_s26 + $0x368] ss:$16 sps:$4 sm:$0xff]   ;;  %v2667_v24 = vld [vmem:[%s2830_s26 + $0x384] ss:$16 sps:$4 sm:$0xff]  }
  0xaf   : > { %1443 = vmatprep.mubr.bf16.mxu1 %v2583_v25  ;;  %1764 = vmatprep.mubr.bf16.mxu0 %v2585_v26 }
  0xb6   : > { %1444 = vmatmul.mubr.bf16.gmra.mrb[56].mxu1 %v2587_v27  ;;  %1765 = vmatmul.mubr.bf16.gmra.mrb[56].mxu0 %v2588_v28 }
  0xb7   : > { %1451 = vmatprep.mubr.bf16.mxu1 %v2589_v29  ;;  %1772 = vmatprep.mubr.bf16.mxu0 %v2591_v30  ;;  %v2669_v29 = vld [vmem:[%s2830_s26 + $0x38c] ss:$16 sps:$4 sm:$0xff]  }
  0xbe   : > { %1452 = vmatmul.mubr.bf16.gmra.mrb[60].mxu1 %v2593_v31  ;;  %1773 = vmatmul.mubr.bf16.gmra.mrb[60].mxu0 %v2594_v32 }
  0xbf   : > { %1459 = vmatprep.mubr.bf16.mxu1 %v2595_v33  ;;  %1780 = vmatprep.mubr.bf16.mxu0 %v2597_v34 }
  0xc6   : > { %1460 = vmatmul.mubr.bf16.gmra.mrb[64].mxu1 %v2599_v35  ;;  %1781 = vmatmul.mubr.bf16.gmra.mrb[64].mxu0 %v2600_v36  ;;  %v2671_v36 = vld [vmem:[%s2830_s26 + $0x380] ss:$16 sps:$4 sm:$0xff]  }
  0xc7   : > { %1467 = vmatprep.mubr.bf16.mxu1 %v2601_v37  ;;  %1788 = vmatprep.mubr.bf16.mxu0 %v2603_v38 }
  0xce   : > { %1468 = vmatmul.mubr.bf16.gmra.mrb[68].mxu1 %v2605_v39  ;;  %1789 = vmatmul.mubr.bf16.gmra.mrb[68].mxu0 %v2606_v40  ;;  %v2672_v39 = vld [vmem:[%s2830_s26 + $0x388] ss:$16 sps:$4 sm:$0xff]   ;;  %v2673_v40 = vld [vmem:[%s2830_s26 + $0x3a4] ss:$16 sps:$4 sm:$0xff]  }
  0xcf   : > { %1475 = vmatprep.mubr.bf16.mxu1 %v2607_v41  ;;  %1796 = vmatprep.mubr.bf16.mxu0 %v2609_v42 }
  0xd6   : > { %1476 = vmatmul.mubr.bf16.gmra.mrb[72].mxu1 %v2611_v43  ;;  %1797 = vmatmul.mubr.bf16.gmra.mrb[72].mxu0 %v2612_v44 }
  0xd7   : > { %1483 = vmatprep.mubr.bf16.mxu1 %v2613_v45  ;;  %1804 = vmatprep.mubr.bf16.mxu0 %v2615_v46  ;;  %v2675_v45 = vld [vmem:[%s2830_s26 + $0x3ac] ss:$16 sps:$4 sm:$0xff]  }
  0xde   : > { %1484 = vmatmul.mubr.bf16.gmra.mrb[76].mxu1 %v2617_v47  ;;  %1805 = vmatmul.mubr.bf16.gmra.mrb[76].mxu0 %v2618_v48 }
  0xdf   : > { %1491 = vmatprep.mubr.bf16.mxu1 %v2619_v49  ;;  %1812 = vmatprep.mubr.bf16.mxu0 %v2621_v50 }
  0xe6   : > { %1492 = vmatmul.mubr.bf16.gmra.mrb[80].mxu1 %v2623_v51  ;;  %1813 = vmatmul.mubr.bf16.gmra.mrb[80].mxu0 %v2624_v52  ;;  %v2677_v52 = vld [vmem:[%s2830_s26 + $0x3a0] ss:$16 sps:$4 sm:$0xff]  }
  0xe7   : > { %1499 = vmatprep.mubr.bf16.mxu1 %v2625_v53  ;;  %1820 = vmatprep.mubr.bf16.mxu0 %v2627_v54 }
  0xee   : > { %1500 = vmatmul.mubr.bf16.gmra.mrb[84].mxu1 %v2629_v55  ;;  %1821 = vmatmul.mubr.bf16.gmra.mrb[84].mxu0 %v2630_v56  ;;  %v2678_v55 = vld [vmem:[%s2830_s26 + $0x3a8] ss:$16 sps:$4 sm:$0xff]   ;;  %v2679_v56 = vld [vmem:[%s2830_s26 + $0x3c4] ss:$16 sps:$4 sm:$0xff]  }
  0xef   : > { %1507 = vmatprep.mubr.bf16.mxu1 %v2631_v57  ;;  %1828 = vmatprep.mubr.bf16.mxu0 %v2633_v58 }
  0xf6   : > { %1508 = vmatmul.mubr.bf16.gmra.mrb[88].mxu1 %v2635_v59  ;;  %1829 = vmatmul.mubr.bf16.gmra.mrb[88].mxu0 %v2636_v60 }
  0xf7   : > { %1515 = vmatprep.mubr.bf16.mxu1 %v2637_v61  ;;  %1836 = vmatprep.mubr.bf16.mxu0 %v2639_v62  ;;  %v2681_v61 = vld [vmem:[%s2830_s26 + $0x3cc] ss:$16 sps:$4 sm:$0xff]  }
  0xfe   : > { %1516 = vmatmul.mubr.bf16.gmra.mrb[92].mxu1 %v2641_v63  ;;  %1837 = vmatmul.mubr.bf16.gmra.mrb[92].mxu0 %v2642_v0 }
  0xff   : > { %1523 = vmatprep.mubr.bf16.mxu1 %v2643_v1  ;;  %1844 = vmatprep.mubr.bf16.mxu0 %v2645_v2 }
 0x106   : > { %1524 = vmatmul.mubr.bf16.gmra.mrb[96].mxu1 %v2647_v3  ;;  %1845 = vmatmul.mubr.bf16.gmra.mrb[96].mxu0 %v2648_v4  ;;  %v2683_v4 = vld [vmem:[%s2830_s26 + $0x3c0] ss:$16 sps:$4 sm:$0xff]  }
 0x107   : > { %1531 = vmatprep.mubr.bf16.mxu1 %v2649_v5  ;;  %1852 = vmatprep.mubr.bf16.mxu0 %v2651_v6 }
 0x10e   : > { %1532 = vmatmul.mubr.bf16.gmra.mrb[100].mxu1 %v2653_v7  ;;  %1853 = vmatmul.mubr.bf16.gmra.mrb[100].mxu0 %v2654_v8  ;;  %v2684_v7 = vld [vmem:[%s2830_s26 + $0x3c8] ss:$16 sps:$4 sm:$0xff]   ;;  %v2685_v8 = vld [vmem:[%s2830_s26 + $0x3e4] ss:$16 sps:$4 sm:$0xff]  }
 0x10f   : > { %1539 = vmatprep.mubr.bf16.mxu1 %v2655_v9  ;;  %1860 = vmatprep.mubr.bf16.mxu0 %v2657_v10 }
 0x116   : > { %1540 = vmatmul.mubr.bf16.gmra.mrb[104].mxu1 %v2659_v11  ;;  %1861 = vmatmul.mubr.bf16.gmra.mrb[104].mxu0 %v2660_v12 }
 0x117   : > { %1547 = vmatprep.mubr.bf16.mxu1 %v2661_v13  ;;  %1868 = vmatprep.mubr.bf16.mxu0 %v2663_v14  ;;  %v2687_v13 = vld [vmem:[%s2830_s26 + $0x3ec] ss:$16 sps:$4 sm:$0xff]  }
 0x119   : > { %v1333_v16 = vpop.f32.mrb[0].mxu1  ;;  %v1654_v18 = vpop.f32.mrb[0].mxu0 }
 0x11a   : > { %v1334_v17 = vadd.f32 %v3006_v15, %v1333_v16  ;;  %v1335_v19 = vpop.f32.mrb[1].mxu1  ;;  %v1656_v21 = vpop.f32.mrb[1].mxu0 }
 0x11b   : > { %v1336_v22 = vpop.f32.mrb[2].mxu1  ;;  %v1657_v27 = vpop.f32.mrb[2].mxu0  ;;  %v2689_v21 = vld [vmem:[%s2830_s26 + $0x3e0] ss:$16 sps:$4 sm:$0xff]  }
 0x11c   : > { %v3012_v25 = vadd.f32 %v1654_v18, %v1334_v17  ;;  %v1337_v26 = vadd.f32 %v3006_v15, %v1336_v22  ;;  %v1338_v28 = vpop.f32.mrb[3].mxu1  ;;  %v1659_v30 = vpop.f32.mrb[3].mxu0 }
 0x11e   : > { %v3016_v31 = vadd.f32 %v1657_v27, %v1337_v26  ;;  %1548 = vmatmul.mubr.bf16.gmra.mrb[108].mxu1 %v2665_v20  ;;  %1869 = vmatmul.mubr.bf16.gmra.mrb[108].mxu0 %v2666_v23  ;;  %v2691_v26 = vld [vmem:[%s2830_s26 + $0x404] ss:$16 sps:$4 sm:$0xff]  }
 0x11f   : > { %1555 = vmatprep.mubr.bf16.mxu1 %v2667_v24  ;;  %1876 = vmatprep.mubr.bf16.mxu0 %v2669_v29  ;;  %v2690_v24 = vld [vmem:[%s2830_s26 + $0x3e8] ss:$16 sps:$4 sm:$0xff]  }
 0x121   : > { %v1341_v32 = vpop.f32.mrb[4].mxu1  ;;  %v1662_v34 = vpop.f32.mrb[4].mxu0 }
 0x122   : > { %v1342_v33 = vadd.f32 %v3006_v15, %v1341_v32  ;;  %v1343_v35 = vpop.f32.mrb[5].mxu1  ;;  %v1664_v37 = vpop.f32.mrb[5].mxu0  ;;  %v2693_v32 = vld [vmem:[%s2830_s26 + $0x40c] ss:$16 sps:$4 sm:$0xff]  }
 0x123   : > { %v1344_v38 = vpop.f32.mrb[6].mxu1  ;;  %v1665_v43 = vpop.f32.mrb[6].mxu0 }
 0x124   : > { %v3022_v41 = vadd.f32 %v1662_v34, %v1342_v33  ;;  %v1345_v42 = vadd.f32 %v3006_v15, %v1344_v38  ;;  %v1346_v44 = vpop.f32.mrb[7].mxu1  ;;  %v1667_v46 = vpop.f32.mrb[7].mxu0 }
 0x125   : > { %v2697_v46 = vld [vmem:[%s2830_s26 + $0x424] ss:$16 sps:$4 sm:$0xff]  }
 0x126   : > { %v3026_v47 = vadd.f32 %v1665_v43, %v1345_v42  ;;  %1556 = vmatmul.mubr.bf16.gmra.mrb[112].mxu1 %v2671_v36  ;;  %1877 = vmatmul.mubr.bf16.gmra.mrb[112].mxu0 %v2672_v39  ;;  %v2695_v42 = vld [vmem:[%s2830_s26 + $0x400] ss:$16 sps:$4 sm:$0xff]  }
 0x127   : > { %1563 = vmatprep.mubr.bf16.mxu1 %v2673_v40  ;;  %1884 = vmatprep.mubr.bf16.mxu0 %v2675_v45  ;;  %v2696_v45 = vld [vmem:[%s2830_s26 + $0x408] ss:$16 sps:$4 sm:$0xff]  }
 0x129   : > { %v1349_v48 = vpop.f32.mrb[8].mxu1  ;;  %v1670_v50 = vpop.f32.mrb[8].mxu0 }
 0x12a   : > { %v1350_v49 = vadd.f32 %v3006_v15, %v1349_v48  ;;  %v1351_v51 = vpop.f32.mrb[9].mxu1  ;;  %v1672_v53 = vpop.f32.mrb[9].mxu0 }
 0x12b   : > { %v1352_v54 = vpop.f32.mrb[10].mxu1  ;;  %v1673_v59 = vpop.f32.mrb[10].mxu0 }
 0x12c   : > { %v3032_v57 = vadd.f32 %v1670_v50, %v1350_v49  ;;  %v1353_v58 = vadd.f32 %v3006_v15, %v1352_v54  ;;  %v1354_v60 = vpop.f32.mrb[11].mxu1  ;;  %v1675_v62 = vpop.f32.mrb[11].mxu0 }
 0x12d   : > { %v2701_v62 = vld [vmem:[%s2830_s26 + $0x420] ss:$16 sps:$4 sm:$0xff]  }
 0x12e   : > { %v3036_v63 = vadd.f32 %v1673_v59, %v1353_v58  ;;  %1564 = vmatmul.mubr.bf16.gmra.mrb[116].mxu1 %v2677_v52  ;;  %1885 = vmatmul.mubr.bf16.gmra.mrb[116].mxu0 %v2678_v55  ;;  %v2699_v52 = vld [vmem:[%s2830_s26 + $0x42c] ss:$16 sps:$4 sm:$0xff]  }
 0x12f   : > { %1571 = vmatprep.mubr.bf16.mxu1 %v2679_v56  ;;  %1892 = vmatprep.mubr.bf16.mxu0 %v2681_v61 }
 0x131   : > { %v1357_v0 = vpop.f32.mrb[12].mxu1  ;;  %v1678_v2 = vpop.f32.mrb[12].mxu0 }
 0x132   : > { %v1358_v1 = vadd.f32 %v3006_v15, %v1357_v0  ;;  %v1359_v3 = vpop.f32.mrb[13].mxu1  ;;  %v1680_v5 = vpop.f32.mrb[13].mxu0 }
 0x133   : > { %v1360_v6 = vpop.f32.mrb[14].mxu1  ;;  %v1681_v11 = vpop.f32.mrb[14].mxu0  ;;  %v2703_v3 = vld [vmem:[%s2830_s26 + $0x444] ss:$16 sps:$4 sm:$0xff]  }
 0x134   : > { %v3042_v9 = vadd.f32 %v1678_v2, %v1358_v1  ;;  %v1361_v10 = vadd.f32 %v3006_v15, %v1360_v6  ;;  %v1362_v12 = vpop.f32.mrb[15].mxu1  ;;  %v1683_v14 = vpop.f32.mrb[15].mxu0  ;;  %v2702_v2 = vld [vmem:[%s2830_s26 + $0x428] ss:$16 sps:$4 sm:$0xff]  }
 0x136   : > { %v3046_v16 = vadd.f32 %v1681_v11, %v1361_v10  ;;  %1572 = vmatmul.mubr.bf16.gmra.mrb[120].mxu1 %v2683_v4  ;;  %1893 = vmatmul.mubr.bf16.gmra.mrb[120].mxu0 %v2684_v7 }
 0x137   : > { %1579 = vmatprep.mubr.bf16.mxu1 %v2685_v8  ;;  %1900 = vmatprep.mubr.bf16.mxu0 %v2687_v13  ;;  %v2705_v8 = vld [vmem:[%s2830_s26 + $0x44c] ss:$16 sps:$4 sm:$0xff]  }
 0x139   : > { %v1365_v17 = vpop.f32.mrb[16].mxu1  ;;  %v1686_v19 = vpop.f32.mrb[16].mxu0 }
 0x13a   : > { %v1366_v18 = vadd.f32 %v3006_v15, %v1365_v17  ;;  %v1367_v20 = vpop.f32.mrb[17].mxu1  ;;  %v1688_v22 = vpop.f32.mrb[17].mxu0 }
 0x13b   : > { %v1368_v23 = vpop.f32.mrb[18].mxu1  ;;  %v1689_v29 = vpop.f32.mrb[18].mxu0  ;;  %v2707_v20 = vld [vmem:[%s2830_s26 + $0x440] ss:$16 sps:$4 sm:$0xff]  }
 0x13c   : > { %v3052_v27 = vadd.f32 %v1686_v19, %v1366_v18  ;;  %v1369_v28 = vadd.f32 %v3006_v15, %v1368_v23  ;;  %v1370_v30 = vpop.f32.mrb[19].mxu1  ;;  %v1691_v33 = vpop.f32.mrb[19].mxu0  ;;  %v2708_v23 = vld [vmem:[%s2830_s26 + $0x448] ss:$16 sps:$4 sm:$0xff]  }
 0x13e   : > { %v1941_v34 = vmax.f32 %v3012_v25, %v3052_v27  ;;  %v3058_v35 = vadd.f32 %v1689_v29, %v1369_v28  ;;  %1580 = vmatmul.mubr.bf16.gmra.mrb[124].mxu1 %v2689_v21  ;;  %1901 = vmatmul.mubr.bf16.gmra.mrb[124].mxu0 %v2690_v24  ;;  %v2709_v24 = vld [vmem:[%s2830_s26 + $0x464] ss:$16 sps:$4 sm:$0xff]  }
 0x13f   : > { %1587 = vmatprep.mubr.bf16.mxu1 %v2691_v26  ;;  %1908 = vmatprep.mubr.bf16.mxu0 %v2693_v32  ;;  %v2711_v32 = vld [vmem:[%s2830_s26 + $0x46c] ss:$16 sps:$4 sm:$0xff]  }
 0x140   : > { %v1942_v36 = vmax.f32 %v3016_v31, %v3058_v35 }
 0x141   : > { %v1373_v37 = vpop.f32.mrb[20].mxu1  ;;  %v1694_v39 = vpop.f32.mrb[20].mxu0 }
 0x142   : > { %v1374_v38 = vadd.f32 %v3006_v15, %v1373_v37  ;;  %v1375_v40 = vpop.f32.mrb[21].mxu1  ;;  %v1696_v43 = vpop.f32.mrb[21].mxu0 }
 0x143   : > { %v1376_v44 = vpop.f32.mrb[22].mxu1  ;;  %v1697_v50 = vpop.f32.mrb[22].mxu0 }
 0x144   : > { %v3066_v48 = vadd.f32 %v1694_v39, %v1374_v38  ;;  %v1377_v49 = vadd.f32 %v3006_v15, %v1376_v44  ;;  %v1378_v51 = vpop.f32.mrb[23].mxu1  ;;  %v1699_v53 = vpop.f32.mrb[23].mxu0 }
 0x146   : > { %v1943_v54 = vmax.f32 %v3022_v41, %v3066_v48  ;;  %v3072_v55 = vadd.f32 %v1697_v50, %v1377_v49  ;;  %1588 = vmatmul.mubr.bf16.gmra.mrb[128].mxu1 %v2695_v42  ;;  %1909 = vmatmul.mubr.bf16.gmra.mrb[128].mxu0 %v2696_v45  ;;  %v2713_v45 = vld [vmem:[%s2830_s26 + $0x460] ss:$16 sps:$4 sm:$0xff]   ;;  %v2714_v50 = vld [vmem:[%s2830_s26 + $0x468] ss:$16 sps:$4 sm:$0xff]  }
 0x147   : > { %1595 = vmatprep.mubr.bf16.mxu1 %v2697_v46  ;;  %1916 = vmatprep.mubr.bf16.mxu0 %v2699_v52 }
 0x148   : > { %v1944_v56 = vmax.f32 %v3026_v47, %v3072_v55 }
 0x149   : > { %v1381_v58 = vpop.f32.mrb[24].mxu1  ;;  %v1702_v60 = vpop.f32.mrb[24].mxu0 }
 0x14a   : > { %v1382_v59 = vadd.f32 %v3006_v15, %v1381_v58  ;;  %v1383_v61 = vpop.f32.mrb[25].mxu1  ;;  %v1704_v0 = vpop.f32.mrb[25].mxu0 }
 0x14b   : > { %v1384_v1 = vpop.f32.mrb[26].mxu1  ;;  %v1705_v6 = vpop.f32.mrb[26].mxu0 }
 0x14c   : > { %v3080_v4 = vadd.f32 %v1702_v60, %v1382_v59  ;;  %v1385_v5 = vadd.f32 %v3006_v15, %v1384_v1  ;;  %v1386_v7 = vpop.f32.mrb[27].mxu1  ;;  %v1707_v10 = vpop.f32.mrb[27].mxu0 }
 0x14e   : > { %v1945_v11 = vmax.f32 %v3032_v57, %v3080_v4  ;;  %v3086_v12 = vadd.f32 %v1705_v6, %v1385_v5  ;;  %1596 = vmatmul.mubr.bf16.gmra.mrb[132].mxu1 %v2701_v62  ;;  %1917 = vmatmul.mubr.bf16.gmra.mrb[132].mxu0 %v2702_v2 }
 0x14f   : > { %1603 = vmatprep.mubr.bf16.mxu1 %v2703_v3  ;;  %1924 = vmatprep.mubr.bf16.mxu0 %v2705_v8 }
 0x150   : > { %v1946_v13 = vmax.f32 %v3036_v63, %v3086_v12 }
 0x151   : > { %v1389_v14 = vpop.f32.mrb[28].mxu1  ;;  %v1710_v18 = vpop.f32.mrb[28].mxu0 }
 0x152   : > { %v1390_v17 = vadd.f32 %v3006_v15, %v1389_v14  ;;  %v1391_v19 = vpop.f32.mrb[29].mxu1  ;;  %v1712_v21 = vpop.f32.mrb[29].mxu0 }
 0x153   : > { %v1392_v22 = vpop.f32.mrb[30].mxu1  ;;  %v1713_v29 = vpop.f32.mrb[30].mxu0 }
 0x154   : > { %v3094_v26 = vadd.f32 %v1710_v18, %v1390_v17  ;;  %v1393_v28 = vadd.f32 %v3006_v15, %v1392_v22  ;;  %v1394_v30 = vpop.f32.mrb[31].mxu1  ;;  %v1715_v33 = vpop.f32.mrb[31].mxu0 }
 0x156   : > { %v1947_v37 = vmax.f32 %v3042_v9, %v3094_v26  ;;  %v3100_v38 = vadd.f32 %v1713_v29, %v1393_v28  ;;  %1604 = vmatmul.mubr.bf16.gmra.mrb[136].mxu1 %v2707_v20  ;;  %1925 = vmatmul.mubr.bf16.gmra.mrb[136].mxu0 %v2708_v23 }
 0x157   : > { %1611 = vmatprep.mubr.bf16.mxu1 %v2709_v24  ;;  %1932 = vmatprep.mubr.bf16.mxu0 %v2711_v32 }
 0x158   : > { %v1948_v39 = vmax.f32 %v3046_v16, %v3100_v38 }
 0x159   : > { %v1397_v40 = vpop.f32.mrb[32].mxu1  ;;  %v1718_v43 = vpop.f32.mrb[32].mxu0 }
 0x15a   : > { %v1398_v42 = vadd.f32 %v3006_v15, %v1397_v40  ;;  %v1399_v44 = vpop.f32.mrb[33].mxu1  ;;  %v1720_v46 = vpop.f32.mrb[33].mxu0 }
 0x15b   : > { %v1400_v49 = vpop.f32.mrb[34].mxu1  ;;  %v1721_v53 = vpop.f32.mrb[34].mxu0 }
 0x15c   : > { %v1719_v51 = vadd.f32 %v1718_v43, %v1398_v42  ;;  %v1401_v52 = vadd.f32 %v3006_v15, %v1400_v49  ;;  %v1402_v58 = vpop.f32.mrb[35].mxu1  ;;  %v1723_v59 = vpop.f32.mrb[35].mxu0 }
 0x15e   : > { %v3111_v16 = vmax.f32 %v1941_v34, %v1719_v51  ;;  %v1722_v60 = vadd.f32 %v1721_v53, %v1401_v52  ;;  %1612 = vmatmul.mubr.bf16.gmra.mrb[140].mxu1 %v2713_v45  ;;  %1933 = vmatmul.mubr.bf16.gmra.mrb[140].mxu0 %v2714_v50 }
 0x160   : > { %v3116_v61 = vmax.f32 %v1942_v36, %v1722_v60 }
 0x161   : > { %v1405_v62 = vpop.f32.mrb[36].mxu1  ;;  %v1726_v1 = vpop.f32.mrb[36].mxu0 }
 0x162   : > { %v1406_v0 = vadd.f32 %v3006_v15, %v1405_v62  ;;  %v1407_v2 = vpop.f32.mrb[37].mxu1  ;;  %v1728_v3 = vpop.f32.mrb[37].mxu0 }
 0x163   : > { %v1408_v5 = vpop.f32.mrb[38].mxu1  ;;  %v1729_v27 = vpop.f32.mrb[38].mxu0 }
 0x164   : > { %v1727_v6 = vadd.f32 %v1726_v1, %v1406_v0  ;;  %v1409_v25 = vadd.f32 %v3006_v15, %v1408_v5  ;;  %v1410_v34 = vpop.f32.mrb[39].mxu1  ;;  %v1731_v7 = vpop.f32.mrb[39].mxu0 }
 0x166   : > { %v3123_v8 = vmax.f32 %v1943_v54, %v1727_v6  ;;  %v1730_v31 = vadd.f32 %v1729_v27, %v1409_v25 }
 0x168   : > { %v3128_v35 = vmax.f32 %v1944_v56, %v1730_v31 }
 0x169   : > { %v1413_v36 = vpop.f32.mrb[40].mxu1  ;;  %v1734_v14 = vpop.f32.mrb[40].mxu0 }
 0x16a   : > { %v1414_v10 = vadd.f32 %v3006_v15, %v1413_v36  ;;  %v1415_v17 = vpop.f32.mrb[41].mxu1  ;;  %v1736_v18 = vpop.f32.mrb[41].mxu0 }
 0x16b   : > { %v1416_v19 = vpop.f32.mrb[42].mxu1  ;;  %v1737_v22 = vpop.f32.mrb[42].mxu0 }
 0x16c   : > { %v1735_v20 = vadd.f32 %v1734_v14, %v1414_v10  ;;  %v1417_v21 = vadd.f32 %v3006_v15, %v1416_v19  ;;  %v1418_v41 = vpop.f32.mrb[43].mxu1  ;;  %v1739_v48 = vpop.f32.mrb[43].mxu0 }
 0x16e   : > { %v3135_v54 = vmax.f32 %v1945_v11, %v1735_v20  ;;  %v1738_v47 = vadd.f32 %v1737_v22, %v1417_v21 }
 0x170   : > { %v3140_v55 = vmax.f32 %v1946_v13, %v1738_v47 }
 0x171   : > { %v1421_v56 = vpop.f32.mrb[44].mxu1  ;;  %v1742_v24 = vpop.f32.mrb[44].mxu0 }
 0x172   : > { %v1422_v23 = vadd.f32 %v3006_v15, %v1421_v56  ;;  %v1423_v28 = vpop.f32.mrb[45].mxu1  ;;  %v1744_v29 = vpop.f32.mrb[45].mxu0 }
 0x173   : > { %v1424_v30 = vpop.f32.mrb[46].mxu1  ;;  %v1745_v38 = vpop.f32.mrb[46].mxu0 }
 0x174   : > { %v1743_v32 = vadd.f32 %v1742_v24, %v1422_v23  ;;  %v1425_v33 = vadd.f32 %v3006_v15, %v1424_v30  ;;  %v1426_v57 = vpop.f32.mrb[47].mxu1  ;;  %v1747_v4 = vpop.f32.mrb[47].mxu0 }
 0x176   : > { %v3147_v11 = vmax.f32 %v1947_v37, %v1743_v32  ;;  %v1746_v63 = vadd.f32 %v1745_v38, %v1425_v33 }
 0x178   : > { %v3149_v12 = vmax.f32 %v1948_v39, %v1746_v63 }
 0x179   : > { %v1429_v13 = vpop.f32.mrb[48].mxu1  ;;  %v1750_v42 = vpop.f32.mrb[48].mxu0 }
 0x17a   : > { %v1430_v40 = vadd.f32 %v3006_v15, %v1429_v13  ;;  %v1431_v43 = vpop.f32.mrb[49].mxu1  ;;  %v1752_v44 = vpop.f32.mrb[49].mxu0 }
 0x17b   : > { %v1432_v45 = vpop.f32.mrb[50].mxu1  ;;  %v1753_v50 = vpop.f32.mrb[50].mxu0 }
 0x17c   : > { %v1751_v46 = vadd.f32 %v1750_v42, %v1430_v40  ;;  %v1433_v49 = vadd.f32 %v3006_v15, %v1432_v45  ;;  %v1434_v51 = vpop.f32.mrb[51].mxu1  ;;  %v1755_v52 = vpop.f32.mrb[51].mxu0 }
 0x17e   : > { %v1957_v9 = vmax.f32 %v3111_v16, %v1751_v46  ;;  %v1754_v26 = vadd.f32 %v1753_v50, %v1433_v49 }
 0x180   : > { %v1958_v37 = vmax.f32 %v3116_v61, %v1754_v26 }
 0x181   : > { %v1437_v39 = vpop.f32.mrb[52].mxu1  ;;  %v1758_v58 = vpop.f32.mrb[52].mxu0 }
 0x182   : > { %v1438_v53 = vadd.f32 %v3006_v15, %v1437_v39  ;;  %v1439_v59 = vpop.f32.mrb[53].mxu1  ;;  %v1760_v60 = vpop.f32.mrb[53].mxu0 }
 0x183   : > { %v1440_v62 = vpop.f32.mrb[54].mxu1  ;;  %v1761_v2 = vpop.f32.mrb[54].mxu0 }
 0x184   : > { %v1759_v0 = vadd.f32 %v1758_v58, %v1438_v53  ;;  %v1441_v1 = vadd.f32 %v3006_v15, %v1440_v62  ;;  %v1442_v3 = vpop.f32.mrb[55].mxu1  ;;  %v1763_v5 = vpop.f32.mrb[55].mxu0 }
 0x186   : > { %v1959_v6 = vmax.f32 %v3123_v8, %v1759_v0  ;;  %v1762_v25 = vadd.f32 %v1761_v2, %v1441_v1 }
 0x188   : > { %v1960_v16 = vmax.f32 %v3128_v35, %v1762_v25 }
 0x189   : > { %v1445_v27 = vpop.f32.mrb[56].mxu1  ;;  %v1766_v34 = vpop.f32.mrb[56].mxu0 }
 0x18a   : > { %v1446_v61 = vadd.f32 %v3006_v15, %v1445_v27  ;;  %v1447_v7 = vpop.f32.mrb[57].mxu1  ;;  %v1768_v31 = vpop.f32.mrb[57].mxu0 }
 0x18b   : > { %v1448_v36 = vpop.f32.mrb[58].mxu1  ;;  %v1769_v17 = vpop.f32.mrb[58].mxu0 }
 0x18c   : > { %v1767_v10 = vadd.f32 %v1766_v34, %v1446_v61  ;;  %v1449_v14 = vadd.f32 %v3006_v15, %v1448_v36  ;;  %v1450_v18 = vpop.f32.mrb[59].mxu1  ;;  %v1771_v19 = vpop.f32.mrb[59].mxu0 }
 0x18e   : > { %v1961_v20 = vmax.f32 %v3135_v54, %v1767_v10  ;;  %v1770_v21 = vadd.f32 %v1769_v17, %v1449_v14 }
 0x190   : > { %v1962_v8 = vmax.f32 %v3140_v55, %v1770_v21 }
 0x191   : > { %v1453_v22 = vpop.f32.mrb[60].mxu1  ;;  %v1774_v41 = vpop.f32.mrb[60].mxu0 }
 0x192   : > { %v1454_v35 = vadd.f32 %v3006_v15, %v1453_v22  ;;  %v1455_v48 = vpop.f32.mrb[61].mxu1  ;;  %v1776_v47 = vpop.f32.mrb[61].mxu0 }
 0x193   : > { %v1456_v56 = vpop.f32.mrb[62].mxu1  ;;  %v1777_v28 = vpop.f32.mrb[62].mxu0 }
 0x194   : > { %v1775_v23 = vadd.f32 %v1774_v41, %v1454_v35  ;;  %v1457_v24 = vadd.f32 %v3006_v15, %v1456_v56  ;;  %v1458_v29 = vpop.f32.mrb[63].mxu1  ;;  %v1779_v30 = vpop.f32.mrb[63].mxu0 }
 0x196   : > { %v1963_v32 = vmax.f32 %v3147_v11, %v1775_v23  ;;  %v1778_v33 = vadd.f32 %v1777_v28, %v1457_v24 }
 0x198   : > { %v1964_v54 = vmax.f32 %v3149_v12, %v1778_v33 }
 0x199   : > { %v1461_v38 = vpop.f32.mrb[64].mxu1  ;;  %v1782_v57 = vpop.f32.mrb[64].mxu0 }
 0x19a   : > { %v1462_v55 = vadd.f32 %v3006_v15, %v1461_v38  ;;  %v1463_v4 = vpop.f32.mrb[65].mxu1  ;;  %v1784_v63 = vpop.f32.mrb[65].mxu0 }
 0x19b   : > { %v1464_v13 = vpop.f32.mrb[66].mxu1  ;;  %v1785_v43 = vpop.f32.mrb[66].mxu0 }
 0x19c   : > { %v1783_v40 = vadd.f32 %v1782_v57, %v1462_v55  ;;  %v1465_v42 = vadd.f32 %v3006_v15, %v1464_v13  ;;  %v1466_v44 = vpop.f32.mrb[67].mxu1  ;;  %v1787_v45 = vpop.f32.mrb[67].mxu0 }
 0x19e   : > { %v3169_v46 = vmax.f32 %v1957_v9, %v1783_v40  ;;  %v1786_v49 = vadd.f32 %v1785_v43, %v1465_v42 }
 0x1a0   : > { %v3171_v11 = vmax.f32 %v1958_v37, %v1786_v49 }
 0x1a1   : > { %v1469_v50 = vpop.f32.mrb[68].mxu1  ;;  %v1790_v51 = vpop.f32.mrb[68].mxu0 }
 0x1a2   : > { %v1470_v12 = vadd.f32 %v3006_v15, %v1469_v50  ;;  %v1471_v52 = vpop.f32.mrb[69].mxu1  ;;  %v1792_v26 = vpop.f32.mrb[69].mxu0 }
 0x1a3   : > { %v1472_v39 = vpop.f32.mrb[70].mxu1  ;;  %v1793_v59 = vpop.f32.mrb[70].mxu0 }
 0x1a4   : > { %v1791_v53 = vadd.f32 %v1790_v51, %v1470_v12  ;;  %v1473_v58 = vadd.f32 %v3006_v15, %v1472_v39  ;;  %v1474_v60 = vpop.f32.mrb[71].mxu1  ;;  %v1795_v62 = vpop.f32.mrb[71].mxu0 }
 0x1a6   : > { %v3175_v0 = vmax.f32 %v1959_v6, %v1791_v53  ;;  %v1794_v9 = vadd.f32 %v1793_v59, %v1473_v58 }
 0x1a8   : > { %v3177_v1 = vmax.f32 %v1960_v16, %v1794_v9 }
 0x1a9   : > { %v1477_v37 = vpop.f32.mrb[72].mxu1  ;;  %v1798_v3 = vpop.f32.mrb[72].mxu0 }
 0x1aa   : > { %v1478_v2 = vadd.f32 %v3006_v15, %v1477_v37  ;;  %v1479_v5 = vpop.f32.mrb[73].mxu1  ;;  %v1800_v25 = vpop.f32.mrb[73].mxu0 }
 0x1ab   : > { %v1480_v27 = vpop.f32.mrb[74].mxu1  ;;  %v1801_v7 = vpop.f32.mrb[74].mxu0 }
 0x1ac   : > { %v1799_v61 = vadd.f32 %v1798_v3, %v1478_v2  ;;  %v1481_v34 = vadd.f32 %v3006_v15, %v1480_v27  ;;  %v1482_v31 = vpop.f32.mrb[75].mxu1  ;;  %v1803_v36 = vpop.f32.mrb[75].mxu0 }
 0x1ae   : > { %v3181_v10 = vmax.f32 %v1961_v20, %v1799_v61  ;;  %v1802_v6 = vadd.f32 %v1801_v7, %v1481_v34 }
 0x1b0   : > { %v3183_v14 = vmax.f32 %v1962_v8, %v1802_v6 }
 0x1b1   : > { %v1485_v16 = vpop.f32.mrb[76].mxu1  ;;  %v1806_v18 = vpop.f32.mrb[76].mxu0 }
 0x1b2   : > { %v1486_v17 = vadd.f32 %v3006_v15, %v1485_v16  ;;  %v1487_v19 = vpop.f32.mrb[77].mxu1  ;;  %v1808_v21 = vpop.f32.mrb[77].mxu0 }
 0x1b3   : > { %v1488_v22 = vpop.f32.mrb[78].mxu1  ;;  %v1809_v48 = vpop.f32.mrb[78].mxu0 }
 0x1b4   : > { %v1807_v35 = vadd.f32 %v1806_v18, %v1486_v17  ;;  %v1489_v41 = vadd.f32 %v3006_v15, %v1488_v22  ;;  %v1490_v47 = vpop.f32.mrb[79].mxu1  ;;  %v1811_v56 = vpop.f32.mrb[79].mxu0 }
 0x1b6   : > { %v3187_v23 = vmax.f32 %v1963_v32, %v1807_v35  ;;  %v1810_v20 = vadd.f32 %v1809_v48, %v1489_v41 }
 0x1b8   : > { %v3189_v24 = vmax.f32 %v1964_v54, %v1810_v20 }
 0x1b9   : > { %v1493_v8 = vpop.f32.mrb[80].mxu1  ;;  %v1814_v29 = vpop.f32.mrb[80].mxu0 }
 0x1ba   : > { %v1494_v28 = vadd.f32 %v3006_v15, %v1493_v8  ;;  %v1495_v30 = vpop.f32.mrb[81].mxu1  ;;  %v1816_v33 = vpop.f32.mrb[81].mxu0 }
 0x1bb   : > { %v1496_v38 = vpop.f32.mrb[82].mxu1  ;;  %v1817_v4 = vpop.f32.mrb[82].mxu0 }
 0x1bc   : > { %v1815_v55 = vadd.f32 %v1814_v29, %v1494_v28  ;;  %v1497_v57 = vadd.f32 %v3006_v15, %v1496_v38  ;;  %v1498_v63 = vpop.f32.mrb[83].mxu1  ;;  %v1819_v13 = vpop.f32.mrb[83].mxu0 }
 0x1be   : > { %v1973_v40 = vmax.f32 %v3169_v46, %v1815_v55  ;;  %v1818_v32 = vadd.f32 %v1817_v4, %v1497_v57 }
 0x1c0   : > { %v1974_v42 = vmax.f32 %v3171_v11, %v1818_v32 }
 0x1c1   : > { %v1501_v54 = vpop.f32.mrb[84].mxu1  ;;  %v1822_v44 = vpop.f32.mrb[84].mxu0 }
 0x1c2   : > { %v1502_v43 = vadd.f32 %v3006_v15, %v1501_v54  ;;  %v1503_v45 = vpop.f32.mrb[85].mxu1  ;;  %v1824_v49 = vpop.f32.mrb[85].mxu0 }
 0x1c3   : > { %v1504_v50 = vpop.f32.mrb[86].mxu1  ;;  %v1825_v52 = vpop.f32.mrb[86].mxu0 }
 0x1c4   : > { %v1823_v12 = vadd.f32 %v1822_v44, %v1502_v43  ;;  %v1505_v51 = vadd.f32 %v3006_v15, %v1504_v50  ;;  %v1506_v26 = vpop.f32.mrb[87].mxu1  ;;  %v1827_v39 = vpop.f32.mrb[87].mxu0 }
 0x1c6   : > { %v1975_v53 = vmax.f32 %v3175_v0, %v1823_v12  ;;  %v1826_v58 = vadd.f32 %v1825_v52, %v1505_v51 }
 0x1c8   : > { %v1976_v46 = vmax.f32 %v3177_v1, %v1826_v58 }
 0x1c9   : > { %v1509_v59 = vpop.f32.mrb[88].mxu1  ;;  %v1830_v60 = vpop.f32.mrb[88].mxu0 }
 0x1ca   : > { %v1510_v11 = vadd.f32 %v3006_v15, %v1509_v59  ;;  %v1511_v62 = vpop.f32.mrb[89].mxu1  ;;  %v1832_v9 = vpop.f32.mrb[89].mxu0 }
 0x1cb   : > { %v1512_v37 = vpop.f32.mrb[90].mxu1  ;;  %v1833_v5 = vpop.f32.mrb[90].mxu0 }
 0x1cc   : > { %v1831_v2 = vadd.f32 %v1830_v60, %v1510_v11  ;;  %v1513_v3 = vadd.f32 %v3006_v15, %v1512_v37  ;;  %v1514_v25 = vpop.f32.mrb[91].mxu1  ;;  %v1835_v27 = vpop.f32.mrb[91].mxu0 }
 0x1ce   : > { %v1977_v61 = vmax.f32 %v3181_v10, %v1831_v2  ;;  %v1834_v34 = vadd.f32 %v1833_v5, %v1513_v3 }
 0x1d0   : > { %v1978_v0 = vmax.f32 %v3183_v14, %v1834_v34 }
 0x1d1   : > { %v1517_v7 = vpop.f32.mrb[92].mxu1  ;;  %v1838_v31 = vpop.f32.mrb[92].mxu0 }
 0x1d2   : > { %v1518_v1 = vadd.f32 %v3006_v15, %v1517_v7  ;;  %v1519_v36 = vpop.f32.mrb[93].mxu1  ;;  %v1840_v6 = vpop.f32.mrb[93].mxu0 }
 0x1d3   : > { %v1520_v16 = vpop.f32.mrb[94].mxu1  ;;  %v1841_v19 = vpop.f32.mrb[94].mxu0 }
 0x1d4   : > { %v1839_v17 = vadd.f32 %v1838_v31, %v1518_v1  ;;  %v1521_v18 = vadd.f32 %v3006_v15, %v1520_v16  ;;  %v1522_v21 = vpop.f32.mrb[95].mxu1  ;;  %v1843_v22 = vpop.f32.mrb[95].mxu0 }
 0x1d6   : > { %v1979_v35 = vmax.f32 %v3187_v23, %v1839_v17  ;;  %v1842_v41 = vadd.f32 %v1841_v19, %v1521_v18 }
 0x1d8   : > { %v1980_v10 = vmax.f32 %v3189_v24, %v1842_v41 }
 0x1d9   : > { %v1525_v48 = vpop.f32.mrb[96].mxu1  ;;  %v1846_v47 = vpop.f32.mrb[96].mxu0 }
 0x1da   : > { %v1526_v14 = vadd.f32 %v3006_v15, %v1525_v48  ;;  %v1527_v56 = vpop.f32.mrb[97].mxu1  ;;  %v1848_v20 = vpop.f32.mrb[97].mxu0 }
 0x1db   : > { %v1528_v8 = vpop.f32.mrb[98].mxu1  ;;  %v1849_v30 = vpop.f32.mrb[98].mxu0 }
 0x1dc   : > { %v1847_v28 = vadd.f32 %v1846_v47, %v1526_v14  ;;  %v1529_v29 = vadd.f32 %v3006_v15, %v1528_v8  ;;  %v1530_v33 = vpop.f32.mrb[99].mxu1  ;;  %v1851_v38 = vpop.f32.mrb[99].mxu0 }
 0x1de   : > { %v3209_v55 = vmax.f32 %v1973_v40, %v1847_v28  ;;  %v1850_v57 = vadd.f32 %v1849_v30, %v1529_v29 }
 0x1e0   : > { %v3211_v23 = vmax.f32 %v1974_v42, %v1850_v57 }
 0x1e1   : > { %v1533_v4 = vpop.f32.mrb[100].mxu1  ;;  %v1854_v63 = vpop.f32.mrb[100].mxu0 }
 0x1e2   : > { %v1534_v24 = vadd.f32 %v3006_v15, %v1533_v4  ;;  %v1535_v13 = vpop.f32.mrb[101].mxu1  ;;  %v1856_v32 = vpop.f32.mrb[101].mxu0 }
 0x1e3   : > { %v1536_v54 = vpop.f32.mrb[102].mxu1  ;;  %v1857_v45 = vpop.f32.mrb[102].mxu0 }
 0x1e4   : > { %v1855_v43 = vadd.f32 %v1854_v63, %v1534_v24  ;;  %v1537_v44 = vadd.f32 %v3006_v15, %v1536_v54  ;;  %v1538_v49 = vpop.f32.mrb[103].mxu1  ;;  %v1859_v50 = vpop.f32.mrb[103].mxu0 }
 0x1e6   : > { %v3215_v12 = vmax.f32 %v1975_v53, %v1855_v43  ;;  %v1858_v40 = vadd.f32 %v1857_v45, %v1537_v44 }
 0x1e8   : > { %v3217_v51 = vmax.f32 %v1976_v46, %v1858_v40 }
 0x1e9   : > { %v1541_v42 = vpop.f32.mrb[104].mxu1  ;;  %v1862_v26 = vpop.f32.mrb[104].mxu0 }
 0x1ea   : > { %v1542_v52 = vadd.f32 %v3006_v15, %v1541_v42  ;;  %v1543_v39 = vpop.f32.mrb[105].mxu1  ;;  %v1864_v58 = vpop.f32.mrb[105].mxu0 }
 0x1eb   : > { %v1544_v59 = vpop.f32.mrb[106].mxu1  ;;  %v1865_v62 = vpop.f32.mrb[106].mxu0 }
 0x1ec   : > { %v1863_v11 = vadd.f32 %v1862_v26, %v1542_v52  ;;  %v1545_v60 = vadd.f32 %v3006_v15, %v1544_v59  ;;  %v1546_v9 = vpop.f32.mrb[107].mxu1  ;;  %v1867_v37 = vpop.f32.mrb[107].mxu0 }
 0x1ee   : > { %v3221_v2 = vmax.f32 %v1977_v61, %v1863_v11  ;;  %v1866_v53 = vadd.f32 %v1865_v62, %v1545_v60 }
 0x1f0   : > { %v3223_v3 = vmax.f32 %v1978_v0, %v1866_v53 }
 0x1f1   : > { %v1549_v46 = vpop.f32.mrb[108].mxu1  ;;  %v1870_v25 = vpop.f32.mrb[108].mxu0 }
 0x1f2   : > { %v1550_v5 = vadd.f32 %v3006_v15, %v1549_v46  ;;  %v1551_v27 = vpop.f32.mrb[109].mxu1  ;;  %v1872_v34 = vpop.f32.mrb[109].mxu0 }
 0x1f3   : > { %v1552_v7 = vpop.f32.mrb[110].mxu1  ;;  %v1873_v36 = vpop.f32.mrb[110].mxu0 }
 0x1f4   : > { %v1871_v1 = vadd.f32 %v1870_v25, %v1550_v5  ;;  %v1553_v31 = vadd.f32 %v3006_v15, %v1552_v7  ;;  %v1554_v6 = vpop.f32.mrb[111].mxu1  ;;  %v1875_v16 = vpop.f32.mrb[111].mxu0 }
 0x1f6   : > { %v3227_v17 = vmax.f32 %v1979_v35, %v1871_v1  ;;  %v1874_v61 = vadd.f32 %v1873_v36, %v1553_v31 }
 0x1f8   : > { %v3229_v18 = vmax.f32 %v1980_v10, %v1874_v61 }
 0x1f9   : > { %v1557_v0 = vpop.f32.mrb[112].mxu1  ;;  %v1878_v21 = vpop.f32.mrb[112].mxu0 }
 0x1fa   : > { %v1558_v19 = vadd.f32 %v3006_v15, %v1557_v0  ;;  %v1559_v22 = vpop.f32.mrb[113].mxu1  ;;  %v1880_v41 = vpop.f32.mrb[113].mxu0  ;;  %v3271_v0 = vld [vmem:[%s3326_s2] ss:$0 sm:$0xff] }
 0x1fb   : > { %v1560_v48 = vpop.f32.mrb[114].mxu1  ;;  %v1881_v56 = vpop.f32.mrb[114].mxu0 }
 0x1fc   : > { %v3232_v14 = vadd.f32 %v1878_v21, %v1558_v19  ;;  %v1561_v47 = vadd.f32 %v3006_v15, %v1560_v48  ;;  %v1562_v20 = vpop.f32.mrb[115].mxu1  ;;  %v1883_v8 = vpop.f32.mrb[115].mxu0 }
 0x1fe   : > { %v1989_v35 = vmax.f32 %v3209_v55, %v3232_v14  ;;  %v1882_v28 = vadd.f32 %v1881_v56, %v1561_v47 }
 0x200   : > { %v1990_v10 = vmax.f32 %v3211_v23, %v1882_v28 }
 0x201   : > { %v1565_v29 = vpop.f32.mrb[116].mxu1  ;;  %v1886_v33 = vpop.f32.mrb[116].mxu0 }
 0x202   : > { %v1566_v30 = vadd.f32 %v3006_v15, %v1565_v29  ;;  %v1567_v38 = vpop.f32.mrb[117].mxu1  ;;  %v1888_v57 = vpop.f32.mrb[117].mxu0 }
 0x203   : > { %v1568_v4 = vpop.f32.mrb[118].mxu1  ;;  %v1889_v13 = vpop.f32.mrb[118].mxu0 }
 0x204   : > { %v3239_v24 = vadd.f32 %v1886_v33, %v1566_v30  ;;  %v1569_v63 = vadd.f32 %v3006_v15, %v1568_v4  ;;  %v1570_v32 = vpop.f32.mrb[119].mxu1  ;;  %v1891_v54 = vpop.f32.mrb[119].mxu0 }
 0x206   : > { %v1991_v55 = vmax.f32 %v3215_v12, %v3239_v24  ;;  %v3244_v43 = vadd.f32 %v1889_v13, %v1569_v63 }
 0x208   : > { %v1992_v23 = vmax.f32 %v3217_v51, %v3244_v43 }
 0x209   : > { %v1573_v44 = vpop.f32.mrb[120].mxu1  ;;  %v1894_v49 = vpop.f32.mrb[120].mxu0 }
 0x20a   : > { %v1574_v45 = vadd.f32 %v3006_v15, %v1573_v44  ;;  %v1575_v50 = vpop.f32.mrb[121].mxu1  ;;  %v1896_v40 = vpop.f32.mrb[121].mxu0 }
 0x20b   : > { %v1576_v42 = vpop.f32.mrb[122].mxu1  ;;  %v1897_v39 = vpop.f32.mrb[122].mxu0 }
 0x20c   : > { %v3249_v52 = vadd.f32 %v1894_v49, %v1574_v45  ;;  %v1577_v26 = vadd.f32 %v3006_v15, %v1576_v42  ;;  %v1578_v58 = vpop.f32.mrb[123].mxu1  ;;  %v1899_v59 = vpop.f32.mrb[123].mxu0 }
 0x20e   : > { %v1993_v11 = vmax.f32 %v3221_v2, %v3249_v52  ;;  %v3254_v60 = vadd.f32 %v1897_v39, %v1577_v26 }
 0x210   : > { %v1994_v62 = vmax.f32 %v3223_v3, %v3254_v60 }
 0x211   : > { %v1581_v9 = vpop.f32.mrb[124].mxu1  ;;  %v1902_v53 = vpop.f32.mrb[124].mxu0 }
 0x212   : > { %v1582_v37 = vadd.f32 %v3006_v15, %v1581_v9  ;;  %v1583_v46 = vpop.f32.mrb[125].mxu1  ;;  %v1904_v5 = vpop.f32.mrb[125].mxu0 }
 0x213   : > { %v1584_v25 = vpop.f32.mrb[126].mxu1  ;;  %v1905_v7 = vpop.f32.mrb[126].mxu0 }
 0x214   : > { %v3259_v27 = vadd.f32 %v1902_v53, %v1582_v37  ;;  %v1585_v34 = vadd.f32 %v3006_v15, %v1584_v25  ;;  %v1586_v1 = vpop.f32.mrb[127].mxu1  ;;  %v1907_v31 = vpop.f32.mrb[127].mxu0 }
 0x216   : > { %v1995_v36 = vmax.f32 %v3227_v17, %v3259_v27  ;;  %v3264_v6 = vadd.f32 %v1905_v7, %v1585_v34 }
 0x218   : > { %v1996_v16 = vmax.f32 %v3229_v18, %v3264_v6 }
 0x219   : > { %v1589_v61 = vpop.f32.mrb[128].mxu1  ;;  %v1910_v19 = vpop.f32.mrb[128].mxu0 }
 0x21a   : > { %v1590_v15 = vadd.f32 %v3271_v0, %v1589_v61  ;;  %v1591_v21 = vpop.f32.mrb[129].mxu1  ;;  %v1912_v22 = vpop.f32.mrb[129].mxu0 }
 0x21b   : > { %v1592_v41 = vpop.f32.mrb[130].mxu1  ;;  %v1913_v47 = vpop.f32.mrb[130].mxu0 }
 0x21c   : > { %v1911_v48 = vadd.f32 %v1910_v19, %v1590_v15  ;;  %v1593_v14 = vadd.f32 %v3271_v0, %v1592_v41  ;;  %v1594_v56 = vpop.f32.mrb[131].mxu1  ;;  %v1915_v20 = vpop.f32.mrb[131].mxu0 }
 0x21e   : > { %v1997_v8 = vmax.f32 %v1989_v35, %v1911_v48  ;;  %v1914_v28 = vadd.f32 %v1913_v47, %v1593_v14 }
 0x220   : > { %v2005_v29 = vmax.f32 %v1997_v8, 0.0  ;;  %v1998_v30 = vmax.f32 %v1990_v10, %v1914_v28 }
 0x221   : > { %v1597_v33 = vpop.f32.mrb[132].mxu1  ;;  %v1918_v63 = vpop.f32.mrb[132].mxu0 }
 0x222   : > { %v2305_v38 = vpack.c.bf16 %v2005_v29, %v2005_v29  ;;  %v2006_v57 = vmax.f32 %v1998_v30, 0.0  ;;  %v1598_v4 = vadd.f32 %v3271_v0, %v1597_v33  ;;  %v1599_v13 = vpop.f32.mrb[133].mxu1  ;;  %v1920_v32 = vpop.f32.mrb[133].mxu0 }
 0x223   : > { %v1600_v35 = vpop.f32.mrb[134].mxu1  ;;  %v1921_v45 = vpop.f32.mrb[134].mxu0 }
 0x224   : > { %2046 = vst.msk [vmem:[%s3279_s14] sm:$0xf] %vm2045_vm0, %v2305_v38  ;;  %v2306_v10 = vpack.c.bf16 %v2006_v57, %v2006_v57  ;;  %v1919_v54 = vadd.f32 %v1918_v63, %v1598_v4  ;;  %v1601_v44 = vadd.f32 %v3271_v0, %v1600_v35  ;;  %v1602_v49 = vpop.f32.mrb[135].mxu1  ;;  %v1923_v50 = vpop.f32.mrb[135].mxu0 }
 0x226   : > { %2047 = vst.msk [vmem:[%s3279_s14 + $0x4] sm:$0xf] %vm2045_vm0, %v2306_v10  ;;  %v1999_v40 = vmax.f32 %v1991_v55, %v1919_v54  ;;  %v1922_v42 = vadd.f32 %v1921_v45, %v1601_v44 }
 0x228   : > { %v2007_v26 = vmax.f32 %v1999_v40, 0.0  ;;  %v2000_v39 = vmax.f32 %v1992_v23, %v1922_v42 }
 0x229   : > { %v1605_v58 = vpop.f32.mrb[136].mxu1  ;;  %v1926_v53 = vpop.f32.mrb[136].mxu0 }
 0x22a   : > { %v2307_v59 = vpack.c.bf16 %v2007_v26, %v2007_v26  ;;  %v2008_v9 = vmax.f32 %v2000_v39, 0.0  ;;  %v1606_v37 = vadd.f32 %v3271_v0, %v1605_v58  ;;  %v1607_v46 = vpop.f32.mrb[137].mxu1  ;;  %v1928_v5 = vpop.f32.mrb[137].mxu0 }
 0x22b   : > { %v1608_v25 = vpop.f32.mrb[138].mxu1  ;;  %v1929_v34 = vpop.f32.mrb[138].mxu0 }
 0x22c   : > { %2048 = vst.msk [vmem:[%s3279_s14 + $0x8] sm:$0xf] %vm2045_vm0, %v2307_v59  ;;  %v2308_v12 = vpack.c.bf16 %v2008_v9, %v2008_v9  ;;  %v1927_v24 = vadd.f32 %v1926_v53, %v1606_v37  ;;  %v1609_v55 = vadd.f32 %v3271_v0, %v1608_v25  ;;  %v1610_v51 = vpop.f32.mrb[139].mxu1  ;;  %v1931_v43 = vpop.f32.mrb[139].mxu0 }
 0x22e   : > { %2049 = vst.msk [vmem:[%s3279_s14 + $0xc] sm:$0xf] %vm2045_vm0, %v2308_v12  ;;  %v2001_v23 = vmax.f32 %v1993_v11, %v1927_v24  ;;  %v1930_v7 = vadd.f32 %v1929_v34, %v1609_v55 }
 0x230   : > { %v2009_v1 = vmax.f32 %v2001_v23, 0.0  ;;  %v2002_v31 = vmax.f32 %v1994_v62, %v1930_v7 }
 0x231   : > { %v1613_v61 = vpop.f32.mrb[140].mxu1  ;;  %v1934_v22 = vpop.f32.mrb[140].mxu0 }
 0x232   : > { %v2309_v15 = vpack.c.bf16 %v2009_v1, %v2009_v1  ;;  %v2010_v19 = vmax.f32 %v2002_v31, 0.0  ;;  %v1614_v21 = vadd.f32 %v3271_v0, %v1613_v61  ;;  %v1615_v41 = vpop.f32.mrb[141].mxu1  ;;  %v1936_v48 = vpop.f32.mrb[141].mxu0 }
 0x233   : > { %v1616_v14 = vpop.f32.mrb[142].mxu1  ;;  %v1937_v3 = vpop.f32.mrb[142].mxu0 }
 0x234   : > { %2050 = vst.msk [vmem:[%s3279_s14 + $0x10] sm:$0xf] %vm2045_vm0, %v2309_v15  ;;  %v2310_v2 = vpack.c.bf16 %v2010_v19, %v2010_v19  ;;  %v1935_v52 = vadd.f32 %v1934_v22, %v1614_v21  ;;  %v1617_v11 = vadd.f32 %v3271_v0, %v1616_v14  ;;  %v1618_v60 = vpop.f32.mrb[143].mxu1  ;;  %v1939_v62 = vpop.f32.mrb[143].mxu0 }
 0x236   : > { %2051 = vst.msk [vmem:[%s3279_s14 + $0x14] sm:$0xf] %vm2045_vm0, %v2310_v2  ;;  %v2003_v47 = vmax.f32 %v1995_v36, %v1935_v52  ;;  %v1938_v56 = vadd.f32 %v1937_v3, %v1617_v11 }
 0x238   : > { %v2011_v20 = vmax.f32 %v2003_v47, 0.0  ;;  %v2004_v8 = vmax.f32 %v1996_v16, %v1938_v56 }
 0x23a   : > { %v2311_v28 = vpack.c.bf16 %v2011_v20, %v2011_v20  ;;  %v2012_v29 = vmax.f32 %v2004_v8, 0.0 }
 0x23c   : > { %2052 = vst.msk [vmem:[%s3279_s14 + $0x18] sm:$0xf] %vm2045_vm0, %v2311_v28  ;;  %v2312_v0 = vpack.c.bf16 %v2012_v29, %v2012_v29 }
 0x23e   : > { %2053 = vst.msk [vmem:[%s3279_s14 + $0x1c] sm:$0xf] %vm2045_vm0, %v2312_v0 }
 0x23f PF: > { %s13_s12 = sadd.s32 1, %s2722_s12  }
 0x240   : > { %p10_p4 = scmp.ge.s32.totalorder %s13_s12, 4  }
 0x242   :  { %12 = sbr.rel (!%p10_p4) target bundleno = 1 (0x1), region = 62 }

// kernel: _lambda_.6
= control target key start
LH: loop header
LB: loop body
LE: loop exit
PB: predicated region body
PF: predicated region fallthrough
CT: control target
= control target key end

     0   :  { %s837_s12 = smov 0   ;;  %s959_s0 = inlined_call_operand.vmem [shape: bf16[2,72,288], index: 0, kind: input, shape index: {}]   ;;  %s960_s1 = inlined_call_operand.vmem [shape: bf16[288,64], index: 1, kind: input, shape index: {}]   ;;  %s961_s2 = inlined_call_operand.vmem [shape: f32[1,64], index: 2, kind: input, shape index: {}]   ;;  %s962_s3 = inlined_call_operand.vmem [shape: bf16[2,8,64], index: 3, kind: output, shape index: {}]  }
   0x1 LB: > { %s634_s13 = sadd.s32 4294967295, %s813_s12   ;;  %p638_p0 = scmp.ge.s32.totalorder %s813_s12, 1  ;;  %s813_s12 = sphi %s837_s12, %s13_s12  }
   0x2   : > { %p137_p1 = scmp.lt.s32.totalorder %s813_s12, 3 }
   0x4   : > { %p138_p2 = pnand %p638_p0, %p137_p1 }
   0x5   : > { %v770_v0 = vld [vmem:[%s960_s1 + $0x40] sm:$0xff] (!%p138_p2)   ;;  %v815_v2 = vmov (!%p138_p2), 0.0   ;;  %v772_v3 = vld [vmem:[%s960_s1 + $0x48] sm:$0xff] (!%p138_p2)   ;;  %p160_p3 = scmp.lt.s32.totalorder (!%p138_p2), %s634_s13, 1  ;;  %vm816_vm0 = vmmov (!%p138_p2), 0   ;;  %v774_v5 = vld [vmem:[%s960_s1 + $0x50] sm:$0xff] (!%p138_p2)  }
   0x6   : > { %141 = sbr.rel (%p138_p2) target bundleno = 296 (0x128), region = 32  ;;  %v771_v1 = vld [vmem:[%s960_s1] sm:$0xff] (!%p138_p2)   ;;  %735 = vmatprep.subr.bf16.mxu1 (!%p138_p2), %v815_v2  ;;  %682 = vmatprep.subr.bf16.mxu0 (!%p138_p2), %v770_v0  ;;  %v773_v4 = vld [vmem:[%s960_s1 + $0x8] sm:$0xff] (!%p138_p2)   ;;  %v775_v6 = vld [vmem:[%s960_s1 + $0x10] sm:$0xff] (!%p138_p2)   ;;  %vm409_vm1 = vcmask (!%p138_p2), 261120   ;;  %vm579_vm2 = vcmask (!%p138_p2), 519168  }
   0x7   : > { %683 = vmatpush3.bf16.msra.mxu0 (!%p138_p2), %v771_v1  ;;  %739 = vmatprep.mubr.msk.bf16.mxu1 (!%p138_p2), %vm816_vm0, %v815_v2  ;;  %v776_v7 = vld [vmem:[%s960_s1 + $0x58] sm:$0xff] (!%p138_p2)   ;;  %v778_v9 = vld [vmem:[%s960_s1 + $0x60] sm:$0xff] (!%p138_p2)   ;;  %v780_v12 = vld [vmem:[%s960_s1 + $0x68] sm:$0xff] (!%p138_p2)  }
   0x8   : > { %684 = vmatprep.subr.bf16.mxu0 (!%p138_p2), %v772_v3  ;;  %v777_v8 = vld [vmem:[%s960_s1 + $0x18] sm:$0xff] (!%p138_p2)   ;;  %v784_v10 = vld [vmem:[%s960_s1 + $0x80] sm:$0xff] (!%p138_p2)   ;;  %v781_v13 = vld [vmem:[%s960_s1 + $0x28] sm:$0xff] (!%p138_p2)  }
   0x9   : > { %v779_v11 = vld [vmem:[%s960_s1 + $0x20] sm:$0xff] (!%p138_p2)   ;;  %736 = vmatpush3.bf16.msra.mxu1 (!%p138_p2), %v784_v10  ;;  %v782_v14 = vld [vmem:[%s960_s1 + $0x70] sm:$0xff] (!%p138_p2)   ;;  %v790_v16 = vld [vmem:[%s960_s1 + $0x88] sm:$0xff] (!%p138_p2)  }
   0xa   : > { %737 = vmatprep.subr.bf16.mxu1 (!%p138_p2), %v815_v2  ;;  %v783_v18 = vld [vmem:[%s960_s1 + $0x30] sm:$0xff] (!%p138_p2)   ;;  %v785_v19 = vld [vmem:[%s960_s1 + $0x78] sm:$0xff] (!%p138_p2)   ;;  %v941_v44 = vld [vmem:[%s961_s2] ss:$0 sm:$0xff] (!%p138_p2) }
   0xb   : > { %685 = vmatpush3.bf16.msra.mxu0 (!%p138_p2), %v773_v4  ;;  %v786_v20 = vld [vmem:[%s960_s1 + $0x38] sm:$0xff] (!%p138_p2)  }
   0xc   : > { %686 = vmatprep.subr.bf16.mxu0 (!%p138_p2), %v774_v5 }
   0xd   : > { %s964_s13 = smov (!%p160_p3, %s634_s13), 1  ;;  %738 = vmatpush3.bf16.msra.mxu1 %v790_v16 }
   0xe   : > { %s759_s30 = smul.u32 108, %s964_s13  ;;  %s640_s4 = sshll.u32 %s964_s13, 2 }
   0xf   : > { %687 = vmatpush3.bf16.msra.mxu0 %v775_v6  ;;  %s168_s7 = scalar_lea.vmem %s962_s3, %s640_s4 }
  0x10   : > { %688 = vmatprep.subr.bf16.mxu0 %v776_v7  ;;  %s887_s14 = scalar_lea.vmem %s959_s0, %s759_s30 }
  0x11   : > { %v789_v15 = vld [vmem:[%s887_s14 + $0x4] ss:$12 sps:$4 sm:$0xff]   ;;  %v791_v17 = vld [vmem:[%s887_s14 + $0x8] ss:$12 sps:$4 sm:$0xff]   ;;  %v795_v21 = vld [vmem:[%s887_s14 + $0x20] ss:$12 sps:$4 sm:$0xff]  }
  0x12   : > { %457 = vmatprep.mubr.bf16.mxu0 %v789_v15  ;;  %740 = vmatmul.mubr.msk.bf16.vlgmr.msra.gmra.mrb[0].mxu1 %vm409_vm1, %v791_v17  ;;  %v787_v22 = vld [vmem:[%s887_s14] ss:$12 sps:$4 sm:$0xff]   ;;  %v792_v23 = vld [vmem:[%s887_s14 + $0x1c] ss:$12 sps:$4 sm:$0xff]   ;;  %v799_v24 = vld [vmem:[%s887_s14 + $0x38] ss:$12 sps:$4 sm:$0xff]  }
  0x13   : > { %689 = vmatpush3.bf16.msra.mxu0 %v777_v8  ;;  %743 = vmatprep.mubr.msk.bf16.mxu1 %vm816_vm0, %v815_v2  ;;  %v794_v25 = vld [vmem:[%s887_s14 + $0x18] ss:$12 sps:$4 sm:$0xff]   ;;  %v796_v26 = vld [vmem:[%s887_s14 + $0x34] ss:$12 sps:$4 sm:$0xff]   ;;  %v803_v27 = vld [vmem:[%s887_s14 + $0x50] ss:$12 sps:$4 sm:$0xff]  }
  0x14   : > { %690 = vmatprep.subr.bf16.mxu0 %v778_v9  ;;  %v798_v28 = vld [vmem:[%s887_s14 + $0x30] ss:$12 sps:$4 sm:$0xff]   ;;  %v800_v29 = vld [vmem:[%s887_s14 + $0x4c] ss:$12 sps:$4 sm:$0xff]   ;;  %v186_v30 = vld [vmem:[%s887_s14 + $0x60] sm:$0xff] }
  0x15   : > { %v806_v31 = vld [vmem:[%s887_s14 + $0x68] ss:$0 sps:$4 sm:$0xff]   ;;  %v655_v33 = vcombine.high %v186_v30, %v186_v30  ;;  %v654_v34 = vcombine.low %v186_v30, %v186_v30 }
  0x16   : > { %v802_v32 = vld [vmem:[%s887_s14 + $0x48] ss:$12 sps:$4 sm:$0xff]  }
  0x17   : > { %691 = vmatpush3.bf16.msra.mxu0 %v779_v11 }
  0x18   : > { %692 = vmatprep.subr.bf16.mxu0 %v780_v12 }
  0x1a   : > { %744 = vmatmul.mubr.msk.bf16.gmra.mrb[4].mxu1 %vm409_vm1, %v795_v21 }
  0x1b   : > { %693 = vmatpush3.bf16.msra.mxu0 %v781_v13  ;;  %747 = vmatprep.mubr.msk.bf16.mxu1 %vm816_vm0, %v815_v2 }
  0x1c   : > { %694 = vmatprep.subr.bf16.mxu0 %v782_v14 }
  0x1f   : > { %695 = vmatpush3.bf16.msra.mxu0 %v783_v18 }
  0x20   : > { %696 = vmatprep.subr.bf16.mxu0 %v785_v19 }
  0x22   : > { %748 = vmatmul.mubr.msk.bf16.gmra.mrb[8].mxu1 %vm409_vm1, %v799_v24 }
  0x23   : > { %697 = vmatpush3.bf16.msra.mxu0 %v786_v20  ;;  %751 = vmatprep.mubr.msk.bf16.mxu1 %vm816_vm0, %v815_v2 }
  0x26   : > { %458 = vmatmul.mubr.bf16.vlgmr.msra.gmra.mrb[0].mxu0 %v787_v22 }
  0x27   : > { %465 = vmatprep.mubr.bf16.mxu0 %v792_v23 }
  0x2a   : > { %752 = vmatmul.mubr.msk.bf16.gmra.mrb[12].mxu1 %vm409_vm1, %v803_v27 }
  0x2b   : > { %755 = vmatprep.mubr.msk.bf16.mxu1 %vm816_vm0, %v815_v2 }
  0x2e   : > { %466 = vmatmul.mubr.bf16.gmra.mrb[4].mxu0 %v794_v25 }
  0x2f   : > { %473 = vmatprep.mubr.bf16.mxu0 %v796_v26 }
  0x32   : > { %756 = vmatmul.mubr.msk.bf16.gmra.mrb[16].mxu1 %vm409_vm1, %v806_v31 }
  0x36   : > { %474 = vmatmul.mubr.bf16.gmra.mrb[8].mxu0 %v798_v28 }
  0x37   : > { %481 = vmatprep.mubr.bf16.mxu0 %v800_v29 }
  0x3e   : > { %482 = vmatmul.mubr.bf16.gmra.mrb[12].mxu0 %v802_v32 }
  0x3f   : > { %489 = vmatprep.mubr.bf16.mxu0 %v655_v33 }
  0x46   : > { %490 = vmatmul.mubr.bf16.gmra.mrb[16].mxu0 %v654_v34 }
  0xe5   : > { %v531_v35 = vpop.f32.mrb[0].mxu1 }
  0xe6   : > { %v741_v36 = vpop.f32.mrb[1].mxu1 }
  0xe7   : > { %v534_v37 = vpop.f32.mrb[2].mxu1 }
  0xe8   : > { %v742_v38 = vpop.f32.mrb[3].mxu1 }
  0xed   : > { %v539_v39 = vpop.f32.mrb[4].mxu1 }
  0xee   : > { %v745_v40 = vpop.f32.mrb[5].mxu1 }
  0xef   : > { %v542_v42 = vpop.f32.mrb[6].mxu1 }
  0xf0   : > { %v746_v45 = vpop.f32.mrb[7].mxu1 }
  0xf5   : > { %v547_v53 = vpop.f32.mrb[8].mxu1 }
  0xf6   : > { %v749_v54 = vpop.f32.mrb[9].mxu1 }
  0xf7   : > { %v550_v57 = vpop.f32.mrb[10].mxu1 }
  0xf8   : > { %v750_v59 = vpop.f32.mrb[11].mxu1 }
  0xf9   : > { %v698_v41 = vpop.f32.mrb[0].mxu0 }
  0xfa   : > { %v699_v43 = vpop.f32.mrb[1].mxu0 }
  0xfb   : > { %v700_v46 = vadd.f32 %v699_v43, %v698_v41  ;;  %v701_v47 = vpop.f32.mrb[2].mxu0 }
  0xfc   : > { %v702_v48 = vpop.f32.mrb[3].mxu0 }
  0xfd   : > { %v460_v49 = vadd.f32 %v700_v46, %v941_v44  ;;  %v703_v50 = vadd.f32 %v702_v48, %v701_v47  ;;  %v555_v4 = vpop.f32.mrb[12].mxu1 }
  0xfe   : > { %v753_v5 = vpop.f32.mrb[13].mxu1 }
  0xff   : > { %v532_v51 = vadd.f32 %v531_v35, %v460_v49  ;;  %v463_v52 = vadd.f32 %v703_v50, %v941_v44  ;;  %v558_v9 = vpop.f32.mrb[14].mxu1 }
 0x100   : > { %v754_v11 = vpop.f32.mrb[15].mxu1 }
 0x101   : > { %v535_v55 = vadd.f32 %v534_v37, %v463_v52  ;;  %v704_v56 = vpop.f32.mrb[4].mxu0 }
 0x102   : > { %v705_v58 = vpop.f32.mrb[5].mxu0 }
 0x103   : > { %v569_v60 = vmax.f32 %v532_v51, %v535_v55  ;;  %v706_v61 = vadd.f32 %v705_v58, %v704_v56  ;;  %v707_v62 = vpop.f32.mrb[6].mxu0 }
 0x104   : > { %v708_v63 = vpop.f32.mrb[7].mxu0 }
 0x105   : > { %v468_v0 = vadd.f32 %v706_v61, %v941_v44  ;;  %v709_v1 = vadd.f32 %v708_v63, %v707_v62  ;;  %v563_v20 = vpop.f32.mrb[16].mxu1 }
 0x106   : > { %v757_v21 = vpop.f32.mrb[17].mxu1 }
 0x107   : > { %v540_v2 = vadd.f32 %v539_v39, %v468_v0  ;;  %v471_v3 = vadd.f32 %v709_v1, %v941_v44  ;;  %v566_v25 = vpop.f32.mrb[18].mxu1 }
 0x108   : > { %v758_v27 = vpop.f32.mrb[19].mxu1 }
 0x109   : > { %v570_v6 = vmax.f32 %v569_v60, %v540_v2  ;;  %v543_v7 = vadd.f32 %v542_v42, %v471_v3  ;;  %v710_v8 = vpop.f32.mrb[8].mxu0 }
 0x10a   : > { %v711_v10 = vpop.f32.mrb[9].mxu0 }
 0x10b   : > { %v571_v12 = vmax.f32 %v570_v6, %v543_v7  ;;  %v712_v13 = vadd.f32 %v711_v10, %v710_v8  ;;  %v713_v14 = vpop.f32.mrb[10].mxu0 }
 0x10c   : > { %v714_v15 = vpop.f32.mrb[11].mxu0 }
 0x10d   : > { %v476_v16 = vadd.f32 %v712_v13, %v941_v44  ;;  %v715_v17 = vadd.f32 %v714_v15, %v713_v14 }
 0x10f   : > { %v548_v18 = vadd.f32 %v547_v53, %v476_v16  ;;  %v479_v19 = vadd.f32 %v715_v17, %v941_v44 }
 0x111   : > { %v572_v22 = vmax.f32 %v571_v12, %v548_v18  ;;  %v551_v23 = vadd.f32 %v550_v57, %v479_v19  ;;  %v716_v24 = vpop.f32.mrb[12].mxu0 }
 0x112   : > { %v717_v26 = vpop.f32.mrb[13].mxu0 }
 0x113   : > { %v573_v28 = vmax.f32 %v572_v22, %v551_v23  ;;  %v718_v29 = vadd.f32 %v717_v26, %v716_v24  ;;  %v719_v30 = vpop.f32.mrb[14].mxu0 }
 0x114   : > { %v720_v31 = vpop.f32.mrb[15].mxu0 }
 0x115   : > { %v484_v32 = vadd.f32 %v718_v29, %v941_v44  ;;  %v721_v33 = vadd.f32 %v720_v31, %v719_v30 }
 0x117   : > { %v556_v34 = vadd.f32 %v555_v4, %v484_v32  ;;  %v487_v35 = vadd.f32 %v721_v33, %v941_v44 }
 0x119   : > { %v574_v36 = vmax.f32 %v573_v28, %v556_v34  ;;  %v559_v37 = vadd.f32 %v558_v9, %v487_v35  ;;  %v722_v38 = vpop.f32.mrb[16].mxu0 }
 0x11a   : > { %v723_v39 = vpop.f32.mrb[17].mxu0 }
 0x11b   : > { %v575_v40 = vmax.f32 %v574_v36, %v559_v37  ;;  %v724_v41 = vadd.f32 %v723_v39, %v722_v38  ;;  %v725_v42 = vpop.f32.mrb[18].mxu0 }
 0x11c   : > { %v726_v43 = vpop.f32.mrb[19].mxu0 }
 0x11d   : > { %v492_v45 = vadd.f32 %v724_v41, %v941_v44 }
 0x11f   : > { %v564_v46 = vadd.f32 %v563_v20, %v492_v45 }
 0x121   : > { %v576_v47 = vmax.f32 %v575_v40, %v564_v46 }
 0x123   : > { %v577_v48 = vmax.f32 %v576_v47, 0.0 }
 0x125   : > { %v578_v49 = vpack.c.bf16 %v577_v48, %v577_v48 }
 0x127   : > { %580 = vst.msk [vmem:[%s168_s7] sm:$0xf] %vm579_vm2, %v578_v49 }
 0x128 PF: > { %s13_s12 = sadd.s32 1, %s813_s12  }
 0x129   : > { %p10_p4 = scmp.ge.s32.totalorder %s13_s12, 4  }
 0x12b   :  { %12 = sbr.rel (!%p10_p4) target bundleno = 1 (0x1), region = 62 }

// kernel: _lambda_.7
= control target key start
LH: loop header
LB: loop body
LE: loop exit
PB: predicated region body
PF: predicated region fallthrough
CT: control target
= control target key end

     0   :  { %v434_v2 = vmov 0.0   ;;  %v74_v10 = vlaneseq  ;;  %v435_v15 = vmov 1966171168   ;;  %s549_s0 = inlined_call_operand.vmem [shape: bf16[2,256], index: 0, kind: input, shape index: {}]   ;;  %s550_s1 = inlined_call_operand.vmem [shape: bf16[256,50], index: 1, kind: input, shape index: {}]   ;;  %s551_s2 = inlined_call_operand.vmem [shape: f32[1,50], index: 2, kind: input, shape index: {}]   ;;  %s552_s3 = inlined_call_operand.vmem [shape: bf16[50,128], index: 3, kind: input, shape index: {}]   ;;  %s553_s4 = inlined_call_operand.vmem [shape: f32[1,128], index: 4, kind: input, shape index: {}]   ;;  %s554_s5 = inlined_call_operand.hbm [shape: f32[2,128], index: 5, kind: output, shape index: {}]  }
   0x1   :  { %v390_v0 = vld [vmem:[%s550_s1 + $0x40] sm:$0xff]   ;;  %374 = vmatprep.subr.bf16.mxu1 %v434_v2  ;;  %v392_v3 = vld [vmem:[%s550_s1 + $0x48] sm:$0xff]   ;;  %v394_v5 = vld [vmem:[%s550_s1 + $0x50] sm:$0xff]   ;;  %v72_v16 = vunpack.c.l.s4 %v435_v15 }
   0x2   :  { %v391_v1 = vld [vmem:[%s550_s1] sm:$0xff]   ;;  %347 = vmatprep.subr.bf16.mxu0 %v390_v0  ;;  %v393_v4 = vld [vmem:[%s550_s1 + $0x8] sm:$0xff]   ;;  %v395_v6 = vld [vmem:[%s550_s1 + $0x10] sm:$0xff]   ;;  %v75_v17 = vshrl.u32 %v74_v10, 7 }
   0x3   :  { %348 = vmatpush3.bf16.msra.mxu0 %v391_v1  ;;  %v396_v7 = vld [vmem:[%s550_s1 + $0x58] sm:$0xff]   ;;  %v398_v9 = vld [vmem:[%s550_s1 + $0x60] sm:$0xff]   ;;  %v400_v12 = vld [vmem:[%s550_s1 + $0x68] sm:$0xff]   ;;  %v73_v21 = vunpack.c.0.s8 %v72_v16 }
   0x4   :  { %349 = vmatprep.subr.bf16.mxu0 %v392_v3  ;;  %v397_v8 = vld [vmem:[%s550_s1 + $0x18] sm:$0xff]   ;;  %v399_v11 = vld [vmem:[%s550_s1 + $0x20] sm:$0xff]   ;;  %v401_v14 = vld [vmem:[%s550_s1 + $0x28] sm:$0xff]  }
   0x5   :  { %v324_v13 = vld.sshfl [vmem:[%s549_s0] sm:$0x11 pattern:$0x75316420]  ;;  %v407_v19 = vld [vmem:[%s552_s3 + $0x8] sm:$0xff]   ;;  %v402_v22 = vld [vmem:[%s550_s1 + $0x70] sm:$0xff]  }
   0x6   :  { %v406_v18 = vld [vmem:[%s552_s3] sm:$0xff]   ;;  %v70_v20 = vcombine.high %v324_v13, %v324_v13 }
   0x7   :  { %350 = vmatpush3.bf16.msra.mxu0 %v393_v4  ;;  %375 = vmatpush3.bf16.msra.mxu1 %v406_v18 }
   0x8   :  { %351 = vmatprep.subr.bf16.mxu0 %v394_v5  ;;  %376 = vmatprep.subr.bf16.mxu1 %v434_v2 }
   0xb   :  { %352 = vmatpush3.bf16.msra.mxu0 %v395_v6 }
   0xc   :  { %353 = vmatprep.subr.bf16.mxu0 %v396_v7 }
   0xf   :  { %354 = vmatpush3.bf16.msra.mxu0 %v397_v8 }
  0x10   :  { %355 = vmatprep.subr.bf16.mxu0 %v398_v9 }
  0x13   :  { %356 = vmatpush3.bf16.msra.mxu0 %v399_v11 }
  0x14   :  { %357 = vmatprep.subr.bf16.mxu0 %v400_v12 }
  0x15   :  { %10 = vsyncpa [#allocation3], 0  ;;  %v76_v23 = vsub.s32 %v73_v21, %v75_v17  ;;  %v403_v24 = vld [vmem:[%s550_s1 + $0x30] sm:$0xff]   ;;  %377 = vmatpush3.bf16.msra.mxu1 %v407_v19  ;;  %v404_v26 = vld [vmem:[%s550_s1 + $0x78] sm:$0xff]   ;;  %vm264_vm0 = vcmask 1040384   ;;  %vm436_vm1 = vmmov 0  }
  0x16   :  { %378 = vmatprep.subr.bf16.mxu1 %v434_v2  ;;  %v405_v27 = vld [vmem:[%s550_s1 + $0x38] sm:$0xff]   ;;  %v408_v29 = vld [vmem:[%s552_s3 + $0x10] sm:$0xff]   ;;  %382 = vmatprep.mubr.msk.bf16.mxu1 %vm436_vm1, %v434_v2  ;;  %v323_v33 = vld [vmem:[%s551_s2] ss:$0 sm:$0xff]  ;;  %vm260_vm2 = vcmask 408576   ;;  %s437_s11 = smov [#allocation2]  }
  0x17   :  { %358 = vmatpush3.bf16.msra.mxu0 %v401_v14  ;;  %v84_v25 = vrot.slane %v70_v20, %v76_v23  ;;  %v77_v28 = vrot.slane %v324_v13, %v76_v23  ;;  %v409_v30 = vld [vmem:[%s552_s3 + $0x18] ss:$0 sps:$4 sm:$0x11]   ;;  %v341_v41 = vld [vmem:[%s553_s4] ss:$0 sm:$0xff]  ;;  %s315_s12 = sshll.u32 %s437_s11, 4  ;;  %s316_s12 = int_to_ptr.vmem [resolvable:$true] %s315_s12 }
  0x18   :  { %359 = vmatprep.subr.bf16.mxu0 %v402_v22  ;;  %v266_v31 = vsel %vm264_vm0, %v409_v30, 0  ;;  %s410_s2 = scalar_lea.vmem %s316_s12, 32  ;;  %p415_p1 = scmp.lt.s32.totalorder %s316_s12, %s316_s12 }
  0x19   :  { %215 = vmatprep.mubr.bf16.mxu0 %v84_v25  ;;  %379 = vmatpush3.bf16.msra.mxu1 %v408_v29  ;;  %p411_p0 = scmp.ne.s32.totalorder %s316_s12, %s410_s2  ;;  %p416_p2 = scmp.lt.s32.totalorder %s410_s2, %s410_s2 }
  0x1a   :  { %380 = vmatprep.subr.bf16.mxu1 %v434_v2 }
  0x1b   :  { %360 = vmatpush3.bf16.msra.mxu0 %v403_v24  ;;  %p417_p3 = por %p416_p2, %p415_p1 }
  0x1c   :  { %361 = vmatprep.subr.bf16.mxu0 %v404_v26 }
  0x1d   :  { %381 = vmatpush3.bf16.msra.mxu1 %v266_v31  ;;  %p418_p4 = pnand %p417_p3, %p411_p0 }
  0x1f   :  { %362 = vmatpush3.bf16.msra.mxu0 %v405_v27 }
  0x22   :  { %216 = vmatmul.mubr.bf16.vlgmr.msra.gmra.mrb[0].mxu0 %v77_v28 }
  0xf5   :  { %v363_v32 = vpop.f32.mrb[0].mxu0 }
  0xf6   :  { %v364_v34 = vpop.f32.mrb[1].mxu0 }
  0xf7   :  { %v365_v35 = vadd.f32 %v364_v34, %v363_v32  ;;  %v366_v36 = vpop.f32.mrb[2].mxu0 }
  0xf8   :  { %v367_v37 = vpop.f32.mrb[3].mxu0 }
  0xf9   :  { %v218_v38 = vadd.f32 %v365_v35, %v323_v33 }
  0xfb   :  { %v223_v39 = vmax.f32 %v218_v38, 0.0 }
  0xfd   :  { %v224_v40 = vpack.c.bf16 %v223_v39, %v223_v39 }
  0xff   :  { %383 = vmatmul.mubr.msk.bf16.vlgmr.msra.gmra.mrb[0].mxu1 %vm260_vm2, %v224_v40 }
 0x1d2   :  { %v302_v42 = vpop.f32.mrb[0].mxu1 }
 0x1d3   :  { %v303_v43 = vadd.f32 %v341_v41, %v302_v42  ;;  %v384_v44 = vpop.f32.mrb[1].mxu1 }
 0x1d4   :  { %v305_v45 = vpop.f32.mrb[2].mxu1 }
 0x1d5   :  { %308 = vst [vmem:[#allocation2] sm:$0x3] %v303_v43  ;;  %v385_v46 = vpop.f32.mrb[3].mxu1 }
 0x1d6   :  { %421 = shalt.err (!%p418_p4)
}
 0x1d7   :  { %s422_s4 = scalar_lea.hbm %s554_s5, 32 }
 0x1d8   :  { %p423_p5 = scmp.ne.s32.totalorder %s554_s5, %s422_s4  ;;  %p426_p6 = scmp.lt.u32.totalorder %s422_s4, %s554_s5 }
 0x1da   :  { %p428_p7 = pnand %p426_p6, %p423_p5 }
 0x1dc   :  { %431 = shalt.err (!%p428_p7)
}
 0x1dd   :  { %318 = dma.vmem_to_hbm [thread:$0]  %s316_s12, 32, %s554_s5, [#allocation3]  }
 0x1de   :  { %432 = dma.done.wait [#allocation3], 32  }
 0x1df   :  { %433 = vsyncadd [#allocation3], 4294967264 }
 0x1e0   :  { %322 = vsyncpa [#allocation3], 1 }

</bundles_post_ra>
